<compile_context>
chip_gen: v7x
topology: tpu7x:2x2x1
jax: 0.10.0
libtpu: 0.0.40
codegen_flags: <defaults>
</compile_context>

<pallas_src>
import math

import jax
import jax.numpy as jnp
from jax import lax
from jax.experimental import pallas as pl
from jax.experimental.pallas import tpu as pltpu


def _round_up(x, m):
    return (x + m - 1) // m * m


def decoder_rnn_kernel(xg_ref,               # (Tc, Bc, 4*Hp)  precomputed x@Wih0^T + b0
                       whh0_ref,             # (Hp, 4*Hp)
                       w1_ref, b1_ref,       # (2*Hp, 4*Hp), (1, 4*Hp)  fused [Wih1; Whh1]
                       w2_ref, b2_ref,       # (2*Hp, 4*Hp), (1, 4*Hp)  fused [Wih2; Whh2]
                       fc1w_ref, fc1b_ref,   # (Hp, FCp), (1, FCp)
                       fc2w_ref, fc2b_ref,   # (FCp, Cp), (1, Cp)
                       out_ref,              # (Bc, Cp)
                       h_scr, c_scr):        # (3, Bc, Hp) f32 each
    tc = pl.program_id(1)
    n_tc = pl.num_programs(1)
    Tc = xg_ref.shape[0]
    Hp = h_scr.shape[-1]
    wdt = whh0_ref.dtype  # matmul-input dtype (f32 or bf16); accumulation stays f32

    @pl.when(tc == 0)
    def _():
        # None initial state in PyTorch == zeros
        h_scr[...] = jnp.zeros_like(h_scr)
        c_scr[...] = jnp.zeros_like(c_scr)

    def gate_math(gates, c_prev):
        # PyTorch gate order i, f, g, o; each gate sits in its own lane-aligned Hp block.
        i = jax.nn.sigmoid(gates[:, 0 * Hp:1 * Hp])
        f = jax.nn.sigmoid(gates[:, 1 * Hp:2 * Hp])
        g = jnp.tanh(gates[:, 2 * Hp:3 * Hp])
        o = jax.nn.sigmoid(gates[:, 3 * Hp:4 * Hp])
        c_new = f * c_prev + i * g
        h_new = o * jnp.tanh(c_new)
        return h_new, c_new

    def step(s, carry):
        h0, c0, h1, c1, h2, c2 = carry
        # layer 0: input projection is precomputed; only the recurrent matmul is serial
        g0 = xg_ref[s] + jnp.dot(h0.astype(wdt), whh0_ref[...],
                                 preferred_element_type=jnp.float32)
        h0, c0 = gate_math(g0, c0)
        # layers 1/2: one fused [x_in, h_prev] @ [Wih; Whh] matmul each
        g1 = jnp.dot(jnp.concatenate([h0, h1], axis=-1).astype(wdt), w1_ref[...],
                     preferred_element_type=jnp.float32) + b1_ref[...]
        h1, c1 = gate_math(g1, c1)
        g2 = jnp.dot(jnp.concatenate([h1, h2], axis=-1).astype(wdt), w2_ref[...],
                     preferred_element_type=jnp.float32) + b2_ref[...]
        h2, c2 = gate_math(g2, c2)
        return (h0, c0, h1, c1, h2, c2)

    carry = (h_scr[0], c_scr[0], h_scr[1], c_scr[1], h_scr[2], c_scr[2])
    h0, c0, h1, c1, h2, c2 = lax.fori_loop(0, Tc, step, carry, unroll=True)
    h_scr[0], c_scr[0] = h0, c0
    h_scr[1], c_scr[1] = h1, c1
    h_scr[2], c_scr[2] = h2, c2

    @pl.when(tc == n_tc - 1)
    def _():
        # fc1(last timestep of top layer) -> ReLU -> fc2 (all lane-dense, padded dims)
        y = jnp.dot(h2.astype(fc1w_ref.dtype), fc1w_ref[...],
                    preferred_element_type=jnp.float32) + fc1b_ref[...]
        y = jnp.maximum(y, 0.0)
        # TODO(synk): F.dropout(training=self.training) — eval mode is identity; no RNG here.
        out_ref[...] = jnp.dot(y.astype(fc2w_ref.dtype), fc2w_ref[...],
                               preferred_element_type=jnp.float32) + fc2b_ref[...]


def decoder_rnn_forward(x_rnn, params, *, use_bf16=False):
    """x_rnn: (B, T, D) float32. Returns (B, num_classes) float32."""
    B, T, D = x_rnn.shape
    H = params["whh0"].shape[1]
    FC = params["fc1w"].shape[0]
    C = params["fc2w"].shape[0]

    # lane / sublane friendly padded dims
    Hp = _round_up(H, 128)        # gate stride -> each i/f/g/o slice is lane-aligned
    FCp = _round_up(FC, 128)
    Cp = _round_up(C, 128)

    if B <= 128:
        Bp, Bc = _round_up(B, 8), _round_up(B, 8)
    else:
        Bp, Bc = _round_up(B, 128), 128
    n_bblk = Bp // Bc

    # time chunking: Tc timesteps per grid step (divisor of T, <= 32)
    Tc = math.gcd(T, 32)
    n_tchunk = T // Tc

    f32 = jnp.float32
    wdt = jnp.bfloat16 if use_bf16 else f32

    def gate_pad_T(w, in_pad):
        # PyTorch (4H, in) -> transposed, per-gate lane-padded (in_pad, 4*Hp)
        in_dim = w.shape[1]
        wT = w.T.reshape(in_dim, 4, H).astype(f32)
        out = jnp.zeros((in_pad, 4, Hp), f32).at[:in_dim, :, :H].set(wT)
        return out.reshape(in_pad, 4 * Hp)

    def bias_pad(b):
        bb = b.reshape(4, H).astype(f32)
        return jnp.zeros((4, Hp), f32).at[:, :H].set(bb).reshape(1, 4 * Hp)

    # ---- layer 0: hoist the non-recurrent input projection out of the recurrence
    wih0_T = gate_pad_T(params["wih0"], D)                       # (D, 4Hp)
    b0 = bias_pad(params["bih0"] + params["bhh0"])               # (1, 4Hp)
    whh0_T = gate_pad_T(params["whh0"], Hp).astype(wdt)          # (Hp, 4Hp)

    x_p = jnp.zeros((Bp, T, D), f32).at[:B].set(x_rnn.astype(f32))
    x_tm = jnp.transpose(x_p, (1, 0, 2)).reshape(T * Bp, D)      # time-major
    xg = (x_tm @ wih0_T + b0).reshape(T, Bp, 4 * Hp)             # (T, Bp, 4Hp) f32

    # ---- layers 1/2: fused [Wih; Whh] stacks
    def fused_layer(l):
        w = jnp.concatenate([gate_pad_T(params[f"wih{l}"], Hp),
                             gate_pad_T(params[f"whh{l}"], Hp)], axis=0)  # (2Hp, 4Hp)
        b = bias_pad(params[f"bih{l}"] + params[f"bhh{l}"])
        return w.astype(wdt), b

    w1, b1 = fused_layer(1)
    w2, b2 = fused_layer(2)

    fc1w = jnp.zeros((Hp, FCp), f32).at[:H, :FC].set(params["fc1w"].T.astype(f32)).astype(wdt)
    fc1b = jnp.zeros((1, FCp), f32).at[:, :FC].set(params["fc1b"].reshape(1, FC).astype(f32))
    fc2w = jnp.zeros((FCp, Cp), f32).at[:FC, :C].set(params["fc2w"].T.astype(f32)).astype(wdt)
    fc2b = jnp.zeros((1, Cp), f32).at[:, :C].set(params["fc2b"].reshape(1, C).astype(f32))

    const2d = lambda arr: pl.BlockSpec(arr.shape, lambda bi, ti: (0, 0))  # resident weights

    out_p = pl.pallas_call(
        decoder_rnn_kernel,
        out_shape=jax.ShapeDtypeStruct((Bp, Cp), f32),
        grid_spec=pltpu.PrefetchScalarGridSpec(
            num_scalar_prefetch=0,
            grid=(n_bblk, n_tchunk),
            in_specs=[
                pl.BlockSpec((Tc, Bc, 4 * Hp), lambda bi, ti: (ti, bi, 0)),  # xg chunk
                const2d(whh0_T),
                const2d(w1), const2d(b1),
                const2d(w2), const2d(b2),
                const2d(fc1w), const2d(fc1b),
                const2d(fc2w), const2d(fc2b),
            ],
            out_specs=pl.BlockSpec((Bc, Cp), lambda bi, ti: (bi, 0)),  # resident across time
            scratch_shapes=[
                pltpu.VMEM((3, Bc, Hp), jnp.float32),  # h per layer
                pltpu.VMEM((3, Bc, Hp), jnp.float32),  # c per layer
            ],
        ),
        # batch axis parallel (v7x megacore), time axis is a sequential recurrence.
        # NOTE: for large H, resident weights are double-buffered by default; if that
        # approaches v7x's 64 MiB VMEM, switch weight specs to pipeline_mode=pl.Buffered(1)
        # and/or use_bf16=True and set vmem_limit_bytes explicitly.
        compiler_params=pltpu.CompilerParams(
            dimension_semantics=("parallel", "arbitrary")),
    )(xg, whh0_T, w1, b1, w2, b2, fc1w, fc1b, fc2w, fc2b)

    return out_p[:B, :C]


def reference_forward(x, p):
    """Pure-JAX reference mirroring the PyTorch forward (eval mode)."""
    B, T, D = x.shape
    H = p["whh0"].shape[1]
    h = [jnp.zeros((B, H), jnp.float32) for _ in range(3)]
    c = [jnp.zeros((B, H), jnp.float32) for _ in range(3)]
    for t in range(T):
        layer_in = x[:, t, :]
        for l in range(3):
            gates = (layer_in @ p[f"wih{l}"].T + h[l] @ p[f"whh{l}"].T
                     + p[f"bih{l}"] + p[f"bhh{l}"])
            i = jax.nn.sigmoid(gates[:, :H])
            f = jax.nn.sigmoid(gates[:, H:2 * H])
            g = jnp.tanh(gates[:, 2 * H:3 * H])
            o = jax.nn.sigmoid(gates[:, 3 * H:])
            c[l] = f * c[l] + i * g
            h[l] = o * jnp.tanh(c[l])
            layer_in = h[l]
    y = jnp.maximum(h[2] @ p["fc1w"].T + p["fc1b"], 0.0)
    return y @ p["fc2w"].T + p["fc2b"]


def init_params(key, D, H, FC, C, n_layers=3):
    """Deterministic uniform(-0.1, 0.1) init, PyTorch-shaped parameters."""
    params = {}
    keys = jax.random.split(key, n_layers * 4 + 4)
    k = 0
    for l in range(n_layers):
        in_dim = D if l == 0 else H
        params[f"wih{l}"] = jax.random.uniform(keys[k], (4 * H, in_dim), jnp.float32, -0.1, 0.1); k += 1
        params[f"whh{l}"] = jax.random.uniform(keys[k], (4 * H, H), jnp.float32, -0.1, 0.1); k += 1
        params[f"bih{l}"] = jax.random.uniform(keys[k], (4 * H,), jnp.float32, -0.1, 0.1); k += 1
        params[f"bhh{l}"] = jax.random.uniform(keys[k], (4 * H,), jnp.float32, -0.1, 0.1); k += 1
    params["fc1w"] = jax.random.uniform(keys[k], (FC, H), jnp.float32, -0.1, 0.1); k += 1
    params["fc1b"] = jax.random.uniform(keys[k], (FC,), jnp.float32, -0.1, 0.1); k += 1
    params["fc2w"] = jax.random.uniform(keys[k], (C, FC), jnp.float32, -0.1, 0.1); k += 1
    params["fc2b"] = jax.random.uniform(keys[k], (C,), jnp.float32, -0.1, 0.1); k += 1
    return params


if __name__ == "__main__":
    # Small shapes consistent with the module: (batch, time, CNN_embed_dim)
    B, T = 2, 8
    CNN_EMBED_DIM = 32   # RNN_input_size
    H_RNN = 32           # hidden size
    H_FC = 32            # fc1 dim
    NUM_CLASSES = 16

    key = jax.random.PRNGKey(0)
    k_x, k_p = jax.random.split(key)
    x_rnn = jax.random.normal(k_x, (B, T, CNN_EMBED_DIM), jnp.float32)
    params = init_params(k_p, CNN_EMBED_DIM, H_RNN, H_FC, NUM_CLASSES)

    out = decoder_rnn_forward(x_rnn, params)
    out = jax.block_until_ready(out)

    ref = jax.block_until_ready(reference_forward(x_rnn, params))
    assert out.shape == (B, NUM_CLASSES)
    assert jnp.allclose(out, ref, atol=1e-4, rtol=1e-4), (
        f"max abs err {jnp.max(jnp.abs(out - ref))}")
    print("KERNEL_OK")
</pallas_src>

<mosaic_0001>
module attributes {stable_mosaic.version = 11 : i64} {
  func.func @decoder_rnn_kernel(%arg0: i32, %arg1: i32, %arg2: memref<8x8x512xf32, #tpu.memory_space<vmem>>, %arg3: memref<128x512xf32, #tpu.memory_space<vmem>>, %arg4: memref<256x512xf32, #tpu.memory_space<vmem>>, %arg5: memref<1x512xf32, #tpu.memory_space<vmem>>, %arg6: memref<256x512xf32, #tpu.memory_space<vmem>>, %arg7: memref<1x512xf32, #tpu.memory_space<vmem>>, %arg8: memref<128x128xf32, #tpu.memory_space<vmem>>, %arg9: memref<1x128xf32, #tpu.memory_space<vmem>>, %arg10: memref<128x128xf32, #tpu.memory_space<vmem>>, %arg11: memref<1x128xf32, #tpu.memory_space<vmem>>, %arg12: memref<8x128xf32, #tpu.memory_space<vmem>>, %arg13: memref<3x8x128xf32, #tpu.memory_space<vmem>>, %arg14: memref<3x8x128xf32, #tpu.memory_space<vmem>>) attributes {dimension_semantics = [#tpu.dimension_semantics<parallel>, #tpu.dimension_semantics<arbitrary>], iteration_bounds = array<i64: 1, 1>, scalar_prefetch = 0 : i64, scratch_operands = 2 : i64, tpu.core_type = #tpu.core_type<tc>, window_params = [{transform_indices = @transform_0, window_bounds = array<i64: 8, 8, 512>}, {pipeline_mode = #tpu.pipeline_mode<synchronous>, transform_indices = @transform_1, window_bounds = array<i64: 128, 512>}, {pipeline_mode = #tpu.pipeline_mode<synchronous>, transform_indices = @transform_2, window_bounds = array<i64: 256, 512>}, {pipeline_mode = #tpu.pipeline_mode<synchronous>, transform_indices = @transform_3, window_bounds = array<i64: 1, 512>}, {pipeline_mode = #tpu.pipeline_mode<synchronous>, transform_indices = @transform_4, window_bounds = array<i64: 256, 512>}, {pipeline_mode = #tpu.pipeline_mode<synchronous>, transform_indices = @transform_5, window_bounds = array<i64: 1, 512>}, {pipeline_mode = #tpu.pipeline_mode<synchronous>, transform_indices = @transform_6, window_bounds = array<i64: 128, 128>}, {pipeline_mode = #tpu.pipeline_mode<synchronous>, transform_indices = @transform_7, window_bounds = array<i64: 1, 128>}, {pipeline_mode = #tpu.pipeline_mode<synchronous>, transform_indices = @transform_8, window_bounds = array<i64: 128, 128>}, {pipeline_mode = #tpu.pipeline_mode<synchronous>, transform_indices = @transform_9, window_bounds = array<i64: 1, 128>}, {transform_indices = @transform_10, window_bounds = array<i64: 8, 128>}]} {
    %c0_i32 = arith.constant 0 : i32
    %0 = arith.cmpi eq, %arg1, %c0_i32 : i32
    %1 = arith.extui %0 : i1 to i32
    %c0_i32_0 = arith.constant 0 : i32
    %2 = arith.cmpi ne, %1, %c0_i32_0 : i32
    scf.if %2 {
      %cst_228 = arith.constant 0.000000e+00 : f32
      %780 = vector.broadcast %cst_228 : f32 to vector<3x8x128xf32>
      %c0_229 = arith.constant 0 : index
      %c0_230 = arith.constant 0 : index
      %c0_231 = arith.constant 0 : index
      %781 = vector.load %arg13[%c0_229, %c0_230, %c0_231] : memref<3x8x128xf32, #tpu.memory_space<vmem>>, vector<3x8x128xf32>
      tpu.vector_store %arg13[%c0_229, %c0_230, %c0_231], %780 {strides = array<i32>} : memref<3x8x128xf32, #tpu.memory_space<vmem>>, vector<3x8x128xf32>,
      %cst_232 = arith.constant 0.000000e+00 : f32
      %782 = vector.broadcast %cst_232 : f32 to vector<3x8x128xf32>
      %c0_233 = arith.constant 0 : index
      %c0_234 = arith.constant 0 : index
      %c0_235 = arith.constant 0 : index
      %783 = vector.load %arg14[%c0_233, %c0_234, %c0_235] : memref<3x8x128xf32, #tpu.memory_space<vmem>>, vector<3x8x128xf32>
      tpu.vector_store %arg14[%c0_233, %c0_234, %c0_235], %782 {strides = array<i32>} : memref<3x8x128xf32, #tpu.memory_space<vmem>>, vector<3x8x128xf32>,
    } else {
    }
    %c0 = arith.constant 0 : index
    %c0_1 = arith.constant 0 : index
    %c0_2 = arith.constant 0 : index
    %3 = vector.load %arg13[%c0, %c0_1, %c0_2] : memref<3x8x128xf32, #tpu.memory_space<vmem>>, vector<1x8x128xf32>
    %4 = vector.shape_cast %3 : vector<1x8x128xf32> to vector<8x128xf32>
    %c0_3 = arith.constant 0 : index
    %c0_4 = arith.constant 0 : index
    %c0_5 = arith.constant 0 : index
    %5 = vector.load %arg14[%c0_3, %c0_4, %c0_5] : memref<3x8x128xf32, #tpu.memory_space<vmem>>, vector<1x8x128xf32>
    %6 = vector.shape_cast %5 : vector<1x8x128xf32> to vector<8x128xf32>
    %c1 = arith.constant 1 : index
    %c0_6 = arith.constant 0 : index
    %c0_7 = arith.constant 0 : index
    %7 = vector.load %arg13[%c1, %c0_6, %c0_7] : memref<3x8x128xf32, #tpu.memory_space<vmem>>, vector<1x8x128xf32>
    %8 = vector.shape_cast %7 : vector<1x8x128xf32> to vector<8x128xf32>
    %c1_8 = arith.constant 1 : index
    %c0_9 = arith.constant 0 : index
    %c0_10 = arith.constant 0 : index
    %9 = vector.load %arg14[%c1_8, %c0_9, %c0_10] : memref<3x8x128xf32, #tpu.memory_space<vmem>>, vector<1x8x128xf32>
    %10 = vector.shape_cast %9 : vector<1x8x128xf32> to vector<8x128xf32>
    %c2 = arith.constant 2 : index
    %c0_11 = arith.constant 0 : index
    %c0_12 = arith.constant 0 : index
    %11 = vector.load %arg13[%c2, %c0_11, %c0_12] : memref<3x8x128xf32, #tpu.memory_space<vmem>>, vector<1x8x128xf32>
    %12 = vector.shape_cast %11 : vector<1x8x128xf32> to vector<8x128xf32>
    %c2_13 = arith.constant 2 : index
    %c0_14 = arith.constant 0 : index
    %c0_15 = arith.constant 0 : index
    %13 = vector.load %arg14[%c2_13, %c0_14, %c0_15] : memref<3x8x128xf32, #tpu.memory_space<vmem>>, vector<1x8x128xf32>
    %14 = vector.shape_cast %13 : vector<1x8x128xf32> to vector<8x128xf32>
    %c0_i32_16 = arith.constant 0 : i32
    %15 = arith.index_cast %c0_i32_16 : i32 to index
    %c0_17 = arith.constant 0 : index
    %c0_18 = arith.constant 0 : index
    %16 = vector.load %arg2[%15, %c0_17, %c0_18] : memref<8x8x512xf32, #tpu.memory_space<vmem>>, vector<1x8x512xf32>
    %17 = vector.shape_cast %16 : vector<1x8x512xf32> to vector<8x512xf32>
    %c0_19 = arith.constant 0 : index
    %c0_20 = arith.constant 0 : index
    %18 = vector.load %arg3[%c0_19, %c0_20] : memref<128x512xf32, #tpu.memory_space<vmem>>, vector<128x512xf32>
    %cst = arith.constant dense<0.000000e+00> : vector<8x512xf32>
    %19 = tpu.matmul %4, %18, %cst {dimension_numbers = #tpu.dot_dimension_numbers<[1], [0], [0], [1], [0, 0, 1, 1], [], []>} : vector<8x128xf32>, vector<128x512xf32>, vector<8x512xf32> -> vector<8x512xf32>
    %20 = arith.addf %17, %19 : vector<8x512xf32>
    %21 = vector.extract_strided_slice %20 {offsets = [0, 0], sizes = [8, 128], strides = [1, 1]} : vector<8x512xf32> to vector<8x128xf32>
    %22 = arith.negf %21 : vector<8x128xf32>
    %23 = math.exp %22 : vector<8x128xf32>
    %cst_21 = arith.constant 1.000000e+00 : f32
    %24 = vector.broadcast %cst_21 : f32 to vector<8x128xf32>
    %25 = arith.addf %24, %23 : vector<8x128xf32>
    %26 = arith.divf %24, %25 : vector<8x128xf32>
    %27 = vector.extract_strided_slice %20 {offsets = [0, 128], sizes = [8, 128], strides = [1, 1]} : vector<8x512xf32> to vector<8x128xf32>
    %28 = arith.negf %27 : vector<8x128xf32>
    %29 = math.exp %28 : vector<8x128xf32>
    %cst_22 = arith.constant 1.000000e+00 : f32
    %30 = vector.broadcast %cst_22 : f32 to vector<8x128xf32>
    %31 = arith.addf %30, %29 : vector<8x128xf32>
    %32 = arith.divf %30, %31 : vector<8x128xf32>
    %33 = vector.extract_strided_slice %20 {offsets = [0, 256], sizes = [8, 128], strides = [1, 1]} : vector<8x512xf32> to vector<8x128xf32>
    %34 = math.tanh %33 : vector<8x128xf32>
    %35 = vector.extract_strided_slice %20 {offsets = [0, 384], sizes = [8, 128], strides = [1, 1]} : vector<8x512xf32> to vector<8x128xf32>
    %36 = arith.negf %35 : vector<8x128xf32>
    %37 = math.exp %36 : vector<8x128xf32>
    %cst_23 = arith.constant 1.000000e+00 : f32
    %38 = vector.broadcast %cst_23 : f32 to vector<8x128xf32>
    %39 = arith.addf %38, %37 : vector<8x128xf32>
    %40 = arith.divf %38, %39 : vector<8x128xf32>
    %41 = arith.mulf %32, %6 : vector<8x128xf32>
    %42 = arith.mulf %26, %34 : vector<8x128xf32>
    %43 = arith.addf %41, %42 : vector<8x128xf32>
    %44 = math.tanh %43 : vector<8x128xf32>
    %45 = arith.mulf %40, %44 : vector<8x128xf32>
    %46 = tpu.concatenate %45, %8 in 1 : vector<8x128xf32>, vector<8x128xf32> -> vector<8x256xf32>
    %c0_24 = arith.constant 0 : index
    %c0_25 = arith.constant 0 : index
    %47 = vector.load %arg4[%c0_24, %c0_25] : memref<256x512xf32, #tpu.memory_space<vmem>>, vector<256x512xf32>
    %cst_26 = arith.constant dense<0.000000e+00> : vector<8x512xf32>
    %48 = tpu.matmul %46, %47, %cst_26 {dimension_numbers = #tpu.dot_dimension_numbers<[1], [0], [0], [1], [0, 0, 1, 1], [], []>} : vector<8x256xf32>, vector<256x512xf32>, vector<8x512xf32> -> vector<8x512xf32>
    %c0_27 = arith.constant 0 : index
    %c0_28 = arith.constant 0 : index
    %49 = vector.load %arg5[%c0_27, %c0_28] : memref<1x512xf32, #tpu.memory_space<vmem>>, vector<1x512xf32>
    %50 = vector.broadcast %49 : vector<1x512xf32> to vector<8x512xf32>
    %51 = arith.addf %48, %50 : vector<8x512xf32>
    %52 = vector.extract_strided_slice %51 {offsets = [0, 0], sizes = [8, 128], strides = [1, 1]} : vector<8x512xf32> to vector<8x128xf32>
    %53 = arith.negf %52 : vector<8x128xf32>
    %54 = math.exp %53 : vector<8x128xf32>
    %cst_29 = arith.constant 1.000000e+00 : f32
    %55 = vector.broadcast %cst_29 : f32 to vector<8x128xf32>
    %56 = arith.addf %55, %54 : vector<8x128xf32>
    %57 = arith.divf %55, %56 : vector<8x128xf32>
    %58 = vector.extract_strided_slice %51 {offsets = [0, 128], sizes = [8, 128], strides = [1, 1]} : vector<8x512xf32> to vector<8x128xf32>
    %59 = arith.negf %58 : vector<8x128xf32>
    %60 = math.exp %59 : vector<8x128xf32>
    %cst_30 = arith.constant 1.000000e+00 : f32
    %61 = vector.broadcast %cst_30 : f32 to vector<8x128xf32>
    %62 = arith.addf %61, %60 : vector<8x128xf32>
    %63 = arith.divf %61, %62 : vector<8x128xf32>
    %64 = vector.extract_strided_slice %51 {offsets = [0, 256], sizes = [8, 128], strides = [1, 1]} : vector<8x512xf32> to vector<8x128xf32>
    %65 = math.tanh %64 : vector<8x128xf32>
    %66 = vector.extract_strided_slice %51 {offsets = [0, 384], sizes = [8, 128], strides = [1, 1]} : vector<8x512xf32> to vector<8x128xf32>
    %67 = arith.negf %66 : vector<8x128xf32>
    %68 = math.exp %67 : vector<8x128xf32>
    %cst_31 = arith.constant 1.000000e+00 : f32
    %69 = vector.broadcast %cst_31 : f32 to vector<8x128xf32>
    %70 = arith.addf %69, %68 : vector<8x128xf32>
    %71 = arith.divf %69, %70 : vector<8x128xf32>
    %72 = arith.mulf %63, %10 : vector<8x128xf32>
    %73 = arith.mulf %57, %65 : vector<8x128xf32>
    %74 = arith.addf %72, %73 : vector<8x128xf32>
    %75 = math.tanh %74 : vector<8x128xf32>
    %76 = arith.mulf %71, %75 : vector<8x128xf32>
    %77 = tpu.concatenate %76, %12 in 1 : vector<8x128xf32>, vector<8x128xf32> -> vector<8x256xf32>
    %c0_32 = arith.constant 0 : index
    %c0_33 = arith.constant 0 : index
    %78 = vector.load %arg6[%c0_32, %c0_33] : memref<256x512xf32, #tpu.memory_space<vmem>>, vector<256x512xf32>
    %cst_34 = arith.constant dense<0.000000e+00> : vector<8x512xf32>
    %79 = tpu.matmul %77, %78, %cst_34 {dimension_numbers = #tpu.dot_dimension_numbers<[1], [0], [0], [1], [0, 0, 1, 1], [], []>} : vector<8x256xf32>, vector<256x512xf32>, vector<8x512xf32> -> vector<8x512xf32>
    %c0_35 = arith.constant 0 : index
    %c0_36 = arith.constant 0 : index
    %80 = vector.load %arg7[%c0_35, %c0_36] : memref<1x512xf32, #tpu.memory_space<vmem>>, vector<1x512xf32>
    %81 = vector.broadcast %80 : vector<1x512xf32> to vector<8x512xf32>
    %82 = arith.addf %79, %81 : vector<8x512xf32>
    %83 = vector.extract_strided_slice %82 {offsets = [0, 0], sizes = [8, 128], strides = [1, 1]} : vector<8x512xf32> to vector<8x128xf32>
    %84 = arith.negf %83 : vector<8x128xf32>
    %85 = math.exp %84 : vector<8x128xf32>
    %cst_37 = arith.constant 1.000000e+00 : f32
    %86 = vector.broadcast %cst_37 : f32 to vector<8x128xf32>
    %87 = arith.addf %86, %85 : vector<8x128xf32>
    %88 = arith.divf %86, %87 : vector<8x128xf32>
    %89 = vector.extract_strided_slice %82 {offsets = [0, 128], sizes = [8, 128], strides = [1, 1]} : vector<8x512xf32> to vector<8x128xf32>
    %90 = arith.negf %89 : vector<8x128xf32>
    %91 = math.exp %90 : vector<8x128xf32>
    %cst_38 = arith.constant 1.000000e+00 : f32
    %92 = vector.broadcast %cst_38 : f32 to vector<8x128xf32>
    %93 = arith.addf %92, %91 : vector<8x128xf32>
    %94 = arith.divf %92, %93 : vector<8x128xf32>
    %95 = vector.extract_strided_slice %82 {offsets = [0, 256], sizes = [8, 128], strides = [1, 1]} : vector<8x512xf32> to vector<8x128xf32>
    %96 = math.tanh %95 : vector<8x128xf32>
    %97 = vector.extract_strided_slice %82 {offsets = [0, 384], sizes = [8, 128], strides = [1, 1]} : vector<8x512xf32> to vector<8x128xf32>
    %98 = arith.negf %97 : vector<8x128xf32>
    %99 = math.exp %98 : vector<8x128xf32>
    %cst_39 = arith.constant 1.000000e+00 : f32
    %100 = vector.broadcast %cst_39 : f32 to vector<8x128xf32>
    %101 = arith.addf %100, %99 : vector<8x128xf32>
    %102 = arith.divf %100, %101 : vector<8x128xf32>
    %103 = arith.mulf %94, %14 : vector<8x128xf32>
    %104 = arith.mulf %88, %96 : vector<8x128xf32>
    %105 = arith.addf %103, %104 : vector<8x128xf32>
    %106 = math.tanh %105 : vector<8x128xf32>
    %107 = arith.mulf %102, %106 : vector<8x128xf32>
    %c1_i32 = arith.constant 1 : i32
    %108 = arith.index_cast %c1_i32 : i32 to index
    %c0_40 = arith.constant 0 : index
    %c0_41 = arith.constant 0 : index
    %109 = vector.load %arg2[%108, %c0_40, %c0_41] : memref<8x8x512xf32, #tpu.memory_space<vmem>>, vector<1x8x512xf32>
    %110 = vector.shape_cast %109 : vector<1x8x512xf32> to vector<8x512xf32>
    %c0_42 = arith.constant 0 : index
    %c0_43 = arith.constant 0 : index
    %111 = vector.load %arg3[%c0_42, %c0_43] : memref<128x512xf32, #tpu.memory_space<vmem>>, vector<128x512xf32>
    %cst_44 = arith.constant dense<0.000000e+00> : vector<8x512xf32>
    %112 = tpu.matmul %45, %111, %cst_44 {dimension_numbers = #tpu.dot_dimension_numbers<[1], [0], [0], [1], [0, 0, 1, 1], [], []>} : vector<8x128xf32>, vector<128x512xf32>, vector<8x512xf32> -> vector<8x512xf32>
    %113 = arith.addf %110, %112 : vector<8x512xf32>
    %114 = vector.extract_strided_slice %113 {offsets = [0, 0], sizes = [8, 128], strides = [1, 1]} : vector<8x512xf32> to vector<8x128xf32>
    %115 = arith.negf %114 : vector<8x128xf32>
    %116 = math.exp %115 : vector<8x128xf32>
    %cst_45 = arith.constant 1.000000e+00 : f32
    %117 = vector.broadcast %cst_45 : f32 to vector<8x128xf32>
    %118 = arith.addf %117, %116 : vector<8x128xf32>
    %119 = arith.divf %117, %118 : vector<8x128xf32>
    %120 = vector.extract_strided_slice %113 {offsets = [0, 128], sizes = [8, 128], strides = [1, 1]} : vector<8x512xf32> to vector<8x128xf32>
    %121 = arith.negf %120 : vector<8x128xf32>
    %122 = math.exp %121 : vector<8x128xf32>
    %cst_46 = arith.constant 1.000000e+00 : f32
    %123 = vector.broadcast %cst_46 : f32 to vector<8x128xf32>
    %124 = arith.addf %123, %122 : vector<8x128xf32>
    %125 = arith.divf %123, %124 : vector<8x128xf32>
    %126 = vector.extract_strided_slice %113 {offsets = [0, 256], sizes = [8, 128], strides = [1, 1]} : vector<8x512xf32> to vector<8x128xf32>
    %127 = math.tanh %126 : vector<8x128xf32>
    %128 = vector.extract_strided_slice %113 {offsets = [0, 384], sizes = [8, 128], strides = [1, 1]} : vector<8x512xf32> to vector<8x128xf32>
    %129 = arith.negf %128 : vector<8x128xf32>
    %130 = math.exp %129 : vector<8x128xf32>
    %cst_47 = arith.constant 1.000000e+00 : f32
    %131 = vector.broadcast %cst_47 : f32 to vector<8x128xf32>
    %132 = arith.addf %131, %130 : vector<8x128xf32>
    %133 = arith.divf %131, %132 : vector<8x128xf32>
    %134 = arith.mulf %125, %43 : vector<8x128xf32>
    %135 = arith.mulf %119, %127 : vector<8x128xf32>
    %136 = arith.addf %134, %135 : vector<8x128xf32>
    %137 = math.tanh %136 : vector<8x128xf32>
    %138 = arith.mulf %133, %137 : vector<8x128xf32>
    %139 = tpu.concatenate %138, %76 in 1 : vector<8x128xf32>, vector<8x128xf32> -> vector<8x256xf32>
    %c0_48 = arith.constant 0 : index
    %c0_49 = arith.constant 0 : index
    %140 = vector.load %arg4[%c0_48, %c0_49] : memref<256x512xf32, #tpu.memory_space<vmem>>, vector<256x512xf32>
    %cst_50 = arith.constant dense<0.000000e+00> : vector<8x512xf32>
    %141 = tpu.matmul %139, %140, %cst_50 {dimension_numbers = #tpu.dot_dimension_numbers<[1], [0], [0], [1], [0, 0, 1, 1], [], []>} : vector<8x256xf32>, vector<256x512xf32>, vector<8x512xf32> -> vector<8x512xf32>
    %c0_51 = arith.constant 0 : index
    %c0_52 = arith.constant 0 : index
    %142 = vector.load %arg5[%c0_51, %c0_52] : memref<1x512xf32, #tpu.memory_space<vmem>>, vector<1x512xf32>
    %143 = vector.broadcast %142 : vector<1x512xf32> to vector<8x512xf32>
    %144 = arith.addf %141, %143 : vector<8x512xf32>
    %145 = vector.extract_strided_slice %144 {offsets = [0, 0], sizes = [8, 128], strides = [1, 1]} : vector<8x512xf32> to vector<8x128xf32>
    %146 = arith.negf %145 : vector<8x128xf32>
    %147 = math.exp %146 : vector<8x128xf32>
    %cst_53 = arith.constant 1.000000e+00 : f32
    %148 = vector.broadcast %cst_53 : f32 to vector<8x128xf32>
    %149 = arith.addf %148, %147 : vector<8x128xf32>
    %150 = arith.divf %148, %149 : vector<8x128xf32>
    %151 = vector.extract_strided_slice %144 {offsets = [0, 128], sizes = [8, 128], strides = [1, 1]} : vector<8x512xf32> to vector<8x128xf32>
    %152 = arith.negf %151 : vector<8x128xf32>
    %153 = math.exp %152 : vector<8x128xf32>
    %cst_54 = arith.constant 1.000000e+00 : f32
    %154 = vector.broadcast %cst_54 : f32 to vector<8x128xf32>
    %155 = arith.addf %154, %153 : vector<8x128xf32>
    %156 = arith.divf %154, %155 : vector<8x128xf32>
    %157 = vector.extract_strided_slice %144 {offsets = [0, 256], sizes = [8, 128], strides = [1, 1]} : vector<8x512xf32> to vector<8x128xf32>
    %158 = math.tanh %157 : vector<8x128xf32>
    %159 = vector.extract_strided_slice %144 {offsets = [0, 384], sizes = [8, 128], strides = [1, 1]} : vector<8x512xf32> to vector<8x128xf32>
    %160 = arith.negf %159 : vector<8x128xf32>
    %161 = math.exp %160 : vector<8x128xf32>
    %cst_55 = arith.constant 1.000000e+00 : f32
    %162 = vector.broadcast %cst_55 : f32 to vector<8x128xf32>
    %163 = arith.addf %162, %161 : vector<8x128xf32>
    %164 = arith.divf %162, %163 : vector<8x128xf32>
    %165 = arith.mulf %156, %74 : vector<8x128xf32>
    %166 = arith.mulf %150, %158 : vector<8x128xf32>
    %167 = arith.addf %165, %166 : vector<8x128xf32>
    %168 = math.tanh %167 : vector<8x128xf32>
    %169 = arith.mulf %164, %168 : vector<8x128xf32>
    %170 = tpu.concatenate %169, %107 in 1 : vector<8x128xf32>, vector<8x128xf32> -> vector<8x256xf32>
    %c0_56 = arith.constant 0 : index
    %c0_57 = arith.constant 0 : index
    %171 = vector.load %arg6[%c0_56, %c0_57] : memref<256x512xf32, #tpu.memory_space<vmem>>, vector<256x512xf32>
    %cst_58 = arith.constant dense<0.000000e+00> : vector<8x512xf32>
    %172 = tpu.matmul %170, %171, %cst_58 {dimension_numbers = #tpu.dot_dimension_numbers<[1], [0], [0], [1], [0, 0, 1, 1], [], []>} : vector<8x256xf32>, vector<256x512xf32>, vector<8x512xf32> -> vector<8x512xf32>
    %c0_59 = arith.constant 0 : index
    %c0_60 = arith.constant 0 : index
    %173 = vector.load %arg7[%c0_59, %c0_60] : memref<1x512xf32, #tpu.memory_space<vmem>>, vector<1x512xf32>
    %174 = vector.broadcast %173 : vector<1x512xf32> to vector<8x512xf32>
    %175 = arith.addf %172, %174 : vector<8x512xf32>
    %176 = vector.extract_strided_slice %175 {offsets = [0, 0], sizes = [8, 128], strides = [1, 1]} : vector<8x512xf32> to vector<8x128xf32>
    %177 = arith.negf %176 : vector<8x128xf32>
    %178 = math.exp %177 : vector<8x128xf32>
    %cst_61 = arith.constant 1.000000e+00 : f32
    %179 = vector.broadcast %cst_61 : f32 to vector<8x128xf32>
    %180 = arith.addf %179, %178 : vector<8x128xf32>
    %181 = arith.divf %179, %180 : vector<8x128xf32>
    %182 = vector.extract_strided_slice %175 {offsets = [0, 128], sizes = [8, 128], strides = [1, 1]} : vector<8x512xf32> to vector<8x128xf32>
    %183 = arith.negf %182 : vector<8x128xf32>
    %184 = math.exp %183 : vector<8x128xf32>
    %cst_62 = arith.constant 1.000000e+00 : f32
    %185 = vector.broadcast %cst_62 : f32 to vector<8x128xf32>
    %186 = arith.addf %185, %184 : vector<8x128xf32>
    %187 = arith.divf %185, %186 : vector<8x128xf32>
    %188 = vector.extract_strided_slice %175 {offsets = [0, 256], sizes = [8, 128], strides = [1, 1]} : vector<8x512xf32> to vector<8x128xf32>
    %189 = math.tanh %188 : vector<8x128xf32>
    %190 = vector.extract_strided_slice %175 {offsets = [0, 384], sizes = [8, 128], strides = [1, 1]} : vector<8x512xf32> to vector<8x128xf32>
    %191 = arith.negf %190 : vector<8x128xf32>
    %192 = math.exp %191 : vector<8x128xf32>
    %cst_63 = arith.constant 1.000000e+00 : f32
    %193 = vector.broadcast %cst_63 : f32 to vector<8x128xf32>
    %194 = arith.addf %193, %192 : vector<8x128xf32>
    %195 = arith.divf %193, %194 : vector<8x128xf32>
    %196 = arith.mulf %187, %105 : vector<8x128xf32>
    %197 = arith.mulf %181, %189 : vector<8x128xf32>
    %198 = arith.addf %196, %197 : vector<8x128xf32>
    %199 = math.tanh %198 : vector<8x128xf32>
    %200 = arith.mulf %195, %199 : vector<8x128xf32>
    %c2_i32 = arith.constant 2 : i32
    %201 = arith.index_cast %c2_i32 : i32 to index
    %c0_64 = arith.constant 0 : index
    %c0_65 = arith.constant 0 : index
    %202 = vector.load %arg2[%201, %c0_64, %c0_65] : memref<8x8x512xf32, #tpu.memory_space<vmem>>, vector<1x8x512xf32>
    %203 = vector.shape_cast %202 : vector<1x8x512xf32> to vector<8x512xf32>
    %c0_66 = arith.constant 0 : index
    %c0_67 = arith.constant 0 : index
    %204 = vector.load %arg3[%c0_66, %c0_67] : memref<128x512xf32, #tpu.memory_space<vmem>>, vector<128x512xf32>
    %cst_68 = arith.constant dense<0.000000e+00> : vector<8x512xf32>
    %205 = tpu.matmul %138, %204, %cst_68 {dimension_numbers = #tpu.dot_dimension_numbers<[1], [0], [0], [1], [0, 0, 1, 1], [], []>} : vector<8x128xf32>, vector<128x512xf32>, vector<8x512xf32> -> vector<8x512xf32>
    %206 = arith.addf %203, %205 : vector<8x512xf32>
    %207 = vector.extract_strided_slice %206 {offsets = [0, 0], sizes = [8, 128], strides = [1, 1]} : vector<8x512xf32> to vector<8x128xf32>
    %208 = arith.negf %207 : vector<8x128xf32>
    %209 = math.exp %208 : vector<8x128xf32>
    %cst_69 = arith.constant 1.000000e+00 : f32
    %210 = vector.broadcast %cst_69 : f32 to vector<8x128xf32>
    %211 = arith.addf %210, %209 : vector<8x128xf32>
    %212 = arith.divf %210, %211 : vector<8x128xf32>
    %213 = vector.extract_strided_slice %206 {offsets = [0, 128], sizes = [8, 128], strides = [1, 1]} : vector<8x512xf32> to vector<8x128xf32>
    %214 = arith.negf %213 : vector<8x128xf32>
    %215 = math.exp %214 : vector<8x128xf32>
    %cst_70 = arith.constant 1.000000e+00 : f32
    %216 = vector.broadcast %cst_70 : f32 to vector<8x128xf32>
    %217 = arith.addf %216, %215 : vector<8x128xf32>
    %218 = arith.divf %216, %217 : vector<8x128xf32>
    %219 = vector.extract_strided_slice %206 {offsets = [0, 256], sizes = [8, 128], strides = [1, 1]} : vector<8x512xf32> to vector<8x128xf32>
    %220 = math.tanh %219 : vector<8x128xf32>
    %221 = vector.extract_strided_slice %206 {offsets = [0, 384], sizes = [8, 128], strides = [1, 1]} : vector<8x512xf32> to vector<8x128xf32>
    %222 = arith.negf %221 : vector<8x128xf32>
    %223 = math.exp %222 : vector<8x128xf32>
    %cst_71 = arith.constant 1.000000e+00 : f32
    %224 = vector.broadcast %cst_71 : f32 to vector<8x128xf32>
    %225 = arith.addf %224, %223 : vector<8x128xf32>
    %226 = arith.divf %224, %225 : vector<8x128xf32>
    %227 = arith.mulf %218, %136 : vector<8x128xf32>
    %228 = arith.mulf %212, %220 : vector<8x128xf32>
    %229 = arith.addf %227, %228 : vector<8x128xf32>
    %230 = math.tanh %229 : vector<8x128xf32>
    %231 = arith.mulf %226, %230 : vector<8x128xf32>
    %232 = tpu.concatenate %231, %169 in 1 : vector<8x128xf32>, vector<8x128xf32> -> vector<8x256xf32>
    %c0_72 = arith.constant 0 : index
    %c0_73 = arith.constant 0 : index
    %233 = vector.load %arg4[%c0_72, %c0_73] : memref<256x512xf32, #tpu.memory_space<vmem>>, vector<256x512xf32>
    %cst_74 = arith.constant dense<0.000000e+00> : vector<8x512xf32>
    %234 = tpu.matmul %232, %233, %cst_74 {dimension_numbers = #tpu.dot_dimension_numbers<[1], [0], [0], [1], [0, 0, 1, 1], [], []>} : vector<8x256xf32>, vector<256x512xf32>, vector<8x512xf32> -> vector<8x512xf32>
    %c0_75 = arith.constant 0 : index
    %c0_76 = arith.constant 0 : index
    %235 = vector.load %arg5[%c0_75, %c0_76] : memref<1x512xf32, #tpu.memory_space<vmem>>, vector<1x512xf32>
    %236 = vector.broadcast %235 : vector<1x512xf32> to vector<8x512xf32>
    %237 = arith.addf %234, %236 : vector<8x512xf32>
    %238 = vector.extract_strided_slice %237 {offsets = [0, 0], sizes = [8, 128], strides = [1, 1]} : vector<8x512xf32> to vector<8x128xf32>
    %239 = arith.negf %238 : vector<8x128xf32>
    %240 = math.exp %239 : vector<8x128xf32>
    %cst_77 = arith.constant 1.000000e+00 : f32
    %241 = vector.broadcast %cst_77 : f32 to vector<8x128xf32>
    %242 = arith.addf %241, %240 : vector<8x128xf32>
    %243 = arith.divf %241, %242 : vector<8x128xf32>
    %244 = vector.extract_strided_slice %237 {offsets = [0, 128], sizes = [8, 128], strides = [1, 1]} : vector<8x512xf32> to vector<8x128xf32>
    %245 = arith.negf %244 : vector<8x128xf32>
    %246 = math.exp %245 : vector<8x128xf32>
    %cst_78 = arith.constant 1.000000e+00 : f32
    %247 = vector.broadcast %cst_78 : f32 to vector<8x128xf32>
    %248 = arith.addf %247, %246 : vector<8x128xf32>
    %249 = arith.divf %247, %248 : vector<8x128xf32>
    %250 = vector.extract_strided_slice %237 {offsets = [0, 256], sizes = [8, 128], strides = [1, 1]} : vector<8x512xf32> to vector<8x128xf32>
    %251 = math.tanh %250 : vector<8x128xf32>
    %252 = vector.extract_strided_slice %237 {offsets = [0, 384], sizes = [8, 128], strides = [1, 1]} : vector<8x512xf32> to vector<8x128xf32>
    %253 = arith.negf %252 : vector<8x128xf32>
    %254 = math.exp %253 : vector<8x128xf32>
    %cst_79 = arith.constant 1.000000e+00 : f32
    %255 = vector.broadcast %cst_79 : f32 to vector<8x128xf32>
    %256 = arith.addf %255, %254 : vector<8x128xf32>
    %257 = arith.divf %255, %256 : vector<8x128xf32>
    %258 = arith.mulf %249, %167 : vector<8x128xf32>
    %259 = arith.mulf %243, %251 : vector<8x128xf32>
    %260 = arith.addf %258, %259 : vector<8x128xf32>
    %261 = math.tanh %260 : vector<8x128xf32>
    %262 = arith.mulf %257, %261 : vector<8x128xf32>
    %263 = tpu.concatenate %262, %200 in 1 : vector<8x128xf32>, vector<8x128xf32> -> vector<8x256xf32>
    %c0_80 = arith.constant 0 : index
    %c0_81 = arith.constant 0 : index
    %264 = vector.load %arg6[%c0_80, %c0_81] : memref<256x512xf32, #tpu.memory_space<vmem>>, vector<256x512xf32>
    %cst_82 = arith.constant dense<0.000000e+00> : vector<8x512xf32>
    %265 = tpu.matmul %263, %264, %cst_82 {dimension_numbers = #tpu.dot_dimension_numbers<[1], [0], [0], [1], [0, 0, 1, 1], [], []>} : vector<8x256xf32>, vector<256x512xf32>, vector<8x512xf32> -> vector<8x512xf32>
    %c0_83 = arith.constant 0 : index
    %c0_84 = arith.constant 0 : index
    %266 = vector.load %arg7[%c0_83, %c0_84] : memref<1x512xf32, #tpu.memory_space<vmem>>, vector<1x512xf32>
    %267 = vector.broadcast %266 : vector<1x512xf32> to vector<8x512xf32>
    %268 = arith.addf %265, %267 : vector<8x512xf32>
    %269 = vector.extract_strided_slice %268 {offsets = [0, 0], sizes = [8, 128], strides = [1, 1]} : vector<8x512xf32> to vector<8x128xf32>
    %270 = arith.negf %269 : vector<8x128xf32>
    %271 = math.exp %270 : vector<8x128xf32>
    %cst_85 = arith.constant 1.000000e+00 : f32
    %272 = vector.broadcast %cst_85 : f32 to vector<8x128xf32>
    %273 = arith.addf %272, %271 : vector<8x128xf32>
    %274 = arith.divf %272, %273 : vector<8x128xf32>
    %275 = vector.extract_strided_slice %268 {offsets = [0, 128], sizes = [8, 128], strides = [1, 1]} : vector<8x512xf32> to vector<8x128xf32>
    %276 = arith.negf %275 : vector<8x128xf32>
    %277 = math.exp %276 : vector<8x128xf32>
    %cst_86 = arith.constant 1.000000e+00 : f32
    %278 = vector.broadcast %cst_86 : f32 to vector<8x128xf32>
    %279 = arith.addf %278, %277 : vector<8x128xf32>
    %280 = arith.divf %278, %279 : vector<8x128xf32>
    %281 = vector.extract_strided_slice %268 {offsets = [0, 256], sizes = [8, 128], strides = [1, 1]} : vector<8x512xf32> to vector<8x128xf32>
    %282 = math.tanh %281 : vector<8x128xf32>
    %283 = vector.extract_strided_slice %268 {offsets = [0, 384], sizes = [8, 128], strides = [1, 1]} : vector<8x512xf32> to vector<8x128xf32>
    %284 = arith.negf %283 : vector<8x128xf32>
    %285 = math.exp %284 : vector<8x128xf32>
    %cst_87 = arith.constant 1.000000e+00 : f32
    %286 = vector.broadcast %cst_87 : f32 to vector<8x128xf32>
    %287 = arith.addf %286, %285 : vector<8x128xf32>
    %288 = arith.divf %286, %287 : vector<8x128xf32>
    %289 = arith.mulf %280, %198 : vector<8x128xf32>
    %290 = arith.mulf %274, %282 : vector<8x128xf32>
    %291 = arith.addf %289, %290 : vector<8x128xf32>
    %292 = math.tanh %291 : vector<8x128xf32>
    %293 = arith.mulf %288, %292 : vector<8x128xf32>
    %c3_i32 = arith.constant 3 : i32
    %294 = arith.index_cast %c3_i32 : i32 to index
    %c0_88 = arith.constant 0 : index
    %c0_89 = arith.constant 0 : index
    %295 = vector.load %arg2[%294, %c0_88, %c0_89] : memref<8x8x512xf32, #tpu.memory_space<vmem>>, vector<1x8x512xf32>
    %296 = vector.shape_cast %295 : vector<1x8x512xf32> to vector<8x512xf32>
    %c0_90 = arith.constant 0 : index
    %c0_91 = arith.constant 0 : index
    %297 = vector.load %arg3[%c0_90, %c0_91] : memref<128x512xf32, #tpu.memory_space<vmem>>, vector<128x512xf32>
    %cst_92 = arith.constant dense<0.000000e+00> : vector<8x512xf32>
    %298 = tpu.matmul %231, %297, %cst_92 {dimension_numbers = #tpu.dot_dimension_numbers<[1], [0], [0], [1], [0, 0, 1, 1], [], []>} : vector<8x128xf32>, vector<128x512xf32>, vector<8x512xf32> -> vector<8x512xf32>
    %299 = arith.addf %296, %298 : vector<8x512xf32>
    %300 = vector.extract_strided_slice %299 {offsets = [0, 0], sizes = [8, 128], strides = [1, 1]} : vector<8x512xf32> to vector<8x128xf32>
    %301 = arith.negf %300 : vector<8x128xf32>
    %302 = math.exp %301 : vector<8x128xf32>
    %cst_93 = arith.constant 1.000000e+00 : f32
    %303 = vector.broadcast %cst_93 : f32 to vector<8x128xf32>
    %304 = arith.addf %303, %302 : vector<8x128xf32>
    %305 = arith.divf %303, %304 : vector<8x128xf32>
    %306 = vector.extract_strided_slice %299 {offsets = [0, 128], sizes = [8, 128], strides = [1, 1]} : vector<8x512xf32> to vector<8x128xf32>
    %307 = arith.negf %306 : vector<8x128xf32>
    %308 = math.exp %307 : vector<8x128xf32>
    %cst_94 = arith.constant 1.000000e+00 : f32
    %309 = vector.broadcast %cst_94 : f32 to vector<8x128xf32>
    %310 = arith.addf %309, %308 : vector<8x128xf32>
    %311 = arith.divf %309, %310 : vector<8x128xf32>
    %312 = vector.extract_strided_slice %299 {offsets = [0, 256], sizes = [8, 128], strides = [1, 1]} : vector<8x512xf32> to vector<8x128xf32>
    %313 = math.tanh %312 : vector<8x128xf32>
    %314 = vector.extract_strided_slice %299 {offsets = [0, 384], sizes = [8, 128], strides = [1, 1]} : vector<8x512xf32> to vector<8x128xf32>
    %315 = arith.negf %314 : vector<8x128xf32>
    %316 = math.exp %315 : vector<8x128xf32>
    %cst_95 = arith.constant 1.000000e+00 : f32
    %317 = vector.broadcast %cst_95 : f32 to vector<8x128xf32>
    %318 = arith.addf %317, %316 : vector<8x128xf32>
    %319 = arith.divf %317, %318 : vector<8x128xf32>
    %320 = arith.mulf %311, %229 : vector<8x128xf32>
    %321 = arith.mulf %305, %313 : vector<8x128xf32>
    %322 = arith.addf %320, %321 : vector<8x128xf32>
    %323 = math.tanh %322 : vector<8x128xf32>
    %324 = arith.mulf %319, %323 : vector<8x128xf32>
    %325 = tpu.concatenate %324, %262 in 1 : vector<8x128xf32>, vector<8x128xf32> -> vector<8x256xf32>
    %c0_96 = arith.constant 0 : index
    %c0_97 = arith.constant 0 : index
    %326 = vector.load %arg4[%c0_96, %c0_97] : memref<256x512xf32, #tpu.memory_space<vmem>>, vector<256x512xf32>
    %cst_98 = arith.constant dense<0.000000e+00> : vector<8x512xf32>
    %327 = tpu.matmul %325, %326, %cst_98 {dimension_numbers = #tpu.dot_dimension_numbers<[1], [0], [0], [1], [0, 0, 1, 1], [], []>} : vector<8x256xf32>, vector<256x512xf32>, vector<8x512xf32> -> vector<8x512xf32>
    %c0_99 = arith.constant 0 : index
    %c0_100 = arith.constant 0 : index
    %328 = vector.load %arg5[%c0_99, %c0_100] : memref<1x512xf32, #tpu.memory_space<vmem>>, vector<1x512xf32>
    %329 = vector.broadcast %328 : vector<1x512xf32> to vector<8x512xf32>
    %330 = arith.addf %327, %329 : vector<8x512xf32>
    %331 = vector.extract_strided_slice %330 {offsets = [0, 0], sizes = [8, 128], strides = [1, 1]} : vector<8x512xf32> to vector<8x128xf32>
    %332 = arith.negf %331 : vector<8x128xf32>
    %333 = math.exp %332 : vector<8x128xf32>
    %cst_101 = arith.constant 1.000000e+00 : f32
    %334 = vector.broadcast %cst_101 : f32 to vector<8x128xf32>
    %335 = arith.addf %334, %333 : vector<8x128xf32>
    %336 = arith.divf %334, %335 : vector<8x128xf32>
    %337 = vector.extract_strided_slice %330 {offsets = [0, 128], sizes = [8, 128], strides = [1, 1]} : vector<8x512xf32> to vector<8x128xf32>
    %338 = arith.negf %337 : vector<8x128xf32>
    %339 = math.exp %338 : vector<8x128xf32>
    %cst_102 = arith.constant 1.000000e+00 : f32
    %340 = vector.broadcast %cst_102 : f32 to vector<8x128xf32>
    %341 = arith.addf %340, %339 : vector<8x128xf32>
    %342 = arith.divf %340, %341 : vector<8x128xf32>
    %343 = vector.extract_strided_slice %330 {offsets = [0, 256], sizes = [8, 128], strides = [1, 1]} : vector<8x512xf32> to vector<8x128xf32>
    %344 = math.tanh %343 : vector<8x128xf32>
    %345 = vector.extract_strided_slice %330 {offsets = [0, 384], sizes = [8, 128], strides = [1, 1]} : vector<8x512xf32> to vector<8x128xf32>
    %346 = arith.negf %345 : vector<8x128xf32>
    %347 = math.exp %346 : vector<8x128xf32>
    %cst_103 = arith.constant 1.000000e+00 : f32
    %348 = vector.broadcast %cst_103 : f32 to vector<8x128xf32>
    %349 = arith.addf %348, %347 : vector<8x128xf32>
    %350 = arith.divf %348, %349 : vector<8x128xf32>
    %351 = arith.mulf %342, %260 : vector<8x128xf32>
    %352 = arith.mulf %336, %344 : vector<8x128xf32>
    %353 = arith.addf %351, %352 : vector<8x128xf32>
    %354 = math.tanh %353 : vector<8x128xf32>
    %355 = arith.mulf %350, %354 : vector<8x128xf32>
    %356 = tpu.concatenate %355, %293 in 1 : vector<8x128xf32>, vector<8x128xf32> -> vector<8x256xf32>
    %c0_104 = arith.constant 0 : index
    %c0_105 = arith.constant 0 : index
    %357 = vector.load %arg6[%c0_104, %c0_105] : memref<256x512xf32, #tpu.memory_space<vmem>>, vector<256x512xf32>
    %cst_106 = arith.constant dense<0.000000e+00> : vector<8x512xf32>
    %358 = tpu.matmul %356, %357, %cst_106 {dimension_numbers = #tpu.dot_dimension_numbers<[1], [0], [0], [1], [0, 0, 1, 1], [], []>} : vector<8x256xf32>, vector<256x512xf32>, vector<8x512xf32> -> vector<8x512xf32>
    %c0_107 = arith.constant 0 : index
    %c0_108 = arith.constant 0 : index
    %359 = vector.load %arg7[%c0_107, %c0_108] : memref<1x512xf32, #tpu.memory_space<vmem>>, vector<1x512xf32>
    %360 = vector.broadcast %359 : vector<1x512xf32> to vector<8x512xf32>
    %361 = arith.addf %358, %360 : vector<8x512xf32>
    %362 = vector.extract_strided_slice %361 {offsets = [0, 0], sizes = [8, 128], strides = [1, 1]} : vector<8x512xf32> to vector<8x128xf32>
    %363 = arith.negf %362 : vector<8x128xf32>
    %364 = math.exp %363 : vector<8x128xf32>
    %cst_109 = arith.constant 1.000000e+00 : f32
    %365 = vector.broadcast %cst_109 : f32 to vector<8x128xf32>
    %366 = arith.addf %365, %364 : vector<8x128xf32>
    %367 = arith.divf %365, %366 : vector<8x128xf32>
    %368 = vector.extract_strided_slice %361 {offsets = [0, 128], sizes = [8, 128], strides = [1, 1]} : vector<8x512xf32> to vector<8x128xf32>
    %369 = arith.negf %368 : vector<8x128xf32>
    %370 = math.exp %369 : vector<8x128xf32>
    %cst_110 = arith.constant 1.000000e+00 : f32
    %371 = vector.broadcast %cst_110 : f32 to vector<8x128xf32>
    %372 = arith.addf %371, %370 : vector<8x128xf32>
    %373 = arith.divf %371, %372 : vector<8x128xf32>
    %374 = vector.extract_strided_slice %361 {offsets = [0, 256], sizes = [8, 128], strides = [1, 1]} : vector<8x512xf32> to vector<8x128xf32>
    %375 = math.tanh %374 : vector<8x128xf32>
    %376 = vector.extract_strided_slice %361 {offsets = [0, 384], sizes = [8, 128], strides = [1, 1]} : vector<8x512xf32> to vector<8x128xf32>
    %377 = arith.negf %376 : vector<8x128xf32>
    %378 = math.exp %377 : vector<8x128xf32>
    %cst_111 = arith.constant 1.000000e+00 : f32
    %379 = vector.broadcast %cst_111 : f32 to vector<8x128xf32>
    %380 = arith.addf %379, %378 : vector<8x128xf32>
    %381 = arith.divf %379, %380 : vector<8x128xf32>
    %382 = arith.mulf %373, %291 : vector<8x128xf32>
    %383 = arith.mulf %367, %375 : vector<8x128xf32>
    %384 = arith.addf %382, %383 : vector<8x128xf32>
    %385 = math.tanh %384 : vector<8x128xf32>
    %386 = arith.mulf %381, %385 : vector<8x128xf32>
    %c4_i32 = arith.constant 4 : i32
    %387 = arith.index_cast %c4_i32 : i32 to index
    %c0_112 = arith.constant 0 : index
    %c0_113 = arith.constant 0 : index
    %388 = vector.load %arg2[%387, %c0_112, %c0_113] : memref<8x8x512xf32, #tpu.memory_space<vmem>>, vector<1x8x512xf32>
    %389 = vector.shape_cast %388 : vector<1x8x512xf32> to vector<8x512xf32>
    %c0_114 = arith.constant 0 : index
    %c0_115 = arith.constant 0 : index
    %390 = vector.load %arg3[%c0_114, %c0_115] : memref<128x512xf32, #tpu.memory_space<vmem>>, vector<128x512xf32>
    %cst_116 = arith.constant dense<0.000000e+00> : vector<8x512xf32>
    %391 = tpu.matmul %324, %390, %cst_116 {dimension_numbers = #tpu.dot_dimension_numbers<[1], [0], [0], [1], [0, 0, 1, 1], [], []>} : vector<8x128xf32>, vector<128x512xf32>, vector<8x512xf32> -> vector<8x512xf32>
    %392 = arith.addf %389, %391 : vector<8x512xf32>
    %393 = vector.extract_strided_slice %392 {offsets = [0, 0], sizes = [8, 128], strides = [1, 1]} : vector<8x512xf32> to vector<8x128xf32>
    %394 = arith.negf %393 : vector<8x128xf32>
    %395 = math.exp %394 : vector<8x128xf32>
    %cst_117 = arith.constant 1.000000e+00 : f32
    %396 = vector.broadcast %cst_117 : f32 to vector<8x128xf32>
    %397 = arith.addf %396, %395 : vector<8x128xf32>
    %398 = arith.divf %396, %397 : vector<8x128xf32>
    %399 = vector.extract_strided_slice %392 {offsets = [0, 128], sizes = [8, 128], strides = [1, 1]} : vector<8x512xf32> to vector<8x128xf32>
    %400 = arith.negf %399 : vector<8x128xf32>
    %401 = math.exp %400 : vector<8x128xf32>
    %cst_118 = arith.constant 1.000000e+00 : f32
    %402 = vector.broadcast %cst_118 : f32 to vector<8x128xf32>
    %403 = arith.addf %402, %401 : vector<8x128xf32>
    %404 = arith.divf %402, %403 : vector<8x128xf32>
    %405 = vector.extract_strided_slice %392 {offsets = [0, 256], sizes = [8, 128], strides = [1, 1]} : vector<8x512xf32> to vector<8x128xf32>
    %406 = math.tanh %405 : vector<8x128xf32>
    %407 = vector.extract_strided_slice %392 {offsets = [0, 384], sizes = [8, 128], strides = [1, 1]} : vector<8x512xf32> to vector<8x128xf32>
    %408 = arith.negf %407 : vector<8x128xf32>
    %409 = math.exp %408 : vector<8x128xf32>
    %cst_119 = arith.constant 1.000000e+00 : f32
    %410 = vector.broadcast %cst_119 : f32 to vector<8x128xf32>
    %411 = arith.addf %410, %409 : vector<8x128xf32>
    %412 = arith.divf %410, %411 : vector<8x128xf32>
    %413 = arith.mulf %404, %322 : vector<8x128xf32>
    %414 = arith.mulf %398, %406 : vector<8x128xf32>
    %415 = arith.addf %413, %414 : vector<8x128xf32>
    %416 = math.tanh %415 : vector<8x128xf32>
    %417 = arith.mulf %412, %416 : vector<8x128xf32>
    %418 = tpu.concatenate %417, %355 in 1 : vector<8x128xf32>, vector<8x128xf32> -> vector<8x256xf32>
    %c0_120 = arith.constant 0 : index
    %c0_121 = arith.constant 0 : index
    %419 = vector.load %arg4[%c0_120, %c0_121] : memref<256x512xf32, #tpu.memory_space<vmem>>, vector<256x512xf32>
    %cst_122 = arith.constant dense<0.000000e+00> : vector<8x512xf32>
    %420 = tpu.matmul %418, %419, %cst_122 {dimension_numbers = #tpu.dot_dimension_numbers<[1], [0], [0], [1], [0, 0, 1, 1], [], []>} : vector<8x256xf32>, vector<256x512xf32>, vector<8x512xf32> -> vector<8x512xf32>
    %c0_123 = arith.constant 0 : index
    %c0_124 = arith.constant 0 : index
    %421 = vector.load %arg5[%c0_123, %c0_124] : memref<1x512xf32, #tpu.memory_space<vmem>>, vector<1x512xf32>
    %422 = vector.broadcast %421 : vector<1x512xf32> to vector<8x512xf32>
    %423 = arith.addf %420, %422 : vector<8x512xf32>
    %424 = vector.extract_strided_slice %423 {offsets = [0, 0], sizes = [8, 128], strides = [1, 1]} : vector<8x512xf32> to vector<8x128xf32>
    %425 = arith.negf %424 : vector<8x128xf32>
    %426 = math.exp %425 : vector<8x128xf32>
    %cst_125 = arith.constant 1.000000e+00 : f32
    %427 = vector.broadcast %cst_125 : f32 to vector<8x128xf32>
    %428 = arith.addf %427, %426 : vector<8x128xf32>
    %429 = arith.divf %427, %428 : vector<8x128xf32>
    %430 = vector.extract_strided_slice %423 {offsets = [0, 128], sizes = [8, 128], strides = [1, 1]} : vector<8x512xf32> to vector<8x128xf32>
    %431 = arith.negf %430 : vector<8x128xf32>
    %432 = math.exp %431 : vector<8x128xf32>
    %cst_126 = arith.constant 1.000000e+00 : f32
    %433 = vector.broadcast %cst_126 : f32 to vector<8x128xf32>
    %434 = arith.addf %433, %432 : vector<8x128xf32>
    %435 = arith.divf %433, %434 : vector<8x128xf32>
    %436 = vector.extract_strided_slice %423 {offsets = [0, 256], sizes = [8, 128], strides = [1, 1]} : vector<8x512xf32> to vector<8x128xf32>
    %437 = math.tanh %436 : vector<8x128xf32>
    %438 = vector.extract_strided_slice %423 {offsets = [0, 384], sizes = [8, 128], strides = [1, 1]} : vector<8x512xf32> to vector<8x128xf32>
    %439 = arith.negf %438 : vector<8x128xf32>
    %440 = math.exp %439 : vector<8x128xf32>
    %cst_127 = arith.constant 1.000000e+00 : f32
    %441 = vector.broadcast %cst_127 : f32 to vector<8x128xf32>
    %442 = arith.addf %441, %440 : vector<8x128xf32>
    %443 = arith.divf %441, %442 : vector<8x128xf32>
    %444 = arith.mulf %435, %353 : vector<8x128xf32>
    %445 = arith.mulf %429, %437 : vector<8x128xf32>
    %446 = arith.addf %444, %445 : vector<8x128xf32>
    %447 = math.tanh %446 : vector<8x128xf32>
    %448 = arith.mulf %443, %447 : vector<8x128xf32>
    %449 = tpu.concatenate %448, %386 in 1 : vector<8x128xf32>, vector<8x128xf32> -> vector<8x256xf32>
    %c0_128 = arith.constant 0 : index
    %c0_129 = arith.constant 0 : index
    %450 = vector.load %arg6[%c0_128, %c0_129] : memref<256x512xf32, #tpu.memory_space<vmem>>, vector<256x512xf32>
    %cst_130 = arith.constant dense<0.000000e+00> : vector<8x512xf32>
    %451 = tpu.matmul %449, %450, %cst_130 {dimension_numbers = #tpu.dot_dimension_numbers<[1], [0], [0], [1], [0, 0, 1, 1], [], []>} : vector<8x256xf32>, vector<256x512xf32>, vector<8x512xf32> -> vector<8x512xf32>
    %c0_131 = arith.constant 0 : index
    %c0_132 = arith.constant 0 : index
    %452 = vector.load %arg7[%c0_131, %c0_132] : memref<1x512xf32, #tpu.memory_space<vmem>>, vector<1x512xf32>
    %453 = vector.broadcast %452 : vector<1x512xf32> to vector<8x512xf32>
    %454 = arith.addf %451, %453 : vector<8x512xf32>
    %455 = vector.extract_strided_slice %454 {offsets = [0, 0], sizes = [8, 128], strides = [1, 1]} : vector<8x512xf32> to vector<8x128xf32>
    %456 = arith.negf %455 : vector<8x128xf32>
    %457 = math.exp %456 : vector<8x128xf32>
    %cst_133 = arith.constant 1.000000e+00 : f32
    %458 = vector.broadcast %cst_133 : f32 to vector<8x128xf32>
    %459 = arith.addf %458, %457 : vector<8x128xf32>
    %460 = arith.divf %458, %459 : vector<8x128xf32>
    %461 = vector.extract_strided_slice %454 {offsets = [0, 128], sizes = [8, 128], strides = [1, 1]} : vector<8x512xf32> to vector<8x128xf32>
    %462 = arith.negf %461 : vector<8x128xf32>
    %463 = math.exp %462 : vector<8x128xf32>
    %cst_134 = arith.constant 1.000000e+00 : f32
    %464 = vector.broadcast %cst_134 : f32 to vector<8x128xf32>
    %465 = arith.addf %464, %463 : vector<8x128xf32>
    %466 = arith.divf %464, %465 : vector<8x128xf32>
    %467 = vector.extract_strided_slice %454 {offsets = [0, 256], sizes = [8, 128], strides = [1, 1]} : vector<8x512xf32> to vector<8x128xf32>
    %468 = math.tanh %467 : vector<8x128xf32>
    %469 = vector.extract_strided_slice %454 {offsets = [0, 384], sizes = [8, 128], strides = [1, 1]} : vector<8x512xf32> to vector<8x128xf32>
    %470 = arith.negf %469 : vector<8x128xf32>
    %471 = math.exp %470 : vector<8x128xf32>
    %cst_135 = arith.constant 1.000000e+00 : f32
    %472 = vector.broadcast %cst_135 : f32 to vector<8x128xf32>
    %473 = arith.addf %472, %471 : vector<8x128xf32>
    %474 = arith.divf %472, %473 : vector<8x128xf32>
    %475 = arith.mulf %466, %384 : vector<8x128xf32>
    %476 = arith.mulf %460, %468 : vector<8x128xf32>
    %477 = arith.addf %475, %476 : vector<8x128xf32>
    %478 = math.tanh %477 : vector<8x128xf32>
    %479 = arith.mulf %474, %478 : vector<8x128xf32>
    %c5_i32 = arith.constant 5 : i32
    %480 = arith.index_cast %c5_i32 : i32 to index
    %c0_136 = arith.constant 0 : index
    %c0_137 = arith.constant 0 : index
    %481 = vector.load %arg2[%480, %c0_136, %c0_137] : memref<8x8x512xf32, #tpu.memory_space<vmem>>, vector<1x8x512xf32>
    %482 = vector.shape_cast %481 : vector<1x8x512xf32> to vector<8x512xf32>
    %c0_138 = arith.constant 0 : index
    %c0_139 = arith.constant 0 : index
    %483 = vector.load %arg3[%c0_138, %c0_139] : memref<128x512xf32, #tpu.memory_space<vmem>>, vector<128x512xf32>
    %cst_140 = arith.constant dense<0.000000e+00> : vector<8x512xf32>
    %484 = tpu.matmul %417, %483, %cst_140 {dimension_numbers = #tpu.dot_dimension_numbers<[1], [0], [0], [1], [0, 0, 1, 1], [], []>} : vector<8x128xf32>, vector<128x512xf32>, vector<8x512xf32> -> vector<8x512xf32>
    %485 = arith.addf %482, %484 : vector<8x512xf32>
    %486 = vector.extract_strided_slice %485 {offsets = [0, 0], sizes = [8, 128], strides = [1, 1]} : vector<8x512xf32> to vector<8x128xf32>
    %487 = arith.negf %486 : vector<8x128xf32>
    %488 = math.exp %487 : vector<8x128xf32>
    %cst_141 = arith.constant 1.000000e+00 : f32
    %489 = vector.broadcast %cst_141 : f32 to vector<8x128xf32>
    %490 = arith.addf %489, %488 : vector<8x128xf32>
    %491 = arith.divf %489, %490 : vector<8x128xf32>
    %492 = vector.extract_strided_slice %485 {offsets = [0, 128], sizes = [8, 128], strides = [1, 1]} : vector<8x512xf32> to vector<8x128xf32>
    %493 = arith.negf %492 : vector<8x128xf32>
    %494 = math.exp %493 : vector<8x128xf32>
    %cst_142 = arith.constant 1.000000e+00 : f32
    %495 = vector.broadcast %cst_142 : f32 to vector<8x128xf32>
    %496 = arith.addf %495, %494 : vector<8x128xf32>
    %497 = arith.divf %495, %496 : vector<8x128xf32>
    %498 = vector.extract_strided_slice %485 {offsets = [0, 256], sizes = [8, 128], strides = [1, 1]} : vector<8x512xf32> to vector<8x128xf32>
    %499 = math.tanh %498 : vector<8x128xf32>
    %500 = vector.extract_strided_slice %485 {offsets = [0, 384], sizes = [8, 128], strides = [1, 1]} : vector<8x512xf32> to vector<8x128xf32>
    %501 = arith.negf %500 : vector<8x128xf32>
    %502 = math.exp %501 : vector<8x128xf32>
    %cst_143 = arith.constant 1.000000e+00 : f32
    %503 = vector.broadcast %cst_143 : f32 to vector<8x128xf32>
    %504 = arith.addf %503, %502 : vector<8x128xf32>
    %505 = arith.divf %503, %504 : vector<8x128xf32>
    %506 = arith.mulf %497, %415 : vector<8x128xf32>
    %507 = arith.mulf %491, %499 : vector<8x128xf32>
    %508 = arith.addf %506, %507 : vector<8x128xf32>
    %509 = math.tanh %508 : vector<8x128xf32>
    %510 = arith.mulf %505, %509 : vector<8x128xf32>
    %511 = tpu.concatenate %510, %448 in 1 : vector<8x128xf32>, vector<8x128xf32> -> vector<8x256xf32>
    %c0_144 = arith.constant 0 : index
    %c0_145 = arith.constant 0 : index
    %512 = vector.load %arg4[%c0_144, %c0_145] : memref<256x512xf32, #tpu.memory_space<vmem>>, vector<256x512xf32>
    %cst_146 = arith.constant dense<0.000000e+00> : vector<8x512xf32>
    %513 = tpu.matmul %511, %512, %cst_146 {dimension_numbers = #tpu.dot_dimension_numbers<[1], [0], [0], [1], [0, 0, 1, 1], [], []>} : vector<8x256xf32>, vector<256x512xf32>, vector<8x512xf32> -> vector<8x512xf32>
    %c0_147 = arith.constant 0 : index
    %c0_148 = arith.constant 0 : index
    %514 = vector.load %arg5[%c0_147, %c0_148] : memref<1x512xf32, #tpu.memory_space<vmem>>, vector<1x512xf32>
    %515 = vector.broadcast %514 : vector<1x512xf32> to vector<8x512xf32>
    %516 = arith.addf %513, %515 : vector<8x512xf32>
    %517 = vector.extract_strided_slice %516 {offsets = [0, 0], sizes = [8, 128], strides = [1, 1]} : vector<8x512xf32> to vector<8x128xf32>
    %518 = arith.negf %517 : vector<8x128xf32>
    %519 = math.exp %518 : vector<8x128xf32>
    %cst_149 = arith.constant 1.000000e+00 : f32
    %520 = vector.broadcast %cst_149 : f32 to vector<8x128xf32>
    %521 = arith.addf %520, %519 : vector<8x128xf32>
    %522 = arith.divf %520, %521 : vector<8x128xf32>
    %523 = vector.extract_strided_slice %516 {offsets = [0, 128], sizes = [8, 128], strides = [1, 1]} : vector<8x512xf32> to vector<8x128xf32>
    %524 = arith.negf %523 : vector<8x128xf32>
    %525 = math.exp %524 : vector<8x128xf32>
    %cst_150 = arith.constant 1.000000e+00 : f32
    %526 = vector.broadcast %cst_150 : f32 to vector<8x128xf32>
    %527 = arith.addf %526, %525 : vector<8x128xf32>
    %528 = arith.divf %526, %527 : vector<8x128xf32>
    %529 = vector.extract_strided_slice %516 {offsets = [0, 256], sizes = [8, 128], strides = [1, 1]} : vector<8x512xf32> to vector<8x128xf32>
    %530 = math.tanh %529 : vector<8x128xf32>
    %531 = vector.extract_strided_slice %516 {offsets = [0, 384], sizes = [8, 128], strides = [1, 1]} : vector<8x512xf32> to vector<8x128xf32>
    %532 = arith.negf %531 : vector<8x128xf32>
    %533 = math.exp %532 : vector<8x128xf32>
    %cst_151 = arith.constant 1.000000e+00 : f32
    %534 = vector.broadcast %cst_151 : f32 to vector<8x128xf32>
    %535 = arith.addf %534, %533 : vector<8x128xf32>
    %536 = arith.divf %534, %535 : vector<8x128xf32>
    %537 = arith.mulf %528, %446 : vector<8x128xf32>
    %538 = arith.mulf %522, %530 : vector<8x128xf32>
    %539 = arith.addf %537, %538 : vector<8x128xf32>
    %540 = math.tanh %539 : vector<8x128xf32>
    %541 = arith.mulf %536, %540 : vector<8x128xf32>
    %542 = tpu.concatenate %541, %479 in 1 : vector<8x128xf32>, vector<8x128xf32> -> vector<8x256xf32>
    %c0_152 = arith.constant 0 : index
    %c0_153 = arith.constant 0 : index
    %543 = vector.load %arg6[%c0_152, %c0_153] : memref<256x512xf32, #tpu.memory_space<vmem>>, vector<256x512xf32>
    %cst_154 = arith.constant dense<0.000000e+00> : vector<8x512xf32>
    %544 = tpu.matmul %542, %543, %cst_154 {dimension_numbers = #tpu.dot_dimension_numbers<[1], [0], [0], [1], [0, 0, 1, 1], [], []>} : vector<8x256xf32>, vector<256x512xf32>, vector<8x512xf32> -> vector<8x512xf32>
    %c0_155 = arith.constant 0 : index
    %c0_156 = arith.constant 0 : index
    %545 = vector.load %arg7[%c0_155, %c0_156] : memref<1x512xf32, #tpu.memory_space<vmem>>, vector<1x512xf32>
    %546 = vector.broadcast %545 : vector<1x512xf32> to vector<8x512xf32>
    %547 = arith.addf %544, %546 : vector<8x512xf32>
    %548 = vector.extract_strided_slice %547 {offsets = [0, 0], sizes = [8, 128], strides = [1, 1]} : vector<8x512xf32> to vector<8x128xf32>
    %549 = arith.negf %548 : vector<8x128xf32>
    %550 = math.exp %549 : vector<8x128xf32>
    %cst_157 = arith.constant 1.000000e+00 : f32
    %551 = vector.broadcast %cst_157 : f32 to vector<8x128xf32>
    %552 = arith.addf %551, %550 : vector<8x128xf32>
    %553 = arith.divf %551, %552 : vector<8x128xf32>
    %554 = vector.extract_strided_slice %547 {offsets = [0, 128], sizes = [8, 128], strides = [1, 1]} : vector<8x512xf32> to vector<8x128xf32>
    %555 = arith.negf %554 : vector<8x128xf32>
    %556 = math.exp %555 : vector<8x128xf32>
    %cst_158 = arith.constant 1.000000e+00 : f32
    %557 = vector.broadcast %cst_158 : f32 to vector<8x128xf32>
    %558 = arith.addf %557, %556 : vector<8x128xf32>
    %559 = arith.divf %557, %558 : vector<8x128xf32>
    %560 = vector.extract_strided_slice %547 {offsets = [0, 256], sizes = [8, 128], strides = [1, 1]} : vector<8x512xf32> to vector<8x128xf32>
    %561 = math.tanh %560 : vector<8x128xf32>
    %562 = vector.extract_strided_slice %547 {offsets = [0, 384], sizes = [8, 128], strides = [1, 1]} : vector<8x512xf32> to vector<8x128xf32>
    %563 = arith.negf %562 : vector<8x128xf32>
    %564 = math.exp %563 : vector<8x128xf32>
    %cst_159 = arith.constant 1.000000e+00 : f32
    %565 = vector.broadcast %cst_159 : f32 to vector<8x128xf32>
    %566 = arith.addf %565, %564 : vector<8x128xf32>
    %567 = arith.divf %565, %566 : vector<8x128xf32>
    %568 = arith.mulf %559, %477 : vector<8x128xf32>
    %569 = arith.mulf %553, %561 : vector<8x128xf32>
    %570 = arith.addf %568, %569 : vector<8x128xf32>
    %571 = math.tanh %570 : vector<8x128xf32>
    %572 = arith.mulf %567, %571 : vector<8x128xf32>
    %c6_i32 = arith.constant 6 : i32
    %573 = arith.index_cast %c6_i32 : i32 to index
    %c0_160 = arith.constant 0 : index
    %c0_161 = arith.constant 0 : index
    %574 = vector.load %arg2[%573, %c0_160, %c0_161] : memref<8x8x512xf32, #tpu.memory_space<vmem>>, vector<1x8x512xf32>
    %575 = vector.shape_cast %574 : vector<1x8x512xf32> to vector<8x512xf32>
    %c0_162 = arith.constant 0 : index
    %c0_163 = arith.constant 0 : index
    %576 = vector.load %arg3[%c0_162, %c0_163] : memref<128x512xf32, #tpu.memory_space<vmem>>, vector<128x512xf32>
    %cst_164 = arith.constant dense<0.000000e+00> : vector<8x512xf32>
    %577 = tpu.matmul %510, %576, %cst_164 {dimension_numbers = #tpu.dot_dimension_numbers<[1], [0], [0], [1], [0, 0, 1, 1], [], []>} : vector<8x128xf32>, vector<128x512xf32>, vector<8x512xf32> -> vector<8x512xf32>
    %578 = arith.addf %575, %577 : vector<8x512xf32>
    %579 = vector.extract_strided_slice %578 {offsets = [0, 0], sizes = [8, 128], strides = [1, 1]} : vector<8x512xf32> to vector<8x128xf32>
    %580 = arith.negf %579 : vector<8x128xf32>
    %581 = math.exp %580 : vector<8x128xf32>
    %cst_165 = arith.constant 1.000000e+00 : f32
    %582 = vector.broadcast %cst_165 : f32 to vector<8x128xf32>
    %583 = arith.addf %582, %581 : vector<8x128xf32>
    %584 = arith.divf %582, %583 : vector<8x128xf32>
    %585 = vector.extract_strided_slice %578 {offsets = [0, 128], sizes = [8, 128], strides = [1, 1]} : vector<8x512xf32> to vector<8x128xf32>
    %586 = arith.negf %585 : vector<8x128xf32>
    %587 = math.exp %586 : vector<8x128xf32>
    %cst_166 = arith.constant 1.000000e+00 : f32
    %588 = vector.broadcast %cst_166 : f32 to vector<8x128xf32>
    %589 = arith.addf %588, %587 : vector<8x128xf32>
    %590 = arith.divf %588, %589 : vector<8x128xf32>
    %591 = vector.extract_strided_slice %578 {offsets = [0, 256], sizes = [8, 128], strides = [1, 1]} : vector<8x512xf32> to vector<8x128xf32>
    %592 = math.tanh %591 : vector<8x128xf32>
    %593 = vector.extract_strided_slice %578 {offsets = [0, 384], sizes = [8, 128], strides = [1, 1]} : vector<8x512xf32> to vector<8x128xf32>
    %594 = arith.negf %593 : vector<8x128xf32>
    %595 = math.exp %594 : vector<8x128xf32>
    %cst_167 = arith.constant 1.000000e+00 : f32
    %596 = vector.broadcast %cst_167 : f32 to vector<8x128xf32>
    %597 = arith.addf %596, %595 : vector<8x128xf32>
    %598 = arith.divf %596, %597 : vector<8x128xf32>
    %599 = arith.mulf %590, %508 : vector<8x128xf32>
    %600 = arith.mulf %584, %592 : vector<8x128xf32>
    %601 = arith.addf %599, %600 : vector<8x128xf32>
    %602 = math.tanh %601 : vector<8x128xf32>
    %603 = arith.mulf %598, %602 : vector<8x128xf32>
    %604 = tpu.concatenate %603, %541 in 1 : vector<8x128xf32>, vector<8x128xf32> -> vector<8x256xf32>
    %c0_168 = arith.constant 0 : index
    %c0_169 = arith.constant 0 : index
    %605 = vector.load %arg4[%c0_168, %c0_169] : memref<256x512xf32, #tpu.memory_space<vmem>>, vector<256x512xf32>
    %cst_170 = arith.constant dense<0.000000e+00> : vector<8x512xf32>
    %606 = tpu.matmul %604, %605, %cst_170 {dimension_numbers = #tpu.dot_dimension_numbers<[1], [0], [0], [1], [0, 0, 1, 1], [], []>} : vector<8x256xf32>, vector<256x512xf32>, vector<8x512xf32> -> vector<8x512xf32>
    %c0_171 = arith.constant 0 : index
    %c0_172 = arith.constant 0 : index
    %607 = vector.load %arg5[%c0_171, %c0_172] : memref<1x512xf32, #tpu.memory_space<vmem>>, vector<1x512xf32>
    %608 = vector.broadcast %607 : vector<1x512xf32> to vector<8x512xf32>
    %609 = arith.addf %606, %608 : vector<8x512xf32>
    %610 = vector.extract_strided_slice %609 {offsets = [0, 0], sizes = [8, 128], strides = [1, 1]} : vector<8x512xf32> to vector<8x128xf32>
    %611 = arith.negf %610 : vector<8x128xf32>
    %612 = math.exp %611 : vector<8x128xf32>
    %cst_173 = arith.constant 1.000000e+00 : f32
    %613 = vector.broadcast %cst_173 : f32 to vector<8x128xf32>
    %614 = arith.addf %613, %612 : vector<8x128xf32>
    %615 = arith.divf %613, %614 : vector<8x128xf32>
    %616 = vector.extract_strided_slice %609 {offsets = [0, 128], sizes = [8, 128], strides = [1, 1]} : vector<8x512xf32> to vector<8x128xf32>
    %617 = arith.negf %616 : vector<8x128xf32>
    %618 = math.exp %617 : vector<8x128xf32>
    %cst_174 = arith.constant 1.000000e+00 : f32
    %619 = vector.broadcast %cst_174 : f32 to vector<8x128xf32>
    %620 = arith.addf %619, %618 : vector<8x128xf32>
    %621 = arith.divf %619, %620 : vector<8x128xf32>
    %622 = vector.extract_strided_slice %609 {offsets = [0, 256], sizes = [8, 128], strides = [1, 1]} : vector<8x512xf32> to vector<8x128xf32>
    %623 = math.tanh %622 : vector<8x128xf32>
    %624 = vector.extract_strided_slice %609 {offsets = [0, 384], sizes = [8, 128], strides = [1, 1]} : vector<8x512xf32> to vector<8x128xf32>
    %625 = arith.negf %624 : vector<8x128xf32>
    %626 = math.exp %625 : vector<8x128xf32>
    %cst_175 = arith.constant 1.000000e+00 : f32
    %627 = vector.broadcast %cst_175 : f32 to vector<8x128xf32>
    %628 = arith.addf %627, %626 : vector<8x128xf32>
    %629 = arith.divf %627, %628 : vector<8x128xf32>
    %630 = arith.mulf %621, %539 : vector<8x128xf32>
    %631 = arith.mulf %615, %623 : vector<8x128xf32>
    %632 = arith.addf %630, %631 : vector<8x128xf32>
    %633 = math.tanh %632 : vector<8x128xf32>
    %634 = arith.mulf %629, %633 : vector<8x128xf32>
    %635 = tpu.concatenate %634, %572 in 1 : vector<8x128xf32>, vector<8x128xf32> -> vector<8x256xf32>
    %c0_176 = arith.constant 0 : index
    %c0_177 = arith.constant 0 : index
    %636 = vector.load %arg6[%c0_176, %c0_177] : memref<256x512xf32, #tpu.memory_space<vmem>>, vector<256x512xf32>
    %cst_178 = arith.constant dense<0.000000e+00> : vector<8x512xf32>
    %637 = tpu.matmul %635, %636, %cst_178 {dimension_numbers = #tpu.dot_dimension_numbers<[1], [0], [0], [1], [0, 0, 1, 1], [], []>} : vector<8x256xf32>, vector<256x512xf32>, vector<8x512xf32> -> vector<8x512xf32>
    %c0_179 = arith.constant 0 : index
    %c0_180 = arith.constant 0 : index
    %638 = vector.load %arg7[%c0_179, %c0_180] : memref<1x512xf32, #tpu.memory_space<vmem>>, vector<1x512xf32>
    %639 = vector.broadcast %638 : vector<1x512xf32> to vector<8x512xf32>
    %640 = arith.addf %637, %639 : vector<8x512xf32>
    %641 = vector.extract_strided_slice %640 {offsets = [0, 0], sizes = [8, 128], strides = [1, 1]} : vector<8x512xf32> to vector<8x128xf32>
    %642 = arith.negf %641 : vector<8x128xf32>
    %643 = math.exp %642 : vector<8x128xf32>
    %cst_181 = arith.constant 1.000000e+00 : f32
    %644 = vector.broadcast %cst_181 : f32 to vector<8x128xf32>
    %645 = arith.addf %644, %643 : vector<8x128xf32>
    %646 = arith.divf %644, %645 : vector<8x128xf32>
    %647 = vector.extract_strided_slice %640 {offsets = [0, 128], sizes = [8, 128], strides = [1, 1]} : vector<8x512xf32> to vector<8x128xf32>
    %648 = arith.negf %647 : vector<8x128xf32>
    %649 = math.exp %648 : vector<8x128xf32>
    %cst_182 = arith.constant 1.000000e+00 : f32
    %650 = vector.broadcast %cst_182 : f32 to vector<8x128xf32>
    %651 = arith.addf %650, %649 : vector<8x128xf32>
    %652 = arith.divf %650, %651 : vector<8x128xf32>
    %653 = vector.extract_strided_slice %640 {offsets = [0, 256], sizes = [8, 128], strides = [1, 1]} : vector<8x512xf32> to vector<8x128xf32>
    %654 = math.tanh %653 : vector<8x128xf32>
    %655 = vector.extract_strided_slice %640 {offsets = [0, 384], sizes = [8, 128], strides = [1, 1]} : vector<8x512xf32> to vector<8x128xf32>
    %656 = arith.negf %655 : vector<8x128xf32>
    %657 = math.exp %656 : vector<8x128xf32>
    %cst_183 = arith.constant 1.000000e+00 : f32
    %658 = vector.broadcast %cst_183 : f32 to vector<8x128xf32>
    %659 = arith.addf %658, %657 : vector<8x128xf32>
    %660 = arith.divf %658, %659 : vector<8x128xf32>
    %661 = arith.mulf %652, %570 : vector<8x128xf32>
    %662 = arith.mulf %646, %654 : vector<8x128xf32>
    %663 = arith.addf %661, %662 : vector<8x128xf32>
    %664 = math.tanh %663 : vector<8x128xf32>
    %665 = arith.mulf %660, %664 : vector<8x128xf32>
    %c7_i32 = arith.constant 7 : i32
    %666 = arith.index_cast %c7_i32 : i32 to index
    %c0_184 = arith.constant 0 : index
    %c0_185 = arith.constant 0 : index
    %667 = vector.load %arg2[%666, %c0_184, %c0_185] : memref<8x8x512xf32, #tpu.memory_space<vmem>>, vector<1x8x512xf32>
    %668 = vector.shape_cast %667 : vector<1x8x512xf32> to vector<8x512xf32>
    %c0_186 = arith.constant 0 : index
    %c0_187 = arith.constant 0 : index
    %669 = vector.load %arg3[%c0_186, %c0_187] : memref<128x512xf32, #tpu.memory_space<vmem>>, vector<128x512xf32>
    %cst_188 = arith.constant dense<0.000000e+00> : vector<8x512xf32>
    %670 = tpu.matmul %603, %669, %cst_188 {dimension_numbers = #tpu.dot_dimension_numbers<[1], [0], [0], [1], [0, 0, 1, 1], [], []>} : vector<8x128xf32>, vector<128x512xf32>, vector<8x512xf32> -> vector<8x512xf32>
    %671 = arith.addf %668, %670 : vector<8x512xf32>
    %672 = vector.extract_strided_slice %671 {offsets = [0, 0], sizes = [8, 128], strides = [1, 1]} : vector<8x512xf32> to vector<8x128xf32>
    %673 = arith.negf %672 : vector<8x128xf32>
    %674 = math.exp %673 : vector<8x128xf32>
    %cst_189 = arith.constant 1.000000e+00 : f32
    %675 = vector.broadcast %cst_189 : f32 to vector<8x128xf32>
    %676 = arith.addf %675, %674 : vector<8x128xf32>
    %677 = arith.divf %675, %676 : vector<8x128xf32>
    %678 = vector.extract_strided_slice %671 {offsets = [0, 128], sizes = [8, 128], strides = [1, 1]} : vector<8x512xf32> to vector<8x128xf32>
    %679 = arith.negf %678 : vector<8x128xf32>
    %680 = math.exp %679 : vector<8x128xf32>
    %cst_190 = arith.constant 1.000000e+00 : f32
    %681 = vector.broadcast %cst_190 : f32 to vector<8x128xf32>
    %682 = arith.addf %681, %680 : vector<8x128xf32>
    %683 = arith.divf %681, %682 : vector<8x128xf32>
    %684 = vector.extract_strided_slice %671 {offsets = [0, 256], sizes = [8, 128], strides = [1, 1]} : vector<8x512xf32> to vector<8x128xf32>
    %685 = math.tanh %684 : vector<8x128xf32>
    %686 = vector.extract_strided_slice %671 {offsets = [0, 384], sizes = [8, 128], strides = [1, 1]} : vector<8x512xf32> to vector<8x128xf32>
    %687 = arith.negf %686 : vector<8x128xf32>
    %688 = math.exp %687 : vector<8x128xf32>
    %cst_191 = arith.constant 1.000000e+00 : f32
    %689 = vector.broadcast %cst_191 : f32 to vector<8x128xf32>
    %690 = arith.addf %689, %688 : vector<8x128xf32>
    %691 = arith.divf %689, %690 : vector<8x128xf32>
    %692 = arith.mulf %683, %601 : vector<8x128xf32>
    %693 = arith.mulf %677, %685 : vector<8x128xf32>
    %694 = arith.addf %692, %693 : vector<8x128xf32>
    %695 = math.tanh %694 : vector<8x128xf32>
    %696 = arith.mulf %691, %695 : vector<8x128xf32>
    %697 = tpu.concatenate %696, %634 in 1 : vector<8x128xf32>, vector<8x128xf32> -> vector<8x256xf32>
    %c0_192 = arith.constant 0 : index
    %c0_193 = arith.constant 0 : index
    %698 = vector.load %arg4[%c0_192, %c0_193] : memref<256x512xf32, #tpu.memory_space<vmem>>, vector<256x512xf32>
    %cst_194 = arith.constant dense<0.000000e+00> : vector<8x512xf32>
    %699 = tpu.matmul %697, %698, %cst_194 {dimension_numbers = #tpu.dot_dimension_numbers<[1], [0], [0], [1], [0, 0, 1, 1], [], []>} : vector<8x256xf32>, vector<256x512xf32>, vector<8x512xf32> -> vector<8x512xf32>
    %c0_195 = arith.constant 0 : index
    %c0_196 = arith.constant 0 : index
    %700 = vector.load %arg5[%c0_195, %c0_196] : memref<1x512xf32, #tpu.memory_space<vmem>>, vector<1x512xf32>
    %701 = vector.broadcast %700 : vector<1x512xf32> to vector<8x512xf32>
    %702 = arith.addf %699, %701 : vector<8x512xf32>
    %703 = vector.extract_strided_slice %702 {offsets = [0, 0], sizes = [8, 128], strides = [1, 1]} : vector<8x512xf32> to vector<8x128xf32>
    %704 = arith.negf %703 : vector<8x128xf32>
    %705 = math.exp %704 : vector<8x128xf32>
    %cst_197 = arith.constant 1.000000e+00 : f32
    %706 = vector.broadcast %cst_197 : f32 to vector<8x128xf32>
    %707 = arith.addf %706, %705 : vector<8x128xf32>
    %708 = arith.divf %706, %707 : vector<8x128xf32>
    %709 = vector.extract_strided_slice %702 {offsets = [0, 128], sizes = [8, 128], strides = [1, 1]} : vector<8x512xf32> to vector<8x128xf32>
    %710 = arith.negf %709 : vector<8x128xf32>
    %711 = math.exp %710 : vector<8x128xf32>
    %cst_198 = arith.constant 1.000000e+00 : f32
    %712 = vector.broadcast %cst_198 : f32 to vector<8x128xf32>
    %713 = arith.addf %712, %711 : vector<8x128xf32>
    %714 = arith.divf %712, %713 : vector<8x128xf32>
    %715 = vector.extract_strided_slice %702 {offsets = [0, 256], sizes = [8, 128], strides = [1, 1]} : vector<8x512xf32> to vector<8x128xf32>
    %716 = math.tanh %715 : vector<8x128xf32>
    %717 = vector.extract_strided_slice %702 {offsets = [0, 384], sizes = [8, 128], strides = [1, 1]} : vector<8x512xf32> to vector<8x128xf32>
    %718 = arith.negf %717 : vector<8x128xf32>
    %719 = math.exp %718 : vector<8x128xf32>
    %cst_199 = arith.constant 1.000000e+00 : f32
    %720 = vector.broadcast %cst_199 : f32 to vector<8x128xf32>
    %721 = arith.addf %720, %719 : vector<8x128xf32>
    %722 = arith.divf %720, %721 : vector<8x128xf32>
    %723 = arith.mulf %714, %632 : vector<8x128xf32>
    %724 = arith.mulf %708, %716 : vector<8x128xf32>
    %725 = arith.addf %723, %724 : vector<8x128xf32>
    %726 = math.tanh %725 : vector<8x128xf32>
    %727 = arith.mulf %722, %726 : vector<8x128xf32>
    %728 = tpu.concatenate %727, %665 in 1 : vector<8x128xf32>, vector<8x128xf32> -> vector<8x256xf32>
    %c0_200 = arith.constant 0 : index
    %c0_201 = arith.constant 0 : index
    %729 = vector.load %arg6[%c0_200, %c0_201] : memref<256x512xf32, #tpu.memory_space<vmem>>, vector<256x512xf32>
    %cst_202 = arith.constant dense<0.000000e+00> : vector<8x512xf32>
    %730 = tpu.matmul %728, %729, %cst_202 {dimension_numbers = #tpu.dot_dimension_numbers<[1], [0], [0], [1], [0, 0, 1, 1], [], []>} : vector<8x256xf32>, vector<256x512xf32>, vector<8x512xf32> -> vector<8x512xf32>
    %c0_203 = arith.constant 0 : index
    %c0_204 = arith.constant 0 : index
    %731 = vector.load %arg7[%c0_203, %c0_204] : memref<1x512xf32, #tpu.memory_space<vmem>>, vector<1x512xf32>
    %732 = vector.broadcast %731 : vector<1x512xf32> to vector<8x512xf32>
    %733 = arith.addf %730, %732 : vector<8x512xf32>
    %734 = vector.extract_strided_slice %733 {offsets = [0, 0], sizes = [8, 128], strides = [1, 1]} : vector<8x512xf32> to vector<8x128xf32>
    %735 = arith.negf %734 : vector<8x128xf32>
    %736 = math.exp %735 : vector<8x128xf32>
    %cst_205 = arith.constant 1.000000e+00 : f32
    %737 = vector.broadcast %cst_205 : f32 to vector<8x128xf32>
    %738 = arith.addf %737, %736 : vector<8x128xf32>
    %739 = arith.divf %737, %738 : vector<8x128xf32>
    %740 = vector.extract_strided_slice %733 {offsets = [0, 128], sizes = [8, 128], strides = [1, 1]} : vector<8x512xf32> to vector<8x128xf32>
    %741 = arith.negf %740 : vector<8x128xf32>
    %742 = math.exp %741 : vector<8x128xf32>
    %cst_206 = arith.constant 1.000000e+00 : f32
    %743 = vector.broadcast %cst_206 : f32 to vector<8x128xf32>
    %744 = arith.addf %743, %742 : vector<8x128xf32>
    %745 = arith.divf %743, %744 : vector<8x128xf32>
    %746 = vector.extract_strided_slice %733 {offsets = [0, 256], sizes = [8, 128], strides = [1, 1]} : vector<8x512xf32> to vector<8x128xf32>
    %747 = math.tanh %746 : vector<8x128xf32>
    %748 = vector.extract_strided_slice %733 {offsets = [0, 384], sizes = [8, 128], strides = [1, 1]} : vector<8x512xf32> to vector<8x128xf32>
    %749 = arith.negf %748 : vector<8x128xf32>
    %750 = math.exp %749 : vector<8x128xf32>
    %cst_207 = arith.constant 1.000000e+00 : f32
    %751 = vector.broadcast %cst_207 : f32 to vector<8x128xf32>
    %752 = arith.addf %751, %750 : vector<8x128xf32>
    %753 = arith.divf %751, %752 : vector<8x128xf32>
    %754 = arith.mulf %745, %663 : vector<8x128xf32>
    %755 = arith.mulf %739, %747 : vector<8x128xf32>
    %756 = arith.addf %754, %755 : vector<8x128xf32>
    %757 = math.tanh %756 : vector<8x128xf32>
    %758 = arith.mulf %753, %757 : vector<8x128xf32>
    %c8_i32 = arith.constant 8 : i32
    %c0_208 = arith.constant 0 : index
    %c0_209 = arith.constant 0 : index
    %c0_210 = arith.constant 0 : index
    %759 = vector.load %arg13[%c0_208, %c0_209, %c0_210] : memref<3x8x128xf32, #tpu.memory_space<vmem>>, vector<1x8x128xf32>
    %760 = vector.shape_cast %759 : vector<1x8x128xf32> to vector<8x128xf32>
    %761 = vector.shape_cast %696 : vector<8x128xf32> to vector<1x8x128xf32>
    tpu.vector_store %arg13[%c0_208, %c0_209, %c0_210], %761 {strides = array<i32>} : memref<3x8x128xf32, #tpu.memory_space<vmem>>, vector<1x8x128xf32>,
    %c0_211 = arith.constant 0 : index
    %c0_212 = arith.constant 0 : index
    %c0_213 = arith.constant 0 : index
    %762 = vector.load %arg14[%c0_211, %c0_212, %c0_213] : memref<3x8x128xf32, #tpu.memory_space<vmem>>, vector<1x8x128xf32>
    %763 = vector.shape_cast %762 : vector<1x8x128xf32> to vector<8x128xf32>
    %764 = vector.shape_cast %694 : vector<8x128xf32> to vector<1x8x128xf32>
    tpu.vector_store %arg14[%c0_211, %c0_212, %c0_213], %764 {strides = array<i32>} : memref<3x8x128xf32, #tpu.memory_space<vmem>>, vector<1x8x128xf32>,
    %c1_214 = arith.constant 1 : index
    %c0_215 = arith.constant 0 : index
    %c0_216 = arith.constant 0 : index
    %765 = vector.load %arg13[%c1_214, %c0_215, %c0_216] : memref<3x8x128xf32, #tpu.memory_space<vmem>>, vector<1x8x128xf32>
    %766 = vector.shape_cast %765 : vector<1x8x128xf32> to vector<8x128xf32>
    %767 = vector.shape_cast %727 : vector<8x128xf32> to vector<1x8x128xf32>
    tpu.vector_store %arg13[%c1_214, %c0_215, %c0_216], %767 {strides = array<i32>} : memref<3x8x128xf32, #tpu.memory_space<vmem>>, vector<1x8x128xf32>,
    %c1_217 = arith.constant 1 : index
    %c0_218 = arith.constant 0 : index
    %c0_219 = arith.constant 0 : index
    %768 = vector.load %arg14[%c1_217, %c0_218, %c0_219] : memref<3x8x128xf32, #tpu.memory_space<vmem>>, vector<1x8x128xf32>
    %769 = vector.shape_cast %768 : vector<1x8x128xf32> to vector<8x128xf32>
    %770 = vector.shape_cast %725 : vector<8x128xf32> to vector<1x8x128xf32>
    tpu.vector_store %arg14[%c1_217, %c0_218, %c0_219], %770 {strides = array<i32>} : memref<3x8x128xf32, #tpu.memory_space<vmem>>, vector<1x8x128xf32>,
    %c2_220 = arith.constant 2 : index
    %c0_221 = arith.constant 0 : index
    %c0_222 = arith.constant 0 : index
    %771 = vector.load %arg13[%c2_220, %c0_221, %c0_222] : memref<3x8x128xf32, #tpu.memory_space<vmem>>, vector<1x8x128xf32>
    %772 = vector.shape_cast %771 : vector<1x8x128xf32> to vector<8x128xf32>
    %773 = vector.shape_cast %758 : vector<8x128xf32> to vector<1x8x128xf32>
    tpu.vector_store %arg13[%c2_220, %c0_221, %c0_222], %773 {strides = array<i32>} : memref<3x8x128xf32, #tpu.memory_space<vmem>>, vector<1x8x128xf32>,
    %c2_223 = arith.constant 2 : index
    %c0_224 = arith.constant 0 : index
    %c0_225 = arith.constant 0 : index
    %774 = vector.load %arg14[%c2_223, %c0_224, %c0_225] : memref<3x8x128xf32, #tpu.memory_space<vmem>>, vector<1x8x128xf32>
    %775 = vector.shape_cast %774 : vector<1x8x128xf32> to vector<8x128xf32>
    %776 = vector.shape_cast %756 : vector<8x128xf32> to vector<1x8x128xf32>
    tpu.vector_store %arg14[%c2_223, %c0_224, %c0_225], %776 {strides = array<i32>} : memref<3x8x128xf32, #tpu.memory_space<vmem>>, vector<1x8x128xf32>,
    %c0_i32_226 = arith.constant 0 : i32
    %777 = arith.cmpi eq, %arg1, %c0_i32_226 : i32
    %778 = arith.extui %777 : i1 to i32
    %c0_i32_227 = arith.constant 0 : i32
    %779 = arith.cmpi ne, %778, %c0_i32_227 : i32
    scf.if %779 {
      %c0_228 = arith.constant 0 : index
      %c0_229 = arith.constant 0 : index
      %780 = vector.load %arg8[%c0_228, %c0_229] : memref<128x128xf32, #tpu.memory_space<vmem>>, vector<128x128xf32>
      %cst_230 = arith.constant dense<0.000000e+00> : vector<8x128xf32>
      %781 = tpu.matmul %758, %780, %cst_230 {dimension_numbers = #tpu.dot_dimension_numbers<[1], [0], [0], [1], [0, 0, 1, 1], [], []>} : vector<8x128xf32>, vector<128x128xf32>, vector<8x128xf32> -> vector<8x128xf32>
      %c0_231 = arith.constant 0 : index
      %c0_232 = arith.constant 0 : index
      %782 = vector.load %arg9[%c0_231, %c0_232] : memref<1x128xf32, #tpu.memory_space<vmem>>, vector<1x128xf32>
      %783 = vector.broadcast %782 : vector<1x128xf32> to vector<8x128xf32>
      %784 = arith.addf %781, %783 : vector<8x128xf32>
      %cst_233 = arith.constant 0.000000e+00 : f32
      %785 = vector.broadcast %cst_233 : f32 to vector<8x128xf32>
      %786 = arith.maximumf %784, %785 : vector<8x128xf32>
      %c0_234 = arith.constant 0 : index
      %c0_235 = arith.constant 0 : index
      %787 = vector.load %arg10[%c0_234, %c0_235] : memref<128x128xf32, #tpu.memory_space<vmem>>, vector<128x128xf32>
      %cst_236 = arith.constant dense<0.000000e+00> : vector<8x128xf32>
      %788 = tpu.matmul %786, %787, %cst_236 {dimension_numbers = #tpu.dot_dimension_numbers<[1], [0], [0], [1], [0, 0, 1, 1], [], []>} : vector<8x128xf32>, vector<128x128xf32>, vector<8x128xf32> -> vector<8x128xf32>
      %c0_237 = arith.constant 0 : index
      %c0_238 = arith.constant 0 : index
      %789 = vector.load %arg11[%c0_237, %c0_238] : memref<1x128xf32, #tpu.memory_space<vmem>>, vector<1x128xf32>
      %790 = vector.broadcast %789 : vector<1x128xf32> to vector<8x128xf32>
      %791 = arith.addf %788, %790 : vector<8x128xf32>
      %c0_239 = arith.constant 0 : index
      %c0_240 = arith.constant 0 : index
      %792 = vector.load %arg12[%c0_239, %c0_240] : memref<8x128xf32, #tpu.memory_space<vmem>>, vector<8x128xf32>
      tpu.vector_store %arg12[%c0_239, %c0_240], %791 {strides = array<i32>} : memref<8x128xf32, #tpu.memory_space<vmem>>, vector<8x128xf32>,
    } else {
    }
    return
  }
  func.func @transform_0(%arg0: i32, %arg1: i32) -> (i32, i32, i32) {
    %c0_i32 = arith.constant 0 : i32
    %c0_i32_0 = arith.constant 0 : i32
    return %arg1, %arg0, %c0_i32 : i32, i32, i32
  }
  func.func @transform_1(%arg0: i32, %arg1: i32) -> (i32, i32) {
    %c0_i32 = arith.constant 0 : i32
    %c0_i32_0 = arith.constant 0 : i32
    %c0_i32_1 = arith.constant 0 : i32
    return %c0_i32, %c0_i32_0 : i32, i32
  }
  func.func @transform_2(%arg0: i32, %arg1: i32) -> (i32, i32) {
    %c0_i32 = arith.constant 0 : i32
    %c0_i32_0 = arith.constant 0 : i32
    %c0_i32_1 = arith.constant 0 : i32
    return %c0_i32, %c0_i32_0 : i32, i32
  }
  func.func @transform_3(%arg0: i32, %arg1: i32) -> (i32, i32) {
    %c0_i32 = arith.constant 0 : i32
    %c0_i32_0 = arith.constant 0 : i32
    %c0_i32_1 = arith.constant 0 : i32
    return %c0_i32, %c0_i32_0 : i32, i32
  }
  func.func @transform_4(%arg0: i32, %arg1: i32) -> (i32, i32) {
    %c0_i32 = arith.constant 0 : i32
    %c0_i32_0 = arith.constant 0 : i32
    %c0_i32_1 = arith.constant 0 : i32
    return %c0_i32, %c0_i32_0 : i32, i32
  }
  func.func @transform_5(%arg0: i32, %arg1: i32) -> (i32, i32) {
    %c0_i32 = arith.constant 0 : i32
    %c0_i32_0 = arith.constant 0 : i32
    %c0_i32_1 = arith.constant 0 : i32
    return %c0_i32, %c0_i32_0 : i32, i32
  }
  func.func @transform_6(%arg0: i32, %arg1: i32) -> (i32, i32) {
    %c0_i32 = arith.constant 0 : i32
    %c0_i32_0 = arith.constant 0 : i32
    %c0_i32_1 = arith.constant 0 : i32
    return %c0_i32, %c0_i32_0 : i32, i32
  }
  func.func @transform_7(%arg0: i32, %arg1: i32) -> (i32, i32) {
    %c0_i32 = arith.constant 0 : i32
    %c0_i32_0 = arith.constant 0 : i32
    %c0_i32_1 = arith.constant 0 : i32
    return %c0_i32, %c0_i32_0 : i32, i32
  }
  func.func @transform_8(%arg0: i32, %arg1: i32) -> (i32, i32) {
    %c0_i32 = arith.constant 0 : i32
    %c0_i32_0 = arith.constant 0 : i32
    %c0_i32_1 = arith.constant 0 : i32
    return %c0_i32, %c0_i32_0 : i32, i32
  }
  func.func @transform_9(%arg0: i32, %arg1: i32) -> (i32, i32) {
    %c0_i32 = arith.constant 0 : i32
    %c0_i32_0 = arith.constant 0 : i32
    %c0_i32_1 = arith.constant 0 : i32
    return %c0_i32, %c0_i32_0 : i32, i32
  }
  func.func @transform_10(%arg0: i32, %arg1: i32) -> (i32, i32) {
    %c0_i32 = arith.constant 0 : i32
    %c0_i32_0 = arith.constant 0 : i32
    return %arg0, %c0_i32 : i32, i32
  }
}

</mosaic_0001>

<bundles_post_ra>
// kernel: tpu_custom_call.1
= control target key start
LH: loop header
LB: loop body
LE: loop exit
PB: predicated region body
PF: predicated region fallthrough
CT: control target
= control target key end

     0   :  { %15 = vsyncpa [#allocation5], 0  ;;  %s10179_s0 = inlined_call_operand.hbm [shape: f32[8,8,512], index: 0, kind: input, shape index: {}]   ;;  %s10180_s1 = inlined_call_operand.hbm [shape: f32[128,512], index: 1, kind: input, shape index: {}]   ;;  %s10181_s2 = inlined_call_operand.hbm [shape: f32[256,512], index: 2, kind: input, shape index: {}]   ;;  %s10182_s3 = inlined_call_operand.vmem [shape: f32[1,512], index: 3, kind: input, shape index: {}]   ;;  %s10183_s4 = inlined_call_operand.hbm [shape: f32[256,512], index: 4, kind: input, shape index: {}]   ;;  %s10184_s5 = inlined_call_operand.vmem [shape: f32[1,512], index: 5, kind: input, shape index: {}]   ;;  %s10185_s6 = inlined_call_operand.hbm [shape: f32[128,128], index: 6, kind: input, shape index: {}]   ;;  %s10186_s7 = inlined_call_operand.vmem [shape: f32[1,128], index: 7, kind: input, shape index: {}]   ;;  %s10187_s8 = inlined_call_operand.hbm [shape: f32[128,128], index: 8, kind: input, shape index: {}]   ;;  %s10188_s9 = inlined_call_operand.vmem [shape: f32[1,128], index: 9, kind: input, shape index: {}]   ;;  %s10189_s10 = inlined_call_operand.hbm [shape: f32[8,128], index: 10, kind: output, shape index: {}]  }
   0x1   :  { %16 = vsyncpa [#allocation8], 0 }
   0x2   :  { %17 = vsyncpa [#allocation11], 0 }
   0x3   :  { %18 = vsyncpa [#allocation14], 0 }
   0x4   :  { %19 = vsyncpa [#allocation6], 0  ;;  %s8120_s13 = smov [#allocation7]   ;;  %s8121_s15 = smov [#allocation10]  }
   0x5   :  { %s37_s14 = sshll.u32 %s8120_s13, 4  ;;  %s63_s16 = sshll.u32 %s8121_s15, 4  ;;  %s38_s14 = int_to_ptr.vmem [resolvable:$true] %s37_s14  ;;  %s8189_s16 = int_to_ptr.vmem [resolvable:$true] %s63_s16 }
   0x6   :  { %s7956_s19 = scalar_lea.hbm %s10180_s1, 8192 }
   0x7   :  { %p7957_p0 = scmp.ne.s32.totalorder %s10180_s1, %s7956_s19  ;;  %p7960_p1 = scmp.lt.u32.totalorder %s7956_s19, %s10180_s1 }
   0x9   :  { %p7962_p2 = pnand %p7960_p1, %p7957_p0 }
   0xb   :  { %7965 = shalt.err (!%p7962_p2)
}
   0xc   :  { %s7966_s24 = scalar_lea.vmem %s38_s14, 8192  ;;  %p7971_p4 = scmp.lt.s32.totalorder %s38_s14, %s38_s14 }
   0xd   :  { %p7967_p3 = scmp.ne.s32.totalorder %s38_s14, %s7966_s24  ;;  %p7972_p5 = scmp.lt.s32.totalorder %s7966_s24, %s7966_s24 }
   0xf   :  { %p7973_p6 = por %p7972_p5, %p7971_p4 }
  0x11   :  { %p7974_p7 = pnand %p7973_p6, %p7967_p3 }
  0x13   :  { %7977 = shalt.err (!%p7974_p7)
}
  0x14   :  { %s8122_s25 = smov 512   ;;  %s8123_s26 = smov 32  }
  0x15   :  { %43 = dma.hbm_to_vmem [thread:$0]  %s10180_s1, 8192, %s38_s14, [#allocation8], %s8122_s25, %s8122_s25, %s8123_s26  }
  0x16   :  { %s7978_s11 = scalar_lea.hbm %s10183_s4, 16384 }
  0x17   :  { %p7979_p8 = scmp.ne.s32.totalorder %s10183_s4, %s7978_s11  ;;  %p7982_p9 = scmp.lt.u32.totalorder %s7978_s11, %s10183_s4 }
  0x19   :  { %p7984_p10 = pnand %p7982_p9, %p7979_p8 }
  0x1b   :  { %7987 = shalt.err (!%p7984_p10)
}
  0x1c   :  { %s7988_s18 = scalar_lea.vmem %s8189_s16, 16384  ;;  %p7993_p12 = scmp.lt.s32.totalorder %s8189_s16, %s8189_s16 }
  0x1d   :  { %p7989_p11 = scmp.ne.s32.totalorder %s8189_s16, %s7988_s18  ;;  %p7994_p13 = scmp.lt.s32.totalorder %s7988_s18, %s7988_s18 }
  0x1f   :  { %p7995_p0 = por %p7994_p13, %p7993_p12 }
  0x21   :  { %p7996_p1 = pnand %p7995_p0, %p7989_p11 }
  0x23   :  { %7999 = shalt.err (!%p7996_p1)
}
  0x24   :  { %69 = dma.hbm_to_vmem [thread:$0]  %s10183_s4, 16384, %s8189_s16, [#allocation11], %s8122_s25, %s8122_s25, %s8123_s26  }
  0x25   :  { %s8124_s19 = smov [#allocation4]   ;;  %s8125_s21 = smov [#allocation9]  }
  0x26   :  { %s25_s20 = sshll.u32 %s8124_s19, 4  ;;  %s49_s22 = sshll.u32 %s8125_s21, 4  ;;  %s26_s20 = int_to_ptr.vmem [resolvable:$true] %s25_s20  ;;  %s8226_s22 = int_to_ptr.vmem [resolvable:$true] %s49_s22 }
  0x27   :  { %s8000_s27 = scalar_lea.hbm %s10179_s0, 4096 }
  0x28   :  { %p8001_p2 = scmp.ne.s32.totalorder %s10179_s0, %s8000_s27  ;;  %p8004_p3 = scmp.lt.u32.totalorder %s8000_s27, %s10179_s0 }
  0x2a   :  { %p8006_p4 = pnand %p8004_p3, %p8001_p2 }
  0x2c   :  { %8009 = shalt.err (!%p8006_p4)
}
  0x2d   :  { %s8010_s4 = scalar_lea.vmem %s26_s20, 4096  ;;  %p8015_p6 = scmp.lt.s32.totalorder %s26_s20, %s26_s20 }
  0x2e   :  { %p8011_p5 = scmp.ne.s32.totalorder %s26_s20, %s8010_s4  ;;  %p8016_p7 = scmp.lt.s32.totalorder %s8010_s4, %s8010_s4 }
  0x30   :  { %p8017_p8 = por %p8016_p7, %p8015_p6 }
  0x32   :  { %p8018_p9 = pnand %p8017_p8, %p8011_p5 }
  0x34   :  { %8021 = shalt.err (!%p8018_p9)
}
  0x35   :  { %31 = dma.hbm_to_vmem [thread:$0]  %s10179_s0, 4096, %s26_s20, [#allocation5], %s8122_s25, %s8122_s25, %s8123_s26  }
  0x36   :  { %s8022_s17 = scalar_lea.hbm %s10181_s2, 16384 }
  0x37   :  { %p8023_p10 = scmp.ne.s32.totalorder %s10181_s2, %s8022_s17  ;;  %p8026_p11 = scmp.lt.u32.totalorder %s8022_s17, %s10181_s2 }
  0x39   :  { %p8028_p12 = pnand %p8026_p11, %p8023_p10 }
  0x3b   :  { %8031 = shalt.err (!%p8028_p12)
}
  0x3c   :  { %s8032_s21 = scalar_lea.vmem %s8226_s22, 16384  ;;  %p8037_p0 = scmp.lt.s32.totalorder %s8226_s22, %s8226_s22 }
  0x3d   :  { %p8033_p13 = scmp.ne.s32.totalorder %s8226_s22, %s8032_s21  ;;  %p8038_p1 = scmp.lt.s32.totalorder %s8032_s21, %s8032_s21 }
  0x3f   :  { %p8039_p2 = por %p8038_p1, %p8037_p0 }
  0x41   :  { %p8040_p3 = pnand %p8039_p2, %p8033_p13 }
  0x43   :  { %8043 = shalt.err (!%p8040_p3)
}
  0x44   :  { %55 = dma.hbm_to_vmem [thread:$0]  %s10181_s2, 16384, %s8226_s22, [#allocation8], %s8122_s25, %s8122_s25, %s8123_s26  }
  0x45   :  { %s8126_s23 = smov [#allocation12]   ;;  %s8044_s29 = scalar_lea.hbm %s10185_s6, 2048 }
  0x46   :  { %s77_s24 = sshll.u32 %s8126_s23, 4  ;;  %p8045_p4 = scmp.ne.s32.totalorder %s10185_s6, %s8044_s29  ;;  %s78_s24 = int_to_ptr.vmem [resolvable:$true] %s77_s24 }
  0x47   :  { %p8048_p5 = scmp.lt.u32.totalorder %s8044_s29, %s10185_s6 }
  0x49   :  { %p8050_p6 = pnand %p8048_p5, %p8045_p4 }
  0x4b   :  { %8053 = shalt.err (!%p8050_p6)
}
  0x4c   :  { %s8054_s12 = scalar_lea.vmem %s78_s24, 2048  ;;  %p8059_p8 = scmp.lt.s32.totalorder %s78_s24, %s78_s24 }
  0x4d   :  { %p8055_p7 = scmp.ne.s32.totalorder %s78_s24, %s8054_s12  ;;  %p8060_p9 = scmp.lt.s32.totalorder %s8054_s12, %s8054_s12 }
  0x4f   :  { %p8061_p10 = por %p8060_p9, %p8059_p8 }
  0x51   :  { %p8062_p11 = pnand %p8061_p10, %p8055_p7 }
  0x53   :  { %8065 = shalt.err (!%p8062_p11)
}
  0x54   :  { %s8127_s2 = smov 128   ;;  %s8128_s25 = smov 8  }
  0x55   :  { %83 = dma.hbm_to_vmem [thread:$0]  %s10185_s6, 2048, %s78_s24, [#allocation11], %s8127_s2, %s8127_s2, %s8128_s25  }
  0x56   :  { %s8129_s13 = smov [#allocation13]   ;;  %s8066_s1 = scalar_lea.hbm %s10187_s8, 2048 }
  0x57   :  { %s91_s15 = sshll.u32 %s8129_s13, 4  ;;  %p8067_p12 = scmp.ne.s32.totalorder %s10187_s8, %s8066_s1  ;;  %s92_s15 = int_to_ptr.vmem [resolvable:$true] %s91_s15 }
  0x58   :  { %p8070_p13 = scmp.lt.u32.totalorder %s8066_s1, %s10187_s8 }
  0x5a   :  { %p8072_p0 = pnand %p8070_p13, %p8067_p12 }
  0x5c   :  { %8075 = shalt.err (!%p8072_p0)
}
  0x5d   :  { %s8076_s20 = scalar_lea.vmem %s92_s15, 2048  ;;  %p8081_p2 = scmp.lt.s32.totalorder %s92_s15, %s92_s15 }
  0x5e   :  { %p8077_p1 = scmp.ne.s32.totalorder %s92_s15, %s8076_s20  ;;  %p8082_p3 = scmp.lt.s32.totalorder %s8076_s20, %s8076_s20 }
  0x60   :  { %p8083_p4 = por %p8082_p3, %p8081_p2 }
  0x62   :  { %p8084_p5 = pnand %p8083_p4, %p8077_p1 }
  0x64   :  { %8087 = shalt.err (!%p8084_p5)
}
  0x65   :  { %97 = dma.hbm_to_vmem [thread:$0]  %s10187_s8, 2048, %s92_s15, [#allocation14], %s8127_s2, %s8127_s2, %s8128_s25  }
  0x66   :  { %8110 = dma.done.wait [#allocation5], 4096  }
  0x67   :  { %8111 = vsyncadd [#allocation5], 4294963200 }
  0x68   :  { %8112 = dma.done.wait [#allocation8], 24576  }
  0x69   :  { %8113 = vsyncadd [#allocation8], 4294942720 }
  0x6a   :  { %8114 = dma.done.wait [#allocation11], 18432  }
  0x6b   :  { %8115 = vsyncadd [#allocation11], 4294948864 }
  0x6c   :  { %8116 = dma.done.wait [#allocation14], 2048  }
  0x6d   :  { %8117 = vsyncadd [#allocation14], 4294965248  ;;  %v10190_v0 = vmov 0.0   ;;  %v143_v1 = vld [vmem:[#allocation7 + $0x8] sm:$0xff]  ;;  %v142_v3 = vld [vmem:[#allocation7] sm:$0xff]  ;;  %vm8132_vm0 = vmmov 0  }
  0x6e   :  { %270 = vmatprep.mubr.f32.mxu0 %v10190_v0  ;;  %341 = vmatprep.mubr.f32.mxu1 %v10190_v0  ;;  %v147_v2 = vld [vmem:[#allocation7 + $0x28] sm:$0xff]  ;;  %v146_v5 = vld [vmem:[#allocation7 + $0x20] sm:$0xff]  ;;  %v145_v19 = vld [vmem:[#allocation7 + $0x18] sm:$0xff]  ;;  %s8133_s11 = smov [#allocation15]  }
  0x6f   :  { %v8289_v4 = vpack.c.bf16 %v147_v2, %v143_v1  ;;  %v151_v6 = vld [vmem:[#allocation7 + $0x48] sm:$0xff]  ;;  %v8291_v8 = vpack.c.bf16 %v146_v5, %v142_v3  ;;  %v150_v10 = vld [vmem:[#allocation7 + $0x40] sm:$0xff]  ;;  %v149_v20 = vld [vmem:[#allocation7 + $0x38] sm:$0xff]  ;;  %s4760_s4 = sshll.u32 %s8133_s11, 4  ;;  %s4761_s4 = int_to_ptr.vmem [resolvable:$true] %s4760_s4 }
  0x70   :  { %v155_v7 = vld [vmem:[#allocation7 + $0x68] sm:$0xff]  ;;  %v154_v11 = vld [vmem:[#allocation7 + $0x60] sm:$0xff]  ;;  %v8302_v22 = vpack.c.bf16 %v149_v20, %v145_v19  ;;  %v144_v23 = vld [vmem:[#allocation7 + $0x10] sm:$0xff]  ;;  %s8088_s16 = scalar_lea.vmem %s4761_s4, 128  ;;  %p8093_p7 = scmp.lt.s32.totalorder %s4761_s4, %s4761_s4 }
  0x71   :  { %10499 = vst [vmem:[#allocation21_spill] sm:$0xff] %v8289_v4  ;;  %v8293_v9 = vpack.c.bf16 %v155_v7, %v151_v6  ;;  %v159_v12 = vld [vmem:[#allocation7 + $0x88] sm:$0xff]  ;;  %4951 = vmatprep.subr.bf16.mxu0 %v8289_v4  ;;  %v8297_v14 = vpack.c.bf16 %v154_v11, %v150_v10  ;;  %v158_v15 = vld [vmem:[#allocation7 + $0x80] sm:$0xff]  ;;  %v148_v24 = vld [vmem:[#allocation7 + $0x30] sm:$0xff]  ;;  %p8089_p6 = scmp.ne.s32.totalorder %s4761_s4, %s8088_s16  ;;  %p8094_p8 = scmp.lt.s32.totalorder %s8088_s16, %s8088_s16 }
  0x72   :  { %v163_v13 = vld [vmem:[#allocation7 + $0xa8] sm:$0xff]  ;;  %4953 = vmatpush1.bf16.msra.mxu0 %v8291_v8  ;;  %v162_v16 = vld [vmem:[#allocation7 + $0xa0] sm:$0xff]  ;;  %10500 = vst [vmem:[#allocation22_spill] sm:$0xff] %v8302_v22  ;;  %v8304_v25 = vpack.c.bf16 %v148_v24, %v144_v23  ;;  %4983 = vmatprep.subr.bf16.mxu1 %v8302_v22  ;;  %v153_v27 = vld [vmem:[#allocation7 + $0x58] sm:$0xff] }
  0x73   :  { %4955 = vmatprep.subr.bf16.mxu0 %v8293_v9  ;;  %v8300_v17 = vpack.c.bf16 %v163_v13, %v159_v12  ;;  %v167_v18 = vld [vmem:[#allocation7 + $0xc8] sm:$0xff]  ;;  %v8307_v26 = vpack.c.bf16 %v162_v16, %v158_v15  ;;  %v157_v28 = vld [vmem:[#allocation7 + $0x78] sm:$0xff]  ;;  %v152_v29 = vld [vmem:[#allocation7 + $0x50] sm:$0xff]  ;;  %p8095_p9 = por %p8094_p8, %p8093_p7 }
  0x74   :  { %v171_v21 = vld [vmem:[#allocation7 + $0xe8] sm:$0xff]  ;;  %v166_v31 = vld [vmem:[#allocation7 + $0xc0] sm:$0xff]  ;;  %4985 = vmatpush1.bf16.msra.mxu1 %v8304_v25  ;;  %v8314_v33 = vpack.c.bf16 %v157_v28, %v153_v27  ;;  %v156_v34 = vld [vmem:[#allocation7 + $0x70] sm:$0xff] }
  0x75   :  { %v8311_v30 = vpack.c.bf16 %v171_v21, %v167_v18  ;;  %v170_v32 = vld [vmem:[#allocation7 + $0xe0] sm:$0xff]  ;;  %v175_v35 = vld [vmem:[#allocation7 + $0x108] sm:$0xff]  ;;  %v8316_v37 = vpack.c.bf16 %v156_v34, %v152_v29  ;;  %v161_v38 = vld [vmem:[#allocation7 + $0x98] sm:$0xff]  ;;  %p8096_p10 = pnand %p8095_p9, %p8089_p6 }
  0x76   :  { %4957 = vmatpush1.bf16.msra.mxu0 %v8297_v14  ;;  %v179_v36 = vld [vmem:[#allocation7 + $0x128] sm:$0xff]  ;;  %4987 = vmatprep.subr.bf16.mxu1 %v8314_v33  ;;  %v165_v39 = vld [vmem:[#allocation7 + $0xb8] sm:$0xff]  ;;  %v160_v40 = vld [vmem:[#allocation7 + $0x90] sm:$0xff]  ;;  %v8320_v42 = vpack.c.bf16 %v170_v32, %v166_v31 }
  0x77   :  { %4959 = vmatprep.subr.bf16.mxu0 %v8300_v17  ;;  %v164_v41 = vld [vmem:[#allocation7 + $0xb0] sm:$0xff]  ;;  %v174_v43 = vld [vmem:[#allocation7 + $0x100] sm:$0xff]  ;;  %v8322_v45 = vpack.c.bf16 %v165_v39, %v161_v38  ;;  %v8325_v46 = vpack.c.bf16 %v179_v36, %v175_v35  ;;  %v183_v47 = vld [vmem:[#allocation7 + $0x148] sm:$0xff] }
  0x78   :  { %v178_v44 = vld [vmem:[#allocation7 + $0x120] sm:$0xff]  ;;  %4989 = vmatpush1.bf16.msra.mxu1 %v8316_v37  ;;  %v8328_v48 = vpack.c.bf16 %v164_v41, %v160_v40  ;;  %v169_v49 = vld [vmem:[#allocation7 + $0xd8] sm:$0xff]  ;;  %v187_v51 = vld [vmem:[#allocation7 + $0x168] sm:$0xff] }
  0x79   :  { %10501 = vst [vmem:[#allocation23_spill] sm:$0xff] %v8325_v46  ;;  %v173_v50 = vld [vmem:[#allocation7 + $0xf8] sm:$0xff]  ;;  %4991 = vmatprep.subr.bf16.mxu1 %v8322_v45  ;;  %v168_v53 = vld [vmem:[#allocation7 + $0xd0] sm:$0xff]  ;;  %v8334_v55 = vpack.c.bf16 %v178_v44, %v174_v43  ;;  %v8337_v58 = vpack.c.bf16 %v187_v51, %v183_v47  ;;  %v182_v59 = vld [vmem:[#allocation7 + $0x140] sm:$0xff] }
  0x7a   :  { %4961 = vmatpush1.bf16.msra.mxu0 %v8307_v26  ;;  %v8331_v52 = vpack.c.bf16 %v173_v50, %v169_v49  ;;  %v172_v54 = vld [vmem:[#allocation7 + $0xf0] sm:$0xff]  ;;  %v177_v56 = vld [vmem:[#allocation7 + $0x118] sm:$0xff]  ;;  %v186_v60 = vld [vmem:[#allocation7 + $0x160] sm:$0xff] }
  0x7b   :  { %4963 = vmatprep.subr.bf16.mxu0 %v8311_v30  ;;  %10502 = vst [vmem:[#allocation24_spill] sm:$0xff] %v8334_v55  ;;  %v181_v57 = vld [vmem:[#allocation7 + $0x138] sm:$0xff]  ;;  %10503 = vst [vmem:[#allocation25_spill] sm:$0xff] %v8337_v58  ;;  %v191_v61 = vld [vmem:[#allocation7 + $0x188] sm:$0xff]  ;;  %v8340_v62 = vpack.c.bf16 %v172_v54, %v168_v53  ;;  %v8346_v7 = vpack.c.bf16 %v186_v60, %v182_v59 }
  0x7c   :  { %4993 = vmatpush1.bf16.msra.mxu1 %v8328_v48  ;;  %v195_v63 = vld [vmem:[#allocation7 + $0x1a8] sm:$0xff]  ;;  %v8343_v1 = vpack.c.bf16 %v181_v57, %v177_v56  ;;  %v176_v2 = vld [vmem:[#allocation7 + $0x110] sm:$0xff]  ;;  %v185_v5 = vld [vmem:[#allocation7 + $0x158] sm:$0xff] }
  0x7d   :  { %10504 = vst [vmem:[#allocation26_spill] sm:$0xff] %v8340_v62  ;;  %4995 = vmatprep.subr.bf16.mxu1 %v8331_v52  ;;  %v180_v3 = vld [vmem:[#allocation7 + $0x130] sm:$0xff]  ;;  %v189_v6 = vld [vmem:[#allocation7 + $0x178] sm:$0xff]  ;;  %10506 = vst [vmem:[#allocation28_spill] sm:$0xff] %v8346_v7  ;;  %v8349_v10 = vpack.c.bf16 %v195_v63, %v191_v61 }
  0x7e   :  { %4965 = vmatpush1.bf16.msra.mxu0 %v8320_v42  ;;  %10505 = vst [vmem:[#allocation27_spill] sm:$0xff] %v8343_v1  ;;  %v190_v11 = vld [vmem:[#allocation7 + $0x180] sm:$0xff]  ;;  %v199_v13 = vld [vmem:[#allocation7 + $0x1c8] sm:$0xff]  ;;  %v8352_v15 = vpack.c.bf16 %v180_v3, %v176_v2  ;;  %v8355_v18 = vpack.c.bf16 %v189_v6, %v185_v5  ;;  %v184_v19 = vld [vmem:[#allocation7 + $0x150] sm:$0xff] }
  0x7f   :  { %4967 = vmatprep.subr.bf16.mxu0 %v8325_v46  ;;  %10507 = vst [vmem:[#allocation29_spill] sm:$0xff] %v8349_v10  ;;  %v194_v12 = vld [vmem:[#allocation7 + $0x1a0] sm:$0xff]  ;;  %v203_v16 = vld [vmem:[#allocation7 + $0x1e8] sm:$0xff]  ;;  %v188_v20 = vld [vmem:[#allocation7 + $0x170] sm:$0xff] }
  0x80   :  { %4997 = vmatpush1.bf16.msra.mxu1 %v8340_v62  ;;  %10508 = vst [vmem:[#allocation30_spill] sm:$0xff] %v8352_v15  ;;  %10509 = vst [vmem:[#allocation31_spill] sm:$0xff] %v8355_v18  ;;  %v193_v21 = vld [vmem:[#allocation7 + $0x198] sm:$0xff]  ;;  %v8358_v24 = vpack.c.bf16 %v194_v12, %v190_v11  ;;  %v8361_v27 = vpack.c.bf16 %v203_v16, %v199_v13  ;;  %v198_v28 = vld [vmem:[#allocation7 + $0x1c0] sm:$0xff]  ;;  %v8364_v31 = vpack.c.bf16 %v188_v20, %v184_v19 }
  0x81   :  { %4999 = vmatprep.subr.bf16.mxu1 %v8343_v1  ;;  %v197_v23 = vld [vmem:[#allocation7 + $0x1b8] sm:$0xff]  ;;  %v202_v29 = vld [vmem:[#allocation7 + $0x1e0] sm:$0xff]  ;;  %v192_v32 = vld [vmem:[#allocation7 + $0x190] sm:$0xff] }
  0x82   :  { %4969 = vmatpush1.bf16.msra.mxu0 %v8334_v55  ;;  %10510 = vst [vmem:[#allocation32_spill] sm:$0xff] %v8358_v24  ;;  %10511 = vst [vmem:[#allocation33_spill] sm:$0xff] %v8361_v27  ;;  %v8367_v34 = vpack.c.bf16 %v197_v23, %v193_v21  ;;  %v196_v35 = vld [vmem:[#allocation7 + $0x1b0] sm:$0xff]  ;;  %v377_v36 = vld [vmem:[#allocation9 + $0x8] sm:$0xff]  ;;  %v8370_v41 = vpack.c.bf16 %v202_v29, %v198_v28 }
  0x83   :  { %4971 = vmatprep.subr.bf16.mxu0 %v8337_v58  ;;  %10512 = vst [vmem:[#allocation34_spill] sm:$0xff] %v8364_v31  ;;  %v381_v38 = vld [vmem:[#allocation9 + $0x28] sm:$0xff]  ;;  %v201_v39 = vld [vmem:[#allocation7 + $0x1d8] sm:$0xff]  ;;  %v8374_v43 = vpack.c.bf16 %v196_v35, %v192_v32  ;;  %v200_v44 = vld [vmem:[#allocation7 + $0x1d0] sm:$0xff] }
  0x84   :  { %5001 = vmatpush1.bf16.msra.mxu1 %v8352_v15  ;;  %10513 = vst [vmem:[#allocation35_spill] sm:$0xff] %v8367_v34  ;;  %v205_v40 = vld [vmem:[#allocation7 + $0x1f8] sm:$0xff]  ;;  %10514 = vst [vmem:[#allocation36_spill] sm:$0xff] %v8370_v41  ;;  %v8376_v47 = vpack.c.bf16 %v381_v38, %v377_v36  ;;  %v376_v49 = vld [vmem:[#allocation9] sm:$0xff] }
  0x85   :  { %5003 = vmatprep.subr.bf16.mxu1 %v8355_v18  ;;  %10515 = vst [vmem:[#allocation37_spill] sm:$0xff] %v8374_v43  ;;  %v380_v50 = vld [vmem:[#allocation9 + $0x20] sm:$0xff]  ;;  %v8379_v51 = vpack.c.bf16 %v205_v40, %v201_v39  ;;  %v204_v53 = vld [vmem:[#allocation7 + $0x1f0] sm:$0xff]  ;;  %v385_v54 = vld [vmem:[#allocation9 + $0x48] sm:$0xff] }
  0x86   :  { %4973 = vmatpush1.bf16.msra.mxu0 %v8346_v7  ;;  %10516 = vst [vmem:[#allocation38_spill] sm:$0xff] %v8376_v47  ;;  %v389_v56 = vld [vmem:[#allocation9 + $0x68] sm:$0xff]  ;;  %v379_v57 = vld [vmem:[#allocation9 + $0x18] sm:$0xff]  ;;  %v8382_v60 = vpack.c.bf16 %v380_v50, %v376_v49  ;;  %v8385_v61 = vpack.c.bf16 %v204_v53, %v200_v44  ;;  %v378_v63 = vld [vmem:[#allocation9 + $0x10] sm:$0xff] }
  0x87   :  { %4975 = vmatprep.subr.bf16.mxu0 %v8349_v10  ;;  %10517 = vst [vmem:[#allocation39_spill] sm:$0xff] %v8379_v51  ;;  %v383_v59 = vld [vmem:[#allocation9 + $0x38] sm:$0xff]  ;;  %v8388_v2 = vpack.c.bf16 %v389_v56, %v385_v54  ;;  %v384_v3 = vld [vmem:[#allocation9 + $0x40] sm:$0xff]  ;;  %v382_v11 = vld [vmem:[#allocation9 + $0x30] sm:$0xff] }
  0x88   :  { %5005 = vmatpush1.bf16.msra.mxu1 %v8364_v31  ;;  %10518 = vst [vmem:[#allocation40_spill] sm:$0xff] %v8382_v60  ;;  %10519 = vst [vmem:[#allocation41_spill] sm:$0xff] %v8385_v61  ;;  %v388_v5 = vld [vmem:[#allocation9 + $0x60] sm:$0xff]  ;;  %v8391_v6 = vpack.c.bf16 %v383_v59, %v379_v57  ;;  %v393_v12 = vld [vmem:[#allocation9 + $0x88] sm:$0xff]  ;;  %v8399_v21 = vpack.c.bf16 %v382_v11, %v378_v63 }
  0x89   :  { %5007 = vmatprep.subr.bf16.mxu1 %v8367_v34  ;;  %10520 = vst [vmem:[#allocation42_spill] sm:$0xff] %v8388_v2  ;;  %v397_v13 = vld [vmem:[#allocation9 + $0xa8] sm:$0xff]  ;;  %v387_v16 = vld [vmem:[#allocation9 + $0x58] sm:$0xff]  ;;  %v8395_v20 = vpack.c.bf16 %v388_v5, %v384_v3  ;;  %v386_v23 = vld [vmem:[#allocation9 + $0x50] sm:$0xff] }
  0x8a   :  { %4977 = vmatpush1.bf16.msra.mxu0 %v8358_v24  ;;  %10521 = vst [vmem:[#allocation43_spill] sm:$0xff] %v8391_v6  ;;  %v391_v19 = vld [vmem:[#allocation9 + $0x78] sm:$0xff]  ;;  %10523 = vst [vmem:[#allocation45_spill] sm:$0xff] %v8399_v21  ;;  %v8402_v28 = vpack.c.bf16 %v397_v13, %v393_v12  ;;  %v392_v29 = vld [vmem:[#allocation9 + $0x80] sm:$0xff] }
  0x8b   :  { %4979 = vmatprep.subr.bf16.mxu0 %v8361_v27  ;;  %10522 = vst [vmem:[#allocation44_spill] sm:$0xff] %v8395_v20  ;;  %v396_v32 = vld [vmem:[#allocation9 + $0xa0] sm:$0xff]  ;;  %v8405_v35 = vpack.c.bf16 %v391_v19, %v387_v16  ;;  %v390_v36 = vld [vmem:[#allocation9 + $0x70] sm:$0xff]  ;;  %v401_v38 = vld [vmem:[#allocation9 + $0xc8] sm:$0xff] }
  0x8c   :  { %5009 = vmatpush1.bf16.msra.mxu1 %v8374_v43  ;;  %10524 = vst [vmem:[#allocation46_spill] sm:$0xff] %v8402_v28  ;;  %v405_v39 = vld [vmem:[#allocation9 + $0xe8] sm:$0xff]  ;;  %v395_v40 = vld [vmem:[#allocation9 + $0x98] sm:$0xff]  ;;  %v8409_v49 = vpack.c.bf16 %v396_v32, %v392_v29  ;;  %v8412_v50 = vpack.c.bf16 %v390_v36, %v386_v23  ;;  %v394_v53 = vld [vmem:[#allocation9 + $0x90] sm:$0xff] }
  0x8d   :  { %5011 = vmatprep.subr.bf16.mxu1 %v8379_v51  ;;  %10525 = vst [vmem:[#allocation47_spill] sm:$0xff] %v8405_v35  ;;  %v399_v44 = vld [vmem:[#allocation9 + $0xb8] sm:$0xff]  ;;  %v8415_v54 = vpack.c.bf16 %v405_v39, %v401_v38  ;;  %v400_v56 = vld [vmem:[#allocation9 + $0xc0] sm:$0xff]  ;;  %v398_v63 = vld [vmem:[#allocation9 + $0xb0] sm:$0xff] }
  0x8e   :  { %4981 = vmatpush1.bf16.msra.mxu0 %v8370_v41  ;;  %10526 = vst [vmem:[#allocation48_spill] sm:$0xff] %v8409_v49  ;;  %10527 = vst [vmem:[#allocation49_spill] sm:$0xff] %v8412_v50  ;;  %v404_v57 = vld [vmem:[#allocation9 + $0xe0] sm:$0xff]  ;;  %v8418_v59 = vpack.c.bf16 %v399_v44, %v395_v40  ;;  %v409_v3 = vld [vmem:[#allocation9 + $0x108] sm:$0xff]  ;;  %v8425_v16 = vpack.c.bf16 %v398_v63, %v394_v53 }
  0x8f   :  { %5015 = vmatprep.subr.bf16.mxu0 %v8376_v47  ;;  %10528 = vst [vmem:[#allocation50_spill] sm:$0xff] %v8415_v54  ;;  %v413_v5 = vld [vmem:[#allocation9 + $0x128] sm:$0xff]  ;;  %v403_v11 = vld [vmem:[#allocation9 + $0xd8] sm:$0xff]  ;;  %v8422_v13 = vpack.c.bf16 %v404_v57, %v400_v56  ;;  %v402_v29 = vld [vmem:[#allocation9 + $0xd0] sm:$0xff] }
  0x90   :  { %5013 = vmatpush1.bf16.msra.mxu1 %v8385_v61  ;;  %10529 = vst [vmem:[#allocation51_spill] sm:$0xff] %v8418_v59  ;;  %v407_v12 = vld [vmem:[#allocation9 + $0xf8] sm:$0xff]  ;;  %10531 = vst [vmem:[#allocation53_spill] sm:$0xff] %v8425_v16  ;;  %v8428_v19 = vpack.c.bf16 %v413_v5, %v409_v3  ;;  %v406_v32 = vld [vmem:[#allocation9 + $0xf0] sm:$0xff] }
  0x91   :  { %271 = vmatmul.mubr.f32.vlgmr.msra.gmra.mrb[0].mxu0 %v10190_v0  ;;  %5079 = vmatprep.subr.bf16.mxu1 %v8391_v6  ;;  %10530 = vst [vmem:[#allocation52_spill] sm:$0xff] %v8422_v13  ;;  %v8431_v23 = vpack.c.bf16 %v407_v12, %v403_v11  ;;  %v411_v36 = vld [vmem:[#allocation9 + $0x118] sm:$0xff]  ;;  %v8435_v39 = vpack.c.bf16 %v406_v32, %v402_v29  ;;  %v408_v44 = vld [vmem:[#allocation9 + $0x100] sm:$0xff]  ;;  %v410_v56 = vld [vmem:[#allocation9 + $0x110] sm:$0xff] }
  0x92   :  { %5017 = vmatpush1.bf16.msra.mxu0 %v8382_v60  ;;  %590 = vmatprep.mubr.f32.mxu0 %v10190_v0  ;;  %10532 = vst [vmem:[#allocation54_spill] sm:$0xff] %v8428_v19  ;;  %v415_v38 = vld [vmem:[#allocation9 + $0x138] sm:$0xff]  ;;  %v412_v53 = vld [vmem:[#allocation9 + $0x120] sm:$0xff]  ;;  %v414_v63 = vld [vmem:[#allocation9 + $0x130] sm:$0xff] }
  0x93   :  { %5019 = vmatprep.subr.bf16.mxu0 %v8388_v2  ;;  %342 = vmatmul.mubr.f32.vlgmr.msra.gmra.mrb[0].mxu1 %v10190_v0  ;;  %10533 = vst [vmem:[#allocation55_spill] sm:$0xff] %v8431_v23  ;;  %10534 = vst [vmem:[#allocation56_spill] sm:$0xff] %v8435_v39  ;;  %v8439_v40 = vpack.c.bf16 %v415_v38, %v411_v36  ;;  %v8443_v57 = vpack.c.bf16 %v412_v53, %v408_v44  ;;  %v417_v5 = vld [vmem:[#allocation9 + $0x148] sm:$0xff]  ;;  %v419_v12 = vld [vmem:[#allocation9 + $0x158] sm:$0xff] }
  0x94   :  { %5081 = vmatpush1.bf16.msra.mxu1 %v8399_v21  ;;  %661 = vmatprep.mubr.f32.mxu1 %v10190_v0  ;;  %v8445_v3 = vpack.c.bf16 %v414_v63, %v410_v56  ;;  %v421_v11 = vld [vmem:[#allocation9 + $0x168] sm:$0xff]  ;;  %v423_v32 = vld [vmem:[#allocation9 + $0x178] sm:$0xff]  ;;  %v416_v36 = vld [vmem:[#allocation9 + $0x140] sm:$0xff] }
  0x95   :  { %5083 = vmatprep.subr.bf16.mxu1 %v8405_v35  ;;  %10535 = vst [vmem:[#allocation57_spill] sm:$0xff] %v8439_v40  ;;  %10536 = vst [vmem:[#allocation58_spill] sm:$0xff] %v8443_v57  ;;  %v8449_v29 = vpack.c.bf16 %v421_v11, %v417_v5  ;;  %v8451_v38 = vpack.c.bf16 %v423_v32, %v419_v12  ;;  %v420_v0 = vld [vmem:[#allocation9 + $0x160] sm:$0xff]  ;;  %v422_v44 = vld [vmem:[#allocation9 + $0x170] sm:$0xff] }
  0x96   :  { %5021 = vmatpush1.bf16.msra.mxu0 %v8395_v20  ;;  %10537 = vst [vmem:[#allocation59_spill] sm:$0xff] %v8445_v3  ;;  %v8454_v53 = vpack.c.bf16 %v420_v0, %v416_v36  ;;  %v425_v63 = vld [vmem:[#allocation9 + $0x188] sm:$0xff]  ;;  %v431_v11 = vld [vmem:[#allocation9 + $0x1b8] sm:$0xff]  ;;  %v424_v12 = vld [vmem:[#allocation9 + $0x180] sm:$0xff] }
  0x97   :  { %5023 = vmatprep.subr.bf16.mxu0 %v8402_v28  ;;  %10538 = vst [vmem:[#allocation60_spill] sm:$0xff] %v8449_v29  ;;  %10539 = vst [vmem:[#allocation61_spill] sm:$0xff] %v8451_v38  ;;  %v428_v32 = vld [vmem:[#allocation9 + $0x1a0] sm:$0xff]  ;;  %v430_v36 = vld [vmem:[#allocation9 + $0x1b0] sm:$0xff] }
  0x98   :  { %5085 = vmatpush1.bf16.msra.mxu1 %v8412_v50  ;;  %10540 = vst [vmem:[#allocation62_spill] sm:$0xff] %v8454_v53  ;;  %v8465_v0 = vpack.c.bf16 %v428_v32, %v424_v12  ;;  %v727_v28 = vld [vmem:[#allocation10 + $0x118] sm:$0xff] }
  0x99   :  { %5087 = vmatprep.subr.bf16.mxu1 %v8418_v59  ;;  %v715_v59 = vld [vmem:[#allocation10 + $0xb8] sm:$0xff] }
  0x9a   :  { %5025 = vmatpush1.bf16.msra.mxu0 %v8409_v49  ;;  %10544 = vst [vmem:[#allocation66_spill] sm:$0xff] %v8465_v0  ;;  %v711_v49 = vld [vmem:[#allocation10 + $0x98] sm:$0xff] }
  0x9b   :  { %5027 = vmatprep.subr.bf16.mxu0 %v8415_v54  ;;  %v709_v54 = vld [vmem:[#allocation10 + $0x88] sm:$0xff] }
  0x9c   :  { %5089 = vmatpush1.bf16.msra.mxu1 %v8425_v16  ;;  %v713_v16 = vld [vmem:[#allocation10 + $0xa8] sm:$0xff] }
  0x9d   :  { %5091 = vmatprep.subr.bf16.mxu1 %v8431_v23 }
  0x9e   :  { %5029 = vmatpush1.bf16.msra.mxu0 %v8422_v13 }
  0x9f   :  { %5031 = vmatprep.subr.bf16.mxu0 %v8428_v19 }
  0xa0   :  { %5093 = vmatpush1.bf16.msra.mxu1 %v8435_v39  ;;  %v495_v39 = vld [vmem:[#allocation9 + $0x3b8] sm:$0xff] }
  0xa1   :  { %5095 = vmatprep.subr.bf16.mxu1 %v8439_v40  ;;  %v418_v40 = vld [vmem:[#allocation9 + $0x150] sm:$0xff] }
  0xa2   :  { %5033 = vmatpush1.bf16.msra.mxu0 %v8443_v57  ;;  %v8456_v56 = vpack.c.bf16 %v422_v44, %v418_v40  ;;  %v429_v57 = vld [vmem:[#allocation9 + $0x1a8] sm:$0xff]  ;;  %v426_v40 = vld [vmem:[#allocation9 + $0x190] sm:$0xff] }
  0xa3   :  { %5035 = vmatprep.subr.bf16.mxu0 %v8449_v29  ;;  %v8461_v5 = vpack.c.bf16 %v429_v57, %v425_v63  ;;  %v8468_v44 = vpack.c.bf16 %v430_v36, %v426_v40  ;;  %v432_v63 = vld [vmem:[#allocation9 + $0x1c0] sm:$0xff]  ;;  %v434_v40 = vld [vmem:[#allocation9 + $0x1d0] sm:$0xff]  ;;  %v493_v29 = vld [vmem:[#allocation9 + $0x3a8] sm:$0xff] }
  0xa4   :  { %5097 = vmatpush1.bf16.msra.mxu1 %v8445_v3  ;;  %10541 = vst [vmem:[#allocation63_spill] sm:$0xff] %v8456_v56  ;;  %v427_v3 = vld [vmem:[#allocation9 + $0x198] sm:$0xff]  ;;  %v438_v36 = vld [vmem:[#allocation9 + $0x1f0] sm:$0xff] }
  0xa5   :  { %5099 = vmatprep.subr.bf16.mxu1 %v8451_v38  ;;  %10542 = vst [vmem:[#allocation64_spill] sm:$0xff] %v8461_v5  ;;  %v8463_v19 = vpack.c.bf16 %v431_v11, %v427_v3  ;;  %10545 = vst [vmem:[#allocation67_spill] sm:$0xff] %v8468_v44  ;;  %v437_v38 = vld [vmem:[#allocation9 + $0x1e8] sm:$0xff]  ;;  %v439_v3 = vld [vmem:[#allocation9 + $0x1f8] sm:$0xff] }
  0xa6   :  { %5037 = vmatpush1.bf16.msra.mxu0 %v8454_v53  ;;  %v433_v53 = vld [vmem:[#allocation9 + $0x1c8] sm:$0xff]  ;;  %v436_v11 = vld [vmem:[#allocation9 + $0x1e0] sm:$0xff] }
  0xa7   :  { %10543 = vst [vmem:[#allocation65_spill] sm:$0xff] %v8463_v19  ;;  %5039 = vmatprep.subr.bf16.mxu0 %v8461_v5  ;;  %v8473_v57 = vpack.c.bf16 %v437_v38, %v433_v53  ;;  %v8477_v32 = vpack.c.bf16 %v436_v11, %v432_v63  ;;  %v445_v5 = vld [vmem:[#allocation9 + $0x228] sm:$0xff]  ;;  %v447_v53 = vld [vmem:[#allocation9 + $0x238] sm:$0xff] }
  0xa8   :  { %5101 = vmatpush1.bf16.msra.mxu1 %v8456_v56  ;;  %v435_v56 = vld [vmem:[#allocation9 + $0x1d8] sm:$0xff] }
  0xa9   :  { %5103 = vmatprep.subr.bf16.mxu1 %v8463_v19  ;;  %10546 = vst [vmem:[#allocation68_spill] sm:$0xff] %v8473_v57  ;;  %v8475_v12 = vpack.c.bf16 %v439_v3, %v435_v56  ;;  %10548 = vst [vmem:[#allocation70_spill] sm:$0xff] %v8477_v32  ;;  %v8480_v19 = vpack.c.bf16 %v438_v36, %v434_v40  ;;  %v440_v56 = vld [vmem:[#allocation9 + $0x200] sm:$0xff]  ;;  %v442_v40 = vld [vmem:[#allocation9 + $0x210] sm:$0xff] }
  0xaa   :  { %5041 = vmatpush1.bf16.msra.mxu0 %v8465_v0  ;;  %v441_v0 = vld [vmem:[#allocation9 + $0x208] sm:$0xff]  ;;  %v444_v3 = vld [vmem:[#allocation9 + $0x220] sm:$0xff]  ;;  %v446_v36 = vld [vmem:[#allocation9 + $0x230] sm:$0xff] }
  0xab   :  { %10547 = vst [vmem:[#allocation69_spill] sm:$0xff] %v8475_v12  ;;  %5043 = vmatprep.subr.bf16.mxu0 %v8473_v57  ;;  %10549 = vst [vmem:[#allocation71_spill] sm:$0xff] %v8480_v19  ;;  %v8485_v38 = vpack.c.bf16 %v445_v5, %v441_v0  ;;  %v8489_v11 = vpack.c.bf16 %v444_v3, %v440_v56  ;;  %v453_v57 = vld [vmem:[#allocation9 + $0x268] sm:$0xff]  ;;  %v455_v0 = vld [vmem:[#allocation9 + $0x278] sm:$0xff] }
  0xac   :  { %5105 = vmatpush1.bf16.msra.mxu1 %v8468_v44  ;;  %v443_v44 = vld [vmem:[#allocation9 + $0x218] sm:$0xff] }
  0xad   :  { %5107 = vmatprep.subr.bf16.mxu1 %v8475_v12  ;;  %10550 = vst [vmem:[#allocation72_spill] sm:$0xff] %v8485_v38  ;;  %v8487_v63 = vpack.c.bf16 %v447_v53, %v443_v44  ;;  %10552 = vst [vmem:[#allocation74_spill] sm:$0xff] %v8489_v11  ;;  %v8492_v12 = vpack.c.bf16 %v446_v36, %v442_v40  ;;  %v448_v44 = vld [vmem:[#allocation9 + $0x240] sm:$0xff]  ;;  %v450_v40 = vld [vmem:[#allocation9 + $0x250] sm:$0xff] }
  0xae   :  { %5045 = vmatpush1.bf16.msra.mxu0 %v8477_v32  ;;  %v449_v32 = vld [vmem:[#allocation9 + $0x248] sm:$0xff]  ;;  %v452_v53 = vld [vmem:[#allocation9 + $0x260] sm:$0xff]  ;;  %v454_v36 = vld [vmem:[#allocation9 + $0x270] sm:$0xff] }
  0xaf   :  { %10551 = vst [vmem:[#allocation73_spill] sm:$0xff] %v8487_v63  ;;  %5047 = vmatprep.subr.bf16.mxu0 %v8485_v38  ;;  %10553 = vst [vmem:[#allocation75_spill] sm:$0xff] %v8492_v12  ;;  %v8497_v5 = vpack.c.bf16 %v453_v57, %v449_v32  ;;  %v8501_v3 = vpack.c.bf16 %v452_v53, %v448_v44  ;;  %v461_v38 = vld [vmem:[#allocation9 + $0x2a8] sm:$0xff]  ;;  %v456_v32 = vld [vmem:[#allocation9 + $0x280] sm:$0xff] }
  0xb0   :  { %5109 = vmatpush1.bf16.msra.mxu1 %v8480_v19  ;;  %v451_v19 = vld [vmem:[#allocation9 + $0x258] sm:$0xff] }
  0xb1   :  { %5111 = vmatprep.subr.bf16.mxu1 %v8487_v63  ;;  %10554 = vst [vmem:[#allocation76_spill] sm:$0xff] %v8497_v5  ;;  %v8499_v56 = vpack.c.bf16 %v455_v0, %v451_v19  ;;  %10556 = vst [vmem:[#allocation78_spill] sm:$0xff] %v8501_v3  ;;  %v8504_v63 = vpack.c.bf16 %v454_v36, %v450_v40  ;;  %v463_v19 = vld [vmem:[#allocation9 + $0x2b8] sm:$0xff]  ;;  %v460_v0 = vld [vmem:[#allocation9 + $0x2a0] sm:$0xff] }
  0xb2   :  { %5049 = vmatpush1.bf16.msra.mxu0 %v8489_v11  ;;  %v457_v11 = vld [vmem:[#allocation9 + $0x288] sm:$0xff]  ;;  %v8513_v53 = vpack.c.bf16 %v460_v0, %v456_v32  ;;  %v458_v40 = vld [vmem:[#allocation9 + $0x290] sm:$0xff] }
  0xb3   :  { %10555 = vst [vmem:[#allocation77_spill] sm:$0xff] %v8499_v56  ;;  %5051 = vmatprep.subr.bf16.mxu0 %v8497_v5  ;;  %10557 = vst [vmem:[#allocation79_spill] sm:$0xff] %v8504_v63  ;;  %v8509_v57 = vpack.c.bf16 %v461_v38, %v457_v11  ;;  %v462_v36 = vld [vmem:[#allocation9 + $0x2b0] sm:$0xff]  ;;  %v469_v5 = vld [vmem:[#allocation9 + $0x2e8] sm:$0xff] }
  0xb4   :  { %5113 = vmatpush1.bf16.msra.mxu1 %v8492_v12  ;;  %v459_v12 = vld [vmem:[#allocation9 + $0x298] sm:$0xff]  ;;  %10560 = vst [vmem:[#allocation82_spill] sm:$0xff] %v8513_v53  ;;  %v464_v11 = vld [vmem:[#allocation9 + $0x2c0] sm:$0xff] }
  0xb5   :  { %5115 = vmatprep.subr.bf16.mxu1 %v8499_v56  ;;  %10558 = vst [vmem:[#allocation80_spill] sm:$0xff] %v8509_v57  ;;  %v8511_v44 = vpack.c.bf16 %v463_v19, %v459_v12  ;;  %v8516_v56 = vpack.c.bf16 %v462_v36, %v458_v40  ;;  %v471_v12 = vld [vmem:[#allocation9 + $0x2f8] sm:$0xff]  ;;  %v468_v19 = vld [vmem:[#allocation9 + $0x2e0] sm:$0xff]  ;;  %v466_v40 = vld [vmem:[#allocation9 + $0x2d0] sm:$0xff] }
  0xb6   :  { %5053 = vmatpush1.bf16.msra.mxu0 %v8501_v3  ;;  %v465_v3 = vld [vmem:[#allocation9 + $0x2c8] sm:$0xff]  ;;  %v8525_v0 = vpack.c.bf16 %v468_v19, %v464_v11  ;;  %v470_v36 = vld [vmem:[#allocation9 + $0x2f0] sm:$0xff] }
  0xb7   :  { %10559 = vst [vmem:[#allocation81_spill] sm:$0xff] %v8511_v44  ;;  %5055 = vmatprep.subr.bf16.mxu0 %v8509_v57  ;;  %10561 = vst [vmem:[#allocation83_spill] sm:$0xff] %v8516_v56  ;;  %v8521_v38 = vpack.c.bf16 %v469_v5, %v465_v3  ;;  %v477_v57 = vld [vmem:[#allocation9 + $0x328] sm:$0xff]  ;;  %v472_v3 = vld [vmem:[#allocation9 + $0x300] sm:$0xff] }
  0xb8   :  { %5117 = vmatpush1.bf16.msra.mxu1 %v8504_v63  ;;  %v467_v63 = vld [vmem:[#allocation9 + $0x2d8] sm:$0xff]  ;;  %10564 = vst [vmem:[#allocation86_spill] sm:$0xff] %v8525_v0 }
  0xb9   :  { %5119 = vmatprep.subr.bf16.mxu1 %v8511_v44  ;;  %10562 = vst [vmem:[#allocation84_spill] sm:$0xff] %v8521_v38  ;;  %v8523_v32 = vpack.c.bf16 %v471_v12, %v467_v63  ;;  %v8528_v44 = vpack.c.bf16 %v470_v36, %v466_v40  ;;  %v479_v63 = vld [vmem:[#allocation9 + $0x338] sm:$0xff]  ;;  %v476_v12 = vld [vmem:[#allocation9 + $0x320] sm:$0xff]  ;;  %v474_v40 = vld [vmem:[#allocation9 + $0x310] sm:$0xff] }
  0xba   :  { %5057 = vmatpush1.bf16.msra.mxu0 %v8513_v53  ;;  %v473_v53 = vld [vmem:[#allocation9 + $0x308] sm:$0xff]  ;;  %v8537_v19 = vpack.c.bf16 %v476_v12, %v472_v3  ;;  %v478_v36 = vld [vmem:[#allocation9 + $0x330] sm:$0xff] }
  0xbb   :  { %10563 = vst [vmem:[#allocation85_spill] sm:$0xff] %v8523_v32  ;;  %5059 = vmatprep.subr.bf16.mxu0 %v8521_v38  ;;  %10565 = vst [vmem:[#allocation87_spill] sm:$0xff] %v8528_v44  ;;  %v8533_v5 = vpack.c.bf16 %v477_v57, %v473_v53  ;;  %v485_v38 = vld [vmem:[#allocation9 + $0x368] sm:$0xff]  ;;  %v480_v53 = vld [vmem:[#allocation9 + $0x340] sm:$0xff] }
  0xbc   :  { %5121 = vmatpush1.bf16.msra.mxu1 %v8516_v56  ;;  %v475_v56 = vld [vmem:[#allocation9 + $0x318] sm:$0xff]  ;;  %10568 = vst [vmem:[#allocation90_spill] sm:$0xff] %v8537_v19 }
  0xbd   :  { %5123 = vmatprep.subr.bf16.mxu1 %v8523_v32  ;;  %10566 = vst [vmem:[#allocation88_spill] sm:$0xff] %v8533_v5  ;;  %v8535_v11 = vpack.c.bf16 %v479_v63, %v475_v56  ;;  %v8540_v32 = vpack.c.bf16 %v478_v36, %v474_v40  ;;  %v487_v56 = vld [vmem:[#allocation9 + $0x378] sm:$0xff]  ;;  %v484_v63 = vld [vmem:[#allocation9 + $0x360] sm:$0xff]  ;;  %v482_v40 = vld [vmem:[#allocation9 + $0x350] sm:$0xff] }
  0xbe   :  { %5061 = vmatpush1.bf16.msra.mxu0 %v8525_v0  ;;  %v481_v0 = vld [vmem:[#allocation9 + $0x348] sm:$0xff]  ;;  %v8549_v12 = vpack.c.bf16 %v484_v63, %v480_v53  ;;  %v486_v36 = vld [vmem:[#allocation9 + $0x370] sm:$0xff] }
  0xbf   :  { %10567 = vst [vmem:[#allocation89_spill] sm:$0xff] %v8535_v11  ;;  %5063 = vmatprep.subr.bf16.mxu0 %v8533_v5  ;;  %10569 = vst [vmem:[#allocation91_spill] sm:$0xff] %v8540_v32  ;;  %v8545_v57 = vpack.c.bf16 %v485_v38, %v481_v0  ;;  %v489_v5 = vld [vmem:[#allocation9 + $0x388] sm:$0xff]  ;;  %v490_v53 = vld [vmem:[#allocation9 + $0x390] sm:$0xff] }
  0xc0   :  { %5125 = vmatpush1.bf16.msra.mxu1 %v8528_v44  ;;  %v483_v44 = vld [vmem:[#allocation9 + $0x358] sm:$0xff]  ;;  %10572 = vst [vmem:[#allocation94_spill] sm:$0xff] %v8549_v12  ;;  %v8555_v38 = vpack.c.bf16 %v493_v29, %v489_v5 }
  0xc1   :  { %5127 = vmatprep.subr.bf16.mxu1 %v8535_v11  ;;  %10570 = vst [vmem:[#allocation92_spill] sm:$0xff] %v8545_v57  ;;  %v8547_v3 = vpack.c.bf16 %v487_v56, %v483_v44  ;;  %v8552_v11 = vpack.c.bf16 %v486_v36, %v482_v40  ;;  %v488_v44 = vld [vmem:[#allocation9 + $0x380] sm:$0xff]  ;;  %v494_v40 = vld [vmem:[#allocation9 + $0x3b0] sm:$0xff]  ;;  %v497_v36 = vld [vmem:[#allocation9 + $0x3c8] sm:$0xff] }
  0xc2   :  { %5065 = vmatpush1.bf16.msra.mxu0 %v8537_v19  ;;  %v491_v19 = vld [vmem:[#allocation9 + $0x398] sm:$0xff]  ;;  %10574 = vst [vmem:[#allocation96_spill] sm:$0xff] %v8555_v38  ;;  %v492_v56 = vld [vmem:[#allocation9 + $0x3a0] sm:$0xff]  ;;  %v8565_v29 = vpack.c.bf16 %v494_v40, %v490_v53  ;;  %v697_v53 = vld [vmem:[#allocation10 + $0x28] sm:$0xff] }
  0xc3   :  { %10571 = vst [vmem:[#allocation93_spill] sm:$0xff] %v8547_v3  ;;  %5067 = vmatprep.subr.bf16.mxu0 %v8545_v57  ;;  %10573 = vst [vmem:[#allocation95_spill] sm:$0xff] %v8552_v11  ;;  %v8557_v0 = vpack.c.bf16 %v495_v39, %v491_v19  ;;  %v8561_v63 = vpack.c.bf16 %v492_v56, %v488_v44  ;;  %v501_v57 = vld [vmem:[#allocation9 + $0x3e8] sm:$0xff]  ;;  %v499_v5 = vld [vmem:[#allocation9 + $0x3d8] sm:$0xff] }
  0xc4   :  { %5129 = vmatpush1.bf16.msra.mxu1 %v8540_v32  ;;  %10577 = vst [vmem:[#allocation99_spill] sm:$0xff] %v8565_v29  ;;  %v8567_v39 = vpack.c.bf16 %v501_v57, %v497_v36  ;;  %v503_v19 = vld [vmem:[#allocation9 + $0x3f8] sm:$0xff]  ;;  %v502_v44 = vld [vmem:[#allocation9 + $0x3f0] sm:$0xff]  ;;  %v693_v57 = vld [vmem:[#allocation10 + $0x8] sm:$0xff] }
  0xc5   :  { %5131 = vmatprep.subr.bf16.mxu1 %v8547_v3  ;;  %10575 = vst [vmem:[#allocation97_spill] sm:$0xff] %v8557_v0  ;;  %10576 = vst [vmem:[#allocation98_spill] sm:$0xff] %v8561_v63  ;;  %v496_v3 = vld [vmem:[#allocation9 + $0x3c0] sm:$0xff]  ;;  %v8569_v32 = vpack.c.bf16 %v503_v19, %v499_v5  ;;  %v695_v40 = vld [vmem:[#allocation10 + $0x18] sm:$0xff]  ;;  %v8581_v36 = vpack.c.bf16 %v697_v53, %v693_v57 }
  0xc6   :  { %5069 = vmatpush1.bf16.msra.mxu0 %v8549_v12  ;;  %10578 = vst [vmem:[#allocation100_spill] sm:$0xff] %v8567_v39  ;;  %v500_v12 = vld [vmem:[#allocation9 + $0x3e0] sm:$0xff]  ;;  %v699_v5 = vld [vmem:[#allocation10 + $0x38] sm:$0xff] }
  0xc7   :  { %5071 = vmatprep.subr.bf16.mxu0 %v8555_v38  ;;  %10579 = vst [vmem:[#allocation101_spill] sm:$0xff] %v8569_v32  ;;  %v8573_v56 = vpack.c.bf16 %v500_v12, %v496_v3  ;;  %10582 = vst [vmem:[#allocation104_spill] sm:$0xff] %v8581_v36  ;;  %v8583_v19 = vpack.c.bf16 %v699_v5, %v695_v40  ;;  %v139_v3 = vld [vmem:[#allocation4 + $0x8] sm:$0xff]  ;;  %v140_v40 = vld [vmem:[#allocation4 + $0x10] sm:$0xff] }
  0xc8   :  { %5133 = vmatpush1.bf16.msra.mxu1 %v8552_v11  ;;  %v498_v11 = vld [vmem:[#allocation9 + $0x3d0] sm:$0xff] }
  0xc9   :  { %5135 = vmatprep.subr.bf16.mxu1 %v8557_v0  ;;  %10580 = vst [vmem:[#allocation102_spill] sm:$0xff] %v8573_v56  ;;  %v8575_v38 = vpack.c.bf16 %v502_v44, %v498_v11  ;;  %10583 = vst [vmem:[#allocation105_spill] sm:$0xff] %v8583_v19  ;;  %v138_v11 = vld [vmem:[#allocation4] sm:$0xff] }
  0xca   :  { %5073 = vmatpush1.bf16.msra.mxu0 %v8561_v63 }
  0xcb   :  { %10581 = vst [vmem:[#allocation103_spill] sm:$0xff] %v8575_v38  ;;  %5075 = vmatprep.subr.bf16.mxu0 %v8567_v39 }
  0xcc   :  { %5137 = vmatpush1.bf16.msra.mxu1 %v8565_v29  ;;  %v141_v29 = vld [vmem:[#allocation4 + $0x18] sm:$0xff] }
  0xcd   :  { %5139 = vmatprep.subr.bf16.mxu1 %v8569_v32 }
  0xce   :  { %5077 = vmatpush1.bf16.msra.mxu0 %v8573_v56 }
  0xcf   :  { %5143 = vmatprep.subr.bf16.mxu0 %v8581_v36 }
  0xd0   :  { %5141 = vmatpush1.bf16.msra.mxu1 %v8575_v38 }
  0xd1   :  { %5207 = vmatprep.subr.bf16.mxu1 %v8583_v19 }
 0x164   :  { %v272_v12 = vpop.f32.mrb[0].mxu0 }
 0x165   :  { %v348_v44 = vadd.f32 %v272_v12, %v138_v11  ;;  %v274_v32 = vpop.f32.mrb[1].mxu0 }
 0x166   :  { %v349_v56 = vadd.f32 %v274_v32, %v139_v3  ;;  %v343_v63 = vpop.f32.mrb[0].mxu1 }
 0x167   :  { %v4772_v39 = vmul.f32 -1.442695, %v348_v44  ;;  %v345_v57 = vpop.f32.mrb[1].mxu1  ;;  %v350_v0 = vadd.f32 %v343_v63, %v140_v40  ;;  %v692_v63 = vld [vmem:[#allocation10] sm:$0xff] }
 0x168   :  { %v4773_v38 = vmul.f32 -1.442695, %v349_v56  ;;  %v351_v53 = vadd.f32 %v345_v57, %v141_v29  ;;  %v696_v29 = vld [vmem:[#allocation10 + $0x20] sm:$0xff]  ;;  %v694_v57 = vld [vmem:[#allocation10 + $0x10] sm:$0xff] }
 0x169   :  { %7572 = vpow2.f32 %v4772_v39 }
 0x16a   :  { %7574 = vpow2.f32 %v4773_v38  ;;  %v4774_v5 = vmul.f32 -1.442695, %v351_v53  ;;  %v707_v53 = vld [vmem:[#allocation10 + $0x78] sm:$0xff] }
 0x16c   :  { %7576 = vpow2.f32 %v4774_v5  ;;  %v8590_v5 = vpack.c.bf16 %v696_v29, %v692_v63 }
 0x16d   :  { %7578 = vtanh.f32 %v350_v0  ;;  %v701_v0 = vld [vmem:[#allocation10 + $0x48] sm:$0xff] }
 0x16e   :  { %10585 = vst [vmem:[#allocation107_spill] sm:$0xff] %v8590_v5 }
 0x173   :  { %v7573_v36 = vpop.eup %7572 }
 0x174   :  { %v7575_v19 = vpop.eup %7574  ;;  %v355_v13 = vadd.f32 1.0, %v7573_v36  ;;  %v698_v36 = vld [vmem:[#allocation10 + $0x30] sm:$0xff] }
 0x175   :  { %v361_v23 = vadd.f32 1.0, %v7575_v19 }
 0x176   :  { %7580 = vrcp.f32 %v355_v13  ;;  %v7577_v32 = vpop.eup %7576  ;;  %v705_v13 = vld [vmem:[#allocation10 + $0x68] sm:$0xff] }
 0x177   :  { %7582 = vrcp.f32 %v361_v23  ;;  %v7579_v11 = vpop.eup %7578  ;;  %v368_v3 = vadd.f32 1.0, %v7577_v32  ;;  %v703_v23 = vld [vmem:[#allocation10 + $0x58] sm:$0xff]  ;;  %v8592_v32 = vpack.c.bf16 %v698_v36, %v694_v57  ;;  %v708_v57 = vld [vmem:[#allocation10 + $0x80] sm:$0xff] }
 0x178   :  { %v712_v36 = vld [vmem:[#allocation10 + $0xa0] sm:$0xff] }
 0x179   :  { %7584 = vrcp.f32 %v368_v3  ;;  %10586 = vst [vmem:[#allocation108_spill] sm:$0xff] %v8592_v32  ;;  %v8596_v3 = vpack.c.bf16 %v705_v13, %v701_v0  ;;  %v8610_v0 = vpack.c.bf16 %v713_v16, %v709_v54  ;;  %v710_v13 = vld [vmem:[#allocation10 + $0x90] sm:$0xff] }
 0x17b   :  { %10587 = vst [vmem:[#allocation109_spill] sm:$0xff] %v8596_v3  ;;  %10591 = vst [vmem:[#allocation113_spill] sm:$0xff] %v8610_v0 }
 0x180   :  { %v7581_v56 = vpop.eup %7580 }
 0x181   :  { %v7583_v39 = vpop.eup %7582  ;;  %v372_v12 = vmul.f32 %v7581_v56, %v7579_v11  ;;  %v700_v11 = vld [vmem:[#allocation10 + $0x40] sm:$0xff] }
 0x182   :  { %v371_v38 = vmul.f32 0.0, %v7583_v39  ;;  %v704_v56 = vld [vmem:[#allocation10 + $0x60] sm:$0xff] }
 0x183   :  { %v7585_v19 = vpop.eup %7584  ;;  %v8604_v63 = vpack.c.bf16 %v704_v56, %v700_v11  ;;  %v10593_v11 = vmov 0.0  }
 0x184   :  { %v8587_v44 = vadd.f32 %v372_v12, %v371_v38  ;;  %v8598_v12 = vpack.c.bf16 %v707_v53, %v703_v23  ;;  %v702_v38 = vld [vmem:[#allocation10 + $0x50] sm:$0xff]  ;;  %v717_v53 = vld [vmem:[#allocation10 + $0xc8] sm:$0xff] }
 0x185   :  { %10589 = vst [vmem:[#allocation111_spill] sm:$0xff] %v8604_v63  ;;  %v714_v23 = vld [vmem:[#allocation10 + $0xb0] sm:$0xff] }
 0x186   :  { %10584 = vst [vmem:[#allocation106_spill] sm:$0xff] %v8587_v44  ;;  %7586 = vtanh.f32 %v8587_v44  ;;  %10588 = vst [vmem:[#allocation110_spill] sm:$0xff] %v8598_v12  ;;  %v706_v44 = vld [vmem:[#allocation10 + $0x70] sm:$0xff]  ;;  %v8620_v54 = vpack.c.bf16 %v714_v23, %v710_v13  ;;  %v724_v13 = vld [vmem:[#allocation10 + $0x100] sm:$0xff] }
 0x187   :  { %v8606_v29 = vpack.c.bf16 %v706_v44, %v702_v38  ;;  %v8618_v44 = vpack.c.bf16 %v712_v36, %v708_v57  ;;  %v718_v38 = vld [vmem:[#allocation10 + $0xd0] sm:$0xff]  ;;  %v728_v23 = vld [vmem:[#allocation10 + $0x120] sm:$0xff] }
 0x188   :  { %10595 = vst [vmem:[#allocation116_spill] sm:$0xff] %v8620_v54 }
 0x189   :  { %10590 = vst [vmem:[#allocation112_spill] sm:$0xff] %v8606_v29  ;;  %10594 = vst [vmem:[#allocation115_spill] sm:$0xff] %v8618_v44 }
 0x190   :  { %v7587_v40 = vpop.eup %7586 }
 0x191   :  { %v8594_v39 = vmul.f32 %v7587_v40, %v7585_v19  ;;  %v8612_v19 = vpack.c.bf16 %v715_v59, %v711_v49  ;;  %v721_v40 = vld [vmem:[#allocation10 + $0xe8] sm:$0xff]  ;;  %v716_v49 = vld [vmem:[#allocation10 + $0xc0] sm:$0xff] }
 0x192   :  { %v720_v59 = vld [vmem:[#allocation10 + $0xe0] sm:$0xff]  ;;  %v8624_v16 = vpack.c.bf16 %v721_v40, %v717_v53  ;;  %v726_v53 = vld [vmem:[#allocation10 + $0x110] sm:$0xff] }
 0x193   :  { %591 = vmatmul.mubr.f32.vlgmr.msra.gmra.mrb[2].mxu0 %v8594_v39  ;;  %662 = vmatmul.mubr.f32.vlgmr.msra.gmra.mrb[2].mxu1 %v8594_v39  ;;  %10592 = vst [vmem:[#allocation114_spill] sm:$0xff] %v8612_v19  ;;  %v8630_v57 = vpack.c.bf16 %v720_v59, %v716_v49  ;;  %v730_v40 = vld [vmem:[#allocation10 + $0x130] sm:$0xff]  ;;  %v8642_v49 = vpack.c.bf16 %v728_v23, %v724_v13  ;;  %v739_v59 = vld [vmem:[#allocation10 + $0x178] sm:$0xff] }
 0x194   :  { %5145 = vmatpush1.bf16.msra.mxu0 %v8590_v5  ;;  %5209 = vmatpush1.bf16.msra.mxu1 %v8592_v32  ;;  %v719_v5 = vld [vmem:[#allocation10 + $0xd8] sm:$0xff]  ;;  %10596 = vst [vmem:[#allocation117_spill] sm:$0xff] %v8624_v16 }
 0x195   :  { %5147 = vmatprep.subr.bf16.mxu0 %v8596_v3  ;;  %5211 = vmatprep.subr.bf16.mxu1 %v8598_v12  ;;  %v723_v32 = vld [vmem:[#allocation10 + $0xf8] sm:$0xff]  ;;  %v722_v12 = vld [vmem:[#allocation10 + $0xf0] sm:$0xff]  ;;  %v725_v3 = vld [vmem:[#allocation10 + $0x108] sm:$0xff]  ;;  %10598 = vst [vmem:[#allocation119_spill] sm:$0xff] %v8630_v57 }
 0x196   :  { %906 = vmatprep.mubr.f32.mxu0 %v10593_v11  ;;  %977 = vmatprep.mubr.f32.mxu1 %v10593_v11  ;;  %v8626_v56 = vpack.c.bf16 %v723_v32, %v719_v5  ;;  %v8632_v36 = vpack.c.bf16 %v722_v12, %v718_v38  ;;  %10602 = vst [vmem:[#allocation123_spill] sm:$0xff] %v8642_v49  ;;  %v732_v38 = vld [vmem:[#allocation10 + $0x140] sm:$0xff] }
 0x197   :  { %v8644_v12 = vpack.c.bf16 %v730_v40, %v726_v53  ;;  %v734_v53 = vld [vmem:[#allocation10 + $0x150] sm:$0xff] }
 0x198   :  { %5149 = vmatpush1.bf16.msra.mxu0 %v8604_v63  ;;  %5213 = vmatpush1.bf16.msra.mxu1 %v8606_v29  ;;  %10597 = vst [vmem:[#allocation118_spill] sm:$0xff] %v8626_v56  ;;  %v729_v63 = vld [vmem:[#allocation10 + $0x128] sm:$0xff]  ;;  %v731_v29 = vld [vmem:[#allocation10 + $0x138] sm:$0xff]  ;;  %10599 = vst [vmem:[#allocation120_spill] sm:$0xff] %v8632_v36 }
 0x199   :  { %5151 = vmatprep.subr.bf16.mxu0 %v8610_v0  ;;  %5215 = vmatprep.subr.bf16.mxu1 %v8612_v19  ;;  %v8636_v5 = vpack.c.bf16 %v729_v63, %v725_v3  ;;  %v8638_v32 = vpack.c.bf16 %v731_v29, %v727_v28  ;;  %10603 = vst [vmem:[#allocation124_spill] sm:$0xff] %v8644_v12  ;;  %v733_v28 = vld [vmem:[#allocation10 + $0x148] sm:$0xff]  ;;  %v735_v63 = vld [vmem:[#allocation10 + $0x158] sm:$0xff]  ;;  %v738_v40 = vld [vmem:[#allocation10 + $0x170] sm:$0xff] }
 0x19a   :  { %v737_v3 = vld [vmem:[#allocation10 + $0x168] sm:$0xff]  ;;  %v8652_v13 = vpack.c.bf16 %v739_v59, %v735_v63  ;;  %v747_v63 = vld [vmem:[#allocation10 + $0x1b8] sm:$0xff]  ;;  %v744_v59 = vld [vmem:[#allocation10 + $0x1a0] sm:$0xff] }
 0x19b   :  { %10600 = vst [vmem:[#allocation121_spill] sm:$0xff] %v8636_v5  ;;  %10601 = vst [vmem:[#allocation122_spill] sm:$0xff] %v8638_v32  ;;  %v8650_v29 = vpack.c.bf16 %v737_v3, %v733_v28  ;;  %v745_v28 = vld [vmem:[#allocation10 + $0x1a8] sm:$0xff]  ;;  %v743_v3 = vld [vmem:[#allocation10 + $0x198] sm:$0xff] }
 0x19c   :  { %5153 = vmatpush1.bf16.msra.mxu0 %v8618_v44  ;;  %5217 = vmatpush1.bf16.msra.mxu1 %v8620_v54  ;;  %10605 = vst [vmem:[#allocation126_spill] sm:$0xff] %v8652_v13 }
 0x19d   :  { %5155 = vmatprep.subr.bf16.mxu0 %v8624_v16  ;;  %5219 = vmatprep.subr.bf16.mxu1 %v8626_v56  ;;  %10604 = vst [vmem:[#allocation125_spill] sm:$0xff] %v8650_v29  ;;  %v811_v56 = vld [vmem:[#allocation10 + $0x3b8] sm:$0xff] }
 0x1a0   :  { %5157 = vmatpush1.bf16.msra.mxu0 %v8630_v57  ;;  %5221 = vmatpush1.bf16.msra.mxu1 %v8632_v36  ;;  %v736_v36 = vld [vmem:[#allocation10 + $0x160] sm:$0xff]  ;;  %v807_v57 = vld [vmem:[#allocation10 + $0x398] sm:$0xff] }
 0x1a1   :  { %5159 = vmatprep.subr.bf16.mxu0 %v8636_v5  ;;  %5223 = vmatprep.subr.bf16.mxu1 %v8638_v32  ;;  %v8654_v23 = vpack.c.bf16 %v736_v36, %v732_v38  ;;  %v8657_v32 = vpack.c.bf16 %v738_v40, %v734_v53  ;;  %v740_v36 = vld [vmem:[#allocation10 + $0x180] sm:$0xff]  ;;  %v8664_v38 = vpack.c.bf16 %v747_v63, %v743_v3  ;;  %v742_v53 = vld [vmem:[#allocation10 + $0x190] sm:$0xff]  ;;  %v755_v3 = vld [vmem:[#allocation10 + $0x1f8] sm:$0xff] }
 0x1a2   :  { %v8666_v5 = vpack.c.bf16 %v744_v59, %v740_v36  ;;  %v746_v40 = vld [vmem:[#allocation10 + $0x1b0] sm:$0xff]  ;;  %v748_v63 = vld [vmem:[#allocation10 + $0x1c0] sm:$0xff] }
 0x1a3   :  { %10606 = vst [vmem:[#allocation127_spill] sm:$0xff] %v8654_v23  ;;  %10607 = vst [vmem:[#allocation128_spill] sm:$0xff] %v8657_v32  ;;  %v752_v36 = vld [vmem:[#allocation10 + $0x1e0] sm:$0xff] }
 0x1a4   :  { %5161 = vmatpush1.bf16.msra.mxu0 %v8642_v49  ;;  %5225 = vmatpush1.bf16.msra.mxu1 %v8644_v12  ;;  %v741_v12 = vld [vmem:[#allocation10 + $0x188] sm:$0xff]  ;;  %10609 = vst [vmem:[#allocation130_spill] sm:$0xff] %v8664_v38  ;;  %10610 = vst [vmem:[#allocation131_spill] sm:$0xff] %v8666_v5 }
 0x1a5   :  { %5163 = vmatprep.subr.bf16.mxu0 %v8650_v29  ;;  %5227 = vmatprep.subr.bf16.mxu1 %v8652_v13  ;;  %v8662_v49 = vpack.c.bf16 %v745_v28, %v741_v12  ;;  %v8669_v13 = vpack.c.bf16 %v746_v40, %v742_v53  ;;  %v753_v12 = vld [vmem:[#allocation10 + $0x1e8] sm:$0xff]  ;;  %v751_v28 = vld [vmem:[#allocation10 + $0x1d8] sm:$0xff]  ;;  %v8678_v29 = vpack.c.bf16 %v752_v36, %v748_v63  ;;  %v750_v53 = vld [vmem:[#allocation10 + $0x1d0] sm:$0xff] }
 0x1a6   :  { %v8676_v59 = vpack.c.bf16 %v755_v3, %v751_v28  ;;  %v754_v40 = vld [vmem:[#allocation10 + $0x1f0] sm:$0xff]  ;;  %v763_v28 = vld [vmem:[#allocation10 + $0x238] sm:$0xff]  ;;  %v756_v3 = vld [vmem:[#allocation10 + $0x200] sm:$0xff] }
 0x1a7   :  { %10608 = vst [vmem:[#allocation129_spill] sm:$0xff] %v8662_v49  ;;  %10611 = vst [vmem:[#allocation132_spill] sm:$0xff] %v8669_v13  ;;  %v760_v63 = vld [vmem:[#allocation10 + $0x220] sm:$0xff] }
 0x1a8   :  { %5165 = vmatpush1.bf16.msra.mxu0 %v8654_v23  ;;  %5229 = vmatpush1.bf16.msra.mxu1 %v8657_v32  ;;  %v749_v32 = vld [vmem:[#allocation10 + $0x1c8] sm:$0xff]  ;;  %10613 = vst [vmem:[#allocation134_spill] sm:$0xff] %v8676_v59  ;;  %10614 = vst [vmem:[#allocation135_spill] sm:$0xff] %v8678_v29 }
 0x1a9   :  { %5167 = vmatprep.subr.bf16.mxu0 %v8662_v49  ;;  %5231 = vmatprep.subr.bf16.mxu1 %v8664_v38  ;;  %v8674_v23 = vpack.c.bf16 %v753_v12, %v749_v32  ;;  %v8681_v38 = vpack.c.bf16 %v754_v40, %v750_v53  ;;  %v761_v32 = vld [vmem:[#allocation10 + $0x228] sm:$0xff]  ;;  %v759_v12 = vld [vmem:[#allocation10 + $0x218] sm:$0xff]  ;;  %v8690_v49 = vpack.c.bf16 %v760_v63, %v756_v3  ;;  %v758_v53 = vld [vmem:[#allocation10 + $0x210] sm:$0xff] }
 0x1aa   :  { %v8688_v36 = vpack.c.bf16 %v763_v28, %v759_v12  ;;  %v762_v40 = vld [vmem:[#allocation10 + $0x230] sm:$0xff]  ;;  %v771_v12 = vld [vmem:[#allocation10 + $0x278] sm:$0xff]  ;;  %v764_v28 = vld [vmem:[#allocation10 + $0x240] sm:$0xff] }
 0x1ab   :  { %10612 = vst [vmem:[#allocation133_spill] sm:$0xff] %v8674_v23  ;;  %10615 = vst [vmem:[#allocation136_spill] sm:$0xff] %v8681_v38  ;;  %v768_v3 = vld [vmem:[#allocation10 + $0x260] sm:$0xff] }
 0x1ac   :  { %5169 = vmatpush1.bf16.msra.mxu0 %v8666_v5  ;;  %5233 = vmatpush1.bf16.msra.mxu1 %v8669_v13  ;;  %v757_v13 = vld [vmem:[#allocation10 + $0x208] sm:$0xff]  ;;  %10617 = vst [vmem:[#allocation138_spill] sm:$0xff] %v8688_v36  ;;  %10618 = vst [vmem:[#allocation139_spill] sm:$0xff] %v8690_v49 }
 0x1ad   :  { %5171 = vmatprep.subr.bf16.mxu0 %v8674_v23  ;;  %5235 = vmatprep.subr.bf16.mxu1 %v8676_v59  ;;  %v8686_v5 = vpack.c.bf16 %v761_v32, %v757_v13  ;;  %v8693_v59 = vpack.c.bf16 %v762_v40, %v758_v53  ;;  %v769_v13 = vld [vmem:[#allocation10 + $0x268] sm:$0xff]  ;;  %v767_v32 = vld [vmem:[#allocation10 + $0x258] sm:$0xff]  ;;  %v8702_v23 = vpack.c.bf16 %v768_v3, %v764_v28  ;;  %v766_v53 = vld [vmem:[#allocation10 + $0x250] sm:$0xff] }
 0x1ae   :  { %v8700_v63 = vpack.c.bf16 %v771_v12, %v767_v32  ;;  %v770_v40 = vld [vmem:[#allocation10 + $0x270] sm:$0xff]  ;;  %v779_v32 = vld [vmem:[#allocation10 + $0x2b8] sm:$0xff]  ;;  %v772_v12 = vld [vmem:[#allocation10 + $0x280] sm:$0xff] }
 0x1af   :  { %10616 = vst [vmem:[#allocation137_spill] sm:$0xff] %v8686_v5  ;;  %10619 = vst [vmem:[#allocation140_spill] sm:$0xff] %v8693_v59  ;;  %v776_v28 = vld [vmem:[#allocation10 + $0x2a0] sm:$0xff] }
 0x1b0   :  { %5173 = vmatpush1.bf16.msra.mxu0 %v8678_v29  ;;  %5237 = vmatpush1.bf16.msra.mxu1 %v8681_v38  ;;  %v765_v38 = vld [vmem:[#allocation10 + $0x248] sm:$0xff]  ;;  %10621 = vst [vmem:[#allocation142_spill] sm:$0xff] %v8700_v63  ;;  %10622 = vst [vmem:[#allocation143_spill] sm:$0xff] %v8702_v23 }
 0x1b1   :  { %5175 = vmatprep.subr.bf16.mxu0 %v8686_v5  ;;  %5239 = vmatprep.subr.bf16.mxu1 %v8688_v36  ;;  %v8698_v29 = vpack.c.bf16 %v769_v13, %v765_v38  ;;  %v8705_v36 = vpack.c.bf16 %v770_v40, %v766_v53  ;;  %v777_v38 = vld [vmem:[#allocation10 + $0x2a8] sm:$0xff]  ;;  %v775_v13 = vld [vmem:[#allocation10 + $0x298] sm:$0xff]  ;;  %v8714_v5 = vpack.c.bf16 %v776_v28, %v772_v12  ;;  %v774_v53 = vld [vmem:[#allocation10 + $0x290] sm:$0xff] }
 0x1b2   :  { %v8712_v3 = vpack.c.bf16 %v779_v32, %v775_v13  ;;  %v778_v40 = vld [vmem:[#allocation10 + $0x2b0] sm:$0xff]  ;;  %v787_v13 = vld [vmem:[#allocation10 + $0x2f8] sm:$0xff]  ;;  %v780_v32 = vld [vmem:[#allocation10 + $0x2c0] sm:$0xff] }
 0x1b3   :  { %10620 = vst [vmem:[#allocation141_spill] sm:$0xff] %v8698_v29  ;;  %10623 = vst [vmem:[#allocation144_spill] sm:$0xff] %v8705_v36  ;;  %v784_v12 = vld [vmem:[#allocation10 + $0x2e0] sm:$0xff] }
 0x1b4   :  { %5177 = vmatpush1.bf16.msra.mxu0 %v8690_v49  ;;  %5241 = vmatpush1.bf16.msra.mxu1 %v8693_v59  ;;  %v773_v59 = vld [vmem:[#allocation10 + $0x288] sm:$0xff]  ;;  %10625 = vst [vmem:[#allocation146_spill] sm:$0xff] %v8712_v3  ;;  %10626 = vst [vmem:[#allocation147_spill] sm:$0xff] %v8714_v5 }
 0x1b5   :  { %5179 = vmatprep.subr.bf16.mxu0 %v8698_v29  ;;  %5243 = vmatprep.subr.bf16.mxu1 %v8700_v63  ;;  %v8710_v49 = vpack.c.bf16 %v777_v38, %v773_v59  ;;  %v8717_v63 = vpack.c.bf16 %v778_v40, %v774_v53  ;;  %v785_v59 = vld [vmem:[#allocation10 + $0x2e8] sm:$0xff]  ;;  %v783_v38 = vld [vmem:[#allocation10 + $0x2d8] sm:$0xff]  ;;  %v8726_v29 = vpack.c.bf16 %v784_v12, %v780_v32  ;;  %v782_v53 = vld [vmem:[#allocation10 + $0x2d0] sm:$0xff] }
 0x1b6   :  { %v8724_v28 = vpack.c.bf16 %v787_v13, %v783_v38  ;;  %v786_v40 = vld [vmem:[#allocation10 + $0x2f0] sm:$0xff]  ;;  %v795_v38 = vld [vmem:[#allocation10 + $0x338] sm:$0xff]  ;;  %v788_v13 = vld [vmem:[#allocation10 + $0x300] sm:$0xff] }
 0x1b7   :  { %10624 = vst [vmem:[#allocation145_spill] sm:$0xff] %v8710_v49  ;;  %10627 = vst [vmem:[#allocation148_spill] sm:$0xff] %v8717_v63  ;;  %v792_v32 = vld [vmem:[#allocation10 + $0x320] sm:$0xff] }
 0x1b8   :  { %5181 = vmatpush1.bf16.msra.mxu0 %v8702_v23  ;;  %5245 = vmatpush1.bf16.msra.mxu1 %v8705_v36  ;;  %v781_v36 = vld [vmem:[#allocation10 + $0x2c8] sm:$0xff]  ;;  %10629 = vst [vmem:[#allocation150_spill] sm:$0xff] %v8724_v28  ;;  %10630 = vst [vmem:[#allocation151_spill] sm:$0xff] %v8726_v29 }
 0x1b9   :  { %5183 = vmatprep.subr.bf16.mxu0 %v8710_v49  ;;  %5247 = vmatprep.subr.bf16.mxu1 %v8712_v3  ;;  %v8722_v23 = vpack.c.bf16 %v785_v59, %v781_v36  ;;  %v8729_v3 = vpack.c.bf16 %v786_v40, %v782_v53  ;;  %v793_v36 = vld [vmem:[#allocation10 + $0x328] sm:$0xff]  ;;  %v791_v59 = vld [vmem:[#allocation10 + $0x318] sm:$0xff]  ;;  %v8738_v49 = vpack.c.bf16 %v792_v32, %v788_v13  ;;  %v790_v53 = vld [vmem:[#allocation10 + $0x310] sm:$0xff] }
 0x1ba   :  { %v8736_v12 = vpack.c.bf16 %v795_v38, %v791_v59  ;;  %v794_v40 = vld [vmem:[#allocation10 + $0x330] sm:$0xff]  ;;  %v803_v59 = vld [vmem:[#allocation10 + $0x378] sm:$0xff]  ;;  %v796_v38 = vld [vmem:[#allocation10 + $0x340] sm:$0xff] }
 0x1bb   :  { %10628 = vst [vmem:[#allocation149_spill] sm:$0xff] %v8722_v23  ;;  %10631 = vst [vmem:[#allocation152_spill] sm:$0xff] %v8729_v3  ;;  %v800_v13 = vld [vmem:[#allocation10 + $0x360] sm:$0xff] }
 0x1bc   :  { %5185 = vmatpush1.bf16.msra.mxu0 %v8714_v5  ;;  %5249 = vmatpush1.bf16.msra.mxu1 %v8717_v63  ;;  %v789_v63 = vld [vmem:[#allocation10 + $0x308] sm:$0xff]  ;;  %10633 = vst [vmem:[#allocation154_spill] sm:$0xff] %v8736_v12  ;;  %10634 = vst [vmem:[#allocation155_spill] sm:$0xff] %v8738_v49 }
 0x1bd   :  { %5187 = vmatprep.subr.bf16.mxu0 %v8722_v23  ;;  %5251 = vmatprep.subr.bf16.mxu1 %v8724_v28  ;;  %v8734_v5 = vpack.c.bf16 %v793_v36, %v789_v63  ;;  %v8741_v28 = vpack.c.bf16 %v794_v40, %v790_v53  ;;  %v801_v63 = vld [vmem:[#allocation10 + $0x368] sm:$0xff]  ;;  %v799_v36 = vld [vmem:[#allocation10 + $0x358] sm:$0xff]  ;;  %v8750_v23 = vpack.c.bf16 %v800_v13, %v796_v38  ;;  %v798_v53 = vld [vmem:[#allocation10 + $0x350] sm:$0xff] }
 0x1be   :  { %v8748_v32 = vpack.c.bf16 %v803_v59, %v799_v36  ;;  %v802_v40 = vld [vmem:[#allocation10 + $0x370] sm:$0xff]  ;;  %v804_v36 = vld [vmem:[#allocation10 + $0x380] sm:$0xff] }
 0x1bf   :  { %10632 = vst [vmem:[#allocation153_spill] sm:$0xff] %v8734_v5  ;;  %10635 = vst [vmem:[#allocation156_spill] sm:$0xff] %v8741_v28  ;;  %v808_v59 = vld [vmem:[#allocation10 + $0x3a0] sm:$0xff]  ;;  %v806_v38 = vld [vmem:[#allocation10 + $0x390] sm:$0xff] }
 0x1c0   :  { %5189 = vmatpush1.bf16.msra.mxu0 %v8726_v29  ;;  %5253 = vmatpush1.bf16.msra.mxu1 %v8729_v3  ;;  %v797_v3 = vld [vmem:[#allocation10 + $0x348] sm:$0xff]  ;;  %10637 = vst [vmem:[#allocation158_spill] sm:$0xff] %v8748_v32  ;;  %10638 = vst [vmem:[#allocation159_spill] sm:$0xff] %v8750_v23  ;;  %v8762_v13 = vpack.c.bf16 %v808_v59, %v804_v36  ;;  %v818_v36 = vld [vmem:[#allocation10 + $0x3f0] sm:$0xff] }
 0x1c1   :  { %5191 = vmatprep.subr.bf16.mxu0 %v8734_v5  ;;  %5255 = vmatprep.subr.bf16.mxu1 %v8736_v12  ;;  %v8746_v29 = vpack.c.bf16 %v801_v63, %v797_v3  ;;  %v805_v5 = vld [vmem:[#allocation10 + $0x388] sm:$0xff]  ;;  %v8759_v63 = vpack.c.bf16 %v811_v56, %v807_v57  ;;  %v815_v56 = vld [vmem:[#allocation10 + $0x3d8] sm:$0xff] }
 0x1c2   :  { %v809_v12 = vld [vmem:[#allocation10 + $0x3a8] sm:$0xff]  ;;  %10642 = vst [vmem:[#allocation163_spill] sm:$0xff] %v8762_v13  ;;  %v819_v57 = vld [vmem:[#allocation10 + $0x3f8] sm:$0xff] }
 0x1c3   :  { %10636 = vst [vmem:[#allocation157_spill] sm:$0xff] %v8746_v29  ;;  %v8757_v3 = vpack.c.bf16 %v809_v12, %v805_v5  ;;  %10641 = vst [vmem:[#allocation162_spill] sm:$0xff] %v8759_v63  ;;  %v812_v12 = vld [vmem:[#allocation10 + $0x3c0] sm:$0xff] }
 0x1c4   :  { %5193 = vmatpush1.bf16.msra.mxu0 %v8738_v49  ;;  %5257 = vmatpush1.bf16.msra.mxu1 %v8741_v28  ;;  %v8753_v49 = vpack.c.bf16 %v802_v40, %v798_v53  ;;  %v810_v53 = vld [vmem:[#allocation10 + $0x3b0] sm:$0xff]  ;;  %v813_v40 = vld [vmem:[#allocation10 + $0x3c8] sm:$0xff]  ;;  %v816_v28 = vld [vmem:[#allocation10 + $0x3e0] sm:$0xff] }
 0x1c5   :  { %5195 = vmatprep.subr.bf16.mxu0 %v8746_v29  ;;  %5259 = vmatprep.subr.bf16.mxu1 %v8748_v32  ;;  %10640 = vst [vmem:[#allocation161_spill] sm:$0xff] %v8757_v3  ;;  %v817_v29 = vld [vmem:[#allocation10 + $0x3e8] sm:$0xff]  ;;  %v8766_v32 = vpack.c.bf16 %v810_v53, %v806_v38  ;;  %v8773_v59 = vpack.c.bf16 %v816_v28, %v812_v12 }
 0x1c6   :  { %10639 = vst [vmem:[#allocation160_spill] sm:$0xff] %v8753_v49  ;;  %v8768_v5 = vpack.c.bf16 %v817_v29, %v813_v40  ;;  %v506_v29 = vlaneseq }
 0x1c7   :  { %10643 = vst [vmem:[#allocation164_spill] sm:$0xff] %v8766_v32  ;;  %10646 = vst [vmem:[#allocation167_spill] sm:$0xff] %v8773_v59 }
 0x1c8   :  { %5197 = vmatpush1.bf16.msra.mxu0 %v8750_v23  ;;  %5261 = vmatpush1.bf16.msra.mxu1 %v8753_v49  ;;  %10644 = vst [vmem:[#allocation165_spill] sm:$0xff] %v8768_v5  ;;  %v8770_v23 = vpack.c.bf16 %v819_v57, %v815_v56  ;;  %v814_v49 = vld [vmem:[#allocation10 + $0x3d0] sm:$0xff]  ;;  %v8784_v53 = vshrl.u32 %v506_v29, 7 }
 0x1c9   :  { %5199 = vmatprep.subr.bf16.mxu0 %v8757_v3  ;;  %5263 = vmatprep.subr.bf16.mxu1 %v8759_v63  ;;  %v8777_v38 = vpack.c.bf16 %v818_v36, %v814_v49  ;;  %v504_v49 = vld [vmem:[%s10182_s3] sm:$0xf] }
 0x1ca   :  { %10645 = vst [vmem:[#allocation166_spill] sm:$0xff] %v8770_v23  ;;  %v10419_v28 = vsub.s32 0, %v8784_v53  ;;  %v10420_v40 = vsub.s32 1, %v8784_v53  ;;  %v10427_v29 = vsub.s32 3, %v8784_v53 }
 0x1cb   :  { %10647 = vst [vmem:[#allocation168_spill] sm:$0xff] %v8777_v38 }
 0x1cc   :  { %5201 = vmatpush1.bf16.msra.mxu0 %v8762_v13  ;;  %5265 = vmatpush1.bf16.msra.mxu1 %v8766_v32  ;;  %v8793_v56 = vrot.slane %v504_v49, %v10419_v28  ;;  %v8797_v57 = vrot.slane %v504_v49, %v10420_v40  ;;  %v8804_v28 = vrot.slane %v504_v49, %v10427_v29  ;;  %v10436_v40 = vsub.s32 2, %v8784_v53 }
 0x1cd   :  { %5203 = vmatprep.subr.bf16.mxu0 %v8768_v5  ;;  %5267 = vmatprep.subr.bf16.mxu1 %v8770_v23 }
 0x1ce   :  { %10648 = vst [vmem:[#allocation169_spill] sm:$0xff] %v8793_v56  ;;  %10649 = vst [vmem:[#allocation170_spill] sm:$0xff] %v8797_v57  ;;  %v8810_v13 = vrot.slane %v504_v49, %v10436_v40  ;;  %v10667_v40 = vld [vmem:[#allocation64_spill] sm:$0xff] }
 0x1cf   :  { %10650 = vst [vmem:[#allocation171_spill] sm:$0xff] %v8804_v28 }
 0x1d0   :  { %5205 = vmatpush1.bf16.msra.mxu0 %v8773_v59  ;;  %5269 = vmatpush1.bf16.msra.mxu1 %v8777_v38 }
 0x1d1   :  { %5271 = vmatprep.subr.bf16.mxu0 %v8289_v4  ;;  %5303 = vmatprep.subr.bf16.mxu1 %v8302_v22 }
 0x266   :  { %v592_v12 = vpop.f32.mrb[2].mxu0  ;;  %v663_v36 = vpop.f32.mrb[2].mxu1 }
 0x267   :  { %v593_v22 = vadd.f32 %v592_v12, %v8793_v56  ;;  %v594_v4 = vpop.f32.mrb[3].mxu0  ;;  %v665_v38 = vpop.f32.mrb[3].mxu1  ;;  %v664_v56 = vadd.f32 %v663_v36, %v8810_v13 }
 0x268   :  { %v595_v59 = vadd.f32 %v594_v4, %v8797_v57  ;;  %v666_v32 = vadd.f32 %v665_v38, %v8804_v28 }
 0x269   :  { %v4775_v23 = vmul.f32 -1.442695, %v593_v22 }
 0x26a   :  { %v4776_v5 = vmul.f32 -1.442695, %v595_v59  ;;  %v4777_v12 = vmul.f32 -1.442695, %v666_v32 }
 0x26b   :  { %7588 = vpow2.f32 %v4775_v23 }
 0x26c   :  { %7590 = vpow2.f32 %v4776_v5 }
 0x26d   :  { %7592 = vpow2.f32 %v4777_v12  ;;  %v10658_v12 = vld [vmem:[#allocation56_spill] sm:$0xff] }
 0x26e   :  { %7594 = vtanh.f32 %v664_v56  ;;  %v10655_v56 = vld [vmem:[#allocation50_spill] sm:$0xff] }
 0x275   :  { %v7589_v4 = vpop.eup %7588 }
 0x276   :  { %v7591_v22 = vpop.eup %7590  ;;  %v671_v59 = vadd.f32 1.0, %v7589_v4 }
 0x277   :  { %v677_v29 = vadd.f32 1.0, %v7591_v22  ;;  %v7593_v23 = vpop.eup %7592  ;;  %v10659_v22 = vld [vmem:[#allocation54_spill] sm:$0xff] }
 0x278   :  { %7596 = vrcp.f32 %v671_v59  ;;  %v7595_v57 = vpop.eup %7594  ;;  %v684_v28 = vadd.f32 1.0, %v7593_v23  ;;  %v10660_v59 = vld [vmem:[#allocation57_spill] sm:$0xff]  ;;  %v10661_v23 = vld [vmem:[#allocation58_spill] sm:$0xff] }
 0x279   :  { %7598 = vrcp.f32 %v677_v29  ;;  %v10657_v29 = vld [vmem:[#allocation52_spill] sm:$0xff] }
 0x27a   :  { %7600 = vrcp.f32 %v684_v28  ;;  %v10653_v28 = vld [vmem:[#allocation48_spill] sm:$0xff] }
 0x282   :  { %v7597_v5 = vpop.eup %7596 }
 0x283   :  { %v7599_v63 = vpop.eup %7598  ;;  %v688_v38 = vmul.f32 %v7597_v5, %v7595_v57  ;;  %v10656_v57 = vld [vmem:[#allocation55_spill] sm:$0xff] }
 0x284   :  { %v687_v3 = vmul.f32 0.0, %v7599_v63  ;;  %v7601_v32 = vpop.eup %7600  ;;  %v10652_v63 = vld [vmem:[#allocation51_spill] sm:$0xff] }
 0x285   :  { %v10662_v5 = vld [vmem:[#allocation59_spill] sm:$0xff] }
 0x286   :  { %v8813_v49 = vadd.f32 %v688_v38, %v687_v3  ;;  %v10651_v3 = vld [vmem:[#allocation46_spill] sm:$0xff]  ;;  %v10663_v38 = vld [vmem:[#allocation60_spill] sm:$0xff] }
 0x288   :  { %7602 = vtanh.f32 %v8813_v49 }
 0x292   :  { %v7603_v36 = vpop.eup %7602 }
 0x293   :  { %v691_v4 = vmul.f32 %v7603_v36, %v7601_v32  ;;  %v10664_v32 = vld [vmem:[#allocation61_spill] sm:$0xff]  ;;  %v10665_v36 = vld [vmem:[#allocation62_spill] sm:$0xff] }
 0x295   :  { %907 = vmatmul.mubr.f32.vlgmr.msra.gmra.mrb[4].mxu0 %v691_v4  ;;  %978 = vmatmul.mubr.f32.vlgmr.msra.gmra.mrb[4].mxu1 %v691_v4 }
 0x296   :  { %5273 = vmatpush1.bf16.msra.mxu0 %v8291_v8  ;;  %5305 = vmatpush1.bf16.msra.mxu1 %v8304_v25 }
 0x297   :  { %5275 = vmatprep.subr.bf16.mxu0 %v8293_v9  ;;  %5307 = vmatprep.subr.bf16.mxu1 %v8314_v33 }
 0x298   :  { %1077 = vmatprep.mubr.f32.mxu0 %v10593_v11  ;;  %1148 = vmatprep.mubr.f32.mxu1 %v10593_v11 }
 0x29a   :  { %5277 = vmatpush1.bf16.msra.mxu0 %v8297_v14  ;;  %5309 = vmatpush1.bf16.msra.mxu1 %v8316_v37 }
 0x29b   :  { %5279 = vmatprep.subr.bf16.mxu0 %v8300_v17  ;;  %5311 = vmatprep.subr.bf16.mxu1 %v8322_v45 }
 0x29e   :  { %5281 = vmatpush1.bf16.msra.mxu0 %v8307_v26  ;;  %5313 = vmatpush1.bf16.msra.mxu1 %v8328_v48 }
 0x29f   :  { %5283 = vmatprep.subr.bf16.mxu0 %v8311_v30  ;;  %5315 = vmatprep.subr.bf16.mxu1 %v8331_v52 }
 0x2a2   :  { %5285 = vmatpush1.bf16.msra.mxu0 %v8320_v42  ;;  %5317 = vmatpush1.bf16.msra.mxu1 %v8340_v62 }
 0x2a3   :  { %5287 = vmatprep.subr.bf16.mxu0 %v8325_v46  ;;  %5319 = vmatprep.subr.bf16.mxu1 %v8343_v1 }
 0x2a6   :  { %5289 = vmatpush1.bf16.msra.mxu0 %v8334_v55  ;;  %5321 = vmatpush1.bf16.msra.mxu1 %v8352_v15 }
 0x2a7   :  { %5291 = vmatprep.subr.bf16.mxu0 %v8337_v58  ;;  %5323 = vmatprep.subr.bf16.mxu1 %v8355_v18 }
 0x2aa   :  { %5293 = vmatpush1.bf16.msra.mxu0 %v8346_v7  ;;  %5325 = vmatpush1.bf16.msra.mxu1 %v8364_v31 }
 0x2ab   :  { %5295 = vmatprep.subr.bf16.mxu0 %v8349_v10  ;;  %5327 = vmatprep.subr.bf16.mxu1 %v8367_v34 }
 0x2ae   :  { %5297 = vmatpush1.bf16.msra.mxu0 %v8358_v24  ;;  %5329 = vmatpush1.bf16.msra.mxu1 %v8374_v43 }
 0x2af   :  { %5299 = vmatprep.subr.bf16.mxu0 %v8361_v27  ;;  %5331 = vmatprep.subr.bf16.mxu1 %v8379_v51 }
 0x2b2   :  { %5301 = vmatpush1.bf16.msra.mxu0 %v8370_v41  ;;  %5333 = vmatpush1.bf16.msra.mxu1 %v8385_v61 }
 0x2b3   :  { %5335 = vmatprep.subr.bf16.mxu0 %v8376_v47  ;;  %5399 = vmatprep.subr.bf16.mxu1 %v8391_v6 }
 0x2b5   :  { %1078 = vmatmul.mubr.f32.vlgmr.msra.gmra.mrb[6].mxu0 %v8594_v39  ;;  %1149 = vmatmul.mubr.f32.vlgmr.msra.gmra.mrb[6].mxu1 %v8594_v39  ;;  %v10654_v39 = vld [vmem:[#allocation53_spill] sm:$0xff] }
 0x2b6   :  { %1247 = vmatprep.mubr.f32.mxu0 %v691_v4  ;;  %1318 = vmatprep.mubr.f32.mxu1 %v691_v4  ;;  %v10666_v4 = vld [vmem:[#allocation63_spill] sm:$0xff] }
 0x2b7   :  { %5337 = vmatpush1.bf16.msra.mxu0 %v8382_v60  ;;  %5401 = vmatpush1.bf16.msra.mxu1 %v8399_v21 }
 0x2b8   :  { %5339 = vmatprep.subr.bf16.mxu0 %v8388_v2  ;;  %5403 = vmatprep.subr.bf16.mxu1 %v8405_v35 }
 0x2bb   :  { %5341 = vmatpush1.bf16.msra.mxu0 %v8395_v20  ;;  %5405 = vmatpush1.bf16.msra.mxu1 %v8412_v50 }
 0x2bc   :  { %5343 = vmatprep.subr.bf16.mxu0 %v10651_v3  ;;  %5407 = vmatprep.subr.bf16.mxu1 %v10652_v63 }
 0x2bf   :  { %5345 = vmatpush1.bf16.msra.mxu0 %v10653_v28  ;;  %5409 = vmatpush1.bf16.msra.mxu1 %v10654_v39  ;;  %v10713_v39 = vsub.s32 2, %v8784_v53 }
 0x2c0   :  { %5347 = vmatprep.subr.bf16.mxu0 %v10655_v56  ;;  %5411 = vmatprep.subr.bf16.mxu1 %v10656_v57 }
 0x2c3   :  { %5349 = vmatpush1.bf16.msra.mxu0 %v10657_v29  ;;  %5413 = vmatpush1.bf16.msra.mxu1 %v10658_v12  ;;  %v10668_v29 = vld [vmem:[#allocation65_spill] sm:$0xff]  ;;  %v10669_v12 = vld [vmem:[#allocation66_spill] sm:$0xff] }
 0x2c4   :  { %5351 = vmatprep.subr.bf16.mxu0 %v10659_v22  ;;  %5415 = vmatprep.subr.bf16.mxu1 %v10660_v59  ;;  %v10670_v22 = vld [vmem:[#allocation67_spill] sm:$0xff]  ;;  %v10671_v59 = vld [vmem:[#allocation68_spill] sm:$0xff] }
 0x2c7   :  { %5353 = vmatpush1.bf16.msra.mxu0 %v10661_v23  ;;  %5417 = vmatpush1.bf16.msra.mxu1 %v10662_v5  ;;  %v10672_v23 = vld [vmem:[#allocation69_spill] sm:$0xff]  ;;  %v10673_v5 = vld [vmem:[#allocation70_spill] sm:$0xff] }
 0x2c8   :  { %5355 = vmatprep.subr.bf16.mxu0 %v10663_v38  ;;  %5419 = vmatprep.subr.bf16.mxu1 %v10664_v32  ;;  %v10674_v38 = vld [vmem:[#allocation71_spill] sm:$0xff]  ;;  %v10675_v32 = vld [vmem:[#allocation72_spill] sm:$0xff] }
 0x2cb   :  { %5357 = vmatpush1.bf16.msra.mxu0 %v10665_v36  ;;  %5421 = vmatpush1.bf16.msra.mxu1 %v10666_v4  ;;  %v10676_v36 = vld [vmem:[#allocation73_spill] sm:$0xff]  ;;  %v10677_v4 = vld [vmem:[#allocation74_spill] sm:$0xff] }
 0x2cc   :  { %5359 = vmatprep.subr.bf16.mxu0 %v10667_v40  ;;  %5423 = vmatprep.subr.bf16.mxu1 %v10668_v29  ;;  %v10678_v40 = vld [vmem:[#allocation75_spill] sm:$0xff]  ;;  %v10679_v29 = vld [vmem:[#allocation76_spill] sm:$0xff] }
 0x2cf   :  { %5361 = vmatpush1.bf16.msra.mxu0 %v10669_v12  ;;  %5425 = vmatpush1.bf16.msra.mxu1 %v10670_v22  ;;  %v10680_v12 = vld [vmem:[#allocation77_spill] sm:$0xff]  ;;  %v10681_v22 = vld [vmem:[#allocation78_spill] sm:$0xff] }
 0x2d0   :  { %5363 = vmatprep.subr.bf16.mxu0 %v10671_v59  ;;  %5427 = vmatprep.subr.bf16.mxu1 %v10672_v23  ;;  %v10682_v59 = vld [vmem:[#allocation79_spill] sm:$0xff]  ;;  %v10683_v23 = vld [vmem:[#allocation80_spill] sm:$0xff] }
 0x2d3   :  { %5365 = vmatpush1.bf16.msra.mxu0 %v10673_v5  ;;  %5429 = vmatpush1.bf16.msra.mxu1 %v10674_v38  ;;  %v10684_v5 = vld [vmem:[#allocation81_spill] sm:$0xff]  ;;  %v10685_v38 = vld [vmem:[#allocation82_spill] sm:$0xff] }
 0x2d4   :  { %5367 = vmatprep.subr.bf16.mxu0 %v10675_v32  ;;  %5431 = vmatprep.subr.bf16.mxu1 %v10676_v36  ;;  %v10686_v32 = vld [vmem:[#allocation83_spill] sm:$0xff]  ;;  %v10687_v36 = vld [vmem:[#allocation84_spill] sm:$0xff] }
 0x2d7   :  { %5369 = vmatpush1.bf16.msra.mxu0 %v10677_v4  ;;  %5433 = vmatpush1.bf16.msra.mxu1 %v10678_v40  ;;  %v10688_v4 = vld [vmem:[#allocation85_spill] sm:$0xff]  ;;  %v10689_v40 = vld [vmem:[#allocation86_spill] sm:$0xff] }
 0x2d8   :  { %5371 = vmatprep.subr.bf16.mxu0 %v10679_v29  ;;  %5435 = vmatprep.subr.bf16.mxu1 %v10680_v12  ;;  %v10690_v29 = vld [vmem:[#allocation87_spill] sm:$0xff]  ;;  %v10691_v12 = vld [vmem:[#allocation88_spill] sm:$0xff] }
 0x2db   :  { %5373 = vmatpush1.bf16.msra.mxu0 %v10681_v22  ;;  %5437 = vmatpush1.bf16.msra.mxu1 %v10682_v59  ;;  %v10692_v22 = vld [vmem:[#allocation89_spill] sm:$0xff]  ;;  %v10693_v59 = vld [vmem:[#allocation90_spill] sm:$0xff] }
 0x2dc   :  { %5375 = vmatprep.subr.bf16.mxu0 %v10683_v23  ;;  %5439 = vmatprep.subr.bf16.mxu1 %v10684_v5  ;;  %v10694_v23 = vld [vmem:[#allocation91_spill] sm:$0xff]  ;;  %v10695_v5 = vld [vmem:[#allocation92_spill] sm:$0xff] }
 0x2df   :  { %5377 = vmatpush1.bf16.msra.mxu0 %v10685_v38  ;;  %5441 = vmatpush1.bf16.msra.mxu1 %v10686_v32  ;;  %v10696_v38 = vld [vmem:[#allocation93_spill] sm:$0xff]  ;;  %v10697_v32 = vld [vmem:[#allocation94_spill] sm:$0xff] }
 0x2e0   :  { %5379 = vmatprep.subr.bf16.mxu0 %v10687_v36  ;;  %5443 = vmatprep.subr.bf16.mxu1 %v10688_v4  ;;  %v10698_v36 = vld [vmem:[#allocation95_spill] sm:$0xff]  ;;  %v10699_v4 = vld [vmem:[#allocation96_spill] sm:$0xff] }
 0x2e3   :  { %5381 = vmatpush1.bf16.msra.mxu0 %v10689_v40  ;;  %5445 = vmatpush1.bf16.msra.mxu1 %v10690_v29  ;;  %v10700_v40 = vld [vmem:[#allocation97_spill] sm:$0xff]  ;;  %v10701_v29 = vld [vmem:[#allocation98_spill] sm:$0xff] }
 0x2e4   :  { %5383 = vmatprep.subr.bf16.mxu0 %v10691_v12  ;;  %5447 = vmatprep.subr.bf16.mxu1 %v10692_v22  ;;  %v10702_v12 = vld [vmem:[#allocation99_spill] sm:$0xff]  ;;  %v10703_v22 = vld [vmem:[#allocation100_spill] sm:$0xff] }
 0x2e7   :  { %5385 = vmatpush1.bf16.msra.mxu0 %v10693_v59  ;;  %5449 = vmatpush1.bf16.msra.mxu1 %v10694_v23  ;;  %v10704_v59 = vld [vmem:[#allocation101_spill] sm:$0xff]  ;;  %v10705_v23 = vld [vmem:[#allocation102_spill] sm:$0xff] }
 0x2e8   :  { %5387 = vmatprep.subr.bf16.mxu0 %v10695_v5  ;;  %5451 = vmatprep.subr.bf16.mxu1 %v10696_v38  ;;  %v10706_v5 = vld [vmem:[#allocation103_spill] sm:$0xff]  ;;  %v10707_v38 = vld [vmem:[#allocation104_spill] sm:$0xff] }
 0x2eb   :  { %5389 = vmatpush1.bf16.msra.mxu0 %v10697_v32  ;;  %5453 = vmatpush1.bf16.msra.mxu1 %v10698_v36  ;;  %v10708_v32 = vld [vmem:[#allocation105_spill] sm:$0xff] }
 0x2ec   :  { %5391 = vmatprep.subr.bf16.mxu0 %v10699_v4  ;;  %5455 = vmatprep.subr.bf16.mxu1 %v10700_v40  ;;  %v820_v40 = vld [vmem:[%s10184_s5] sm:$0xf] }
 0x2ef   :  { %5393 = vmatpush1.bf16.msra.mxu0 %v10701_v29  ;;  %5457 = vmatpush1.bf16.msra.mxu1 %v10702_v12  ;;  %v10709_v29 = vsub.s32 0, %v8784_v53 }
 0x2f0   :  { %5395 = vmatprep.subr.bf16.mxu0 %v10703_v22  ;;  %5459 = vmatprep.subr.bf16.mxu1 %v10704_v59  ;;  %v10711_v22 = vsub.s32 1, %v8784_v53 }
 0x2f1   :  { %v8921_v4 = vrot.slane %v820_v40, %v10709_v29  ;;  %v8931_v29 = vrot.slane %v820_v40, %v10713_v39 }
 0x2f2   :  { %v8925_v12 = vrot.slane %v820_v40, %v10711_v22 }
 0x2f3   :  { %5397 = vmatpush1.bf16.msra.mxu0 %v10705_v23  ;;  %5461 = vmatpush1.bf16.msra.mxu1 %v10706_v5  ;;  %10710 = vst [vmem:[#allocation172_spill] sm:$0xff] %v8921_v4  ;;  %10714 = vst [vmem:[#allocation174_spill] sm:$0xff] %v8931_v29 }
 0x2f4   :  { %5463 = vmatprep.subr.bf16.mxu0 %v10707_v38  ;;  %5527 = vmatprep.subr.bf16.mxu1 %v10708_v32  ;;  %10712 = vst [vmem:[#allocation173_spill] sm:$0xff] %v8925_v12 }
 0x368   :  { %v908_v59 = vpop.f32.mrb[4].mxu0  ;;  %v979_v23 = vpop.f32.mrb[4].mxu1 }
 0x369   :  { %v909_v5 = vadd.f32 %v908_v59, %v8921_v4  ;;  %v910_v36 = vpop.f32.mrb[5].mxu0  ;;  %v981_v38 = vpop.f32.mrb[5].mxu1  ;;  %v980_v28 = vadd.f32 %v979_v23, %v8931_v29 }
 0x36a   :  { %v911_v32 = vadd.f32 %v910_v36, %v8925_v12 }
 0x36b   :  { %v4778_v57 = vmul.f32 -1.442695, %v909_v5 }
 0x36c   :  { %v4779_v56 = vmul.f32 -1.442695, %v911_v32 }
 0x36d   :  { %7604 = vpow2.f32 %v4778_v57  ;;  %v1009_v57 = vld [vmem:[#allocation4 + $0x20] sm:$0xff] }
 0x36e   :  { %7606 = vpow2.f32 %v4779_v56  ;;  %v1010_v56 = vld [vmem:[#allocation4 + $0x28] sm:$0xff] }
 0x36f   :  { %7608 = vtanh.f32 %v980_v28  ;;  %v10715_v28 = vsub.s32 3, %v8784_v53 }
 0x377   :  { %v7605_v22 = vpop.eup %7604 }
 0x378   :  { %v7607_v63 = vpop.eup %7606  ;;  %v987_v3 = vadd.f32 1.0, %v7605_v22  ;;  %v1012_v22 = vld [vmem:[#allocation4 + $0x38] sm:$0xff] }
 0x379   :  { %v993_v50 = vadd.f32 1.0, %v7607_v63  ;;  %v7609_v59 = vpop.eup %7608  ;;  %v8938_v63 = vrot.slane %v820_v40, %v10715_v28 }
 0x37a   :  { %7610 = vrcp.f32 %v987_v3 }
 0x37b   :  { %7612 = vrcp.f32 %v993_v50 }
 0x384   :  { %v7611_v4 = vpop.eup %7610 }
 0x385   :  { %v7613_v36 = vpop.eup %7612  ;;  %v1004_v5 = vmul.f32 %v7611_v4, %v7609_v59  ;;  %v982_v4 = vadd.f32 %v981_v38, %v8938_v63 }
 0x386   :  { %v1003_v32 = vmul.f32 0.0, %v7613_v36  ;;  %v1011_v36 = vld [vmem:[#allocation4 + $0x30] sm:$0xff] }
 0x388   :  { %v8934_v12 = vadd.f32 %v1004_v5, %v1003_v32  ;;  %v1079_v39 = vpop.f32.mrb[6].mxu0  ;;  %v1150_v20 = vpop.f32.mrb[6].mxu1  ;;  %v4780_v5 = vmul.f32 -1.442695, %v982_v4 }
 0x389   :  { %v1155_v35 = vadd.f32 %v1079_v39, %v1009_v57  ;;  %v1081_v23 = vpop.f32.mrb[7].mxu0  ;;  %v1152_v29 = vpop.f32.mrb[7].mxu1  ;;  %v1157_v21 = vadd.f32 %v1150_v20, %v1011_v36 }
 0x38a   :  { %v1156_v2 = vadd.f32 %v1081_v23, %v1010_v56  ;;  %v1158_v59 = vadd.f32 %v1152_v29, %v1012_v22 }
 0x38b   :  { %v4781_v50 = vmul.f32 -1.442695, %v1155_v35 }
 0x38c   :  { %v4782_v3 = vmul.f32 -1.442695, %v1156_v2  ;;  %v4783_v32 = vmul.f32 -1.442695, %v1158_v59 }
 0x38d   :  { %7614 = vpow2.f32 %v4781_v50  ;;  %v10716_v50 = vld [vmem:[#allocation106_spill] sm:$0xff] }
 0x38e   :  { %7616 = vpow2.f32 %v4782_v3 }
 0x38f   :  { %7618 = vpow2.f32 %v4780_v5 }
 0x390   :  { %7620 = vpow2.f32 %v4783_v32 }
 0x391   :  { %7622 = vtanh.f32 %v1157_v21 }
 0x397   :  { %v7615_v57 = vpop.eup %7614 }
 0x398   :  { %v7617_v39 = vpop.eup %7616  ;;  %v1162_v56 = vadd.f32 1.0, %v7615_v57  ;;  %v10717_v57 = vld [vmem:[#allocation107_spill] sm:$0xff] }
 0x399   :  { %v1168_v53 = vadd.f32 1.0, %v7617_v39  ;;  %v7619_v2 = vpop.eup %7618  ;;  %v10718_v39 = vld [vmem:[#allocation108_spill] sm:$0xff] }
 0x39a   :  { %7624 = vrcp.f32 %v1162_v56  ;;  %v7621_v35 = vpop.eup %7620  ;;  %v1000_v22 = vadd.f32 1.0, %v7619_v2  ;;  %v10719_v56 = vld [vmem:[#allocation109_spill] sm:$0xff]  ;;  %v10721_v2 = vld [vmem:[#allocation111_spill] sm:$0xff] }
 0x39b   :  { %7626 = vrcp.f32 %v1168_v53  ;;  %v7623_v40 = vpop.eup %7622  ;;  %v1175_v29 = vadd.f32 1.0, %v7621_v35  ;;  %v10720_v53 = vld [vmem:[#allocation110_spill] sm:$0xff]  ;;  %v10722_v35 = vld [vmem:[#allocation112_spill] sm:$0xff] }
 0x39c   :  { %7628 = vtanh.f32 %v8934_v12 }
 0x39d   :  { %7630 = vrcp.f32 %v1175_v29  ;;  %v10727_v29 = vld [vmem:[#allocation122_spill] sm:$0xff] }
 0x3a4   :  { %v7625_v23 = vpop.eup %7624 }
 0x3a5   :  { %v7627_v28 = vpop.eup %7626  ;;  %v1179_v38 = vmul.f32 %v7625_v23, %v7623_v40  ;;  %v10723_v40 = vld [vmem:[#allocation118_spill] sm:$0xff]  ;;  %v10724_v23 = vld [vmem:[#allocation119_spill] sm:$0xff] }
 0x3a6   :  { %v1178_v3 = vmul.f32 %v7627_v28, %v10716_v50  ;;  %v7629_v21 = vpop.eup %7628  ;;  %v10725_v28 = vld [vmem:[#allocation120_spill] sm:$0xff]  ;;  %v10728_v50 = vld [vmem:[#allocation123_spill] sm:$0xff] }
 0x3a7   :  { %v7631_v4 = vpop.eup %7630 }
 0x3a8   :  { %v8943_v20 = vadd.f32 %v1179_v38, %v1178_v3  ;;  %v10726_v38 = vld [vmem:[#allocation121_spill] sm:$0xff]  ;;  %v10729_v3 = vld [vmem:[#allocation124_spill] sm:$0xff] }
 0x3aa   :  { %7632 = vtanh.f32 %v8943_v20 }
 0x3ab   :  { %7634 = vrcp.f32 %v1000_v22  ;;  %v10730_v22 = vld [vmem:[#allocation125_spill] sm:$0xff] }
 0x3b4   :  { %v7633_v59 = vpop.eup %7632 }
 0x3b5   :  { %v7635_v36 = vpop.eup %7634  ;;  %v8946_v5 = vmul.f32 %v7633_v59, %v7631_v4  ;;  %v10732_v4 = vld [vmem:[#allocation127_spill] sm:$0xff]  ;;  %v10733_v59 = vld [vmem:[#allocation128_spill] sm:$0xff] }
 0x3b6   :  { %v1007_v32 = vmul.f32 %v7635_v36, %v7629_v21  ;;  %v10731_v21 = vld [vmem:[#allocation126_spill] sm:$0xff]  ;;  %v10734_v36 = vld [vmem:[#allocation129_spill] sm:$0xff] }
 0x3b7   :  { %1248 = vmatmul.mubr.f32.vlgmr.msra.gmra.mrb[8].mxu0 %v8946_v5  ;;  %1319 = vmatmul.mubr.f32.vlgmr.msra.gmra.mrb[8].mxu1 %v8946_v5 }
 0x3b8   :  { %1413 = vmatprep.mubr.f32.mxu0 %v1007_v32  ;;  %1484 = vmatprep.mubr.f32.mxu1 %v1007_v32  ;;  %v10735_v32 = vld [vmem:[#allocation130_spill] sm:$0xff] }
 0x3b9   :  { %5465 = vmatpush1.bf16.msra.mxu0 %v10717_v57  ;;  %5529 = vmatpush1.bf16.msra.mxu1 %v10718_v39 }
 0x3ba   :  { %5467 = vmatprep.subr.bf16.mxu0 %v10719_v56  ;;  %5531 = vmatprep.subr.bf16.mxu1 %v10720_v53 }
 0x3bd   :  { %5469 = vmatpush1.bf16.msra.mxu0 %v10721_v2  ;;  %5533 = vmatpush1.bf16.msra.mxu1 %v10722_v35 }
 0x3be   :  { %5471 = vmatprep.subr.bf16.mxu0 %v8610_v0  ;;  %5535 = vmatprep.subr.bf16.mxu1 %v8612_v19 }
 0x3c1   :  { %5473 = vmatpush1.bf16.msra.mxu0 %v8618_v44  ;;  %5537 = vmatpush1.bf16.msra.mxu1 %v8620_v54 }
 0x3c2   :  { %5475 = vmatprep.subr.bf16.mxu0 %v8624_v16  ;;  %5539 = vmatprep.subr.bf16.mxu1 %v10723_v40  ;;  %v10777_v16 = vld [vmem:[#allocation170_spill] sm:$0xff] }
 0x3c5   :  { %5477 = vmatpush1.bf16.msra.mxu0 %v10724_v23  ;;  %5541 = vmatpush1.bf16.msra.mxu1 %v10725_v28  ;;  %v10736_v28 = vld [vmem:[#allocation131_spill] sm:$0xff]  ;;  %v10776_v23 = vld [vmem:[#allocation169_spill] sm:$0xff] }
 0x3c6   :  { %5479 = vmatprep.subr.bf16.mxu0 %v10726_v38  ;;  %5543 = vmatprep.subr.bf16.mxu1 %v10727_v29  ;;  %v10737_v38 = vld [vmem:[#allocation132_spill] sm:$0xff]  ;;  %v10738_v29 = vld [vmem:[#allocation133_spill] sm:$0xff] }
 0x3c9   :  { %5481 = vmatpush1.bf16.msra.mxu0 %v10728_v50  ;;  %5545 = vmatpush1.bf16.msra.mxu1 %v10729_v3  ;;  %v10739_v50 = vld [vmem:[#allocation134_spill] sm:$0xff]  ;;  %v10740_v3 = vld [vmem:[#allocation135_spill] sm:$0xff] }
 0x3ca   :  { %5483 = vmatprep.subr.bf16.mxu0 %v10730_v22  ;;  %5547 = vmatprep.subr.bf16.mxu1 %v10731_v21  ;;  %v10741_v22 = vld [vmem:[#allocation136_spill] sm:$0xff]  ;;  %v10742_v21 = vld [vmem:[#allocation137_spill] sm:$0xff] }
 0x3cd   :  { %5485 = vmatpush1.bf16.msra.mxu0 %v10732_v4  ;;  %5549 = vmatpush1.bf16.msra.mxu1 %v10733_v59  ;;  %v10743_v4 = vld [vmem:[#allocation138_spill] sm:$0xff]  ;;  %v10744_v59 = vld [vmem:[#allocation139_spill] sm:$0xff] }
 0x3ce   :  { %5487 = vmatprep.subr.bf16.mxu0 %v10734_v36  ;;  %5551 = vmatprep.subr.bf16.mxu1 %v10735_v32  ;;  %v10745_v36 = vld [vmem:[#allocation140_spill] sm:$0xff]  ;;  %v10746_v32 = vld [vmem:[#allocation141_spill] sm:$0xff] }
 0x3d1   :  { %5489 = vmatpush1.bf16.msra.mxu0 %v10736_v28  ;;  %5553 = vmatpush1.bf16.msra.mxu1 %v10737_v38  ;;  %v10747_v28 = vld [vmem:[#allocation142_spill] sm:$0xff]  ;;  %v10748_v38 = vld [vmem:[#allocation143_spill] sm:$0xff] }
 0x3d2   :  { %5491 = vmatprep.subr.bf16.mxu0 %v10738_v29  ;;  %5555 = vmatprep.subr.bf16.mxu1 %v10739_v50  ;;  %v10749_v29 = vld [vmem:[#allocation144_spill] sm:$0xff]  ;;  %v10750_v50 = vld [vmem:[#allocation145_spill] sm:$0xff] }
 0x3d5   :  { %5493 = vmatpush1.bf16.msra.mxu0 %v10740_v3  ;;  %5557 = vmatpush1.bf16.msra.mxu1 %v10741_v22  ;;  %v10751_v3 = vld [vmem:[#allocation146_spill] sm:$0xff]  ;;  %v10752_v22 = vld [vmem:[#allocation147_spill] sm:$0xff] }
 0x3d6   :  { %5495 = vmatprep.subr.bf16.mxu0 %v10742_v21  ;;  %5559 = vmatprep.subr.bf16.mxu1 %v10743_v4  ;;  %v10753_v21 = vld [vmem:[#allocation148_spill] sm:$0xff]  ;;  %v10754_v4 = vld [vmem:[#allocation149_spill] sm:$0xff] }
 0x3d9   :  { %5497 = vmatpush1.bf16.msra.mxu0 %v10744_v59  ;;  %5561 = vmatpush1.bf16.msra.mxu1 %v10745_v36  ;;  %v10755_v59 = vld [vmem:[#allocation150_spill] sm:$0xff]  ;;  %v10756_v36 = vld [vmem:[#allocation151_spill] sm:$0xff] }
 0x3da   :  { %5499 = vmatprep.subr.bf16.mxu0 %v10746_v32  ;;  %5563 = vmatprep.subr.bf16.mxu1 %v10747_v28  ;;  %v10757_v32 = vld [vmem:[#allocation152_spill] sm:$0xff]  ;;  %v10758_v28 = vld [vmem:[#allocation153_spill] sm:$0xff] }
 0x3dd   :  { %5501 = vmatpush1.bf16.msra.mxu0 %v10748_v38  ;;  %5565 = vmatpush1.bf16.msra.mxu1 %v10749_v29  ;;  %v10759_v38 = vld [vmem:[#allocation154_spill] sm:$0xff]  ;;  %v10760_v29 = vld [vmem:[#allocation155_spill] sm:$0xff] }
 0x3de   :  { %5503 = vmatprep.subr.bf16.mxu0 %v10750_v50  ;;  %5567 = vmatprep.subr.bf16.mxu1 %v10751_v3  ;;  %v10761_v50 = vld [vmem:[#allocation156_spill] sm:$0xff]  ;;  %v10762_v3 = vld [vmem:[#allocation157_spill] sm:$0xff] }
 0x3e1   :  { %5505 = vmatpush1.bf16.msra.mxu0 %v10752_v22  ;;  %5569 = vmatpush1.bf16.msra.mxu1 %v10753_v21  ;;  %v10763_v22 = vld [vmem:[#allocation158_spill] sm:$0xff]  ;;  %v10764_v21 = vld [vmem:[#allocation159_spill] sm:$0xff] }
 0x3e2   :  { %5507 = vmatprep.subr.bf16.mxu0 %v10754_v4  ;;  %5571 = vmatprep.subr.bf16.mxu1 %v10755_v59  ;;  %v10765_v4 = vld [vmem:[#allocation160_spill] sm:$0xff]  ;;  %v10766_v59 = vld [vmem:[#allocation161_spill] sm:$0xff] }
 0x3e5   :  { %5509 = vmatpush1.bf16.msra.mxu0 %v10756_v36  ;;  %5573 = vmatpush1.bf16.msra.mxu1 %v10757_v32  ;;  %v10767_v36 = vld [vmem:[#allocation162_spill] sm:$0xff]  ;;  %v10768_v32 = vld [vmem:[#allocation163_spill] sm:$0xff] }
 0x3e6   :  { %5511 = vmatprep.subr.bf16.mxu0 %v10758_v28  ;;  %5575 = vmatprep.subr.bf16.mxu1 %v10759_v38  ;;  %v10769_v28 = vld [vmem:[#allocation164_spill] sm:$0xff]  ;;  %v10770_v38 = vld [vmem:[#allocation165_spill] sm:$0xff] }
 0x3e9   :  { %5513 = vmatpush1.bf16.msra.mxu0 %v10760_v29  ;;  %5577 = vmatpush1.bf16.msra.mxu1 %v10761_v50  ;;  %v10771_v29 = vld [vmem:[#allocation166_spill] sm:$0xff]  ;;  %v10772_v50 = vld [vmem:[#allocation167_spill] sm:$0xff] }
 0x3ea   :  { %5515 = vmatprep.subr.bf16.mxu0 %v10762_v3  ;;  %5579 = vmatprep.subr.bf16.mxu1 %v10763_v22  ;;  %v10773_v3 = vld [vmem:[#allocation168_spill] sm:$0xff]  ;;  %v10774_v22 = vld [vmem:[#allocation21_spill] sm:$0xff] }
 0x3ed   :  { %5517 = vmatpush1.bf16.msra.mxu0 %v10764_v21  ;;  %5581 = vmatpush1.bf16.msra.mxu1 %v10765_v4  ;;  %v10775_v21 = vld [vmem:[#allocation22_spill] sm:$0xff] }
 0x3ee   :  { %5519 = vmatprep.subr.bf16.mxu0 %v10766_v59  ;;  %5583 = vmatprep.subr.bf16.mxu1 %v10767_v36 }
 0x3f1   :  { %5521 = vmatpush1.bf16.msra.mxu0 %v10768_v32  ;;  %5585 = vmatpush1.bf16.msra.mxu1 %v10769_v28 }
 0x3f2   :  { %5523 = vmatprep.subr.bf16.mxu0 %v10770_v38  ;;  %5587 = vmatprep.subr.bf16.mxu1 %v10771_v29  ;;  %v10778_v29 = vld [vmem:[#allocation171_spill] sm:$0xff] }
 0x3f5   :  { %5525 = vmatpush1.bf16.msra.mxu0 %v10772_v50  ;;  %5589 = vmatpush1.bf16.msra.mxu1 %v10773_v3 }
 0x3f6   :  { %5591 = vmatprep.subr.bf16.mxu0 %v10774_v22  ;;  %5623 = vmatprep.subr.bf16.mxu1 %v10775_v21 }
 0x48a   :  { %v1249_v4 = vpop.f32.mrb[8].mxu0  ;;  %v1320_v59 = vpop.f32.mrb[8].mxu1 }
 0x48b   :  { %v1250_v36 = vadd.f32 %v1249_v4, %v10776_v23  ;;  %v1251_v40 = vpop.f32.mrb[9].mxu0  ;;  %v1322_v32 = vpop.f32.mrb[9].mxu1  ;;  %v1321_v3 = vadd.f32 %v1320_v59, %v8810_v13  ;;  %v10785_v59 = vld [vmem:[#allocation51_spill] sm:$0xff] }
 0x48c   :  { %v1252_v28 = vadd.f32 %v1251_v40, %v10777_v16  ;;  %v1323_v50 = vadd.f32 %v1322_v32, %v10778_v29 }
 0x48d   :  { %v4784_v54 = vmul.f32 -1.442695, %v1250_v36 }
 0x48e   :  { %v4785_v38 = vmul.f32 -1.442695, %v1252_v28  ;;  %v4786_v44 = vmul.f32 -1.442695, %v1323_v50 }
 0x48f   :  { %7636 = vpow2.f32 %v4784_v54 }
 0x490   :  { %7638 = vpow2.f32 %v4785_v38 }
 0x491   :  { %7640 = vpow2.f32 %v4786_v44 }
 0x492   :  { %7642 = vtanh.f32 %v1321_v3  ;;  %v10783_v3 = vld [vmem:[#allocation49_spill] sm:$0xff] }
 0x499   :  { %v7637_v22 = vpop.eup %7636 }
 0x49a   :  { %v7639_v19 = vpop.eup %7638  ;;  %v1328_v21 = vadd.f32 1.0, %v7637_v22 }
 0x49b   :  { %v1334_v0 = vadd.f32 1.0, %v7639_v19  ;;  %v7641_v4 = vpop.eup %7640  ;;  %v10780_v19 = vld [vmem:[#allocation42_spill] sm:$0xff] }
 0x49c   :  { %7644 = vrcp.f32 %v1328_v21  ;;  %v7643_v23 = vpop.eup %7642  ;;  %v1341_v54 = vadd.f32 1.0, %v7641_v4  ;;  %v10784_v21 = vld [vmem:[#allocation46_spill] sm:$0xff]  ;;  %v10786_v4 = vld [vmem:[#allocation48_spill] sm:$0xff] }
 0x49d   :  { %7646 = vrcp.f32 %v1334_v0  ;;  %v10779_v0 = vld [vmem:[#allocation45_spill] sm:$0xff] }
 0x49e   :  { %7648 = vrcp.f32 %v1341_v54  ;;  %v10791_v54 = vld [vmem:[#allocation56_spill] sm:$0xff] }
 0x4a6   :  { %v7645_v40 = vpop.eup %7644 }
 0x4a7   :  { %v7647_v36 = vpop.eup %7646  ;;  %v1345_v28 = vmul.f32 %v7645_v40, %v7643_v23  ;;  %v10782_v23 = vld [vmem:[#allocation44_spill] sm:$0xff]  ;;  %v10788_v40 = vld [vmem:[#allocation50_spill] sm:$0xff] }
 0x4a8   :  { %v1344_v38 = vmul.f32 %v7647_v36, %v8813_v49  ;;  %v7649_v50 = vpop.eup %7648  ;;  %v10781_v49 = vld [vmem:[#allocation47_spill] sm:$0xff] }
 0x4a9   :  { %v10789_v36 = vld [vmem:[#allocation55_spill] sm:$0xff] }
 0x4aa   :  { %v9019_v32 = vadd.f32 %v1345_v28, %v1344_v38  ;;  %v10790_v28 = vld [vmem:[#allocation52_spill] sm:$0xff]  ;;  %v10792_v38 = vld [vmem:[#allocation54_spill] sm:$0xff] }
 0x4ac   :  { %7650 = vtanh.f32 %v9019_v32 }
 0x4b6   :  { %v7651_v22 = vpop.eup %7650 }
 0x4b7   :  { %v1348_v44 = vmul.f32 %v7651_v22, %v7649_v50  ;;  %v10793_v50 = vld [vmem:[#allocation57_spill] sm:$0xff]  ;;  %v10794_v22 = vld [vmem:[#allocation58_spill] sm:$0xff] }
 0x4b9   :  { %1414 = vmatmul.mubr.f32.vlgmr.msra.gmra.mrb[10].mxu0 %v1348_v44  ;;  %1485 = vmatmul.mubr.f32.vlgmr.msra.gmra.mrb[10].mxu1 %v1348_v44 }
 0x4ba   :  { %5593 = vmatpush1.bf16.msra.mxu0 %v8291_v8  ;;  %5625 = vmatpush1.bf16.msra.mxu1 %v8304_v25 }
 0x4bb   :  { %5595 = vmatprep.subr.bf16.mxu0 %v8293_v9  ;;  %5627 = vmatprep.subr.bf16.mxu1 %v8314_v33 }
 0x4bc   :  { %1584 = vmatprep.mubr.f32.mxu0 %v10593_v11  ;;  %1655 = vmatprep.mubr.f32.mxu1 %v10593_v11 }
 0x4be   :  { %5597 = vmatpush1.bf16.msra.mxu0 %v8297_v14  ;;  %5629 = vmatpush1.bf16.msra.mxu1 %v8316_v37 }
 0x4bf   :  { %5599 = vmatprep.subr.bf16.mxu0 %v8300_v17  ;;  %5631 = vmatprep.subr.bf16.mxu1 %v8322_v45 }
 0x4c2   :  { %5601 = vmatpush1.bf16.msra.mxu0 %v8307_v26  ;;  %5633 = vmatpush1.bf16.msra.mxu1 %v8328_v48 }
 0x4c3   :  { %5603 = vmatprep.subr.bf16.mxu0 %v8311_v30  ;;  %5635 = vmatprep.subr.bf16.mxu1 %v8331_v52 }
 0x4c6   :  { %5605 = vmatpush1.bf16.msra.mxu0 %v8320_v42  ;;  %5637 = vmatpush1.bf16.msra.mxu1 %v8340_v62 }
 0x4c7   :  { %5607 = vmatprep.subr.bf16.mxu0 %v8325_v46  ;;  %5639 = vmatprep.subr.bf16.mxu1 %v8343_v1 }
 0x4ca   :  { %5609 = vmatpush1.bf16.msra.mxu0 %v8334_v55  ;;  %5641 = vmatpush1.bf16.msra.mxu1 %v8352_v15 }
 0x4cb   :  { %5611 = vmatprep.subr.bf16.mxu0 %v8337_v58  ;;  %5643 = vmatprep.subr.bf16.mxu1 %v8355_v18 }
 0x4ce   :  { %5613 = vmatpush1.bf16.msra.mxu0 %v8346_v7  ;;  %5645 = vmatpush1.bf16.msra.mxu1 %v8364_v31 }
 0x4cf   :  { %5615 = vmatprep.subr.bf16.mxu0 %v8349_v10  ;;  %5647 = vmatprep.subr.bf16.mxu1 %v8367_v34 }
 0x4d2   :  { %5617 = vmatpush1.bf16.msra.mxu0 %v8358_v24  ;;  %5649 = vmatpush1.bf16.msra.mxu1 %v8374_v43 }
 0x4d3   :  { %5619 = vmatprep.subr.bf16.mxu0 %v8361_v27  ;;  %5651 = vmatprep.subr.bf16.mxu1 %v8379_v51 }
 0x4d6   :  { %5621 = vmatpush1.bf16.msra.mxu0 %v8370_v41  ;;  %5653 = vmatpush1.bf16.msra.mxu1 %v8385_v61 }
 0x4d7   :  { %5655 = vmatprep.subr.bf16.mxu0 %v8376_v47  ;;  %5719 = vmatprep.subr.bf16.mxu1 %v8391_v6 }
 0x4d9   :  { %1585 = vmatmul.mubr.f32.vlgmr.msra.gmra.mrb[12].mxu0 %v8946_v5  ;;  %1656 = vmatmul.mubr.f32.vlgmr.msra.gmra.mrb[12].mxu1 %v8946_v5  ;;  %v10787_v5 = vld [vmem:[#allocation53_spill] sm:$0xff] }
 0x4da   :  { %1754 = vmatprep.mubr.f32.mxu0 %v1348_v44  ;;  %1825 = vmatprep.mubr.f32.mxu1 %v1348_v44  ;;  %v10795_v44 = vld [vmem:[#allocation59_spill] sm:$0xff] }
 0x4db   :  { %5657 = vmatpush1.bf16.msra.mxu0 %v8382_v60  ;;  %5721 = vmatpush1.bf16.msra.mxu1 %v10779_v0 }
 0x4dc   :  { %5659 = vmatprep.subr.bf16.mxu0 %v10780_v19  ;;  %5723 = vmatprep.subr.bf16.mxu1 %v10781_v49 }
 0x4df   :  { %5661 = vmatpush1.bf16.msra.mxu0 %v10782_v23  ;;  %5725 = vmatpush1.bf16.msra.mxu1 %v10783_v3  ;;  %v10843_v23 = vld [vmem:[#allocation173_spill] sm:$0xff] }
 0x4e0   :  { %5663 = vmatprep.subr.bf16.mxu0 %v10784_v21  ;;  %5727 = vmatprep.subr.bf16.mxu1 %v10785_v59  ;;  %v10796_v59 = vld [vmem:[#allocation60_spill] sm:$0xff] }
 0x4e1   :  { %v10842_v21 = vld [vmem:[#allocation172_spill] sm:$0xff] }
 0x4e3   :  { %5665 = vmatpush1.bf16.msra.mxu0 %v10786_v4  ;;  %5729 = vmatpush1.bf16.msra.mxu1 %v10787_v5  ;;  %v10797_v4 = vld [vmem:[#allocation61_spill] sm:$0xff]  ;;  %v10798_v5 = vld [vmem:[#allocation62_spill] sm:$0xff] }
 0x4e4   :  { %5667 = vmatprep.subr.bf16.mxu0 %v10788_v40  ;;  %5731 = vmatprep.subr.bf16.mxu1 %v10789_v36  ;;  %v10799_v40 = vld [vmem:[#allocation63_spill] sm:$0xff]  ;;  %v10800_v36 = vld [vmem:[#allocation64_spill] sm:$0xff] }
 0x4e7   :  { %5669 = vmatpush1.bf16.msra.mxu0 %v10790_v28  ;;  %5733 = vmatpush1.bf16.msra.mxu1 %v10791_v54  ;;  %v10801_v28 = vld [vmem:[#allocation65_spill] sm:$0xff]  ;;  %v10802_v54 = vld [vmem:[#allocation66_spill] sm:$0xff] }
 0x4e8   :  { %5671 = vmatprep.subr.bf16.mxu0 %v10792_v38  ;;  %5735 = vmatprep.subr.bf16.mxu1 %v10793_v50  ;;  %v10803_v38 = vld [vmem:[#allocation67_spill] sm:$0xff]  ;;  %v10804_v50 = vld [vmem:[#allocation68_spill] sm:$0xff] }
 0x4eb   :  { %5673 = vmatpush1.bf16.msra.mxu0 %v10794_v22  ;;  %5737 = vmatpush1.bf16.msra.mxu1 %v10795_v44  ;;  %v10805_v22 = vld [vmem:[#allocation69_spill] sm:$0xff]  ;;  %v10806_v44 = vld [vmem:[#allocation70_spill] sm:$0xff] }
 0x4ec   :  { %5675 = vmatprep.subr.bf16.mxu0 %v10796_v59  ;;  %5739 = vmatprep.subr.bf16.mxu1 %v10797_v4  ;;  %v10807_v59 = vld [vmem:[#allocation71_spill] sm:$0xff]  ;;  %v10808_v4 = vld [vmem:[#allocation72_spill] sm:$0xff] }
 0x4ef   :  { %5677 = vmatpush1.bf16.msra.mxu0 %v10798_v5  ;;  %5741 = vmatpush1.bf16.msra.mxu1 %v10799_v40  ;;  %v10809_v5 = vld [vmem:[#allocation73_spill] sm:$0xff]  ;;  %v10810_v40 = vld [vmem:[#allocation74_spill] sm:$0xff] }
 0x4f0   :  { %5679 = vmatprep.subr.bf16.mxu0 %v10800_v36  ;;  %5743 = vmatprep.subr.bf16.mxu1 %v10801_v28  ;;  %v10811_v36 = vld [vmem:[#allocation75_spill] sm:$0xff]  ;;  %v10812_v28 = vld [vmem:[#allocation76_spill] sm:$0xff] }
 0x4f3   :  { %5681 = vmatpush1.bf16.msra.mxu0 %v10802_v54  ;;  %5745 = vmatpush1.bf16.msra.mxu1 %v10803_v38  ;;  %v10813_v54 = vld [vmem:[#allocation77_spill] sm:$0xff]  ;;  %v10814_v38 = vld [vmem:[#allocation78_spill] sm:$0xff] }
 0x4f4   :  { %5683 = vmatprep.subr.bf16.mxu0 %v10804_v50  ;;  %5747 = vmatprep.subr.bf16.mxu1 %v10805_v22  ;;  %v10815_v50 = vld [vmem:[#allocation79_spill] sm:$0xff]  ;;  %v10816_v22 = vld [vmem:[#allocation80_spill] sm:$0xff] }
 0x4f7   :  { %5685 = vmatpush1.bf16.msra.mxu0 %v10806_v44  ;;  %5749 = vmatpush1.bf16.msra.mxu1 %v10807_v59  ;;  %v10817_v44 = vld [vmem:[#allocation81_spill] sm:$0xff]  ;;  %v10818_v59 = vld [vmem:[#allocation82_spill] sm:$0xff] }
 0x4f8   :  { %5687 = vmatprep.subr.bf16.mxu0 %v10808_v4  ;;  %5751 = vmatprep.subr.bf16.mxu1 %v10809_v5  ;;  %v10819_v4 = vld [vmem:[#allocation83_spill] sm:$0xff]  ;;  %v10820_v5 = vld [vmem:[#allocation84_spill] sm:$0xff] }
 0x4fb   :  { %5689 = vmatpush1.bf16.msra.mxu0 %v10810_v40  ;;  %5753 = vmatpush1.bf16.msra.mxu1 %v10811_v36  ;;  %v10821_v40 = vld [vmem:[#allocation85_spill] sm:$0xff]  ;;  %v10822_v36 = vld [vmem:[#allocation86_spill] sm:$0xff] }
 0x4fc   :  { %5691 = vmatprep.subr.bf16.mxu0 %v10812_v28  ;;  %5755 = vmatprep.subr.bf16.mxu1 %v10813_v54  ;;  %v10823_v28 = vld [vmem:[#allocation87_spill] sm:$0xff]  ;;  %v10824_v54 = vld [vmem:[#allocation88_spill] sm:$0xff] }
 0x4ff   :  { %5693 = vmatpush1.bf16.msra.mxu0 %v10814_v38  ;;  %5757 = vmatpush1.bf16.msra.mxu1 %v10815_v50  ;;  %v10825_v38 = vld [vmem:[#allocation89_spill] sm:$0xff]  ;;  %v10826_v50 = vld [vmem:[#allocation90_spill] sm:$0xff] }
 0x500   :  { %5695 = vmatprep.subr.bf16.mxu0 %v10816_v22  ;;  %5759 = vmatprep.subr.bf16.mxu1 %v10817_v44  ;;  %v10827_v22 = vld [vmem:[#allocation91_spill] sm:$0xff]  ;;  %v10828_v44 = vld [vmem:[#allocation92_spill] sm:$0xff] }
 0x503   :  { %5697 = vmatpush1.bf16.msra.mxu0 %v10818_v59  ;;  %5761 = vmatpush1.bf16.msra.mxu1 %v10819_v4  ;;  %v10829_v59 = vld [vmem:[#allocation93_spill] sm:$0xff]  ;;  %v10830_v4 = vld [vmem:[#allocation94_spill] sm:$0xff] }
 0x504   :  { %5699 = vmatprep.subr.bf16.mxu0 %v10820_v5  ;;  %5763 = vmatprep.subr.bf16.mxu1 %v10821_v40  ;;  %v10831_v5 = vld [vmem:[#allocation95_spill] sm:$0xff]  ;;  %v10832_v40 = vld [vmem:[#allocation96_spill] sm:$0xff] }
 0x507   :  { %5701 = vmatpush1.bf16.msra.mxu0 %v10822_v36  ;;  %5765 = vmatpush1.bf16.msra.mxu1 %v10823_v28  ;;  %v10833_v36 = vld [vmem:[#allocation97_spill] sm:$0xff]  ;;  %v10834_v28 = vld [vmem:[#allocation98_spill] sm:$0xff] }
 0x508   :  { %5703 = vmatprep.subr.bf16.mxu0 %v10824_v54  ;;  %5767 = vmatprep.subr.bf16.mxu1 %v10825_v38  ;;  %v10835_v54 = vld [vmem:[#allocation99_spill] sm:$0xff]  ;;  %v10836_v38 = vld [vmem:[#allocation100_spill] sm:$0xff] }
 0x50b   :  { %5705 = vmatpush1.bf16.msra.mxu0 %v10826_v50  ;;  %5769 = vmatpush1.bf16.msra.mxu1 %v10827_v22  ;;  %v10837_v50 = vld [vmem:[#allocation101_spill] sm:$0xff]  ;;  %v10838_v22 = vld [vmem:[#allocation102_spill] sm:$0xff] }
 0x50c   :  { %5707 = vmatprep.subr.bf16.mxu0 %v10828_v44  ;;  %5771 = vmatprep.subr.bf16.mxu1 %v10829_v59  ;;  %v10839_v44 = vld [vmem:[#allocation103_spill] sm:$0xff]  ;;  %v10840_v59 = vld [vmem:[#allocation104_spill] sm:$0xff] }
 0x50f   :  { %5709 = vmatpush1.bf16.msra.mxu0 %v10830_v4  ;;  %5773 = vmatpush1.bf16.msra.mxu1 %v10831_v5  ;;  %v10841_v4 = vld [vmem:[#allocation105_spill] sm:$0xff] }
 0x510   :  { %5711 = vmatprep.subr.bf16.mxu0 %v10832_v40  ;;  %5775 = vmatprep.subr.bf16.mxu1 %v10833_v36 }
 0x513   :  { %5713 = vmatpush1.bf16.msra.mxu0 %v10834_v28  ;;  %5777 = vmatpush1.bf16.msra.mxu1 %v10835_v54 }
 0x514   :  { %5715 = vmatprep.subr.bf16.mxu0 %v10836_v38  ;;  %5779 = vmatprep.subr.bf16.mxu1 %v10837_v50  ;;  %v10844_v50 = vld [vmem:[#allocation174_spill] sm:$0xff] }
 0x517   :  { %5717 = vmatpush1.bf16.msra.mxu0 %v10838_v22  ;;  %5781 = vmatpush1.bf16.msra.mxu1 %v10839_v44 }
 0x518   :  { %5783 = vmatprep.subr.bf16.mxu0 %v10840_v59  ;;  %5847 = vmatprep.subr.bf16.mxu1 %v10841_v4 }
 0x58c   :  { %v1415_v5 = vpop.f32.mrb[10].mxu0  ;;  %v1486_v40 = vpop.f32.mrb[10].mxu1 }
 0x58d   :  { %v1416_v36 = vadd.f32 %v1415_v5, %v10842_v21  ;;  %v1417_v3 = vpop.f32.mrb[11].mxu0  ;;  %v1488_v28 = vpop.f32.mrb[11].mxu1  ;;  %v1487_v22 = vadd.f32 %v1486_v40, %v10844_v50 }
 0x58e   :  { %v1418_v54 = vadd.f32 %v1417_v3, %v10843_v23  ;;  %v1516_v3 = vld [vmem:[#allocation4 + $0x40] sm:$0xff] }
 0x58f   :  { %v4787_v49 = vmul.f32 -1.442695, %v1416_v36  ;;  %v1517_v36 = vld [vmem:[#allocation4 + $0x48] sm:$0xff] }
 0x590   :  { %v4788_v38 = vmul.f32 -1.442695, %v1418_v54 }
 0x591   :  { %7652 = vpow2.f32 %v4787_v49 }
 0x592   :  { %7654 = vpow2.f32 %v4788_v38 }
 0x593   :  { %7656 = vtanh.f32 %v1487_v22 }
 0x59b   :  { %v7653_v19 = vpop.eup %7652 }
 0x59c   :  { %v7655_v44 = vpop.eup %7654  ;;  %v1494_v0 = vadd.f32 1.0, %v7653_v19 }
 0x59d   :  { %v1500_v59 = vadd.f32 1.0, %v7655_v44  ;;  %v7657_v4 = vpop.eup %7656 }
 0x59e   :  { %7658 = vrcp.f32 %v1494_v0  ;;  %v1519_v0 = vld [vmem:[#allocation4 + $0x58] sm:$0xff] }
 0x59f   :  { %7660 = vrcp.f32 %v1500_v59  ;;  %v1489_v59 = vadd.f32 %v1488_v28, %v8938_v63 }
 0x5a8   :  { %v7659_v60 = vpop.eup %7658 }
 0x5a9   :  { %v7661_v5 = vpop.eup %7660  ;;  %v1511_v21 = vmul.f32 %v7659_v60, %v7657_v4  ;;  %v1518_v4 = vld [vmem:[#allocation4 + $0x50] sm:$0xff] }
 0x5aa   :  { %v1510_v6 = vmul.f32 %v7661_v5, %v8934_v12  ;;  %v4789_v12 = vmul.f32 -1.442695, %v1489_v59 }
 0x5ac   :  { %v1586_v54 = vpop.f32.mrb[12].mxu0  ;;  %v1657_v49 = vpop.f32.mrb[12].mxu1  ;;  %v9126_v38 = vadd.f32 %v1511_v21, %v1510_v6 }
 0x5ad   :  { %v1662_v40 = vadd.f32 %v1586_v54, %v1516_v3  ;;  %v1588_v50 = vpop.f32.mrb[13].mxu0  ;;  %v1659_v23 = vpop.f32.mrb[13].mxu1  ;;  %v1664_v47 = vadd.f32 %v1657_v49, %v1518_v4 }
 0x5ae   :  { %v1663_v19 = vadd.f32 %v1588_v50, %v1517_v36  ;;  %v1665_v60 = vadd.f32 %v1659_v23, %v1519_v0 }
 0x5af   :  { %v4790_v22 = vmul.f32 -1.442695, %v1662_v40 }
 0x5b0   :  { %v4791_v44 = vmul.f32 -1.442695, %v1663_v19  ;;  %v4792_v5 = vmul.f32 -1.442695, %v1665_v60 }
 0x5b1   :  { %7662 = vpow2.f32 %v4790_v22 }
 0x5b2   :  { %7664 = vpow2.f32 %v4791_v44 }
 0x5b3   :  { %7666 = vpow2.f32 %v4789_v12  ;;  %v10846_v12 = vld [vmem:[#allocation114_spill] sm:$0xff] }
 0x5b4   :  { %7668 = vpow2.f32 %v4792_v5  ;;  %v10847_v5 = vld [vmem:[#allocation115_spill] sm:$0xff] }
 0x5b5   :  { %7670 = vtanh.f32 %v1664_v47 }
 0x5bb   :  { %v7663_v61 = vpop.eup %7662 }
 0x5bc   :  { %v7665_v6 = vpop.eup %7664  ;;  %v1669_v21 = vadd.f32 1.0, %v7663_v61 }
 0x5bd   :  { %v1675_v3 = vadd.f32 1.0, %v7665_v6  ;;  %v7667_v50 = vpop.eup %7666  ;;  %v10848_v6 = vld [vmem:[#allocation116_spill] sm:$0xff] }
 0x5be   :  { %7672 = vrcp.f32 %v1669_v21  ;;  %v7669_v36 = vpop.eup %7668  ;;  %v1507_v44 = vadd.f32 1.0, %v7667_v50  ;;  %v10849_v21 = vld [vmem:[#allocation117_spill] sm:$0xff]  ;;  %v10851_v50 = vld [vmem:[#allocation119_spill] sm:$0xff] }
 0x5bf   :  { %7674 = vrcp.f32 %v1675_v3  ;;  %v7671_v54 = vpop.eup %7670  ;;  %v1682_v23 = vadd.f32 1.0, %v7669_v36  ;;  %v10850_v3 = vld [vmem:[#allocation118_spill] sm:$0xff]  ;;  %v10852_v36 = vld [vmem:[#allocation120_spill] sm:$0xff] }
 0x5c0   :  { %7676 = vtanh.f32 %v9126_v38 }
 0x5c1   :  { %7678 = vrcp.f32 %v1682_v23  ;;  %v10857_v23 = vld [vmem:[#allocation125_spill] sm:$0xff] }
 0x5c8   :  { %v7673_v40 = vpop.eup %7672 }
 0x5c9   :  { %v7675_v19 = vpop.eup %7674  ;;  %v1686_v28 = vmul.f32 %v7673_v40, %v7671_v54  ;;  %v10853_v54 = vld [vmem:[#allocation121_spill] sm:$0xff]  ;;  %v10854_v40 = vld [vmem:[#allocation122_spill] sm:$0xff] }
 0x5ca   :  { %v1685_v22 = vmul.f32 %v7675_v19, %v8943_v20  ;;  %v7677_v47 = vpop.eup %7676  ;;  %v10845_v20 = vld [vmem:[#allocation113_spill] sm:$0xff]  ;;  %v10855_v19 = vld [vmem:[#allocation123_spill] sm:$0xff] }
 0x5cb   :  { %v7679_v61 = vpop.eup %7678 }
 0x5cc   :  { %v9130_v49 = vadd.f32 %v1686_v28, %v1685_v22  ;;  %v10856_v28 = vld [vmem:[#allocation124_spill] sm:$0xff]  ;;  %v10858_v22 = vld [vmem:[#allocation126_spill] sm:$0xff] }
 0x5ce   :  { %7680 = vtanh.f32 %v9130_v49 }
 0x5cf   :  { %7682 = vrcp.f32 %v1507_v44  ;;  %v10859_v44 = vld [vmem:[#allocation127_spill] sm:$0xff] }
 0x5d8   :  { %v7681_v0 = vpop.eup %7680 }
 0x5d9   :  { %v7683_v59 = vpop.eup %7682  ;;  %v9134_v60 = vmul.f32 %v7681_v0, %v7679_v61  ;;  %v10861_v61 = vld [vmem:[#allocation129_spill] sm:$0xff]  ;;  %v10862_v0 = vld [vmem:[#allocation130_spill] sm:$0xff] }
 0x5da   :  { %v1514_v4 = vmul.f32 %v7683_v59, %v7677_v47  ;;  %v10860_v47 = vld [vmem:[#allocation128_spill] sm:$0xff]  ;;  %v10863_v59 = vld [vmem:[#allocation131_spill] sm:$0xff] }
 0x5db   :  { %1755 = vmatmul.mubr.f32.vlgmr.msra.gmra.mrb[14].mxu0 %v9134_v60  ;;  %1826 = vmatmul.mubr.f32.vlgmr.msra.gmra.mrb[14].mxu1 %v9134_v60 }
 0x5dc   :  { %1920 = vmatprep.mubr.f32.mxu0 %v1514_v4  ;;  %1991 = vmatprep.mubr.f32.mxu1 %v1514_v4  ;;  %v10864_v4 = vld [vmem:[#allocation132_spill] sm:$0xff] }
 0x5dd   :  { %5785 = vmatpush1.bf16.msra.mxu0 %v10717_v57  ;;  %5849 = vmatpush1.bf16.msra.mxu1 %v10718_v39 }
 0x5de   :  { %5787 = vmatprep.subr.bf16.mxu0 %v10719_v56  ;;  %5851 = vmatprep.subr.bf16.mxu1 %v10720_v53 }
 0x5e1   :  { %5789 = vmatpush1.bf16.msra.mxu0 %v10721_v2  ;;  %5853 = vmatpush1.bf16.msra.mxu1 %v10722_v35 }
 0x5e2   :  { %5791 = vmatprep.subr.bf16.mxu0 %v10845_v20  ;;  %5855 = vmatprep.subr.bf16.mxu1 %v10846_v12 }
 0x5e5   :  { %5793 = vmatpush1.bf16.msra.mxu0 %v10847_v5  ;;  %5857 = vmatpush1.bf16.msra.mxu1 %v10848_v6 }
 0x5e6   :  { %5795 = vmatprep.subr.bf16.mxu0 %v10849_v21  ;;  %5859 = vmatprep.subr.bf16.mxu1 %v10850_v3 }
 0x5e9   :  { %5797 = vmatpush1.bf16.msra.mxu0 %v10851_v50  ;;  %5861 = vmatpush1.bf16.msra.mxu1 %v10852_v36 }
 0x5ea   :  { %5799 = vmatprep.subr.bf16.mxu0 %v10853_v54  ;;  %5863 = vmatprep.subr.bf16.mxu1 %v10854_v40  ;;  %v10865_v40 = vld [vmem:[#allocation133_spill] sm:$0xff] }
 0x5eb   :  { %v10903_v54 = vld [vmem:[#allocation169_spill] sm:$0xff] }
 0x5ed   :  { %5801 = vmatpush1.bf16.msra.mxu0 %v10855_v19  ;;  %5865 = vmatpush1.bf16.msra.mxu1 %v10856_v28  ;;  %v10866_v19 = vld [vmem:[#allocation134_spill] sm:$0xff]  ;;  %v10867_v28 = vld [vmem:[#allocation135_spill] sm:$0xff] }
 0x5ee   :  { %5803 = vmatprep.subr.bf16.mxu0 %v10857_v23  ;;  %5867 = vmatprep.subr.bf16.mxu1 %v10858_v22  ;;  %v10868_v23 = vld [vmem:[#allocation136_spill] sm:$0xff]  ;;  %v10869_v22 = vld [vmem:[#allocation137_spill] sm:$0xff] }
 0x5f1   :  { %5805 = vmatpush1.bf16.msra.mxu0 %v10859_v44  ;;  %5869 = vmatpush1.bf16.msra.mxu1 %v10860_v47  ;;  %v10870_v44 = vld [vmem:[#allocation138_spill] sm:$0xff]  ;;  %v10871_v47 = vld [vmem:[#allocation139_spill] sm:$0xff] }
 0x5f2   :  { %5807 = vmatprep.subr.bf16.mxu0 %v10861_v61  ;;  %5871 = vmatprep.subr.bf16.mxu1 %v10862_v0  ;;  %v10872_v61 = vld [vmem:[#allocation140_spill] sm:$0xff]  ;;  %v10873_v0 = vld [vmem:[#allocation141_spill] sm:$0xff] }
 0x5f5   :  { %5809 = vmatpush1.bf16.msra.mxu0 %v10863_v59  ;;  %5873 = vmatpush1.bf16.msra.mxu1 %v10864_v4  ;;  %v10874_v59 = vld [vmem:[#allocation142_spill] sm:$0xff]  ;;  %v10875_v4 = vld [vmem:[#allocation143_spill] sm:$0xff] }
 0x5f6   :  { %5811 = vmatprep.subr.bf16.mxu0 %v10865_v40  ;;  %5875 = vmatprep.subr.bf16.mxu1 %v10866_v19  ;;  %v10876_v40 = vld [vmem:[#allocation144_spill] sm:$0xff]  ;;  %v10877_v19 = vld [vmem:[#allocation145_spill] sm:$0xff] }
 0x5f9   :  { %5813 = vmatpush1.bf16.msra.mxu0 %v10867_v28  ;;  %5877 = vmatpush1.bf16.msra.mxu1 %v10868_v23  ;;  %v10878_v28 = vld [vmem:[#allocation146_spill] sm:$0xff]  ;;  %v10879_v23 = vld [vmem:[#allocation147_spill] sm:$0xff] }
 0x5fa   :  { %5815 = vmatprep.subr.bf16.mxu0 %v10869_v22  ;;  %5879 = vmatprep.subr.bf16.mxu1 %v10870_v44  ;;  %v10880_v22 = vld [vmem:[#allocation148_spill] sm:$0xff]  ;;  %v10881_v44 = vld [vmem:[#allocation149_spill] sm:$0xff] }
 0x5fd   :  { %5817 = vmatpush1.bf16.msra.mxu0 %v10871_v47  ;;  %5881 = vmatpush1.bf16.msra.mxu1 %v10872_v61  ;;  %v10882_v47 = vld [vmem:[#allocation150_spill] sm:$0xff]  ;;  %v10883_v61 = vld [vmem:[#allocation151_spill] sm:$0xff] }
 0x5fe   :  { %5819 = vmatprep.subr.bf16.mxu0 %v10873_v0  ;;  %5883 = vmatprep.subr.bf16.mxu1 %v10874_v59  ;;  %v10884_v0 = vld [vmem:[#allocation152_spill] sm:$0xff]  ;;  %v10885_v59 = vld [vmem:[#allocation153_spill] sm:$0xff] }
 0x601   :  { %5821 = vmatpush1.bf16.msra.mxu0 %v10875_v4  ;;  %5885 = vmatpush1.bf16.msra.mxu1 %v10876_v40  ;;  %v10886_v4 = vld [vmem:[#allocation154_spill] sm:$0xff]  ;;  %v10887_v40 = vld [vmem:[#allocation155_spill] sm:$0xff] }
 0x602   :  { %5823 = vmatprep.subr.bf16.mxu0 %v10877_v19  ;;  %5887 = vmatprep.subr.bf16.mxu1 %v10878_v28  ;;  %v10888_v19 = vld [vmem:[#allocation156_spill] sm:$0xff]  ;;  %v10889_v28 = vld [vmem:[#allocation157_spill] sm:$0xff] }
 0x605   :  { %5825 = vmatpush1.bf16.msra.mxu0 %v10879_v23  ;;  %5889 = vmatpush1.bf16.msra.mxu1 %v10880_v22  ;;  %v10890_v23 = vld [vmem:[#allocation158_spill] sm:$0xff]  ;;  %v10891_v22 = vld [vmem:[#allocation159_spill] sm:$0xff] }
 0x606   :  { %5827 = vmatprep.subr.bf16.mxu0 %v10881_v44  ;;  %5891 = vmatprep.subr.bf16.mxu1 %v10882_v47  ;;  %v10892_v44 = vld [vmem:[#allocation160_spill] sm:$0xff]  ;;  %v10893_v47 = vld [vmem:[#allocation161_spill] sm:$0xff] }
 0x609   :  { %5829 = vmatpush1.bf16.msra.mxu0 %v10883_v61  ;;  %5893 = vmatpush1.bf16.msra.mxu1 %v10884_v0  ;;  %v10894_v61 = vld [vmem:[#allocation162_spill] sm:$0xff]  ;;  %v10895_v0 = vld [vmem:[#allocation163_spill] sm:$0xff] }
 0x60a   :  { %5831 = vmatprep.subr.bf16.mxu0 %v10885_v59  ;;  %5895 = vmatprep.subr.bf16.mxu1 %v10886_v4  ;;  %v10896_v59 = vld [vmem:[#allocation164_spill] sm:$0xff]  ;;  %v10897_v4 = vld [vmem:[#allocation165_spill] sm:$0xff] }
 0x60d   :  { %5833 = vmatpush1.bf16.msra.mxu0 %v10887_v40  ;;  %5897 = vmatpush1.bf16.msra.mxu1 %v10888_v19  ;;  %v10898_v40 = vld [vmem:[#allocation166_spill] sm:$0xff]  ;;  %v10899_v19 = vld [vmem:[#allocation167_spill] sm:$0xff] }
 0x60e   :  { %5835 = vmatprep.subr.bf16.mxu0 %v10889_v28  ;;  %5899 = vmatprep.subr.bf16.mxu1 %v10890_v23  ;;  %v10900_v28 = vld [vmem:[#allocation168_spill] sm:$0xff]  ;;  %v10901_v23 = vld [vmem:[#allocation21_spill] sm:$0xff] }
 0x611   :  { %5837 = vmatpush1.bf16.msra.mxu0 %v10891_v22  ;;  %5901 = vmatpush1.bf16.msra.mxu1 %v10892_v44  ;;  %v10902_v22 = vld [vmem:[#allocation22_spill] sm:$0xff] }
 0x612   :  { %5839 = vmatprep.subr.bf16.mxu0 %v10893_v47  ;;  %5903 = vmatprep.subr.bf16.mxu1 %v10894_v61 }
 0x615   :  { %5841 = vmatpush1.bf16.msra.mxu0 %v10895_v0  ;;  %5905 = vmatpush1.bf16.msra.mxu1 %v10896_v59 }
 0x616   :  { %5843 = vmatprep.subr.bf16.mxu0 %v10897_v4  ;;  %5907 = vmatprep.subr.bf16.mxu1 %v10898_v40 }
 0x619   :  { %5845 = vmatpush1.bf16.msra.mxu0 %v10899_v19  ;;  %5909 = vmatpush1.bf16.msra.mxu1 %v10900_v28 }
 0x61a   :  { %5911 = vmatprep.subr.bf16.mxu0 %v10901_v23  ;;  %5943 = vmatprep.subr.bf16.mxu1 %v10902_v22 }
 0x6ae   :  { %v1756_v44 = vpop.f32.mrb[14].mxu0  ;;  %v1827_v47 = vpop.f32.mrb[14].mxu1 }
 0x6af   :  { %v1757_v61 = vadd.f32 %v1756_v44, %v10903_v54  ;;  %v1758_v36 = vpop.f32.mrb[15].mxu0  ;;  %v1829_v0 = vpop.f32.mrb[15].mxu1  ;;  %v1828_v28 = vadd.f32 %v1827_v47, %v8810_v13  ;;  %v10910_v47 = vld [vmem:[#allocation47_spill] sm:$0xff] }
 0x6b0   :  { %v1759_v59 = vadd.f32 %v1758_v36, %v10777_v16  ;;  %v1830_v19 = vadd.f32 %v1829_v0, %v10778_v29 }
 0x6b1   :  { %v4793_v50 = vmul.f32 -1.442695, %v1757_v61 }
 0x6b2   :  { %v4794_v4 = vmul.f32 -1.442695, %v1759_v59  ;;  %v4795_v40 = vmul.f32 -1.442695, %v1830_v19 }
 0x6b3   :  { %7684 = vpow2.f32 %v4793_v50 }
 0x6b4   :  { %7686 = vpow2.f32 %v4794_v4 }
 0x6b5   :  { %7688 = vpow2.f32 %v4795_v40 }
 0x6b6   :  { %7690 = vtanh.f32 %v1828_v28  ;;  %v10908_v28 = vld [vmem:[#allocation45_spill] sm:$0xff] }
 0x6bd   :  { %v7685_v23 = vpop.eup %7684 }
 0x6be   :  { %v7687_v3 = vpop.eup %7686  ;;  %v1835_v22 = vadd.f32 1.0, %v7685_v23 }
 0x6bf   :  { %v1841_v21 = vadd.f32 1.0, %v7687_v3  ;;  %v7689_v44 = vpop.eup %7688  ;;  %v10906_v3 = vld [vmem:[#allocation43_spill] sm:$0xff] }
 0x6c0   :  { %7692 = vrcp.f32 %v1835_v22  ;;  %v7691_v54 = vpop.eup %7690  ;;  %v1848_v50 = vadd.f32 1.0, %v7689_v44  ;;  %v10909_v22 = vld [vmem:[#allocation42_spill] sm:$0xff]  ;;  %v10911_v44 = vld [vmem:[#allocation44_spill] sm:$0xff] }
 0x6c1   :  { %7694 = vrcp.f32 %v1841_v21  ;;  %v10905_v21 = vld [vmem:[#allocation38_spill] sm:$0xff] }
 0x6c2   :  { %7696 = vrcp.f32 %v1848_v50  ;;  %v10915_v50 = vld [vmem:[#allocation48_spill] sm:$0xff] }
 0x6ca   :  { %v7693_v36 = vpop.eup %7692 }
 0x6cb   :  { %v7695_v61 = vpop.eup %7694  ;;  %v1852_v59 = vmul.f32 %v7693_v36, %v7691_v54  ;;  %v10907_v54 = vld [vmem:[#allocation40_spill] sm:$0xff]  ;;  %v10912_v36 = vld [vmem:[#allocation49_spill] sm:$0xff] }
 0x6cc   :  { %v1851_v4 = vmul.f32 %v7695_v61, %v9019_v32  ;;  %v7697_v19 = vpop.eup %7696  ;;  %v10904_v32 = vld [vmem:[#allocation41_spill] sm:$0xff]  ;;  %v10913_v61 = vld [vmem:[#allocation46_spill] sm:$0xff] }
 0x6ce   :  { %v9207_v0 = vadd.f32 %v1852_v59, %v1851_v4  ;;  %v10914_v59 = vld [vmem:[#allocation51_spill] sm:$0xff]  ;;  %v10917_v4 = vld [vmem:[#allocation50_spill] sm:$0xff] }
 0x6d0   :  { %7698 = vtanh.f32 %v9207_v0 }
 0x6da   :  { %v7699_v23 = vpop.eup %7698 }
 0x6db   :  { %v1855_v40 = vmul.f32 %v7699_v23, %v7697_v19  ;;  %v10918_v19 = vld [vmem:[#allocation55_spill] sm:$0xff]  ;;  %v10919_v23 = vld [vmem:[#allocation52_spill] sm:$0xff] }
 0x6dd   :  { %1921 = vmatmul.mubr.f32.vlgmr.msra.gmra.mrb[16].mxu0 %v1855_v40  ;;  %1992 = vmatmul.mubr.f32.vlgmr.msra.gmra.mrb[16].mxu1 %v1855_v40 }
 0x6de   :  { %5913 = vmatpush1.bf16.msra.mxu0 %v8291_v8  ;;  %5945 = vmatpush1.bf16.msra.mxu1 %v8304_v25 }
 0x6df   :  { %5915 = vmatprep.subr.bf16.mxu0 %v8293_v9  ;;  %5947 = vmatprep.subr.bf16.mxu1 %v8314_v33 }
 0x6e0   :  { %2091 = vmatprep.mubr.f32.mxu0 %v10593_v11  ;;  %2162 = vmatprep.mubr.f32.mxu1 %v10593_v11 }
 0x6e2   :  { %5917 = vmatpush1.bf16.msra.mxu0 %v8297_v14  ;;  %5949 = vmatpush1.bf16.msra.mxu1 %v8316_v37 }
 0x6e3   :  { %5919 = vmatprep.subr.bf16.mxu0 %v8300_v17  ;;  %5951 = vmatprep.subr.bf16.mxu1 %v8322_v45 }
 0x6e6   :  { %5921 = vmatpush1.bf16.msra.mxu0 %v8307_v26  ;;  %5953 = vmatpush1.bf16.msra.mxu1 %v8328_v48 }
 0x6e7   :  { %5923 = vmatprep.subr.bf16.mxu0 %v8311_v30  ;;  %5955 = vmatprep.subr.bf16.mxu1 %v8331_v52 }
 0x6ea   :  { %5925 = vmatpush1.bf16.msra.mxu0 %v8320_v42  ;;  %5957 = vmatpush1.bf16.msra.mxu1 %v8340_v62 }
 0x6eb   :  { %5927 = vmatprep.subr.bf16.mxu0 %v8325_v46  ;;  %5959 = vmatprep.subr.bf16.mxu1 %v8343_v1 }
 0x6ee   :  { %5929 = vmatpush1.bf16.msra.mxu0 %v8334_v55  ;;  %5961 = vmatpush1.bf16.msra.mxu1 %v8352_v15 }
 0x6ef   :  { %5931 = vmatprep.subr.bf16.mxu0 %v8337_v58  ;;  %5963 = vmatprep.subr.bf16.mxu1 %v8355_v18 }
 0x6f2   :  { %5933 = vmatpush1.bf16.msra.mxu0 %v8346_v7  ;;  %5965 = vmatpush1.bf16.msra.mxu1 %v8364_v31 }
 0x6f3   :  { %5935 = vmatprep.subr.bf16.mxu0 %v8349_v10  ;;  %5967 = vmatprep.subr.bf16.mxu1 %v8367_v34 }
 0x6f6   :  { %5937 = vmatpush1.bf16.msra.mxu0 %v8358_v24  ;;  %5969 = vmatpush1.bf16.msra.mxu1 %v8374_v43 }
 0x6f7   :  { %5939 = vmatprep.subr.bf16.mxu0 %v8361_v27  ;;  %5971 = vmatprep.subr.bf16.mxu1 %v8379_v51 }
 0x6fa   :  { %5941 = vmatpush1.bf16.msra.mxu0 %v8370_v41  ;;  %5973 = vmatpush1.bf16.msra.mxu1 %v10904_v32 }
 0x6fb   :  { %5975 = vmatprep.subr.bf16.mxu0 %v10905_v21  ;;  %6039 = vmatprep.subr.bf16.mxu1 %v10906_v3 }
 0x6fd   :  { %2092 = vmatmul.mubr.f32.vlgmr.msra.gmra.mrb[18].mxu0 %v9134_v60  ;;  %2163 = vmatmul.mubr.f32.vlgmr.msra.gmra.mrb[18].mxu1 %v9134_v60  ;;  %v10916_v60 = vld [vmem:[#allocation53_spill] sm:$0xff] }
 0x6fe   :  { %2261 = vmatprep.mubr.f32.mxu0 %v1855_v40  ;;  %2332 = vmatprep.mubr.f32.mxu1 %v1855_v40  ;;  %v10920_v40 = vld [vmem:[#allocation56_spill] sm:$0xff] }
 0x6ff   :  { %5977 = vmatpush1.bf16.msra.mxu0 %v10907_v54  ;;  %6041 = vmatpush1.bf16.msra.mxu1 %v10908_v28  ;;  %v10972_v54 = vld [vmem:[#allocation173_spill] sm:$0xff] }
 0x700   :  { %5979 = vmatprep.subr.bf16.mxu0 %v10909_v22  ;;  %6043 = vmatprep.subr.bf16.mxu1 %v10910_v47  ;;  %v10921_v47 = vld [vmem:[#allocation54_spill] sm:$0xff]  ;;  %v10971_v22 = vld [vmem:[#allocation172_spill] sm:$0xff] }
 0x703   :  { %5981 = vmatpush1.bf16.msra.mxu0 %v10911_v44  ;;  %6045 = vmatpush1.bf16.msra.mxu1 %v10912_v36  ;;  %v10922_v44 = vld [vmem:[#allocation57_spill] sm:$0xff]  ;;  %v10923_v36 = vld [vmem:[#allocation58_spill] sm:$0xff] }
 0x704   :  { %5983 = vmatprep.subr.bf16.mxu0 %v10913_v61  ;;  %6047 = vmatprep.subr.bf16.mxu1 %v10914_v59  ;;  %v10924_v61 = vld [vmem:[#allocation59_spill] sm:$0xff]  ;;  %v10925_v59 = vld [vmem:[#allocation60_spill] sm:$0xff] }
 0x707   :  { %5985 = vmatpush1.bf16.msra.mxu0 %v10915_v50  ;;  %6049 = vmatpush1.bf16.msra.mxu1 %v10916_v60  ;;  %v10926_v50 = vld [vmem:[#allocation61_spill] sm:$0xff]  ;;  %v10927_v60 = vld [vmem:[#allocation62_spill] sm:$0xff] }
 0x708   :  { %5987 = vmatprep.subr.bf16.mxu0 %v10917_v4  ;;  %6051 = vmatprep.subr.bf16.mxu1 %v10918_v19  ;;  %v10928_v4 = vld [vmem:[#allocation63_spill] sm:$0xff]  ;;  %v10929_v19 = vld [vmem:[#allocation64_spill] sm:$0xff] }
 0x70b   :  { %5989 = vmatpush1.bf16.msra.mxu0 %v10919_v23  ;;  %6053 = vmatpush1.bf16.msra.mxu1 %v10920_v40  ;;  %v10930_v23 = vld [vmem:[#allocation65_spill] sm:$0xff]  ;;  %v10931_v40 = vld [vmem:[#allocation66_spill] sm:$0xff] }
 0x70c   :  { %5991 = vmatprep.subr.bf16.mxu0 %v10921_v47  ;;  %6055 = vmatprep.subr.bf16.mxu1 %v10922_v44  ;;  %v10932_v47 = vld [vmem:[#allocation67_spill] sm:$0xff]  ;;  %v10933_v44 = vld [vmem:[#allocation68_spill] sm:$0xff] }
 0x70f   :  { %5993 = vmatpush1.bf16.msra.mxu0 %v10923_v36  ;;  %6057 = vmatpush1.bf16.msra.mxu1 %v10924_v61  ;;  %v10934_v36 = vld [vmem:[#allocation69_spill] sm:$0xff]  ;;  %v10935_v61 = vld [vmem:[#allocation70_spill] sm:$0xff] }
 0x710   :  { %5995 = vmatprep.subr.bf16.mxu0 %v10925_v59  ;;  %6059 = vmatprep.subr.bf16.mxu1 %v10926_v50  ;;  %v10936_v59 = vld [vmem:[#allocation71_spill] sm:$0xff]  ;;  %v10937_v50 = vld [vmem:[#allocation72_spill] sm:$0xff] }
 0x713   :  { %5997 = vmatpush1.bf16.msra.mxu0 %v10927_v60  ;;  %6061 = vmatpush1.bf16.msra.mxu1 %v10928_v4  ;;  %v10938_v60 = vld [vmem:[#allocation73_spill] sm:$0xff]  ;;  %v10939_v4 = vld [vmem:[#allocation74_spill] sm:$0xff] }
 0x714   :  { %5999 = vmatprep.subr.bf16.mxu0 %v10929_v19  ;;  %6063 = vmatprep.subr.bf16.mxu1 %v10930_v23  ;;  %v10940_v19 = vld [vmem:[#allocation75_spill] sm:$0xff]  ;;  %v10941_v23 = vld [vmem:[#allocation76_spill] sm:$0xff] }
 0x717   :  { %6001 = vmatpush1.bf16.msra.mxu0 %v10931_v40  ;;  %6065 = vmatpush1.bf16.msra.mxu1 %v10932_v47  ;;  %v10942_v40 = vld [vmem:[#allocation77_spill] sm:$0xff]  ;;  %v10943_v47 = vld [vmem:[#allocation78_spill] sm:$0xff] }
 0x718   :  { %6003 = vmatprep.subr.bf16.mxu0 %v10933_v44  ;;  %6067 = vmatprep.subr.bf16.mxu1 %v10934_v36  ;;  %v10944_v44 = vld [vmem:[#allocation79_spill] sm:$0xff]  ;;  %v10945_v36 = vld [vmem:[#allocation80_spill] sm:$0xff] }
 0x71b   :  { %6005 = vmatpush1.bf16.msra.mxu0 %v10935_v61  ;;  %6069 = vmatpush1.bf16.msra.mxu1 %v10936_v59  ;;  %v10946_v61 = vld [vmem:[#allocation81_spill] sm:$0xff]  ;;  %v10947_v59 = vld [vmem:[#allocation82_spill] sm:$0xff] }
 0x71c   :  { %6007 = vmatprep.subr.bf16.mxu0 %v10937_v50  ;;  %6071 = vmatprep.subr.bf16.mxu1 %v10938_v60  ;;  %v10948_v50 = vld [vmem:[#allocation83_spill] sm:$0xff]  ;;  %v10949_v60 = vld [vmem:[#allocation84_spill] sm:$0xff] }
 0x71f   :  { %6009 = vmatpush1.bf16.msra.mxu0 %v10939_v4  ;;  %6073 = vmatpush1.bf16.msra.mxu1 %v10940_v19  ;;  %v10950_v4 = vld [vmem:[#allocation85_spill] sm:$0xff]  ;;  %v10951_v19 = vld [vmem:[#allocation86_spill] sm:$0xff] }
 0x720   :  { %6011 = vmatprep.subr.bf16.mxu0 %v10941_v23  ;;  %6075 = vmatprep.subr.bf16.mxu1 %v10942_v40  ;;  %v10952_v23 = vld [vmem:[#allocation87_spill] sm:$0xff]  ;;  %v10953_v40 = vld [vmem:[#allocation88_spill] sm:$0xff] }
 0x723   :  { %6013 = vmatpush1.bf16.msra.mxu0 %v10943_v47  ;;  %6077 = vmatpush1.bf16.msra.mxu1 %v10944_v44  ;;  %v10954_v47 = vld [vmem:[#allocation89_spill] sm:$0xff]  ;;  %v10955_v44 = vld [vmem:[#allocation90_spill] sm:$0xff] }
 0x724   :  { %6015 = vmatprep.subr.bf16.mxu0 %v10945_v36  ;;  %6079 = vmatprep.subr.bf16.mxu1 %v10946_v61  ;;  %v10956_v36 = vld [vmem:[#allocation91_spill] sm:$0xff]  ;;  %v10957_v61 = vld [vmem:[#allocation92_spill] sm:$0xff] }
 0x727   :  { %6017 = vmatpush1.bf16.msra.mxu0 %v10947_v59  ;;  %6081 = vmatpush1.bf16.msra.mxu1 %v10948_v50  ;;  %v10958_v59 = vld [vmem:[#allocation93_spill] sm:$0xff]  ;;  %v10959_v50 = vld [vmem:[#allocation94_spill] sm:$0xff] }
 0x728   :  { %6019 = vmatprep.subr.bf16.mxu0 %v10949_v60  ;;  %6083 = vmatprep.subr.bf16.mxu1 %v10950_v4  ;;  %v10960_v60 = vld [vmem:[#allocation95_spill] sm:$0xff]  ;;  %v10961_v4 = vld [vmem:[#allocation96_spill] sm:$0xff] }
 0x72b   :  { %6021 = vmatpush1.bf16.msra.mxu0 %v10951_v19  ;;  %6085 = vmatpush1.bf16.msra.mxu1 %v10952_v23  ;;  %v10962_v19 = vld [vmem:[#allocation97_spill] sm:$0xff]  ;;  %v10963_v23 = vld [vmem:[#allocation98_spill] sm:$0xff] }
 0x72c   :  { %6023 = vmatprep.subr.bf16.mxu0 %v10953_v40  ;;  %6087 = vmatprep.subr.bf16.mxu1 %v10954_v47  ;;  %v10964_v40 = vld [vmem:[#allocation99_spill] sm:$0xff]  ;;  %v10965_v47 = vld [vmem:[#allocation100_spill] sm:$0xff] }
 0x72f   :  { %6025 = vmatpush1.bf16.msra.mxu0 %v10955_v44  ;;  %6089 = vmatpush1.bf16.msra.mxu1 %v10956_v36  ;;  %v10966_v44 = vld [vmem:[#allocation101_spill] sm:$0xff]  ;;  %v10967_v36 = vld [vmem:[#allocation102_spill] sm:$0xff] }
 0x730   :  { %6027 = vmatprep.subr.bf16.mxu0 %v10957_v61  ;;  %6091 = vmatprep.subr.bf16.mxu1 %v10958_v59  ;;  %v10968_v61 = vld [vmem:[#allocation103_spill] sm:$0xff]  ;;  %v10969_v59 = vld [vmem:[#allocation104_spill] sm:$0xff] }
 0x733   :  { %6029 = vmatpush1.bf16.msra.mxu0 %v10959_v50  ;;  %6093 = vmatpush1.bf16.msra.mxu1 %v10960_v60  ;;  %v10970_v50 = vld [vmem:[#allocation105_spill] sm:$0xff] }
 0x734   :  { %6031 = vmatprep.subr.bf16.mxu0 %v10961_v4  ;;  %6095 = vmatprep.subr.bf16.mxu1 %v10962_v19 }
 0x737   :  { %6033 = vmatpush1.bf16.msra.mxu0 %v10963_v23  ;;  %6097 = vmatpush1.bf16.msra.mxu1 %v10964_v40 }
 0x738   :  { %6035 = vmatprep.subr.bf16.mxu0 %v10965_v47  ;;  %6099 = vmatprep.subr.bf16.mxu1 %v10966_v44  ;;  %v10973_v44 = vld [vmem:[#allocation174_spill] sm:$0xff] }
 0x73b   :  { %6037 = vmatpush1.bf16.msra.mxu0 %v10967_v36  ;;  %6101 = vmatpush1.bf16.msra.mxu1 %v10968_v61 }
 0x73c   :  { %6103 = vmatprep.subr.bf16.mxu0 %v10969_v59  ;;  %6167 = vmatprep.subr.bf16.mxu1 %v10970_v50 }
 0x7b0   :  { %v1922_v60 = vpop.f32.mrb[16].mxu0  ;;  %v1993_v4 = vpop.f32.mrb[16].mxu1 }
 0x7b1   :  { %v1923_v19 = vadd.f32 %v1922_v60, %v10971_v22  ;;  %v1924_v28 = vpop.f32.mrb[17].mxu0  ;;  %v1995_v23 = vpop.f32.mrb[17].mxu1  ;;  %v1994_v36 = vadd.f32 %v1993_v4, %v10973_v44 }
 0x7b2   :  { %v1925_v40 = vadd.f32 %v1924_v28, %v10972_v54  ;;  %v2023_v28 = vld [vmem:[#allocation4 + $0x60] sm:$0xff] }
 0x7b3   :  { %v4796_v3 = vmul.f32 -1.442695, %v1923_v19  ;;  %v2024_v19 = vld [vmem:[#allocation4 + $0x68] sm:$0xff] }
 0x7b4   :  { %v4797_v47 = vmul.f32 -1.442695, %v1925_v40 }
 0x7b5   :  { %7700 = vpow2.f32 %v4796_v3 }
 0x7b6   :  { %7702 = vpow2.f32 %v4797_v47 }
 0x7b7   :  { %7704 = vtanh.f32 %v1994_v36 }
 0x7bf   :  { %v7701_v21 = vpop.eup %7700 }
 0x7c0   :  { %v7703_v61 = vpop.eup %7702  ;;  %v2001_v32 = vadd.f32 1.0, %v7701_v21 }
 0x7c1   :  { %v2007_v59 = vadd.f32 1.0, %v7703_v61  ;;  %v7705_v50 = vpop.eup %7704 }
 0x7c2   :  { %7706 = vrcp.f32 %v2001_v32  ;;  %v2026_v32 = vld [vmem:[#allocation4 + $0x78] sm:$0xff] }
 0x7c3   :  { %7708 = vrcp.f32 %v2007_v59  ;;  %v1996_v59 = vadd.f32 %v1995_v23, %v8938_v63 }
 0x7cc   :  { %v7707_v41 = vpop.eup %7706 }
 0x7cd   :  { %v7709_v60 = vpop.eup %7708  ;;  %v2018_v22 = vmul.f32 %v7707_v41, %v7705_v50  ;;  %v2025_v50 = vld [vmem:[#allocation4 + $0x70] sm:$0xff] }
 0x7ce   :  { %v2017_v51 = vmul.f32 %v7709_v60, %v9126_v38  ;;  %v4798_v38 = vmul.f32 -1.442695, %v1996_v59 }
 0x7d0   :  { %v2093_v40 = vpop.f32.mrb[18].mxu0  ;;  %v2164_v3 = vpop.f32.mrb[18].mxu1  ;;  %v9314_v47 = vadd.f32 %v2018_v22, %v2017_v51 }
 0x7d1   :  { %v2169_v4 = vadd.f32 %v2093_v40, %v2023_v28  ;;  %v2095_v44 = vpop.f32.mrb[19].mxu0  ;;  %v2166_v54 = vpop.f32.mrb[19].mxu1  ;;  %v2171_v27 = vadd.f32 %v2164_v3, %v2025_v50 }
 0x7d2   :  { %v2170_v21 = vadd.f32 %v2095_v44, %v2024_v19  ;;  %v2172_v41 = vadd.f32 %v2166_v54, %v2026_v32 }
 0x7d3   :  { %v4799_v36 = vmul.f32 -1.442695, %v2169_v4 }
 0x7d4   :  { %v4800_v61 = vmul.f32 -1.442695, %v2170_v21  ;;  %v4801_v60 = vmul.f32 -1.442695, %v2172_v41 }
 0x7d5   :  { %7710 = vpow2.f32 %v4799_v36 }
 0x7d6   :  { %7712 = vpow2.f32 %v4800_v61 }
 0x7d7   :  { %7714 = vpow2.f32 %v4798_v38  ;;  %v10975_v38 = vld [vmem:[#allocation118_spill] sm:$0xff] }
 0x7d8   :  { %7716 = vpow2.f32 %v4801_v60  ;;  %v10976_v60 = vld [vmem:[#allocation119_spill] sm:$0xff] }
 0x7d9   :  { %7718 = vtanh.f32 %v2171_v27 }
 0x7df   :  { %v7711_v43 = vpop.eup %7710 }
 0x7e0   :  { %v7713_v51 = vpop.eup %7712  ;;  %v2176_v22 = vadd.f32 1.0, %v7711_v43 }
 0x7e1   :  { %v2182_v28 = vadd.f32 1.0, %v7713_v51  ;;  %v7715_v44 = vpop.eup %7714  ;;  %v10977_v51 = vld [vmem:[#allocation120_spill] sm:$0xff] }
 0x7e2   :  { %7720 = vrcp.f32 %v2176_v22  ;;  %v7717_v19 = vpop.eup %7716  ;;  %v2014_v61 = vadd.f32 1.0, %v7715_v44  ;;  %v10978_v22 = vld [vmem:[#allocation121_spill] sm:$0xff]  ;;  %v10980_v44 = vld [vmem:[#allocation123_spill] sm:$0xff] }
 0x7e3   :  { %7722 = vrcp.f32 %v2182_v28  ;;  %v7719_v40 = vpop.eup %7718  ;;  %v2189_v54 = vadd.f32 1.0, %v7717_v19  ;;  %v10979_v28 = vld [vmem:[#allocation122_spill] sm:$0xff]  ;;  %v10981_v19 = vld [vmem:[#allocation124_spill] sm:$0xff] }
 0x7e4   :  { %7724 = vtanh.f32 %v9314_v47 }
 0x7e5   :  { %7726 = vrcp.f32 %v2189_v54  ;;  %v10986_v54 = vld [vmem:[#allocation129_spill] sm:$0xff] }
 0x7ec   :  { %v7721_v4 = vpop.eup %7720 }
 0x7ed   :  { %v7723_v21 = vpop.eup %7722  ;;  %v2193_v23 = vmul.f32 %v7721_v4, %v7719_v40  ;;  %v10982_v40 = vld [vmem:[#allocation125_spill] sm:$0xff]  ;;  %v10983_v4 = vld [vmem:[#allocation126_spill] sm:$0xff] }
 0x7ee   :  { %v2192_v36 = vmul.f32 %v7723_v21, %v9130_v49  ;;  %v7725_v27 = vpop.eup %7724  ;;  %v10974_v49 = vld [vmem:[#allocation117_spill] sm:$0xff]  ;;  %v10984_v21 = vld [vmem:[#allocation127_spill] sm:$0xff] }
 0x7ef   :  { %v7727_v43 = vpop.eup %7726 }
 0x7f0   :  { %v9318_v3 = vadd.f32 %v2193_v23, %v2192_v36  ;;  %v10985_v23 = vld [vmem:[#allocation128_spill] sm:$0xff]  ;;  %v10987_v36 = vld [vmem:[#allocation130_spill] sm:$0xff] }
 0x7f2   :  { %7728 = vtanh.f32 %v9318_v3 }
 0x7f3   :  { %7730 = vrcp.f32 %v2014_v61  ;;  %v10988_v61 = vld [vmem:[#allocation131_spill] sm:$0xff] }
 0x7fc   :  { %v7729_v32 = vpop.eup %7728 }
 0x7fd   :  { %v7731_v59 = vpop.eup %7730  ;;  %v9322_v41 = vmul.f32 %v7729_v32, %v7727_v43  ;;  %v10990_v43 = vld [vmem:[#allocation133_spill] sm:$0xff]  ;;  %v10991_v32 = vld [vmem:[#allocation134_spill] sm:$0xff] }
 0x7fe   :  { %v2021_v50 = vmul.f32 %v7731_v59, %v7725_v27  ;;  %v10989_v27 = vld [vmem:[#allocation132_spill] sm:$0xff]  ;;  %v10992_v59 = vld [vmem:[#allocation135_spill] sm:$0xff] }
 0x7ff   :  { %2262 = vmatmul.mubr.f32.vlgmr.msra.gmra.mrb[20].mxu0 %v9322_v41  ;;  %2333 = vmatmul.mubr.f32.vlgmr.msra.gmra.mrb[20].mxu1 %v9322_v41 }
 0x800   :  { %2427 = vmatprep.mubr.f32.mxu0 %v2021_v50  ;;  %2498 = vmatprep.mubr.f32.mxu1 %v2021_v50  ;;  %v10993_v50 = vld [vmem:[#allocation136_spill] sm:$0xff] }
 0x801   :  { %6105 = vmatpush1.bf16.msra.mxu0 %v10717_v57  ;;  %6169 = vmatpush1.bf16.msra.mxu1 %v10718_v39 }
 0x802   :  { %6107 = vmatprep.subr.bf16.mxu0 %v10719_v56  ;;  %6171 = vmatprep.subr.bf16.mxu1 %v10720_v53 }
 0x805   :  { %6109 = vmatpush1.bf16.msra.mxu0 %v10721_v2  ;;  %6173 = vmatpush1.bf16.msra.mxu1 %v10722_v35 }
 0x806   :  { %6111 = vmatprep.subr.bf16.mxu0 %v10845_v20  ;;  %6175 = vmatprep.subr.bf16.mxu1 %v10846_v12 }
 0x809   :  { %6113 = vmatpush1.bf16.msra.mxu0 %v10847_v5  ;;  %6177 = vmatpush1.bf16.msra.mxu1 %v10848_v6 }
 0x80a   :  { %6115 = vmatprep.subr.bf16.mxu0 %v10974_v49  ;;  %6179 = vmatprep.subr.bf16.mxu1 %v10975_v38 }
 0x80d   :  { %6117 = vmatpush1.bf16.msra.mxu0 %v10976_v60  ;;  %6181 = vmatpush1.bf16.msra.mxu1 %v10977_v51 }
 0x80e   :  { %6119 = vmatprep.subr.bf16.mxu0 %v10978_v22  ;;  %6183 = vmatprep.subr.bf16.mxu1 %v10979_v28 }
 0x811   :  { %6121 = vmatpush1.bf16.msra.mxu0 %v10980_v44  ;;  %6185 = vmatpush1.bf16.msra.mxu1 %v10981_v19 }
 0x812   :  { %6123 = vmatprep.subr.bf16.mxu0 %v10982_v40  ;;  %6187 = vmatprep.subr.bf16.mxu1 %v10983_v4  ;;  %v10994_v4 = vld [vmem:[#allocation137_spill] sm:$0xff] }
 0x813   :  { %v11028_v40 = vld [vmem:[#allocation169_spill] sm:$0xff] }
 0x815   :  { %6125 = vmatpush1.bf16.msra.mxu0 %v10984_v21  ;;  %6189 = vmatpush1.bf16.msra.mxu1 %v10985_v23  ;;  %v10995_v21 = vld [vmem:[#allocation138_spill] sm:$0xff]  ;;  %v10996_v23 = vld [vmem:[#allocation139_spill] sm:$0xff] }
 0x816   :  { %6127 = vmatprep.subr.bf16.mxu0 %v10986_v54  ;;  %6191 = vmatprep.subr.bf16.mxu1 %v10987_v36  ;;  %v10997_v54 = vld [vmem:[#allocation140_spill] sm:$0xff]  ;;  %v10998_v36 = vld [vmem:[#allocation141_spill] sm:$0xff] }
 0x819   :  { %6129 = vmatpush1.bf16.msra.mxu0 %v10988_v61  ;;  %6193 = vmatpush1.bf16.msra.mxu1 %v10989_v27  ;;  %v10999_v61 = vld [vmem:[#allocation142_spill] sm:$0xff]  ;;  %v11000_v27 = vld [vmem:[#allocation143_spill] sm:$0xff] }
 0x81a   :  { %6131 = vmatprep.subr.bf16.mxu0 %v10990_v43  ;;  %6195 = vmatprep.subr.bf16.mxu1 %v10991_v32  ;;  %v11001_v43 = vld [vmem:[#allocation144_spill] sm:$0xff]  ;;  %v11002_v32 = vld [vmem:[#allocation145_spill] sm:$0xff] }
 0x81d   :  { %6133 = vmatpush1.bf16.msra.mxu0 %v10992_v59  ;;  %6197 = vmatpush1.bf16.msra.mxu1 %v10993_v50  ;;  %v11003_v59 = vld [vmem:[#allocation146_spill] sm:$0xff]  ;;  %v11004_v50 = vld [vmem:[#allocation147_spill] sm:$0xff] }
 0x81e   :  { %6135 = vmatprep.subr.bf16.mxu0 %v10994_v4  ;;  %6199 = vmatprep.subr.bf16.mxu1 %v10995_v21  ;;  %v11005_v4 = vld [vmem:[#allocation148_spill] sm:$0xff]  ;;  %v11006_v21 = vld [vmem:[#allocation149_spill] sm:$0xff] }
 0x821   :  { %6137 = vmatpush1.bf16.msra.mxu0 %v10996_v23  ;;  %6201 = vmatpush1.bf16.msra.mxu1 %v10997_v54  ;;  %v11007_v23 = vld [vmem:[#allocation150_spill] sm:$0xff]  ;;  %v11008_v54 = vld [vmem:[#allocation151_spill] sm:$0xff] }
 0x822   :  { %6139 = vmatprep.subr.bf16.mxu0 %v10998_v36  ;;  %6203 = vmatprep.subr.bf16.mxu1 %v10999_v61  ;;  %v11009_v36 = vld [vmem:[#allocation152_spill] sm:$0xff]  ;;  %v11010_v61 = vld [vmem:[#allocation153_spill] sm:$0xff] }
 0x825   :  { %6141 = vmatpush1.bf16.msra.mxu0 %v11000_v27  ;;  %6205 = vmatpush1.bf16.msra.mxu1 %v11001_v43  ;;  %v11011_v27 = vld [vmem:[#allocation154_spill] sm:$0xff]  ;;  %v11012_v43 = vld [vmem:[#allocation155_spill] sm:$0xff] }
 0x826   :  { %6143 = vmatprep.subr.bf16.mxu0 %v11002_v32  ;;  %6207 = vmatprep.subr.bf16.mxu1 %v11003_v59  ;;  %v11013_v32 = vld [vmem:[#allocation156_spill] sm:$0xff]  ;;  %v11014_v59 = vld [vmem:[#allocation157_spill] sm:$0xff] }
 0x829   :  { %6145 = vmatpush1.bf16.msra.mxu0 %v11004_v50  ;;  %6209 = vmatpush1.bf16.msra.mxu1 %v11005_v4  ;;  %v11015_v50 = vld [vmem:[#allocation158_spill] sm:$0xff]  ;;  %v11016_v4 = vld [vmem:[#allocation159_spill] sm:$0xff] }
 0x82a   :  { %6147 = vmatprep.subr.bf16.mxu0 %v11006_v21  ;;  %6211 = vmatprep.subr.bf16.mxu1 %v11007_v23  ;;  %v11017_v21 = vld [vmem:[#allocation160_spill] sm:$0xff]  ;;  %v11018_v23 = vld [vmem:[#allocation161_spill] sm:$0xff] }
 0x82d   :  { %6149 = vmatpush1.bf16.msra.mxu0 %v11008_v54  ;;  %6213 = vmatpush1.bf16.msra.mxu1 %v11009_v36  ;;  %v11019_v54 = vld [vmem:[#allocation162_spill] sm:$0xff]  ;;  %v11020_v36 = vld [vmem:[#allocation163_spill] sm:$0xff] }
 0x82e   :  { %6151 = vmatprep.subr.bf16.mxu0 %v11010_v61  ;;  %6215 = vmatprep.subr.bf16.mxu1 %v11011_v27  ;;  %v11021_v61 = vld [vmem:[#allocation164_spill] sm:$0xff]  ;;  %v11022_v27 = vld [vmem:[#allocation165_spill] sm:$0xff] }
 0x831   :  { %6153 = vmatpush1.bf16.msra.mxu0 %v11012_v43  ;;  %6217 = vmatpush1.bf16.msra.mxu1 %v11013_v32  ;;  %v11023_v43 = vld [vmem:[#allocation166_spill] sm:$0xff]  ;;  %v11024_v32 = vld [vmem:[#allocation167_spill] sm:$0xff] }
 0x832   :  { %6155 = vmatprep.subr.bf16.mxu0 %v11014_v59  ;;  %6219 = vmatprep.subr.bf16.mxu1 %v11015_v50  ;;  %v11025_v59 = vld [vmem:[#allocation168_spill] sm:$0xff]  ;;  %v11026_v50 = vld [vmem:[#allocation21_spill] sm:$0xff] }
 0x835   :  { %6157 = vmatpush1.bf16.msra.mxu0 %v11016_v4  ;;  %6221 = vmatpush1.bf16.msra.mxu1 %v11017_v21  ;;  %v11027_v4 = vld [vmem:[#allocation22_spill] sm:$0xff] }
 0x836   :  { %6159 = vmatprep.subr.bf16.mxu0 %v11018_v23  ;;  %6223 = vmatprep.subr.bf16.mxu1 %v11019_v54 }
 0x839   :  { %6161 = vmatpush1.bf16.msra.mxu0 %v11020_v36  ;;  %6225 = vmatpush1.bf16.msra.mxu1 %v11021_v61 }
 0x83a   :  { %6163 = vmatprep.subr.bf16.mxu0 %v11022_v27  ;;  %6227 = vmatprep.subr.bf16.mxu1 %v11023_v43 }
 0x83d   :  { %6165 = vmatpush1.bf16.msra.mxu0 %v11024_v32  ;;  %6229 = vmatpush1.bf16.msra.mxu1 %v11025_v59 }
 0x83e   :  { %6231 = vmatprep.subr.bf16.mxu0 %v11026_v50  ;;  %6263 = vmatprep.subr.bf16.mxu1 %v11027_v4 }
 0x8d2   :  { %v2263_v21 = vpop.f32.mrb[20].mxu0  ;;  %v2334_v23 = vpop.f32.mrb[20].mxu1 }
 0x8d3   :  { %v2264_v54 = vadd.f32 %v2263_v21, %v11028_v40  ;;  %v2265_v19 = vpop.f32.mrb[21].mxu0  ;;  %v2336_v36 = vpop.f32.mrb[21].mxu1  ;;  %v2335_v59 = vadd.f32 %v2334_v23, %v8810_v13 }
 0x8d4   :  { %v2266_v61 = vadd.f32 %v2265_v19, %v10777_v16  ;;  %v2337_v32 = vadd.f32 %v2336_v36, %v10778_v29 }
 0x8d5   :  { %v4802_v44 = vmul.f32 -1.442695, %v2264_v54 }
 0x8d6   :  { %v4803_v27 = vmul.f32 -1.442695, %v2266_v61  ;;  %v4804_v43 = vmul.f32 -1.442695, %v2337_v32 }
 0x8d7   :  { %7732 = vpow2.f32 %v4802_v44 }
 0x8d8   :  { %7734 = vpow2.f32 %v4803_v27 }
 0x8d9   :  { %7736 = vpow2.f32 %v4804_v43 }
 0x8da   :  { %7738 = vtanh.f32 %v2335_v59  ;;  %v11034_v59 = vld [vmem:[#allocation38_spill] sm:$0xff] }
 0x8e1   :  { %v7733_v50 = vpop.eup %7732 }
 0x8e2   :  { %v7735_v28 = vpop.eup %7734  ;;  %v2342_v4 = vadd.f32 1.0, %v7733_v50  ;;  %v11035_v50 = vld [vmem:[#allocation43_spill] sm:$0xff] }
 0x8e3   :  { %v2348_v22 = vadd.f32 1.0, %v7735_v28  ;;  %v7737_v21 = vpop.eup %7736  ;;  %v11031_v28 = vld [vmem:[#allocation39_spill] sm:$0xff] }
 0x8e4   :  { %7740 = vrcp.f32 %v2342_v4  ;;  %v7739_v40 = vpop.eup %7738  ;;  %v2355_v44 = vadd.f32 1.0, %v7737_v21  ;;  %v11033_v4 = vld [vmem:[#allocation41_spill] sm:$0xff]  ;;  %v11036_v21 = vld [vmem:[#allocation40_spill] sm:$0xff] }
 0x8e5   :  { %7742 = vrcp.f32 %v2348_v22  ;;  %v11030_v22 = vld [vmem:[#allocation33_spill] sm:$0xff] }
 0x8e6   :  { %7744 = vrcp.f32 %v2355_v44  ;;  %v11040_v44 = vld [vmem:[#allocation44_spill] sm:$0xff] }
 0x8ee   :  { %v7741_v19 = vpop.eup %7740 }
 0x8ef   :  { %v7743_v54 = vpop.eup %7742  ;;  %v2359_v61 = vmul.f32 %v7741_v19, %v7739_v40  ;;  %v11032_v40 = vld [vmem:[#allocation36_spill] sm:$0xff]  ;;  %v11037_v19 = vld [vmem:[#allocation45_spill] sm:$0xff] }
 0x8f0   :  { %v2358_v27 = vmul.f32 %v7743_v54, %v9207_v0  ;;  %v7745_v23 = vpop.eup %7744  ;;  %v11029_v0 = vld [vmem:[#allocation37_spill] sm:$0xff]  ;;  %v11038_v54 = vld [vmem:[#allocation42_spill] sm:$0xff] }
 0x8f2   :  { %v9395_v36 = vadd.f32 %v2359_v61, %v2358_v27  ;;  %v11039_v61 = vld [vmem:[#allocation47_spill] sm:$0xff]  ;;  %v11041_v27 = vld [vmem:[#allocation49_spill] sm:$0xff] }
 0x8f4   :  { %7746 = vtanh.f32 %v9395_v36 }
 0x8fe   :  { %v7747_v32 = vpop.eup %7746 }
 0x8ff   :  { %v2362_v43 = vmul.f32 %v7747_v32, %v7745_v23  ;;  %v11042_v23 = vld [vmem:[#allocation46_spill] sm:$0xff]  ;;  %v11043_v32 = vld [vmem:[#allocation51_spill] sm:$0xff] }
 0x901   :  { %2428 = vmatmul.mubr.f32.vlgmr.msra.gmra.mrb[22].mxu0 %v2362_v43  ;;  %2499 = vmatmul.mubr.f32.vlgmr.msra.gmra.mrb[22].mxu1 %v2362_v43 }
 0x902   :  { %6233 = vmatpush1.bf16.msra.mxu0 %v8291_v8  ;;  %6265 = vmatpush1.bf16.msra.mxu1 %v8304_v25 }
 0x903   :  { %6235 = vmatprep.subr.bf16.mxu0 %v8293_v9  ;;  %6267 = vmatprep.subr.bf16.mxu1 %v8314_v33 }
 0x904   :  { %2598 = vmatprep.mubr.f32.mxu0 %v10593_v11  ;;  %2669 = vmatprep.mubr.f32.mxu1 %v10593_v11 }
 0x906   :  { %6237 = vmatpush1.bf16.msra.mxu0 %v8297_v14  ;;  %6269 = vmatpush1.bf16.msra.mxu1 %v8316_v37 }
 0x907   :  { %6239 = vmatprep.subr.bf16.mxu0 %v8300_v17  ;;  %6271 = vmatprep.subr.bf16.mxu1 %v8322_v45 }
 0x90a   :  { %6241 = vmatpush1.bf16.msra.mxu0 %v8307_v26  ;;  %6273 = vmatpush1.bf16.msra.mxu1 %v8328_v48 }
 0x90b   :  { %6243 = vmatprep.subr.bf16.mxu0 %v8311_v30  ;;  %6275 = vmatprep.subr.bf16.mxu1 %v8331_v52 }
 0x90e   :  { %6245 = vmatpush1.bf16.msra.mxu0 %v8320_v42  ;;  %6277 = vmatpush1.bf16.msra.mxu1 %v8340_v62 }
 0x90f   :  { %6247 = vmatprep.subr.bf16.mxu0 %v8325_v46  ;;  %6279 = vmatprep.subr.bf16.mxu1 %v8343_v1 }
 0x912   :  { %6249 = vmatpush1.bf16.msra.mxu0 %v8334_v55  ;;  %6281 = vmatpush1.bf16.msra.mxu1 %v8352_v15 }
 0x913   :  { %6251 = vmatprep.subr.bf16.mxu0 %v8337_v58  ;;  %6283 = vmatprep.subr.bf16.mxu1 %v8355_v18 }
 0x916   :  { %6253 = vmatpush1.bf16.msra.mxu0 %v8346_v7  ;;  %6285 = vmatpush1.bf16.msra.mxu1 %v8364_v31 }
 0x917   :  { %6255 = vmatprep.subr.bf16.mxu0 %v8349_v10  ;;  %6287 = vmatprep.subr.bf16.mxu1 %v8367_v34 }
 0x91a   :  { %6257 = vmatpush1.bf16.msra.mxu0 %v8358_v24  ;;  %6289 = vmatpush1.bf16.msra.mxu1 %v11029_v0 }
 0x91b   :  { %6259 = vmatprep.subr.bf16.mxu0 %v11030_v22  ;;  %6291 = vmatprep.subr.bf16.mxu1 %v11031_v28 }
 0x91e   :  { %6261 = vmatpush1.bf16.msra.mxu0 %v11032_v40  ;;  %6293 = vmatpush1.bf16.msra.mxu1 %v11033_v4  ;;  %v11101_v40 = vld [vmem:[#allocation173_spill] sm:$0xff] }
 0x91f   :  { %6295 = vmatprep.subr.bf16.mxu0 %v11034_v59  ;;  %6359 = vmatprep.subr.bf16.mxu1 %v11035_v50  ;;  %v11044_v50 = vld [vmem:[#allocation48_spill] sm:$0xff] }
 0x920   :  { %v11100_v59 = vld [vmem:[#allocation172_spill] sm:$0xff] }
 0x921   :  { %2599 = vmatmul.mubr.f32.vlgmr.msra.gmra.mrb[24].mxu0 %v9322_v41  ;;  %2670 = vmatmul.mubr.f32.vlgmr.msra.gmra.mrb[24].mxu1 %v9322_v41  ;;  %v11045_v41 = vld [vmem:[#allocation53_spill] sm:$0xff] }
 0x922   :  { %2768 = vmatprep.mubr.f32.mxu0 %v2362_v43  ;;  %2839 = vmatprep.mubr.f32.mxu1 %v2362_v43  ;;  %v11046_v43 = vld [vmem:[#allocation50_spill] sm:$0xff] }
 0x923   :  { %6297 = vmatpush1.bf16.msra.mxu0 %v11036_v21  ;;  %6361 = vmatpush1.bf16.msra.mxu1 %v11037_v19  ;;  %v11047_v21 = vld [vmem:[#allocation55_spill] sm:$0xff]  ;;  %v11048_v19 = vld [vmem:[#allocation52_spill] sm:$0xff] }
 0x924   :  { %6299 = vmatprep.subr.bf16.mxu0 %v11038_v54  ;;  %6363 = vmatprep.subr.bf16.mxu1 %v11039_v61  ;;  %v11049_v54 = vld [vmem:[#allocation56_spill] sm:$0xff]  ;;  %v11050_v61 = vld [vmem:[#allocation54_spill] sm:$0xff] }
 0x927   :  { %6301 = vmatpush1.bf16.msra.mxu0 %v11040_v44  ;;  %6365 = vmatpush1.bf16.msra.mxu1 %v11041_v27  ;;  %v11051_v44 = vld [vmem:[#allocation57_spill] sm:$0xff]  ;;  %v11052_v27 = vld [vmem:[#allocation58_spill] sm:$0xff] }
 0x928   :  { %6303 = vmatprep.subr.bf16.mxu0 %v11042_v23  ;;  %6367 = vmatprep.subr.bf16.mxu1 %v11043_v32  ;;  %v11053_v23 = vld [vmem:[#allocation59_spill] sm:$0xff]  ;;  %v11054_v32 = vld [vmem:[#allocation60_spill] sm:$0xff] }
 0x92b   :  { %6305 = vmatpush1.bf16.msra.mxu0 %v11044_v50  ;;  %6369 = vmatpush1.bf16.msra.mxu1 %v11045_v41  ;;  %v11055_v50 = vld [vmem:[#allocation61_spill] sm:$0xff]  ;;  %v11056_v41 = vld [vmem:[#allocation62_spill] sm:$0xff] }
 0x92c   :  { %6307 = vmatprep.subr.bf16.mxu0 %v11046_v43  ;;  %6371 = vmatprep.subr.bf16.mxu1 %v11047_v21  ;;  %v11057_v43 = vld [vmem:[#allocation63_spill] sm:$0xff]  ;;  %v11058_v21 = vld [vmem:[#allocation64_spill] sm:$0xff] }
 0x92f   :  { %6309 = vmatpush1.bf16.msra.mxu0 %v11048_v19  ;;  %6373 = vmatpush1.bf16.msra.mxu1 %v11049_v54  ;;  %v11059_v19 = vld [vmem:[#allocation65_spill] sm:$0xff]  ;;  %v11060_v54 = vld [vmem:[#allocation66_spill] sm:$0xff] }
 0x930   :  { %6311 = vmatprep.subr.bf16.mxu0 %v11050_v61  ;;  %6375 = vmatprep.subr.bf16.mxu1 %v11051_v44  ;;  %v11061_v61 = vld [vmem:[#allocation67_spill] sm:$0xff]  ;;  %v11062_v44 = vld [vmem:[#allocation68_spill] sm:$0xff] }
 0x933   :  { %6313 = vmatpush1.bf16.msra.mxu0 %v11052_v27  ;;  %6377 = vmatpush1.bf16.msra.mxu1 %v11053_v23  ;;  %v11063_v27 = vld [vmem:[#allocation69_spill] sm:$0xff]  ;;  %v11064_v23 = vld [vmem:[#allocation70_spill] sm:$0xff] }
 0x934   :  { %6315 = vmatprep.subr.bf16.mxu0 %v11054_v32  ;;  %6379 = vmatprep.subr.bf16.mxu1 %v11055_v50  ;;  %v11065_v32 = vld [vmem:[#allocation71_spill] sm:$0xff]  ;;  %v11066_v50 = vld [vmem:[#allocation72_spill] sm:$0xff] }
 0x937   :  { %6317 = vmatpush1.bf16.msra.mxu0 %v11056_v41  ;;  %6381 = vmatpush1.bf16.msra.mxu1 %v11057_v43  ;;  %v11067_v41 = vld [vmem:[#allocation73_spill] sm:$0xff]  ;;  %v11068_v43 = vld [vmem:[#allocation74_spill] sm:$0xff] }
 0x938   :  { %6319 = vmatprep.subr.bf16.mxu0 %v11058_v21  ;;  %6383 = vmatprep.subr.bf16.mxu1 %v11059_v19  ;;  %v11069_v21 = vld [vmem:[#allocation75_spill] sm:$0xff]  ;;  %v11070_v19 = vld [vmem:[#allocation76_spill] sm:$0xff] }
 0x93b   :  { %6321 = vmatpush1.bf16.msra.mxu0 %v11060_v54  ;;  %6385 = vmatpush1.bf16.msra.mxu1 %v11061_v61  ;;  %v11071_v54 = vld [vmem:[#allocation77_spill] sm:$0xff]  ;;  %v11072_v61 = vld [vmem:[#allocation78_spill] sm:$0xff] }
 0x93c   :  { %6323 = vmatprep.subr.bf16.mxu0 %v11062_v44  ;;  %6387 = vmatprep.subr.bf16.mxu1 %v11063_v27  ;;  %v11073_v44 = vld [vmem:[#allocation79_spill] sm:$0xff]  ;;  %v11074_v27 = vld [vmem:[#allocation80_spill] sm:$0xff] }
 0x93f   :  { %6325 = vmatpush1.bf16.msra.mxu0 %v11064_v23  ;;  %6389 = vmatpush1.bf16.msra.mxu1 %v11065_v32  ;;  %v11075_v23 = vld [vmem:[#allocation81_spill] sm:$0xff]  ;;  %v11076_v32 = vld [vmem:[#allocation82_spill] sm:$0xff] }
 0x940   :  { %6327 = vmatprep.subr.bf16.mxu0 %v11066_v50  ;;  %6391 = vmatprep.subr.bf16.mxu1 %v11067_v41  ;;  %v11077_v50 = vld [vmem:[#allocation83_spill] sm:$0xff]  ;;  %v11078_v41 = vld [vmem:[#allocation84_spill] sm:$0xff] }
 0x943   :  { %6329 = vmatpush1.bf16.msra.mxu0 %v11068_v43  ;;  %6393 = vmatpush1.bf16.msra.mxu1 %v11069_v21  ;;  %v11079_v43 = vld [vmem:[#allocation85_spill] sm:$0xff]  ;;  %v11080_v21 = vld [vmem:[#allocation86_spill] sm:$0xff] }
 0x944   :  { %6331 = vmatprep.subr.bf16.mxu0 %v11070_v19  ;;  %6395 = vmatprep.subr.bf16.mxu1 %v11071_v54  ;;  %v11081_v19 = vld [vmem:[#allocation87_spill] sm:$0xff]  ;;  %v11082_v54 = vld [vmem:[#allocation88_spill] sm:$0xff] }
 0x947   :  { %6333 = vmatpush1.bf16.msra.mxu0 %v11072_v61  ;;  %6397 = vmatpush1.bf16.msra.mxu1 %v11073_v44  ;;  %v11083_v61 = vld [vmem:[#allocation89_spill] sm:$0xff]  ;;  %v11084_v44 = vld [vmem:[#allocation90_spill] sm:$0xff] }
 0x948   :  { %6335 = vmatprep.subr.bf16.mxu0 %v11074_v27  ;;  %6399 = vmatprep.subr.bf16.mxu1 %v11075_v23  ;;  %v11085_v27 = vld [vmem:[#allocation91_spill] sm:$0xff]  ;;  %v11086_v23 = vld [vmem:[#allocation92_spill] sm:$0xff] }
 0x94b   :  { %6337 = vmatpush1.bf16.msra.mxu0 %v11076_v32  ;;  %6401 = vmatpush1.bf16.msra.mxu1 %v11077_v50  ;;  %v11087_v32 = vld [vmem:[#allocation93_spill] sm:$0xff]  ;;  %v11088_v50 = vld [vmem:[#allocation94_spill] sm:$0xff] }
 0x94c   :  { %6339 = vmatprep.subr.bf16.mxu0 %v11078_v41  ;;  %6403 = vmatprep.subr.bf16.mxu1 %v11079_v43  ;;  %v11089_v41 = vld [vmem:[#allocation95_spill] sm:$0xff]  ;;  %v11090_v43 = vld [vmem:[#allocation96_spill] sm:$0xff] }
 0x94f   :  { %6341 = vmatpush1.bf16.msra.mxu0 %v11080_v21  ;;  %6405 = vmatpush1.bf16.msra.mxu1 %v11081_v19  ;;  %v11091_v21 = vld [vmem:[#allocation97_spill] sm:$0xff]  ;;  %v11092_v19 = vld [vmem:[#allocation98_spill] sm:$0xff] }
 0x950   :  { %6343 = vmatprep.subr.bf16.mxu0 %v11082_v54  ;;  %6407 = vmatprep.subr.bf16.mxu1 %v11083_v61  ;;  %v11093_v54 = vld [vmem:[#allocation99_spill] sm:$0xff]  ;;  %v11094_v61 = vld [vmem:[#allocation100_spill] sm:$0xff] }
 0x953   :  { %6345 = vmatpush1.bf16.msra.mxu0 %v11084_v44  ;;  %6409 = vmatpush1.bf16.msra.mxu1 %v11085_v27  ;;  %v11095_v44 = vld [vmem:[#allocation101_spill] sm:$0xff]  ;;  %v11096_v27 = vld [vmem:[#allocation102_spill] sm:$0xff] }
 0x954   :  { %6347 = vmatprep.subr.bf16.mxu0 %v11086_v23  ;;  %6411 = vmatprep.subr.bf16.mxu1 %v11087_v32  ;;  %v11097_v23 = vld [vmem:[#allocation103_spill] sm:$0xff]  ;;  %v11098_v32 = vld [vmem:[#allocation104_spill] sm:$0xff] }
 0x957   :  { %6349 = vmatpush1.bf16.msra.mxu0 %v11088_v50  ;;  %6413 = vmatpush1.bf16.msra.mxu1 %v11089_v41  ;;  %v11099_v50 = vld [vmem:[#allocation105_spill] sm:$0xff] }
 0x958   :  { %6351 = vmatprep.subr.bf16.mxu0 %v11090_v43  ;;  %6415 = vmatprep.subr.bf16.mxu1 %v11091_v21 }
 0x95b   :  { %6353 = vmatpush1.bf16.msra.mxu0 %v11092_v19  ;;  %6417 = vmatpush1.bf16.msra.mxu1 %v11093_v54 }
 0x95c   :  { %6355 = vmatprep.subr.bf16.mxu0 %v11094_v61  ;;  %6419 = vmatprep.subr.bf16.mxu1 %v11095_v44  ;;  %v11102_v44 = vld [vmem:[#allocation174_spill] sm:$0xff] }
 0x95f   :  { %6357 = vmatpush1.bf16.msra.mxu0 %v11096_v27  ;;  %6421 = vmatpush1.bf16.msra.mxu1 %v11097_v23 }
 0x960   :  { %6423 = vmatprep.subr.bf16.mxu0 %v11098_v32  ;;  %6487 = vmatprep.subr.bf16.mxu1 %v11099_v50 }
 0x9d4   :  { %v2429_v41 = vpop.f32.mrb[22].mxu0  ;;  %v2500_v43 = vpop.f32.mrb[22].mxu1 }
 0x9d5   :  { %v2430_v21 = vadd.f32 %v2429_v41, %v11100_v59  ;;  %v2431_v4 = vpop.f32.mrb[23].mxu0  ;;  %v2502_v19 = vpop.f32.mrb[23].mxu1  ;;  %v2501_v27 = vadd.f32 %v2500_v43, %v11102_v44 }
 0x9d6   :  { %v2432_v54 = vadd.f32 %v2431_v4, %v11101_v40  ;;  %v2530_v4 = vld [vmem:[#allocation4 + $0x80] sm:$0xff] }
 0x9d7   :  { %v4805_v28 = vmul.f32 -1.442695, %v2430_v21  ;;  %v2531_v21 = vld [vmem:[#allocation4 + $0x88] sm:$0xff] }
 0x9d8   :  { %v4806_v61 = vmul.f32 -1.442695, %v2432_v54 }
 0x9d9   :  { %7748 = vpow2.f32 %v4805_v28 }
 0x9da   :  { %7750 = vpow2.f32 %v4806_v61 }
 0x9db   :  { %7752 = vtanh.f32 %v2501_v27 }
 0x9e3   :  { %v7749_v22 = vpop.eup %7748 }
 0x9e4   :  { %v7751_v23 = vpop.eup %7750  ;;  %v2508_v0 = vadd.f32 1.0, %v7749_v22 }
 0x9e5   :  { %v2514_v32 = vadd.f32 1.0, %v7751_v23  ;;  %v7753_v50 = vpop.eup %7752 }
 0x9e6   :  { %7754 = vrcp.f32 %v2508_v0  ;;  %v2533_v0 = vld [vmem:[#allocation4 + $0x98] sm:$0xff] }
 0x9e7   :  { %7756 = vrcp.f32 %v2514_v32  ;;  %v2503_v32 = vadd.f32 %v2502_v19, %v8938_v63 }
 0x9f0   :  { %v7755_v24 = vpop.eup %7754 }
 0x9f1   :  { %v7757_v41 = vpop.eup %7756  ;;  %v2525_v59 = vmul.f32 %v7755_v24, %v7753_v50  ;;  %v2532_v50 = vld [vmem:[#allocation4 + $0x90] sm:$0xff] }
 0x9f2   :  { %v2524_v34 = vmul.f32 %v7757_v41, %v9314_v47  ;;  %v4807_v47 = vmul.f32 -1.442695, %v2503_v32 }
 0x9f4   :  { %v2600_v54 = vpop.f32.mrb[24].mxu0  ;;  %v2671_v28 = vpop.f32.mrb[24].mxu1  ;;  %v9502_v61 = vadd.f32 %v2525_v59, %v2524_v34 }
 0x9f5   :  { %v2676_v43 = vadd.f32 %v2600_v54, %v2530_v4  ;;  %v2602_v44 = vpop.f32.mrb[25].mxu0  ;;  %v2673_v40 = vpop.f32.mrb[25].mxu1  ;;  %v2678_v10 = vadd.f32 %v2671_v28, %v2532_v50 }
 0x9f6   :  { %v2677_v22 = vadd.f32 %v2602_v44, %v2531_v21  ;;  %v2679_v24 = vadd.f32 %v2673_v40, %v2533_v0 }
 0x9f7   :  { %v4808_v27 = vmul.f32 -1.442695, %v2676_v43 }
 0x9f8   :  { %v4809_v23 = vmul.f32 -1.442695, %v2677_v22  ;;  %v4810_v41 = vmul.f32 -1.442695, %v2679_v24 }
 0x9f9   :  { %7758 = vpow2.f32 %v4808_v27 }
 0x9fa   :  { %7760 = vpow2.f32 %v4809_v23 }
 0x9fb   :  { %7762 = vpow2.f32 %v4807_v47  ;;  %v11104_v47 = vld [vmem:[#allocation122_spill] sm:$0xff] }
 0x9fc   :  { %7764 = vpow2.f32 %v4810_v41  ;;  %v11105_v41 = vld [vmem:[#allocation123_spill] sm:$0xff] }
 0x9fd   :  { %7766 = vtanh.f32 %v2678_v10 }
 0xa03   :  { %v7759_v31 = vpop.eup %7758 }
 0xa04   :  { %v7761_v34 = vpop.eup %7760  ;;  %v2683_v59 = vadd.f32 1.0, %v7759_v31 }
 0xa05   :  { %v2689_v4 = vadd.f32 1.0, %v7761_v34  ;;  %v7763_v44 = vpop.eup %7762  ;;  %v11106_v34 = vld [vmem:[#allocation124_spill] sm:$0xff] }
 0xa06   :  { %7768 = vrcp.f32 %v2683_v59  ;;  %v7765_v21 = vpop.eup %7764  ;;  %v2521_v23 = vadd.f32 1.0, %v7763_v44  ;;  %v11107_v59 = vld [vmem:[#allocation125_spill] sm:$0xff]  ;;  %v11109_v44 = vld [vmem:[#allocation127_spill] sm:$0xff] }
 0xa07   :  { %7770 = vrcp.f32 %v2689_v4  ;;  %v7767_v54 = vpop.eup %7766  ;;  %v2696_v40 = vadd.f32 1.0, %v7765_v21  ;;  %v11108_v4 = vld [vmem:[#allocation126_spill] sm:$0xff]  ;;  %v11110_v21 = vld [vmem:[#allocation128_spill] sm:$0xff] }
 0xa08   :  { %7772 = vtanh.f32 %v9502_v61 }
 0xa09   :  { %7774 = vrcp.f32 %v2696_v40  ;;  %v11115_v40 = vld [vmem:[#allocation133_spill] sm:$0xff] }
 0xa10   :  { %v7769_v43 = vpop.eup %7768 }
 0xa11   :  { %v7771_v22 = vpop.eup %7770  ;;  %v2700_v19 = vmul.f32 %v7769_v43, %v7767_v54  ;;  %v11111_v54 = vld [vmem:[#allocation129_spill] sm:$0xff]  ;;  %v11112_v43 = vld [vmem:[#allocation130_spill] sm:$0xff] }
 0xa12   :  { %v2699_v27 = vmul.f32 %v7771_v22, %v9318_v3  ;;  %v7773_v10 = vpop.eup %7772  ;;  %v11103_v3 = vld [vmem:[#allocation121_spill] sm:$0xff]  ;;  %v11113_v22 = vld [vmem:[#allocation131_spill] sm:$0xff] }
 0xa13   :  { %v7775_v31 = vpop.eup %7774 }
 0xa14   :  { %v9506_v28 = vadd.f32 %v2700_v19, %v2699_v27  ;;  %v11114_v19 = vld [vmem:[#allocation132_spill] sm:$0xff]  ;;  %v11116_v27 = vld [vmem:[#allocation134_spill] sm:$0xff] }
 0xa16   :  { %7776 = vtanh.f32 %v9506_v28 }
 0xa17   :  { %7778 = vrcp.f32 %v2521_v23  ;;  %v11117_v23 = vld [vmem:[#allocation135_spill] sm:$0xff] }
 0xa20   :  { %v7777_v0 = vpop.eup %7776 }
 0xa21   :  { %v7779_v32 = vpop.eup %7778  ;;  %v9510_v24 = vmul.f32 %v7777_v0, %v7775_v31  ;;  %v11119_v31 = vld [vmem:[#allocation137_spill] sm:$0xff]  ;;  %v11120_v0 = vld [vmem:[#allocation138_spill] sm:$0xff] }
 0xa22   :  { %v2528_v50 = vmul.f32 %v7779_v32, %v7773_v10  ;;  %v11118_v10 = vld [vmem:[#allocation136_spill] sm:$0xff]  ;;  %v11121_v32 = vld [vmem:[#allocation139_spill] sm:$0xff] }
 0xa23   :  { %2769 = vmatmul.mubr.f32.vlgmr.msra.gmra.mrb[26].mxu0 %v9510_v24  ;;  %2840 = vmatmul.mubr.f32.vlgmr.msra.gmra.mrb[26].mxu1 %v9510_v24 }
 0xa24   :  { %2934 = vmatprep.mubr.f32.mxu0 %v2528_v50  ;;  %3005 = vmatprep.mubr.f32.mxu1 %v2528_v50  ;;  %v11122_v50 = vld [vmem:[#allocation140_spill] sm:$0xff] }
 0xa25   :  { %6425 = vmatpush1.bf16.msra.mxu0 %v10717_v57  ;;  %6489 = vmatpush1.bf16.msra.mxu1 %v10718_v39 }
 0xa26   :  { %6427 = vmatprep.subr.bf16.mxu0 %v10719_v56  ;;  %6491 = vmatprep.subr.bf16.mxu1 %v10720_v53 }
 0xa29   :  { %6429 = vmatpush1.bf16.msra.mxu0 %v10721_v2  ;;  %6493 = vmatpush1.bf16.msra.mxu1 %v10722_v35 }
 0xa2a   :  { %6431 = vmatprep.subr.bf16.mxu0 %v10845_v20  ;;  %6495 = vmatprep.subr.bf16.mxu1 %v10846_v12 }
 0xa2d   :  { %6433 = vmatpush1.bf16.msra.mxu0 %v10847_v5  ;;  %6497 = vmatpush1.bf16.msra.mxu1 %v10848_v6 }
 0xa2e   :  { %6435 = vmatprep.subr.bf16.mxu0 %v10974_v49  ;;  %6499 = vmatprep.subr.bf16.mxu1 %v10975_v38 }
 0xa31   :  { %6437 = vmatpush1.bf16.msra.mxu0 %v10976_v60  ;;  %6501 = vmatpush1.bf16.msra.mxu1 %v10977_v51 }
 0xa32   :  { %6439 = vmatprep.subr.bf16.mxu0 %v11103_v3  ;;  %6503 = vmatprep.subr.bf16.mxu1 %v11104_v47 }
 0xa35   :  { %6441 = vmatpush1.bf16.msra.mxu0 %v11105_v41  ;;  %6505 = vmatpush1.bf16.msra.mxu1 %v11106_v34 }
 0xa36   :  { %6443 = vmatprep.subr.bf16.mxu0 %v11107_v59  ;;  %6507 = vmatprep.subr.bf16.mxu1 %v11108_v4 }
 0xa39   :  { %6445 = vmatpush1.bf16.msra.mxu0 %v11109_v44  ;;  %6509 = vmatpush1.bf16.msra.mxu1 %v11110_v21 }
 0xa3a   :  { %6447 = vmatprep.subr.bf16.mxu0 %v11111_v54  ;;  %6511 = vmatprep.subr.bf16.mxu1 %v11112_v43  ;;  %v11123_v43 = vld [vmem:[#allocation141_spill] sm:$0xff] }
 0xa3b   :  { %v11153_v54 = vld [vmem:[#allocation169_spill] sm:$0xff] }
 0xa3d   :  { %6449 = vmatpush1.bf16.msra.mxu0 %v11113_v22  ;;  %6513 = vmatpush1.bf16.msra.mxu1 %v11114_v19  ;;  %v11124_v22 = vld [vmem:[#allocation142_spill] sm:$0xff]  ;;  %v11125_v19 = vld [vmem:[#allocation143_spill] sm:$0xff] }
 0xa3e   :  { %6451 = vmatprep.subr.bf16.mxu0 %v11115_v40  ;;  %6515 = vmatprep.subr.bf16.mxu1 %v11116_v27  ;;  %v11126_v40 = vld [vmem:[#allocation144_spill] sm:$0xff]  ;;  %v11127_v27 = vld [vmem:[#allocation145_spill] sm:$0xff] }
 0xa41   :  { %6453 = vmatpush1.bf16.msra.mxu0 %v11117_v23  ;;  %6517 = vmatpush1.bf16.msra.mxu1 %v11118_v10  ;;  %v11128_v23 = vld [vmem:[#allocation146_spill] sm:$0xff]  ;;  %v11129_v10 = vld [vmem:[#allocation147_spill] sm:$0xff] }
 0xa42   :  { %6455 = vmatprep.subr.bf16.mxu0 %v11119_v31  ;;  %6519 = vmatprep.subr.bf16.mxu1 %v11120_v0  ;;  %v11130_v31 = vld [vmem:[#allocation148_spill] sm:$0xff]  ;;  %v11131_v0 = vld [vmem:[#allocation149_spill] sm:$0xff] }
 0xa45   :  { %6457 = vmatpush1.bf16.msra.mxu0 %v11121_v32  ;;  %6521 = vmatpush1.bf16.msra.mxu1 %v11122_v50  ;;  %v11132_v32 = vld [vmem:[#allocation150_spill] sm:$0xff]  ;;  %v11133_v50 = vld [vmem:[#allocation151_spill] sm:$0xff] }
 0xa46   :  { %6459 = vmatprep.subr.bf16.mxu0 %v11123_v43  ;;  %6523 = vmatprep.subr.bf16.mxu1 %v11124_v22  ;;  %v11134_v43 = vld [vmem:[#allocation152_spill] sm:$0xff]  ;;  %v11135_v22 = vld [vmem:[#allocation153_spill] sm:$0xff] }
 0xa49   :  { %6461 = vmatpush1.bf16.msra.mxu0 %v11125_v19  ;;  %6525 = vmatpush1.bf16.msra.mxu1 %v11126_v40  ;;  %v11136_v19 = vld [vmem:[#allocation154_spill] sm:$0xff]  ;;  %v11137_v40 = vld [vmem:[#allocation155_spill] sm:$0xff] }
 0xa4a   :  { %6463 = vmatprep.subr.bf16.mxu0 %v11127_v27  ;;  %6527 = vmatprep.subr.bf16.mxu1 %v11128_v23  ;;  %v11138_v27 = vld [vmem:[#allocation156_spill] sm:$0xff]  ;;  %v11139_v23 = vld [vmem:[#allocation157_spill] sm:$0xff] }
 0xa4d   :  { %6465 = vmatpush1.bf16.msra.mxu0 %v11129_v10  ;;  %6529 = vmatpush1.bf16.msra.mxu1 %v11130_v31  ;;  %v11140_v10 = vld [vmem:[#allocation158_spill] sm:$0xff]  ;;  %v11141_v31 = vld [vmem:[#allocation159_spill] sm:$0xff] }
 0xa4e   :  { %6467 = vmatprep.subr.bf16.mxu0 %v11131_v0  ;;  %6531 = vmatprep.subr.bf16.mxu1 %v11132_v32  ;;  %v11142_v0 = vld [vmem:[#allocation160_spill] sm:$0xff]  ;;  %v11143_v32 = vld [vmem:[#allocation161_spill] sm:$0xff] }
 0xa51   :  { %6469 = vmatpush1.bf16.msra.mxu0 %v11133_v50  ;;  %6533 = vmatpush1.bf16.msra.mxu1 %v11134_v43  ;;  %v11144_v50 = vld [vmem:[#allocation162_spill] sm:$0xff]  ;;  %v11145_v43 = vld [vmem:[#allocation163_spill] sm:$0xff] }
 0xa52   :  { %6471 = vmatprep.subr.bf16.mxu0 %v11135_v22  ;;  %6535 = vmatprep.subr.bf16.mxu1 %v11136_v19  ;;  %v11146_v22 = vld [vmem:[#allocation164_spill] sm:$0xff]  ;;  %v11147_v19 = vld [vmem:[#allocation165_spill] sm:$0xff] }
 0xa55   :  { %6473 = vmatpush1.bf16.msra.mxu0 %v11137_v40  ;;  %6537 = vmatpush1.bf16.msra.mxu1 %v11138_v27  ;;  %v11148_v40 = vld [vmem:[#allocation166_spill] sm:$0xff]  ;;  %v11149_v27 = vld [vmem:[#allocation167_spill] sm:$0xff] }
 0xa56   :  { %6475 = vmatprep.subr.bf16.mxu0 %v11139_v23  ;;  %6539 = vmatprep.subr.bf16.mxu1 %v11140_v10  ;;  %v11150_v23 = vld [vmem:[#allocation168_spill] sm:$0xff]  ;;  %v11151_v10 = vld [vmem:[#allocation21_spill] sm:$0xff] }
 0xa59   :  { %6477 = vmatpush1.bf16.msra.mxu0 %v11141_v31  ;;  %6541 = vmatpush1.bf16.msra.mxu1 %v11142_v0  ;;  %v11152_v31 = vld [vmem:[#allocation22_spill] sm:$0xff] }
 0xa5a   :  { %6479 = vmatprep.subr.bf16.mxu0 %v11143_v32  ;;  %6543 = vmatprep.subr.bf16.mxu1 %v11144_v50 }
 0xa5d   :  { %6481 = vmatpush1.bf16.msra.mxu0 %v11145_v43  ;;  %6545 = vmatpush1.bf16.msra.mxu1 %v11146_v22 }
 0xa5e   :  { %6483 = vmatprep.subr.bf16.mxu0 %v11147_v19  ;;  %6547 = vmatprep.subr.bf16.mxu1 %v11148_v40 }
 0xa61   :  { %6485 = vmatpush1.bf16.msra.mxu0 %v11149_v27  ;;  %6549 = vmatpush1.bf16.msra.mxu1 %v11150_v23 }
 0xa62   :  { %6551 = vmatprep.subr.bf16.mxu0 %v11151_v10  ;;  %6583 = vmatprep.subr.bf16.mxu1 %v11152_v31 }
 0xaf6   :  { %v2770_v0 = vpop.f32.mrb[26].mxu0  ;;  %v2841_v32 = vpop.f32.mrb[26].mxu1 }
 0xaf7   :  { %v2771_v50 = vadd.f32 %v2770_v0, %v11153_v54  ;;  %v2772_v21 = vpop.f32.mrb[27].mxu0  ;;  %v2843_v43 = vpop.f32.mrb[27].mxu1  ;;  %v2842_v23 = vadd.f32 %v2841_v32, %v8810_v13  ;;  %v11160_v32 = vld [vmem:[#allocation39_spill] sm:$0xff] }
 0xaf8   :  { %v2773_v22 = vadd.f32 %v2772_v21, %v10777_v16  ;;  %v2844_v27 = vadd.f32 %v2843_v43, %v10778_v29 }
 0xaf9   :  { %v4811_v44 = vmul.f32 -1.442695, %v2771_v50 }
 0xafa   :  { %v4812_v19 = vmul.f32 -1.442695, %v2773_v22  ;;  %v4813_v40 = vmul.f32 -1.442695, %v2844_v27 }
 0xafb   :  { %7780 = vpow2.f32 %v4811_v44 }
 0xafc   :  { %7782 = vpow2.f32 %v4812_v19 }
 0xafd   :  { %7784 = vpow2.f32 %v4813_v40 }
 0xafe   :  { %7786 = vtanh.f32 %v2842_v23  ;;  %v11158_v23 = vld [vmem:[#allocation37_spill] sm:$0xff] }
 0xb05   :  { %v7781_v10 = vpop.eup %7780 }
 0xb06   :  { %v7783_v4 = vpop.eup %7782  ;;  %v2849_v31 = vadd.f32 1.0, %v7781_v10 }
 0xb07   :  { %v2855_v59 = vadd.f32 1.0, %v7783_v4  ;;  %v7785_v0 = vpop.eup %7784  ;;  %v11156_v4 = vld [vmem:[#allocation35_spill] sm:$0xff] }
 0xb08   :  { %7788 = vrcp.f32 %v2849_v31  ;;  %v7787_v54 = vpop.eup %7786  ;;  %v2862_v44 = vadd.f32 1.0, %v7785_v0  ;;  %v11159_v31 = vld [vmem:[#allocation33_spill] sm:$0xff]  ;;  %v11161_v0 = vld [vmem:[#allocation36_spill] sm:$0xff] }
 0xb09   :  { %7790 = vrcp.f32 %v2855_v59  ;;  %v11155_v59 = vld [vmem:[#allocation29_spill] sm:$0xff] }
 0xb0a   :  { %7792 = vrcp.f32 %v2862_v44  ;;  %v11165_v44 = vld [vmem:[#allocation40_spill] sm:$0xff] }
 0xb12   :  { %v7789_v21 = vpop.eup %7788 }
 0xb13   :  { %v7791_v50 = vpop.eup %7790  ;;  %v2866_v22 = vmul.f32 %v7789_v21, %v7787_v54  ;;  %v11157_v54 = vld [vmem:[#allocation32_spill] sm:$0xff]  ;;  %v11162_v21 = vld [vmem:[#allocation41_spill] sm:$0xff] }
 0xb14   :  { %v2865_v19 = vmul.f32 %v7791_v50, %v9395_v36  ;;  %v7793_v27 = vpop.eup %7792  ;;  %v11154_v36 = vld [vmem:[#allocation34_spill] sm:$0xff] }
 0xb15   :  { %v11163_v50 = vld [vmem:[#allocation38_spill] sm:$0xff] }
 0xb16   :  { %v9583_v43 = vadd.f32 %v2866_v22, %v2865_v19  ;;  %v11164_v22 = vld [vmem:[#allocation43_spill] sm:$0xff]  ;;  %v11166_v19 = vld [vmem:[#allocation45_spill] sm:$0xff] }
 0xb18   :  { %7794 = vtanh.f32 %v9583_v43 }
 0xb22   :  { %v7795_v10 = vpop.eup %7794 }
 0xb23   :  { %v2869_v40 = vmul.f32 %v7795_v10, %v7793_v27  ;;  %v11167_v27 = vld [vmem:[#allocation42_spill] sm:$0xff]  ;;  %v11168_v10 = vld [vmem:[#allocation47_spill] sm:$0xff] }
 0xb25   :  { %2935 = vmatmul.mubr.f32.vlgmr.msra.gmra.mrb[28].mxu0 %v2869_v40  ;;  %3006 = vmatmul.mubr.f32.vlgmr.msra.gmra.mrb[28].mxu1 %v2869_v40 }
 0xb26   :  { %6553 = vmatpush1.bf16.msra.mxu0 %v8291_v8  ;;  %6585 = vmatpush1.bf16.msra.mxu1 %v8304_v25 }
 0xb27   :  { %6555 = vmatprep.subr.bf16.mxu0 %v8293_v9  ;;  %6587 = vmatprep.subr.bf16.mxu1 %v8314_v33 }
 0xb28   :  { %3105 = vmatprep.mubr.f32.mxu0 %v10593_v11  ;;  %3176 = vmatprep.mubr.f32.mxu1 %v10593_v11 }
 0xb2a   :  { %6557 = vmatpush1.bf16.msra.mxu0 %v8297_v14  ;;  %6589 = vmatpush1.bf16.msra.mxu1 %v8316_v37 }
 0xb2b   :  { %6559 = vmatprep.subr.bf16.mxu0 %v8300_v17  ;;  %6591 = vmatprep.subr.bf16.mxu1 %v8322_v45 }
 0xb2e   :  { %6561 = vmatpush1.bf16.msra.mxu0 %v8307_v26  ;;  %6593 = vmatpush1.bf16.msra.mxu1 %v8328_v48 }
 0xb2f   :  { %6563 = vmatprep.subr.bf16.mxu0 %v8311_v30  ;;  %6595 = vmatprep.subr.bf16.mxu1 %v8331_v52 }
 0xb32   :  { %6565 = vmatpush1.bf16.msra.mxu0 %v8320_v42  ;;  %6597 = vmatpush1.bf16.msra.mxu1 %v8340_v62 }
 0xb33   :  { %6567 = vmatprep.subr.bf16.mxu0 %v8325_v46  ;;  %6599 = vmatprep.subr.bf16.mxu1 %v8343_v1 }
 0xb36   :  { %6569 = vmatpush1.bf16.msra.mxu0 %v8334_v55  ;;  %6601 = vmatpush1.bf16.msra.mxu1 %v8352_v15 }
 0xb37   :  { %6571 = vmatprep.subr.bf16.mxu0 %v8337_v58  ;;  %6603 = vmatprep.subr.bf16.mxu1 %v8355_v18 }
 0xb3a   :  { %6573 = vmatpush1.bf16.msra.mxu0 %v8346_v7  ;;  %6605 = vmatpush1.bf16.msra.mxu1 %v11154_v36 }
 0xb3b   :  { %6575 = vmatprep.subr.bf16.mxu0 %v11155_v59  ;;  %6607 = vmatprep.subr.bf16.mxu1 %v11156_v4 }
 0xb3e   :  { %6577 = vmatpush1.bf16.msra.mxu0 %v11157_v54  ;;  %6609 = vmatpush1.bf16.msra.mxu1 %v11158_v23  ;;  %v11230_v54 = vld [vmem:[#allocation173_spill] sm:$0xff] }
 0xb3f   :  { %6579 = vmatprep.subr.bf16.mxu0 %v11159_v31  ;;  %6611 = vmatprep.subr.bf16.mxu1 %v11160_v32  ;;  %v11173_v32 = vld [vmem:[#allocation48_spill] sm:$0xff] }
 0xb40   :  { %v11229_v31 = vld [vmem:[#allocation172_spill] sm:$0xff] }
 0xb42   :  { %6581 = vmatpush1.bf16.msra.mxu0 %v11161_v0  ;;  %6613 = vmatpush1.bf16.msra.mxu1 %v11162_v21  ;;  %v11169_v0 = vld [vmem:[#allocation44_spill] sm:$0xff]  ;;  %v11170_v21 = vld [vmem:[#allocation49_spill] sm:$0xff] }
 0xb43   :  { %6615 = vmatprep.subr.bf16.mxu0 %v11163_v50  ;;  %6679 = vmatprep.subr.bf16.mxu1 %v11164_v22  ;;  %v11171_v50 = vld [vmem:[#allocation46_spill] sm:$0xff]  ;;  %v11172_v22 = vld [vmem:[#allocation51_spill] sm:$0xff] }
 0xb45   :  { %3106 = vmatmul.mubr.f32.vlgmr.msra.gmra.mrb[30].mxu0 %v9510_v24  ;;  %3177 = vmatmul.mubr.f32.vlgmr.msra.gmra.mrb[30].mxu1 %v9510_v24  ;;  %v11174_v24 = vld [vmem:[#allocation53_spill] sm:$0xff] }
 0xb46   :  { %3275 = vmatprep.mubr.f32.mxu0 %v2869_v40  ;;  %3346 = vmatprep.mubr.f32.mxu1 %v2869_v40  ;;  %v11175_v40 = vld [vmem:[#allocation50_spill] sm:$0xff] }
 0xb47   :  { %6617 = vmatpush1.bf16.msra.mxu0 %v11165_v44  ;;  %6681 = vmatpush1.bf16.msra.mxu1 %v11166_v19  ;;  %v11176_v44 = vld [vmem:[#allocation55_spill] sm:$0xff]  ;;  %v11177_v19 = vld [vmem:[#allocation52_spill] sm:$0xff] }
 0xb48   :  { %6619 = vmatprep.subr.bf16.mxu0 %v11167_v27  ;;  %6683 = vmatprep.subr.bf16.mxu1 %v11168_v10  ;;  %v11178_v27 = vld [vmem:[#allocation56_spill] sm:$0xff]  ;;  %v11179_v10 = vld [vmem:[#allocation54_spill] sm:$0xff] }
 0xb4b   :  { %6621 = vmatpush1.bf16.msra.mxu0 %v11169_v0  ;;  %6685 = vmatpush1.bf16.msra.mxu1 %v11170_v21  ;;  %v11180_v0 = vld [vmem:[#allocation57_spill] sm:$0xff]  ;;  %v11181_v21 = vld [vmem:[#allocation58_spill] sm:$0xff] }
 0xb4c   :  { %6623 = vmatprep.subr.bf16.mxu0 %v11171_v50  ;;  %6687 = vmatprep.subr.bf16.mxu1 %v11172_v22  ;;  %v11182_v50 = vld [vmem:[#allocation59_spill] sm:$0xff]  ;;  %v11183_v22 = vld [vmem:[#allocation60_spill] sm:$0xff] }
 0xb4f   :  { %6625 = vmatpush1.bf16.msra.mxu0 %v11173_v32  ;;  %6689 = vmatpush1.bf16.msra.mxu1 %v11174_v24  ;;  %v11184_v32 = vld [vmem:[#allocation61_spill] sm:$0xff]  ;;  %v11185_v24 = vld [vmem:[#allocation62_spill] sm:$0xff] }
 0xb50   :  { %6627 = vmatprep.subr.bf16.mxu0 %v11175_v40  ;;  %6691 = vmatprep.subr.bf16.mxu1 %v11176_v44  ;;  %v11186_v40 = vld [vmem:[#allocation63_spill] sm:$0xff]  ;;  %v11187_v44 = vld [vmem:[#allocation64_spill] sm:$0xff] }
 0xb53   :  { %6629 = vmatpush1.bf16.msra.mxu0 %v11177_v19  ;;  %6693 = vmatpush1.bf16.msra.mxu1 %v11178_v27  ;;  %v11188_v19 = vld [vmem:[#allocation65_spill] sm:$0xff]  ;;  %v11189_v27 = vld [vmem:[#allocation66_spill] sm:$0xff] }
 0xb54   :  { %6631 = vmatprep.subr.bf16.mxu0 %v11179_v10  ;;  %6695 = vmatprep.subr.bf16.mxu1 %v11180_v0  ;;  %v11190_v10 = vld [vmem:[#allocation67_spill] sm:$0xff]  ;;  %v11191_v0 = vld [vmem:[#allocation68_spill] sm:$0xff] }
 0xb57   :  { %6633 = vmatpush1.bf16.msra.mxu0 %v11181_v21  ;;  %6697 = vmatpush1.bf16.msra.mxu1 %v11182_v50  ;;  %v11192_v21 = vld [vmem:[#allocation69_spill] sm:$0xff]  ;;  %v11193_v50 = vld [vmem:[#allocation70_spill] sm:$0xff] }
 0xb58   :  { %6635 = vmatprep.subr.bf16.mxu0 %v11183_v22  ;;  %6699 = vmatprep.subr.bf16.mxu1 %v11184_v32  ;;  %v11194_v22 = vld [vmem:[#allocation71_spill] sm:$0xff]  ;;  %v11195_v32 = vld [vmem:[#allocation72_spill] sm:$0xff] }
 0xb5b   :  { %6637 = vmatpush1.bf16.msra.mxu0 %v11185_v24  ;;  %6701 = vmatpush1.bf16.msra.mxu1 %v11186_v40  ;;  %v11196_v24 = vld [vmem:[#allocation73_spill] sm:$0xff]  ;;  %v11197_v40 = vld [vmem:[#allocation74_spill] sm:$0xff] }
 0xb5c   :  { %6639 = vmatprep.subr.bf16.mxu0 %v11187_v44  ;;  %6703 = vmatprep.subr.bf16.mxu1 %v11188_v19  ;;  %v11198_v44 = vld [vmem:[#allocation75_spill] sm:$0xff]  ;;  %v11199_v19 = vld [vmem:[#allocation76_spill] sm:$0xff] }
 0xb5f   :  { %6641 = vmatpush1.bf16.msra.mxu0 %v11189_v27  ;;  %6705 = vmatpush1.bf16.msra.mxu1 %v11190_v10  ;;  %v11200_v27 = vld [vmem:[#allocation77_spill] sm:$0xff]  ;;  %v11201_v10 = vld [vmem:[#allocation78_spill] sm:$0xff] }
 0xb60   :  { %6643 = vmatprep.subr.bf16.mxu0 %v11191_v0  ;;  %6707 = vmatprep.subr.bf16.mxu1 %v11192_v21  ;;  %v11202_v0 = vld [vmem:[#allocation79_spill] sm:$0xff]  ;;  %v11203_v21 = vld [vmem:[#allocation80_spill] sm:$0xff] }
 0xb63   :  { %6645 = vmatpush1.bf16.msra.mxu0 %v11193_v50  ;;  %6709 = vmatpush1.bf16.msra.mxu1 %v11194_v22  ;;  %v11204_v50 = vld [vmem:[#allocation81_spill] sm:$0xff]  ;;  %v11205_v22 = vld [vmem:[#allocation82_spill] sm:$0xff] }
 0xb64   :  { %6647 = vmatprep.subr.bf16.mxu0 %v11195_v32  ;;  %6711 = vmatprep.subr.bf16.mxu1 %v11196_v24  ;;  %v11206_v32 = vld [vmem:[#allocation83_spill] sm:$0xff]  ;;  %v11207_v24 = vld [vmem:[#allocation84_spill] sm:$0xff] }
 0xb67   :  { %6649 = vmatpush1.bf16.msra.mxu0 %v11197_v40  ;;  %6713 = vmatpush1.bf16.msra.mxu1 %v11198_v44  ;;  %v11208_v40 = vld [vmem:[#allocation85_spill] sm:$0xff]  ;;  %v11209_v44 = vld [vmem:[#allocation86_spill] sm:$0xff] }
 0xb68   :  { %6651 = vmatprep.subr.bf16.mxu0 %v11199_v19  ;;  %6715 = vmatprep.subr.bf16.mxu1 %v11200_v27  ;;  %v11210_v19 = vld [vmem:[#allocation87_spill] sm:$0xff]  ;;  %v11211_v27 = vld [vmem:[#allocation88_spill] sm:$0xff] }
 0xb6b   :  { %6653 = vmatpush1.bf16.msra.mxu0 %v11201_v10  ;;  %6717 = vmatpush1.bf16.msra.mxu1 %v11202_v0  ;;  %v11212_v10 = vld [vmem:[#allocation89_spill] sm:$0xff]  ;;  %v11213_v0 = vld [vmem:[#allocation90_spill] sm:$0xff] }
 0xb6c   :  { %6655 = vmatprep.subr.bf16.mxu0 %v11203_v21  ;;  %6719 = vmatprep.subr.bf16.mxu1 %v11204_v50  ;;  %v11214_v21 = vld [vmem:[#allocation91_spill] sm:$0xff]  ;;  %v11215_v50 = vld [vmem:[#allocation92_spill] sm:$0xff] }
 0xb6f   :  { %6657 = vmatpush1.bf16.msra.mxu0 %v11205_v22  ;;  %6721 = vmatpush1.bf16.msra.mxu1 %v11206_v32  ;;  %v11216_v22 = vld [vmem:[#allocation93_spill] sm:$0xff]  ;;  %v11217_v32 = vld [vmem:[#allocation94_spill] sm:$0xff] }
 0xb70   :  { %6659 = vmatprep.subr.bf16.mxu0 %v11207_v24  ;;  %6723 = vmatprep.subr.bf16.mxu1 %v11208_v40  ;;  %v11218_v24 = vld [vmem:[#allocation95_spill] sm:$0xff]  ;;  %v11219_v40 = vld [vmem:[#allocation96_spill] sm:$0xff] }
 0xb73   :  { %6661 = vmatpush1.bf16.msra.mxu0 %v11209_v44  ;;  %6725 = vmatpush1.bf16.msra.mxu1 %v11210_v19  ;;  %v11220_v44 = vld [vmem:[#allocation97_spill] sm:$0xff]  ;;  %v11221_v19 = vld [vmem:[#allocation98_spill] sm:$0xff] }
 0xb74   :  { %6663 = vmatprep.subr.bf16.mxu0 %v11211_v27  ;;  %6727 = vmatprep.subr.bf16.mxu1 %v11212_v10  ;;  %v11222_v27 = vld [vmem:[#allocation99_spill] sm:$0xff]  ;;  %v11223_v10 = vld [vmem:[#allocation100_spill] sm:$0xff] }
 0xb77   :  { %6665 = vmatpush1.bf16.msra.mxu0 %v11213_v0  ;;  %6729 = vmatpush1.bf16.msra.mxu1 %v11214_v21  ;;  %v11224_v0 = vld [vmem:[#allocation101_spill] sm:$0xff]  ;;  %v11225_v21 = vld [vmem:[#allocation102_spill] sm:$0xff] }
 0xb78   :  { %6667 = vmatprep.subr.bf16.mxu0 %v11215_v50  ;;  %6731 = vmatprep.subr.bf16.mxu1 %v11216_v22  ;;  %v11226_v50 = vld [vmem:[#allocation103_spill] sm:$0xff]  ;;  %v11227_v22 = vld [vmem:[#allocation104_spill] sm:$0xff] }
 0xb7b   :  { %6669 = vmatpush1.bf16.msra.mxu0 %v11217_v32  ;;  %6733 = vmatpush1.bf16.msra.mxu1 %v11218_v24  ;;  %v11228_v32 = vld [vmem:[#allocation105_spill] sm:$0xff] }
 0xb7c   :  { %6671 = vmatprep.subr.bf16.mxu0 %v11219_v40  ;;  %6735 = vmatprep.subr.bf16.mxu1 %v11220_v44 }
 0xb7f   :  { %6673 = vmatpush1.bf16.msra.mxu0 %v11221_v19  ;;  %6737 = vmatpush1.bf16.msra.mxu1 %v11222_v27 }
 0xb80   :  { %6675 = vmatprep.subr.bf16.mxu0 %v11223_v10  ;;  %6739 = vmatprep.subr.bf16.mxu1 %v11224_v0  ;;  %v11231_v0 = vld [vmem:[#allocation174_spill] sm:$0xff] }
 0xb83   :  { %6677 = vmatpush1.bf16.msra.mxu0 %v11225_v21  ;;  %6741 = vmatpush1.bf16.msra.mxu1 %v11226_v50 }
 0xb84   :  { %6743 = vmatprep.subr.bf16.mxu0 %v11227_v22  ;;  %6807 = vmatprep.subr.bf16.mxu1 %v11228_v32 }
 0xbf8   :  { %v2936_v24 = vpop.f32.mrb[28].mxu0  ;;  %v3007_v40 = vpop.f32.mrb[28].mxu1 }
 0xbf9   :  { %v2937_v44 = vadd.f32 %v2936_v24, %v11229_v31  ;;  %v2938_v23 = vpop.f32.mrb[29].mxu0  ;;  %v3009_v19 = vpop.f32.mrb[29].mxu1  ;;  %v3008_v21 = vadd.f32 %v3007_v40, %v11231_v0 }
 0xbfa   :  { %v2939_v27 = vadd.f32 %v2938_v23, %v11230_v54  ;;  %v3037_v23 = vld [vmem:[#allocation4 + $0xa0] sm:$0xff] }
 0xbfb   :  { %v4814_v4 = vmul.f32 -1.442695, %v2937_v44  ;;  %v3038_v44 = vld [vmem:[#allocation4 + $0xa8] sm:$0xff] }
 0xbfc   :  { %v4815_v10 = vmul.f32 -1.442695, %v2939_v27 }
 0xbfd   :  { %7796 = vpow2.f32 %v4814_v4 }
 0xbfe   :  { %7798 = vpow2.f32 %v4815_v10 }
 0xbff   :  { %7800 = vtanh.f32 %v3008_v21 }
 0xc07   :  { %v7797_v59 = vpop.eup %7796 }
 0xc08   :  { %v7799_v50 = vpop.eup %7798  ;;  %v3015_v36 = vadd.f32 1.0, %v7797_v59 }
 0xc09   :  { %v3021_v22 = vadd.f32 1.0, %v7799_v50  ;;  %v7801_v32 = vpop.eup %7800 }
 0xc0a   :  { %7802 = vrcp.f32 %v3015_v36  ;;  %v3040_v36 = vld [vmem:[#allocation4 + $0xb8] sm:$0xff] }
 0xc0b   :  { %7804 = vrcp.f32 %v3021_v22  ;;  %v3010_v22 = vadd.f32 %v3009_v19, %v8938_v63 }
 0xc14   :  { %v7803_v7 = vpop.eup %7802 }
 0xc15   :  { %v7805_v24 = vpop.eup %7804  ;;  %v3032_v31 = vmul.f32 %v7803_v7, %v7801_v32  ;;  %v3039_v32 = vld [vmem:[#allocation4 + $0xb0] sm:$0xff] }
 0xc16   :  { %v3031_v18 = vmul.f32 %v7805_v24, %v9502_v61  ;;  %v4816_v61 = vmul.f32 -1.442695, %v3010_v22 }
 0xc18   :  { %v3107_v27 = vpop.f32.mrb[30].mxu0  ;;  %v3178_v4 = vpop.f32.mrb[30].mxu1  ;;  %v9690_v10 = vadd.f32 %v3032_v31, %v3031_v18 }
 0xc19   :  { %v3183_v40 = vadd.f32 %v3107_v27, %v3037_v23  ;;  %v3109_v0 = vpop.f32.mrb[31].mxu0  ;;  %v3180_v54 = vpop.f32.mrb[31].mxu1  ;;  %v3185_v58 = vadd.f32 %v3178_v4, %v3039_v32 }
 0xc1a   :  { %v3184_v59 = vadd.f32 %v3109_v0, %v3038_v44  ;;  %v3186_v7 = vadd.f32 %v3180_v54, %v3040_v36 }
 0xc1b   :  { %v4817_v21 = vmul.f32 -1.442695, %v3183_v40 }
 0xc1c   :  { %v4818_v50 = vmul.f32 -1.442695, %v3184_v59  ;;  %v4819_v24 = vmul.f32 -1.442695, %v3186_v7 }
 0xc1d   :  { %7806 = vpow2.f32 %v4817_v21 }
 0xc1e   :  { %7808 = vpow2.f32 %v4818_v50 }
 0xc1f   :  { %7810 = vpow2.f32 %v4816_v61  ;;  %v11233_v61 = vld [vmem:[#allocation126_spill] sm:$0xff] }
 0xc20   :  { %7812 = vpow2.f32 %v4819_v24  ;;  %v11234_v24 = vld [vmem:[#allocation127_spill] sm:$0xff] }
 0xc21   :  { %7814 = vtanh.f32 %v3185_v58 }
 0xc27   :  { %v7807_v15 = vpop.eup %7806 }
 0xc28   :  { %v7809_v18 = vpop.eup %7808  ;;  %v3190_v31 = vadd.f32 1.0, %v7807_v15 }
 0xc29   :  { %v3196_v23 = vadd.f32 1.0, %v7809_v18  ;;  %v7811_v0 = vpop.eup %7810  ;;  %v11235_v18 = vld [vmem:[#allocation128_spill] sm:$0xff] }
 0xc2a   :  { %7816 = vrcp.f32 %v3190_v31  ;;  %v7813_v44 = vpop.eup %7812  ;;  %v3028_v50 = vadd.f32 1.0, %v7811_v0  ;;  %v11236_v31 = vld [vmem:[#allocation129_spill] sm:$0xff]  ;;  %v11238_v0 = vld [vmem:[#allocation131_spill] sm:$0xff] }
 0xc2b   :  { %7818 = vrcp.f32 %v3196_v23  ;;  %v7815_v27 = vpop.eup %7814  ;;  %v3203_v54 = vadd.f32 1.0, %v7813_v44  ;;  %v11237_v23 = vld [vmem:[#allocation130_spill] sm:$0xff]  ;;  %v11239_v44 = vld [vmem:[#allocation132_spill] sm:$0xff] }
 0xc2c   :  { %7820 = vtanh.f32 %v9690_v10 }
 0xc2d   :  { %7822 = vrcp.f32 %v3203_v54  ;;  %v11244_v54 = vld [vmem:[#allocation137_spill] sm:$0xff] }
 0xc34   :  { %v7817_v40 = vpop.eup %7816 }
 0xc35   :  { %v7819_v59 = vpop.eup %7818  ;;  %v3207_v19 = vmul.f32 %v7817_v40, %v7815_v27  ;;  %v11240_v27 = vld [vmem:[#allocation133_spill] sm:$0xff]  ;;  %v11241_v40 = vld [vmem:[#allocation134_spill] sm:$0xff] }
 0xc36   :  { %v3206_v21 = vmul.f32 %v7819_v59, %v9506_v28  ;;  %v7821_v58 = vpop.eup %7820  ;;  %v11232_v28 = vld [vmem:[#allocation125_spill] sm:$0xff]  ;;  %v11242_v59 = vld [vmem:[#allocation135_spill] sm:$0xff] }
 0xc37   :  { %v7823_v15 = vpop.eup %7822 }
 0xc38   :  { %v9694_v4 = vadd.f32 %v3207_v19, %v3206_v21  ;;  %v11243_v19 = vld [vmem:[#allocation136_spill] sm:$0xff]  ;;  %v11245_v21 = vld [vmem:[#allocation138_spill] sm:$0xff] }
 0xc3a   :  { %7824 = vtanh.f32 %v9694_v4 }
 0xc3b   :  { %7826 = vrcp.f32 %v3028_v50  ;;  %v11246_v50 = vld [vmem:[#allocation139_spill] sm:$0xff] }
 0xc44   :  { %v7825_v36 = vpop.eup %7824 }
 0xc45   :  { %v7827_v22 = vpop.eup %7826  ;;  %v9698_v7 = vmul.f32 %v7825_v36, %v7823_v15  ;;  %v11248_v15 = vld [vmem:[#allocation141_spill] sm:$0xff]  ;;  %v11249_v36 = vld [vmem:[#allocation142_spill] sm:$0xff] }
 0xc46   :  { %v3035_v32 = vmul.f32 %v7827_v22, %v7821_v58  ;;  %v11247_v58 = vld [vmem:[#allocation140_spill] sm:$0xff]  ;;  %v11250_v22 = vld [vmem:[#allocation143_spill] sm:$0xff] }
 0xc47   :  { %3276 = vmatmul.mubr.f32.vlgmr.msra.gmra.mrb[32].mxu0 %v9698_v7  ;;  %3347 = vmatmul.mubr.f32.vlgmr.msra.gmra.mrb[32].mxu1 %v9698_v7 }
 0xc48   :  { %3441 = vmatprep.mubr.f32.mxu0 %v3035_v32  ;;  %3512 = vmatprep.mubr.f32.mxu1 %v3035_v32  ;;  %v11251_v32 = vld [vmem:[#allocation144_spill] sm:$0xff] }
 0xc49   :  { %6745 = vmatpush1.bf16.msra.mxu0 %v10717_v57  ;;  %6809 = vmatpush1.bf16.msra.mxu1 %v10718_v39 }
 0xc4a   :  { %6747 = vmatprep.subr.bf16.mxu0 %v10719_v56  ;;  %6811 = vmatprep.subr.bf16.mxu1 %v10720_v53 }
 0xc4d   :  { %6749 = vmatpush1.bf16.msra.mxu0 %v10721_v2  ;;  %6813 = vmatpush1.bf16.msra.mxu1 %v10722_v35 }
 0xc4e   :  { %6751 = vmatprep.subr.bf16.mxu0 %v10845_v20  ;;  %6815 = vmatprep.subr.bf16.mxu1 %v10846_v12 }
 0xc51   :  { %6753 = vmatpush1.bf16.msra.mxu0 %v10847_v5  ;;  %6817 = vmatpush1.bf16.msra.mxu1 %v10848_v6 }
 0xc52   :  { %6755 = vmatprep.subr.bf16.mxu0 %v10974_v49  ;;  %6819 = vmatprep.subr.bf16.mxu1 %v10975_v38 }
 0xc55   :  { %6757 = vmatpush1.bf16.msra.mxu0 %v10976_v60  ;;  %6821 = vmatpush1.bf16.msra.mxu1 %v10977_v51 }
 0xc56   :  { %6759 = vmatprep.subr.bf16.mxu0 %v11103_v3  ;;  %6823 = vmatprep.subr.bf16.mxu1 %v11104_v47 }
 0xc59   :  { %6761 = vmatpush1.bf16.msra.mxu0 %v11105_v41  ;;  %6825 = vmatpush1.bf16.msra.mxu1 %v11106_v34 }
 0xc5a   :  { %6763 = vmatprep.subr.bf16.mxu0 %v11232_v28  ;;  %6827 = vmatprep.subr.bf16.mxu1 %v11233_v61 }
 0xc5d   :  { %6765 = vmatpush1.bf16.msra.mxu0 %v11234_v24  ;;  %6829 = vmatpush1.bf16.msra.mxu1 %v11235_v18 }
 0xc5e   :  { %6767 = vmatprep.subr.bf16.mxu0 %v11236_v31  ;;  %6831 = vmatprep.subr.bf16.mxu1 %v11237_v23 }
 0xc61   :  { %6769 = vmatpush1.bf16.msra.mxu0 %v11238_v0  ;;  %6833 = vmatpush1.bf16.msra.mxu1 %v11239_v44 }
 0xc62   :  { %6771 = vmatprep.subr.bf16.mxu0 %v11240_v27  ;;  %6835 = vmatprep.subr.bf16.mxu1 %v11241_v40  ;;  %v11252_v40 = vld [vmem:[#allocation145_spill] sm:$0xff] }
 0xc63   :  { %v11278_v27 = vld [vmem:[#allocation169_spill] sm:$0xff] }
 0xc65   :  { %6773 = vmatpush1.bf16.msra.mxu0 %v11242_v59  ;;  %6837 = vmatpush1.bf16.msra.mxu1 %v11243_v19  ;;  %v11253_v59 = vld [vmem:[#allocation146_spill] sm:$0xff]  ;;  %v11254_v19 = vld [vmem:[#allocation147_spill] sm:$0xff] }
 0xc66   :  { %6775 = vmatprep.subr.bf16.mxu0 %v11244_v54  ;;  %6839 = vmatprep.subr.bf16.mxu1 %v11245_v21  ;;  %v11255_v54 = vld [vmem:[#allocation148_spill] sm:$0xff]  ;;  %v11256_v21 = vld [vmem:[#allocation149_spill] sm:$0xff] }
 0xc69   :  { %6777 = vmatpush1.bf16.msra.mxu0 %v11246_v50  ;;  %6841 = vmatpush1.bf16.msra.mxu1 %v11247_v58  ;;  %v11257_v50 = vld [vmem:[#allocation150_spill] sm:$0xff]  ;;  %v11258_v58 = vld [vmem:[#allocation151_spill] sm:$0xff] }
 0xc6a   :  { %6779 = vmatprep.subr.bf16.mxu0 %v11248_v15  ;;  %6843 = vmatprep.subr.bf16.mxu1 %v11249_v36  ;;  %v11259_v15 = vld [vmem:[#allocation152_spill] sm:$0xff]  ;;  %v11260_v36 = vld [vmem:[#allocation153_spill] sm:$0xff] }
 0xc6d   :  { %6781 = vmatpush1.bf16.msra.mxu0 %v11250_v22  ;;  %6845 = vmatpush1.bf16.msra.mxu1 %v11251_v32  ;;  %v11261_v22 = vld [vmem:[#allocation154_spill] sm:$0xff]  ;;  %v11262_v32 = vld [vmem:[#allocation155_spill] sm:$0xff] }
 0xc6e   :  { %6783 = vmatprep.subr.bf16.mxu0 %v11252_v40  ;;  %6847 = vmatprep.subr.bf16.mxu1 %v11253_v59  ;;  %v11263_v40 = vld [vmem:[#allocation156_spill] sm:$0xff]  ;;  %v11264_v59 = vld [vmem:[#allocation157_spill] sm:$0xff] }
 0xc71   :  { %6785 = vmatpush1.bf16.msra.mxu0 %v11254_v19  ;;  %6849 = vmatpush1.bf16.msra.mxu1 %v11255_v54  ;;  %v11265_v19 = vld [vmem:[#allocation158_spill] sm:$0xff]  ;;  %v11266_v54 = vld [vmem:[#allocation159_spill] sm:$0xff] }
 0xc72   :  { %6787 = vmatprep.subr.bf16.mxu0 %v11256_v21  ;;  %6851 = vmatprep.subr.bf16.mxu1 %v11257_v50  ;;  %v11267_v21 = vld [vmem:[#allocation160_spill] sm:$0xff]  ;;  %v11268_v50 = vld [vmem:[#allocation161_spill] sm:$0xff] }
 0xc75   :  { %6789 = vmatpush1.bf16.msra.mxu0 %v11258_v58  ;;  %6853 = vmatpush1.bf16.msra.mxu1 %v11259_v15  ;;  %v11269_v58 = vld [vmem:[#allocation162_spill] sm:$0xff]  ;;  %v11270_v15 = vld [vmem:[#allocation163_spill] sm:$0xff] }
 0xc76   :  { %6791 = vmatprep.subr.bf16.mxu0 %v11260_v36  ;;  %6855 = vmatprep.subr.bf16.mxu1 %v11261_v22  ;;  %v11271_v36 = vld [vmem:[#allocation164_spill] sm:$0xff]  ;;  %v11272_v22 = vld [vmem:[#allocation165_spill] sm:$0xff] }
 0xc79   :  { %6793 = vmatpush1.bf16.msra.mxu0 %v11262_v32  ;;  %6857 = vmatpush1.bf16.msra.mxu1 %v11263_v40  ;;  %v11273_v32 = vld [vmem:[#allocation166_spill] sm:$0xff]  ;;  %v11274_v40 = vld [vmem:[#allocation167_spill] sm:$0xff] }
 0xc7a   :  { %6795 = vmatprep.subr.bf16.mxu0 %v11264_v59  ;;  %6859 = vmatprep.subr.bf16.mxu1 %v11265_v19  ;;  %v11275_v59 = vld [vmem:[#allocation168_spill] sm:$0xff]  ;;  %v11276_v19 = vld [vmem:[#allocation21_spill] sm:$0xff] }
 0xc7d   :  { %6797 = vmatpush1.bf16.msra.mxu0 %v11266_v54  ;;  %6861 = vmatpush1.bf16.msra.mxu1 %v11267_v21  ;;  %v11277_v54 = vld [vmem:[#allocation22_spill] sm:$0xff] }
 0xc7e   :  { %6799 = vmatprep.subr.bf16.mxu0 %v11268_v50  ;;  %6863 = vmatprep.subr.bf16.mxu1 %v11269_v58 }
 0xc81   :  { %6801 = vmatpush1.bf16.msra.mxu0 %v11270_v15  ;;  %6865 = vmatpush1.bf16.msra.mxu1 %v11271_v36 }
 0xc82   :  { %6803 = vmatprep.subr.bf16.mxu0 %v11272_v22  ;;  %6867 = vmatprep.subr.bf16.mxu1 %v11273_v32 }
 0xc85   :  { %6805 = vmatpush1.bf16.msra.mxu0 %v11274_v40  ;;  %6869 = vmatpush1.bf16.msra.mxu1 %v11275_v59 }
 0xc86   :  { %6871 = vmatprep.subr.bf16.mxu0 %v11276_v19  ;;  %6903 = vmatprep.subr.bf16.mxu1 %v11277_v54 }
 0xd1a   :  { %v3277_v21 = vpop.f32.mrb[32].mxu0  ;;  %v3348_v50 = vpop.f32.mrb[32].mxu1 }
 0xd1b   :  { %v3278_v58 = vadd.f32 %v3277_v21, %v11278_v27  ;;  %v3279_v44 = vpop.f32.mrb[33].mxu0  ;;  %v3350_v15 = vpop.f32.mrb[33].mxu1  ;;  %v3349_v59 = vadd.f32 %v3348_v50, %v8810_v13 }
 0xd1c   :  { %v3280_v36 = vadd.f32 %v3279_v44, %v10777_v16  ;;  %v3351_v40 = vadd.f32 %v3350_v15, %v10778_v29 }
 0xd1d   :  { %v4820_v0 = vmul.f32 -1.442695, %v3278_v58 }
 0xd1e   :  { %v4821_v22 = vmul.f32 -1.442695, %v3280_v36  ;;  %v4822_v32 = vmul.f32 -1.442695, %v3351_v40 }
 0xd1f   :  { %7828 = vpow2.f32 %v4820_v0 }
 0xd20   :  { %7830 = vpow2.f32 %v4821_v22 }
 0xd21   :  { %7832 = vpow2.f32 %v4822_v32  ;;  %v11285_v32 = vld [vmem:[#allocation35_spill] sm:$0xff] }
 0xd22   :  { %7834 = vtanh.f32 %v3349_v59  ;;  %v11283_v59 = vld [vmem:[#allocation34_spill] sm:$0xff] }
 0xd29   :  { %v7829_v19 = vpop.eup %7828 }
 0xd2a   :  { %v7831_v23 = vpop.eup %7830  ;;  %v3356_v54 = vadd.f32 1.0, %v7829_v19 }
 0xd2b   :  { %v3362_v31 = vadd.f32 1.0, %v7831_v23  ;;  %v7833_v21 = vpop.eup %7832  ;;  %v11281_v23 = vld [vmem:[#allocation31_spill] sm:$0xff] }
 0xd2c   :  { %7836 = vrcp.f32 %v3356_v54  ;;  %v7835_v27 = vpop.eup %7834  ;;  %v3369_v0 = vadd.f32 1.0, %v7833_v21  ;;  %v11284_v54 = vld [vmem:[#allocation29_spill] sm:$0xff]  ;;  %v11286_v21 = vld [vmem:[#allocation32_spill] sm:$0xff] }
 0xd2d   :  { %7838 = vrcp.f32 %v3362_v31  ;;  %v11280_v31 = vld [vmem:[#allocation25_spill] sm:$0xff] }
 0xd2e   :  { %7840 = vrcp.f32 %v3369_v0  ;;  %v11290_v0 = vld [vmem:[#allocation36_spill] sm:$0xff] }
 0xd36   :  { %v7837_v44 = vpop.eup %7836 }
 0xd37   :  { %v7839_v58 = vpop.eup %7838  ;;  %v3373_v36 = vmul.f32 %v7837_v44, %v7835_v27  ;;  %v11282_v27 = vld [vmem:[#allocation28_spill] sm:$0xff]  ;;  %v11287_v44 = vld [vmem:[#allocation37_spill] sm:$0xff] }
 0xd38   :  { %v3372_v22 = vmul.f32 %v7839_v58, %v9583_v43  ;;  %v7841_v40 = vpop.eup %7840  ;;  %v11279_v43 = vld [vmem:[#allocation30_spill] sm:$0xff]  ;;  %v11288_v58 = vld [vmem:[#allocation33_spill] sm:$0xff] }
 0xd3a   :  { %v9771_v15 = vadd.f32 %v3373_v36, %v3372_v22  ;;  %v11289_v36 = vld [vmem:[#allocation39_spill] sm:$0xff]  ;;  %v11291_v22 = vld [vmem:[#allocation41_spill] sm:$0xff] }
 0xd3c   :  { %7842 = vtanh.f32 %v9771_v15 }
 0xd46   :  { %v7843_v19 = vpop.eup %7842 }
 0xd47   :  { %v3376_v50 = vmul.f32 %v7843_v19, %v7841_v40  ;;  %v11292_v40 = vld [vmem:[#allocation38_spill] sm:$0xff]  ;;  %v11293_v19 = vld [vmem:[#allocation43_spill] sm:$0xff] }
 0xd49   :  { %3442 = vmatmul.mubr.f32.vlgmr.msra.gmra.mrb[34].mxu0 %v3376_v50  ;;  %3513 = vmatmul.mubr.f32.vlgmr.msra.gmra.mrb[34].mxu1 %v3376_v50 }
 0xd4a   :  { %6873 = vmatpush1.bf16.msra.mxu0 %v8291_v8  ;;  %6905 = vmatpush1.bf16.msra.mxu1 %v8304_v25 }
 0xd4b   :  { %6875 = vmatprep.subr.bf16.mxu0 %v8293_v9  ;;  %6907 = vmatprep.subr.bf16.mxu1 %v8314_v33 }
 0xd4c   :  { %3612 = vmatprep.mubr.f32.mxu0 %v10593_v11  ;;  %3683 = vmatprep.mubr.f32.mxu1 %v10593_v11 }
 0xd4e   :  { %6877 = vmatpush1.bf16.msra.mxu0 %v8297_v14  ;;  %6909 = vmatpush1.bf16.msra.mxu1 %v8316_v37 }
 0xd4f   :  { %6879 = vmatprep.subr.bf16.mxu0 %v8300_v17  ;;  %6911 = vmatprep.subr.bf16.mxu1 %v8322_v45 }
 0xd52   :  { %6881 = vmatpush1.bf16.msra.mxu0 %v8307_v26  ;;  %6913 = vmatpush1.bf16.msra.mxu1 %v8328_v48 }
 0xd53   :  { %6883 = vmatprep.subr.bf16.mxu0 %v8311_v30  ;;  %6915 = vmatprep.subr.bf16.mxu1 %v8331_v52 }
 0xd56   :  { %6885 = vmatpush1.bf16.msra.mxu0 %v8320_v42  ;;  %6917 = vmatpush1.bf16.msra.mxu1 %v8340_v62 }
 0xd57   :  { %6887 = vmatprep.subr.bf16.mxu0 %v8325_v46  ;;  %6919 = vmatprep.subr.bf16.mxu1 %v8343_v1 }
 0xd5a   :  { %6889 = vmatpush1.bf16.msra.mxu0 %v8334_v55  ;;  %6921 = vmatpush1.bf16.msra.mxu1 %v11279_v43 }
 0xd5b   :  { %6891 = vmatprep.subr.bf16.mxu0 %v11280_v31  ;;  %6923 = vmatprep.subr.bf16.mxu1 %v11281_v23 }
 0xd5e   :  { %6893 = vmatpush1.bf16.msra.mxu0 %v11282_v27  ;;  %6925 = vmatpush1.bf16.msra.mxu1 %v11283_v59  ;;  %v11359_v27 = vld [vmem:[#allocation173_spill] sm:$0xff] }
 0xd5f   :  { %6895 = vmatprep.subr.bf16.mxu0 %v11284_v54  ;;  %6927 = vmatprep.subr.bf16.mxu1 %v11285_v32  ;;  %v11302_v32 = vld [vmem:[#allocation48_spill] sm:$0xff] }
 0xd60   :  { %v11358_v54 = vld [vmem:[#allocation172_spill] sm:$0xff] }
 0xd62   :  { %6897 = vmatpush1.bf16.msra.mxu0 %v11286_v21  ;;  %6929 = vmatpush1.bf16.msra.mxu1 %v11287_v44  ;;  %v11294_v21 = vld [vmem:[#allocation40_spill] sm:$0xff]  ;;  %v11295_v44 = vld [vmem:[#allocation45_spill] sm:$0xff] }
 0xd63   :  { %6899 = vmatprep.subr.bf16.mxu0 %v11288_v58  ;;  %6931 = vmatprep.subr.bf16.mxu1 %v11289_v36  ;;  %v11296_v58 = vld [vmem:[#allocation42_spill] sm:$0xff]  ;;  %v11297_v36 = vld [vmem:[#allocation47_spill] sm:$0xff] }
 0xd66   :  { %6901 = vmatpush1.bf16.msra.mxu0 %v11290_v0  ;;  %6933 = vmatpush1.bf16.msra.mxu1 %v11291_v22  ;;  %v11298_v0 = vld [vmem:[#allocation44_spill] sm:$0xff]  ;;  %v11299_v22 = vld [vmem:[#allocation49_spill] sm:$0xff] }
 0xd67   :  { %6935 = vmatprep.subr.bf16.mxu0 %v11292_v40  ;;  %6999 = vmatprep.subr.bf16.mxu1 %v11293_v19  ;;  %v11300_v40 = vld [vmem:[#allocation46_spill] sm:$0xff]  ;;  %v11301_v19 = vld [vmem:[#allocation51_spill] sm:$0xff] }
 0xd69   :  { %3613 = vmatmul.mubr.f32.vlgmr.msra.gmra.mrb[36].mxu0 %v9698_v7  ;;  %3684 = vmatmul.mubr.f32.vlgmr.msra.gmra.mrb[36].mxu1 %v9698_v7  ;;  %v11303_v7 = vld [vmem:[#allocation53_spill] sm:$0xff] }
 0xd6a   :  { %3782 = vmatprep.mubr.f32.mxu0 %v3376_v50  ;;  %3853 = vmatprep.mubr.f32.mxu1 %v3376_v50  ;;  %v11304_v50 = vld [vmem:[#allocation50_spill] sm:$0xff] }
 0xd6b   :  { %6937 = vmatpush1.bf16.msra.mxu0 %v11294_v21  ;;  %7001 = vmatpush1.bf16.msra.mxu1 %v11295_v44  ;;  %v11305_v21 = vld [vmem:[#allocation55_spill] sm:$0xff]  ;;  %v11306_v44 = vld [vmem:[#allocation52_spill] sm:$0xff] }
 0xd6c   :  { %6939 = vmatprep.subr.bf16.mxu0 %v11296_v58  ;;  %7003 = vmatprep.subr.bf16.mxu1 %v11297_v36  ;;  %v11307_v58 = vld [vmem:[#allocation56_spill] sm:$0xff]  ;;  %v11308_v36 = vld [vmem:[#allocation54_spill] sm:$0xff] }
 0xd6f   :  { %6941 = vmatpush1.bf16.msra.mxu0 %v11298_v0  ;;  %7005 = vmatpush1.bf16.msra.mxu1 %v11299_v22  ;;  %v11309_v0 = vld [vmem:[#allocation57_spill] sm:$0xff]  ;;  %v11310_v22 = vld [vmem:[#allocation58_spill] sm:$0xff] }
 0xd70   :  { %6943 = vmatprep.subr.bf16.mxu0 %v11300_v40  ;;  %7007 = vmatprep.subr.bf16.mxu1 %v11301_v19  ;;  %v11311_v40 = vld [vmem:[#allocation59_spill] sm:$0xff]  ;;  %v11312_v19 = vld [vmem:[#allocation60_spill] sm:$0xff] }
 0xd73   :  { %6945 = vmatpush1.bf16.msra.mxu0 %v11302_v32  ;;  %7009 = vmatpush1.bf16.msra.mxu1 %v11303_v7  ;;  %v11313_v32 = vld [vmem:[#allocation61_spill] sm:$0xff]  ;;  %v11314_v7 = vld [vmem:[#allocation62_spill] sm:$0xff] }
 0xd74   :  { %6947 = vmatprep.subr.bf16.mxu0 %v11304_v50  ;;  %7011 = vmatprep.subr.bf16.mxu1 %v11305_v21  ;;  %v11315_v50 = vld [vmem:[#allocation63_spill] sm:$0xff]  ;;  %v11316_v21 = vld [vmem:[#allocation64_spill] sm:$0xff] }
 0xd77   :  { %6949 = vmatpush1.bf16.msra.mxu0 %v11306_v44  ;;  %7013 = vmatpush1.bf16.msra.mxu1 %v11307_v58  ;;  %v11317_v44 = vld [vmem:[#allocation65_spill] sm:$0xff]  ;;  %v11318_v58 = vld [vmem:[#allocation66_spill] sm:$0xff] }
 0xd78   :  { %6951 = vmatprep.subr.bf16.mxu0 %v11308_v36  ;;  %7015 = vmatprep.subr.bf16.mxu1 %v11309_v0  ;;  %v11319_v36 = vld [vmem:[#allocation67_spill] sm:$0xff]  ;;  %v11320_v0 = vld [vmem:[#allocation68_spill] sm:$0xff] }
 0xd7b   :  { %6953 = vmatpush1.bf16.msra.mxu0 %v11310_v22  ;;  %7017 = vmatpush1.bf16.msra.mxu1 %v11311_v40  ;;  %v11321_v22 = vld [vmem:[#allocation69_spill] sm:$0xff]  ;;  %v11322_v40 = vld [vmem:[#allocation70_spill] sm:$0xff] }
 0xd7c   :  { %6955 = vmatprep.subr.bf16.mxu0 %v11312_v19  ;;  %7019 = vmatprep.subr.bf16.mxu1 %v11313_v32  ;;  %v11323_v19 = vld [vmem:[#allocation71_spill] sm:$0xff]  ;;  %v11324_v32 = vld [vmem:[#allocation72_spill] sm:$0xff] }
 0xd7f   :  { %6957 = vmatpush1.bf16.msra.mxu0 %v11314_v7  ;;  %7021 = vmatpush1.bf16.msra.mxu1 %v11315_v50  ;;  %v11325_v7 = vld [vmem:[#allocation73_spill] sm:$0xff]  ;;  %v11326_v50 = vld [vmem:[#allocation74_spill] sm:$0xff] }
 0xd80   :  { %6959 = vmatprep.subr.bf16.mxu0 %v11316_v21  ;;  %7023 = vmatprep.subr.bf16.mxu1 %v11317_v44  ;;  %v11327_v21 = vld [vmem:[#allocation75_spill] sm:$0xff]  ;;  %v11328_v44 = vld [vmem:[#allocation76_spill] sm:$0xff] }
 0xd83   :  { %6961 = vmatpush1.bf16.msra.mxu0 %v11318_v58  ;;  %7025 = vmatpush1.bf16.msra.mxu1 %v11319_v36  ;;  %v11329_v58 = vld [vmem:[#allocation77_spill] sm:$0xff]  ;;  %v11330_v36 = vld [vmem:[#allocation78_spill] sm:$0xff] }
 0xd84   :  { %6963 = vmatprep.subr.bf16.mxu0 %v11320_v0  ;;  %7027 = vmatprep.subr.bf16.mxu1 %v11321_v22  ;;  %v11331_v0 = vld [vmem:[#allocation79_spill] sm:$0xff]  ;;  %v11332_v22 = vld [vmem:[#allocation80_spill] sm:$0xff] }
 0xd87   :  { %6965 = vmatpush1.bf16.msra.mxu0 %v11322_v40  ;;  %7029 = vmatpush1.bf16.msra.mxu1 %v11323_v19  ;;  %v11333_v40 = vld [vmem:[#allocation81_spill] sm:$0xff]  ;;  %v11334_v19 = vld [vmem:[#allocation82_spill] sm:$0xff] }
 0xd88   :  { %6967 = vmatprep.subr.bf16.mxu0 %v11324_v32  ;;  %7031 = vmatprep.subr.bf16.mxu1 %v11325_v7  ;;  %v11335_v32 = vld [vmem:[#allocation83_spill] sm:$0xff]  ;;  %v11336_v7 = vld [vmem:[#allocation84_spill] sm:$0xff] }
 0xd8b   :  { %6969 = vmatpush1.bf16.msra.mxu0 %v11326_v50  ;;  %7033 = vmatpush1.bf16.msra.mxu1 %v11327_v21  ;;  %v11337_v50 = vld [vmem:[#allocation85_spill] sm:$0xff]  ;;  %v11338_v21 = vld [vmem:[#allocation86_spill] sm:$0xff] }
 0xd8c   :  { %6971 = vmatprep.subr.bf16.mxu0 %v11328_v44  ;;  %7035 = vmatprep.subr.bf16.mxu1 %v11329_v58  ;;  %v11339_v44 = vld [vmem:[#allocation87_spill] sm:$0xff]  ;;  %v11340_v58 = vld [vmem:[#allocation88_spill] sm:$0xff] }
 0xd8f   :  { %6973 = vmatpush1.bf16.msra.mxu0 %v11330_v36  ;;  %7037 = vmatpush1.bf16.msra.mxu1 %v11331_v0  ;;  %v11341_v36 = vld [vmem:[#allocation89_spill] sm:$0xff]  ;;  %v11342_v0 = vld [vmem:[#allocation90_spill] sm:$0xff] }
 0xd90   :  { %6975 = vmatprep.subr.bf16.mxu0 %v11332_v22  ;;  %7039 = vmatprep.subr.bf16.mxu1 %v11333_v40  ;;  %v11343_v22 = vld [vmem:[#allocation91_spill] sm:$0xff]  ;;  %v11344_v40 = vld [vmem:[#allocation92_spill] sm:$0xff] }
 0xd93   :  { %6977 = vmatpush1.bf16.msra.mxu0 %v11334_v19  ;;  %7041 = vmatpush1.bf16.msra.mxu1 %v11335_v32  ;;  %v11345_v19 = vld [vmem:[#allocation93_spill] sm:$0xff]  ;;  %v11346_v32 = vld [vmem:[#allocation94_spill] sm:$0xff] }
 0xd94   :  { %6979 = vmatprep.subr.bf16.mxu0 %v11336_v7  ;;  %7043 = vmatprep.subr.bf16.mxu1 %v11337_v50  ;;  %v11347_v7 = vld [vmem:[#allocation95_spill] sm:$0xff]  ;;  %v11348_v50 = vld [vmem:[#allocation96_spill] sm:$0xff] }
 0xd97   :  { %6981 = vmatpush1.bf16.msra.mxu0 %v11338_v21  ;;  %7045 = vmatpush1.bf16.msra.mxu1 %v11339_v44  ;;  %v11349_v21 = vld [vmem:[#allocation97_spill] sm:$0xff]  ;;  %v11350_v44 = vld [vmem:[#allocation98_spill] sm:$0xff] }
 0xd98   :  { %6983 = vmatprep.subr.bf16.mxu0 %v11340_v58  ;;  %7047 = vmatprep.subr.bf16.mxu1 %v11341_v36  ;;  %v11351_v58 = vld [vmem:[#allocation99_spill] sm:$0xff]  ;;  %v11352_v36 = vld [vmem:[#allocation100_spill] sm:$0xff] }
 0xd9b   :  { %6985 = vmatpush1.bf16.msra.mxu0 %v11342_v0  ;;  %7049 = vmatpush1.bf16.msra.mxu1 %v11343_v22  ;;  %v11353_v0 = vld [vmem:[#allocation101_spill] sm:$0xff]  ;;  %v11354_v22 = vld [vmem:[#allocation102_spill] sm:$0xff] }
 0xd9c   :  { %6987 = vmatprep.subr.bf16.mxu0 %v11344_v40  ;;  %7051 = vmatprep.subr.bf16.mxu1 %v11345_v19  ;;  %v11355_v40 = vld [vmem:[#allocation103_spill] sm:$0xff]  ;;  %v11356_v19 = vld [vmem:[#allocation104_spill] sm:$0xff] }
 0xd9f   :  { %6989 = vmatpush1.bf16.msra.mxu0 %v11346_v32  ;;  %7053 = vmatpush1.bf16.msra.mxu1 %v11347_v7  ;;  %v11357_v32 = vld [vmem:[#allocation105_spill] sm:$0xff] }
 0xda0   :  { %6991 = vmatprep.subr.bf16.mxu0 %v11348_v50  ;;  %7055 = vmatprep.subr.bf16.mxu1 %v11349_v21 }
 0xda3   :  { %6993 = vmatpush1.bf16.msra.mxu0 %v11350_v44  ;;  %7057 = vmatpush1.bf16.msra.mxu1 %v11351_v58 }
 0xda4   :  { %6995 = vmatprep.subr.bf16.mxu0 %v11352_v36  ;;  %7059 = vmatprep.subr.bf16.mxu1 %v11353_v0  ;;  %v11360_v0 = vld [vmem:[#allocation174_spill] sm:$0xff] }
 0xda7   :  { %6997 = vmatpush1.bf16.msra.mxu0 %v11354_v22  ;;  %7061 = vmatpush1.bf16.msra.mxu1 %v11355_v40 }
 0xda8   :  { %7063 = vmatprep.subr.bf16.mxu0 %v11356_v19  ;;  %7127 = vmatprep.subr.bf16.mxu1 %v11357_v32 }
 0xe1c   :  { %v3443_v7 = vpop.f32.mrb[34].mxu0  ;;  %v3514_v50 = vpop.f32.mrb[34].mxu1 }
 0xe1d   :  { %v3444_v21 = vadd.f32 %v3443_v7, %v11358_v54  ;;  %v3445_v59 = vpop.f32.mrb[35].mxu0  ;;  %v3516_v44 = vpop.f32.mrb[35].mxu1  ;;  %v3515_v22 = vadd.f32 %v3514_v50, %v11360_v0 }
 0xe1e   :  { %v3446_v58 = vadd.f32 %v3445_v59, %v11359_v27  ;;  %v3544_v59 = vld [vmem:[#allocation4 + $0xc0] sm:$0xff] }
 0xe1f   :  { %v4823_v23 = vmul.f32 -1.442695, %v3444_v21  ;;  %v3545_v21 = vld [vmem:[#allocation4 + $0xc8] sm:$0xff] }
 0xe20   :  { %v4824_v36 = vmul.f32 -1.442695, %v3446_v58 }
 0xe21   :  { %7844 = vpow2.f32 %v4823_v23 }
 0xe22   :  { %7846 = vpow2.f32 %v4824_v36 }
 0xe23   :  { %7848 = vtanh.f32 %v3515_v22 }
 0xe2b   :  { %v7845_v31 = vpop.eup %7844 }
 0xe2c   :  { %v7847_v40 = vpop.eup %7846  ;;  %v3522_v43 = vadd.f32 1.0, %v7845_v31 }
 0xe2d   :  { %v3528_v19 = vadd.f32 1.0, %v7847_v40  ;;  %v7849_v32 = vpop.eup %7848 }
 0xe2e   :  { %7850 = vrcp.f32 %v3522_v43  ;;  %v3547_v43 = vld [vmem:[#allocation4 + $0xd8] sm:$0xff] }
 0xe2f   :  { %7852 = vrcp.f32 %v3528_v19  ;;  %v3517_v19 = vadd.f32 %v3516_v44, %v8938_v63 }
 0xe38   :  { %v7851_v55 = vpop.eup %7850 }
 0xe39   :  { %v7853_v7 = vpop.eup %7852  ;;  %v3539_v54 = vmul.f32 %v7851_v55, %v7849_v32  ;;  %v3546_v32 = vld [vmem:[#allocation4 + $0xd0] sm:$0xff] }
 0xe3a   :  { %v3538_v1 = vmul.f32 %v7853_v7, %v9690_v10  ;;  %v4825_v10 = vmul.f32 -1.442695, %v3517_v19 }
 0xe3c   :  { %v3614_v58 = vpop.f32.mrb[36].mxu0  ;;  %v3685_v23 = vpop.f32.mrb[36].mxu1  ;;  %v9878_v36 = vadd.f32 %v3539_v54, %v3538_v1 }
 0xe3d   :  { %v3690_v50 = vadd.f32 %v3614_v58, %v3544_v59  ;;  %v3616_v0 = vpop.f32.mrb[37].mxu0  ;;  %v3687_v27 = vpop.f32.mrb[37].mxu1  ;;  %v3692_v46 = vadd.f32 %v3685_v23, %v3546_v32 }
 0xe3e   :  { %v3691_v31 = vadd.f32 %v3616_v0, %v3545_v21  ;;  %v3693_v55 = vadd.f32 %v3687_v27, %v3547_v43 }
 0xe3f   :  { %v4826_v22 = vmul.f32 -1.442695, %v3690_v50 }
 0xe40   :  { %v4827_v40 = vmul.f32 -1.442695, %v3691_v31  ;;  %v4828_v7 = vmul.f32 -1.442695, %v3693_v55 }
 0xe41   :  { %7854 = vpow2.f32 %v4826_v22 }
 0xe42   :  { %7856 = vpow2.f32 %v4827_v40 }
 0xe43   :  { %7858 = vpow2.f32 %v4825_v10  ;;  %v11362_v10 = vld [vmem:[#allocation130_spill] sm:$0xff] }
 0xe44   :  { %7860 = vpow2.f32 %v4828_v7  ;;  %v11363_v7 = vld [vmem:[#allocation131_spill] sm:$0xff] }
 0xe45   :  { %7862 = vtanh.f32 %v3692_v46 }
 0xe4b   :  { %v7855_v62 = vpop.eup %7854 }
 0xe4c   :  { %v7857_v1 = vpop.eup %7856  ;;  %v3697_v54 = vadd.f32 1.0, %v7855_v62 }
 0xe4d   :  { %v3703_v59 = vadd.f32 1.0, %v7857_v1  ;;  %v7859_v0 = vpop.eup %7858  ;;  %v11364_v1 = vld [vmem:[#allocation132_spill] sm:$0xff] }
 0xe4e   :  { %7864 = vrcp.f32 %v3697_v54  ;;  %v7861_v21 = vpop.eup %7860  ;;  %v3535_v40 = vadd.f32 1.0, %v7859_v0  ;;  %v11365_v54 = vld [vmem:[#allocation133_spill] sm:$0xff]  ;;  %v11367_v0 = vld [vmem:[#allocation135_spill] sm:$0xff] }
 0xe4f   :  { %7866 = vrcp.f32 %v3703_v59  ;;  %v7863_v58 = vpop.eup %7862  ;;  %v3710_v27 = vadd.f32 1.0, %v7861_v21  ;;  %v11366_v59 = vld [vmem:[#allocation134_spill] sm:$0xff]  ;;  %v11368_v21 = vld [vmem:[#allocation136_spill] sm:$0xff] }
 0xe50   :  { %7868 = vtanh.f32 %v9878_v36 }
 0xe51   :  { %7870 = vrcp.f32 %v3710_v27  ;;  %v11373_v27 = vld [vmem:[#allocation141_spill] sm:$0xff] }
 0xe58   :  { %v7865_v50 = vpop.eup %7864 }
 0xe59   :  { %v7867_v31 = vpop.eup %7866  ;;  %v3714_v44 = vmul.f32 %v7865_v50, %v7863_v58  ;;  %v11369_v58 = vld [vmem:[#allocation137_spill] sm:$0xff]  ;;  %v11370_v50 = vld [vmem:[#allocation138_spill] sm:$0xff] }
 0xe5a   :  { %v3713_v22 = vmul.f32 %v7867_v31, %v9694_v4  ;;  %v7869_v46 = vpop.eup %7868  ;;  %v11361_v4 = vld [vmem:[#allocation129_spill] sm:$0xff]  ;;  %v11371_v31 = vld [vmem:[#allocation139_spill] sm:$0xff] }
 0xe5b   :  { %v7871_v62 = vpop.eup %7870 }
 0xe5c   :  { %v9882_v23 = vadd.f32 %v3714_v44, %v3713_v22  ;;  %v11372_v44 = vld [vmem:[#allocation140_spill] sm:$0xff]  ;;  %v11374_v22 = vld [vmem:[#allocation142_spill] sm:$0xff] }
 0xe5e   :  { %7872 = vtanh.f32 %v9882_v23 }
 0xe5f   :  { %7874 = vrcp.f32 %v3535_v40  ;;  %v11375_v40 = vld [vmem:[#allocation143_spill] sm:$0xff] }
 0xe68   :  { %v7873_v43 = vpop.eup %7872 }
 0xe69   :  { %v7875_v19 = vpop.eup %7874  ;;  %v9886_v55 = vmul.f32 %v7873_v43, %v7871_v62  ;;  %v11377_v62 = vld [vmem:[#allocation145_spill] sm:$0xff]  ;;  %v11378_v43 = vld [vmem:[#allocation146_spill] sm:$0xff] }
 0xe6a   :  { %v3542_v32 = vmul.f32 %v7875_v19, %v7869_v46  ;;  %v11376_v46 = vld [vmem:[#allocation144_spill] sm:$0xff]  ;;  %v11379_v19 = vld [vmem:[#allocation147_spill] sm:$0xff] }
 0xe6b   :  { %3783 = vmatmul.mubr.f32.vlgmr.msra.gmra.mrb[38].mxu0 %v9886_v55  ;;  %3854 = vmatmul.mubr.f32.vlgmr.msra.gmra.mrb[38].mxu1 %v9886_v55 }
 0xe6c   :  { %3948 = vmatprep.mubr.f32.mxu0 %v3542_v32  ;;  %4019 = vmatprep.mubr.f32.mxu1 %v3542_v32  ;;  %v11380_v32 = vld [vmem:[#allocation148_spill] sm:$0xff] }
 0xe6d   :  { %7065 = vmatpush1.bf16.msra.mxu0 %v10717_v57  ;;  %7129 = vmatpush1.bf16.msra.mxu1 %v10718_v39 }
 0xe6e   :  { %7067 = vmatprep.subr.bf16.mxu0 %v10719_v56  ;;  %7131 = vmatprep.subr.bf16.mxu1 %v10720_v53 }
 0xe71   :  { %7069 = vmatpush1.bf16.msra.mxu0 %v10721_v2  ;;  %7133 = vmatpush1.bf16.msra.mxu1 %v10722_v35 }
 0xe72   :  { %7071 = vmatprep.subr.bf16.mxu0 %v10845_v20  ;;  %7135 = vmatprep.subr.bf16.mxu1 %v10846_v12 }
 0xe75   :  { %7073 = vmatpush1.bf16.msra.mxu0 %v10847_v5  ;;  %7137 = vmatpush1.bf16.msra.mxu1 %v10848_v6 }
 0xe76   :  { %7075 = vmatprep.subr.bf16.mxu0 %v10974_v49  ;;  %7139 = vmatprep.subr.bf16.mxu1 %v10975_v38 }
 0xe79   :  { %7077 = vmatpush1.bf16.msra.mxu0 %v10976_v60  ;;  %7141 = vmatpush1.bf16.msra.mxu1 %v10977_v51 }
 0xe7a   :  { %7079 = vmatprep.subr.bf16.mxu0 %v11103_v3  ;;  %7143 = vmatprep.subr.bf16.mxu1 %v11104_v47 }
 0xe7d   :  { %7081 = vmatpush1.bf16.msra.mxu0 %v11105_v41  ;;  %7145 = vmatpush1.bf16.msra.mxu1 %v11106_v34 }
 0xe7e   :  { %7083 = vmatprep.subr.bf16.mxu0 %v11232_v28  ;;  %7147 = vmatprep.subr.bf16.mxu1 %v11233_v61 }
 0xe81   :  { %7085 = vmatpush1.bf16.msra.mxu0 %v11234_v24  ;;  %7149 = vmatpush1.bf16.msra.mxu1 %v11235_v18 }
 0xe82   :  { %7087 = vmatprep.subr.bf16.mxu0 %v11361_v4  ;;  %7151 = vmatprep.subr.bf16.mxu1 %v11362_v10 }
 0xe85   :  { %7089 = vmatpush1.bf16.msra.mxu0 %v11363_v7  ;;  %7153 = vmatpush1.bf16.msra.mxu1 %v11364_v1 }
 0xe86   :  { %7091 = vmatprep.subr.bf16.mxu0 %v11365_v54  ;;  %7155 = vmatprep.subr.bf16.mxu1 %v11366_v59 }
 0xe89   :  { %7093 = vmatpush1.bf16.msra.mxu0 %v11367_v0  ;;  %7157 = vmatpush1.bf16.msra.mxu1 %v11368_v21 }
 0xe8a   :  { %7095 = vmatprep.subr.bf16.mxu0 %v11369_v58  ;;  %7159 = vmatprep.subr.bf16.mxu1 %v11370_v50  ;;  %v11381_v50 = vld [vmem:[#allocation149_spill] sm:$0xff] }
 0xe8b   :  { %v11403_v58 = vld [vmem:[#allocation169_spill] sm:$0xff] }
 0xe8d   :  { %7097 = vmatpush1.bf16.msra.mxu0 %v11371_v31  ;;  %7161 = vmatpush1.bf16.msra.mxu1 %v11372_v44  ;;  %v11382_v31 = vld [vmem:[#allocation150_spill] sm:$0xff]  ;;  %v11383_v44 = vld [vmem:[#allocation151_spill] sm:$0xff] }
 0xe8e   :  { %7099 = vmatprep.subr.bf16.mxu0 %v11373_v27  ;;  %7163 = vmatprep.subr.bf16.mxu1 %v11374_v22  ;;  %v11384_v27 = vld [vmem:[#allocation152_spill] sm:$0xff]  ;;  %v11385_v22 = vld [vmem:[#allocation153_spill] sm:$0xff] }
 0xe91   :  { %7101 = vmatpush1.bf16.msra.mxu0 %v11375_v40  ;;  %7165 = vmatpush1.bf16.msra.mxu1 %v11376_v46  ;;  %v11386_v40 = vld [vmem:[#allocation154_spill] sm:$0xff]  ;;  %v11387_v46 = vld [vmem:[#allocation155_spill] sm:$0xff] }
 0xe92   :  { %7103 = vmatprep.subr.bf16.mxu0 %v11377_v62  ;;  %7167 = vmatprep.subr.bf16.mxu1 %v11378_v43  ;;  %v11388_v62 = vld [vmem:[#allocation156_spill] sm:$0xff]  ;;  %v11389_v43 = vld [vmem:[#allocation157_spill] sm:$0xff] }
 0xe95   :  { %7105 = vmatpush1.bf16.msra.mxu0 %v11379_v19  ;;  %7169 = vmatpush1.bf16.msra.mxu1 %v11380_v32  ;;  %v11390_v19 = vld [vmem:[#allocation158_spill] sm:$0xff]  ;;  %v11391_v32 = vld [vmem:[#allocation159_spill] sm:$0xff] }
 0xe96   :  { %7107 = vmatprep.subr.bf16.mxu0 %v11381_v50  ;;  %7171 = vmatprep.subr.bf16.mxu1 %v11382_v31  ;;  %v11392_v50 = vld [vmem:[#allocation160_spill] sm:$0xff]  ;;  %v11393_v31 = vld [vmem:[#allocation161_spill] sm:$0xff] }
 0xe99   :  { %7109 = vmatpush1.bf16.msra.mxu0 %v11383_v44  ;;  %7173 = vmatpush1.bf16.msra.mxu1 %v11384_v27  ;;  %v11394_v44 = vld [vmem:[#allocation162_spill] sm:$0xff]  ;;  %v11395_v27 = vld [vmem:[#allocation163_spill] sm:$0xff] }
 0xe9a   :  { %7111 = vmatprep.subr.bf16.mxu0 %v11385_v22  ;;  %7175 = vmatprep.subr.bf16.mxu1 %v11386_v40  ;;  %v11396_v22 = vld [vmem:[#allocation164_spill] sm:$0xff]  ;;  %v11397_v40 = vld [vmem:[#allocation165_spill] sm:$0xff] }
 0xe9d   :  { %7113 = vmatpush1.bf16.msra.mxu0 %v11387_v46  ;;  %7177 = vmatpush1.bf16.msra.mxu1 %v11388_v62  ;;  %v11398_v46 = vld [vmem:[#allocation166_spill] sm:$0xff]  ;;  %v11399_v62 = vld [vmem:[#allocation167_spill] sm:$0xff] }
 0xe9e   :  { %7115 = vmatprep.subr.bf16.mxu0 %v11389_v43  ;;  %7179 = vmatprep.subr.bf16.mxu1 %v11390_v19  ;;  %v11400_v43 = vld [vmem:[#allocation168_spill] sm:$0xff]  ;;  %v11401_v19 = vld [vmem:[#allocation21_spill] sm:$0xff] }
 0xea1   :  { %7117 = vmatpush1.bf16.msra.mxu0 %v11391_v32  ;;  %7181 = vmatpush1.bf16.msra.mxu1 %v11392_v50  ;;  %v11402_v32 = vld [vmem:[#allocation22_spill] sm:$0xff] }
 0xea2   :  { %7119 = vmatprep.subr.bf16.mxu0 %v11393_v31  ;;  %7183 = vmatprep.subr.bf16.mxu1 %v11394_v44 }
 0xea5   :  { %7121 = vmatpush1.bf16.msra.mxu0 %v11395_v27  ;;  %7185 = vmatpush1.bf16.msra.mxu1 %v11396_v22 }
 0xea6   :  { %7123 = vmatprep.subr.bf16.mxu0 %v11397_v40  ;;  %7187 = vmatprep.subr.bf16.mxu1 %v11398_v46 }
 0xea9   :  { %7125 = vmatpush1.bf16.msra.mxu0 %v11399_v62  ;;  %7189 = vmatpush1.bf16.msra.mxu1 %v11400_v43 }
 0xeaa   :  { %7191 = vmatprep.subr.bf16.mxu0 %v11401_v19  ;;  %7223 = vmatprep.subr.bf16.mxu1 %v11402_v32 }
 0xf3e   :  { %v3784_v50 = vpop.f32.mrb[38].mxu0  ;;  %v3855_v31 = vpop.f32.mrb[38].mxu1 }
 0xf3f   :  { %v3785_v44 = vadd.f32 %v3784_v50, %v11403_v58  ;;  %v3786_v21 = vpop.f32.mrb[39].mxu0  ;;  %v3857_v27 = vpop.f32.mrb[39].mxu1  ;;  %v3856_v43 = vadd.f32 %v3855_v31, %v8810_v13 }
 0xf40   :  { %v3787_v22 = vadd.f32 %v3786_v21, %v10777_v16  ;;  %v3858_v62 = vadd.f32 %v3857_v27, %v10778_v29 }
 0xf41   :  { %v4829_v0 = vmul.f32 -1.442695, %v3785_v44 }
 0xf42   :  { %v4830_v40 = vmul.f32 -1.442695, %v3787_v22  ;;  %v4831_v46 = vmul.f32 -1.442695, %v3858_v62 }
 0xf43   :  { %7876 = vpow2.f32 %v4829_v0 }
 0xf44   :  { %7878 = vpow2.f32 %v4830_v40 }
 0xf45   :  { %7880 = vpow2.f32 %v4831_v46 }
 0xf46   :  { %7882 = vtanh.f32 %v3856_v43  ;;  %v11421_v43 = vld [vmem:[#allocation38_spill] sm:$0xff] }
 0xf4d   :  { %v7877_v19 = vpop.eup %7876 }
 0xf4e   :  { %v7879_v59 = vpop.eup %7878  ;;  %v3863_v32 = vadd.f32 1.0, %v7877_v19  ;;  %v11422_v19 = vld [vmem:[#allocation43_spill] sm:$0xff] }
 0xf4f   :  { %v3869_v54 = vadd.f32 1.0, %v7879_v59  ;;  %v7881_v50 = vpop.eup %7880  ;;  %v11419_v59 = vld [vmem:[#allocation36_spill] sm:$0xff] }
 0xf50   :  { %7884 = vrcp.f32 %v3863_v32  ;;  %v7883_v58 = vpop.eup %7882  ;;  %v3876_v0 = vadd.f32 1.0, %v7881_v50  ;;  %v11423_v32 = vld [vmem:[#allocation40_spill] sm:$0xff]  ;;  %v11424_v50 = vld [vmem:[#allocation45_spill] sm:$0xff] }
 0xf51   :  { %7886 = vrcp.f32 %v3869_v54  ;;  %v11418_v54 = vld [vmem:[#allocation39_spill] sm:$0xff] }
 0xf52   :  { %7888 = vrcp.f32 %v3876_v0  ;;  %v11428_v0 = vld [vmem:[#allocation49_spill] sm:$0xff] }
 0xf5a   :  { %v7885_v21 = vpop.eup %7884 }
 0xf5b   :  { %v7887_v44 = vpop.eup %7886  ;;  %v3880_v22 = vmul.f32 %v7885_v21, %v7883_v58  ;;  %v11420_v58 = vld [vmem:[#allocation41_spill] sm:$0xff]  ;;  %v11425_v21 = vld [vmem:[#allocation42_spill] sm:$0xff] }
 0xf5c   :  { %v3879_v40 = vmul.f32 %v7887_v44, %v9771_v15  ;;  %v7889_v31 = vpop.eup %7888  ;;  %v11417_v15 = vld [vmem:[#allocation33_spill] sm:$0xff]  ;;  %v11426_v44 = vld [vmem:[#allocation47_spill] sm:$0xff] }
 0xf5e   :  { %v9959_v27 = vadd.f32 %v3880_v22, %v3879_v40  ;;  %v11427_v22 = vld [vmem:[#allocation44_spill] sm:$0xff]  ;;  %v11429_v40 = vld [vmem:[#allocation46_spill] sm:$0xff] }
 0xf60   :  { %7890 = vtanh.f32 %v9959_v27 }
 0xf6a   :  { %v7891_v62 = vpop.eup %7890 }
 0xf6b   :  { %v3883_v46 = vmul.f32 %v7891_v62, %v7889_v31  ;;  %v11430_v31 = vld [vmem:[#allocation51_spill] sm:$0xff]  ;;  %v11431_v62 = vld [vmem:[#allocation48_spill] sm:$0xff] }
 0xf6d   :  { %3949 = vmatmul.mubr.f32.vlgmr.msra.gmra.mrb[40].mxu0 %v3883_v46  ;;  %4020 = vmatmul.mubr.f32.vlgmr.msra.gmra.mrb[40].mxu1 %v3883_v46 }
 0xf6e   :  { %7193 = vmatpush1.bf16.msra.mxu0 %v8291_v8  ;;  %7225 = vmatpush1.bf16.msra.mxu1 %v8304_v25  ;;  %v11404_v8 = vld [vmem:[#allocation26_spill] sm:$0xff]  ;;  %v11407_v25 = vld [vmem:[#allocation24_spill] sm:$0xff] }
 0xf6f   :  { %7195 = vmatprep.subr.bf16.mxu0 %v8293_v9  ;;  %7227 = vmatprep.subr.bf16.mxu1 %v8314_v33  ;;  %v11405_v9 = vld [vmem:[#allocation23_spill] sm:$0xff]  ;;  %v11409_v33 = vld [vmem:[#allocation25_spill] sm:$0xff] }
 0xf70   :  { %4119 = vmatprep.mubr.f32.mxu0 %v10593_v11  ;;  %4190 = vmatprep.mubr.f32.mxu1 %v10593_v11 }
 0xf72   :  { %7197 = vmatpush1.bf16.msra.mxu0 %v8297_v14  ;;  %7229 = vmatpush1.bf16.msra.mxu1 %v8316_v37  ;;  %v11406_v14 = vld [vmem:[#allocation27_spill] sm:$0xff]  ;;  %v11411_v37 = vld [vmem:[#allocation28_spill] sm:$0xff] }
 0xf73   :  { %7199 = vmatprep.subr.bf16.mxu0 %v8300_v17  ;;  %7231 = vmatprep.subr.bf16.mxu1 %v8322_v45  ;;  %v11408_v17 = vld [vmem:[#allocation30_spill] sm:$0xff]  ;;  %v11413_v45 = vld [vmem:[#allocation29_spill] sm:$0xff] }
 0xf76   :  { %7201 = vmatpush1.bf16.msra.mxu0 %v8307_v26  ;;  %7233 = vmatpush1.bf16.msra.mxu1 %v8328_v48  ;;  %v11410_v26 = vld [vmem:[#allocation31_spill] sm:$0xff]  ;;  %v11415_v48 = vld [vmem:[#allocation32_spill] sm:$0xff] }
 0xf77   :  { %7203 = vmatprep.subr.bf16.mxu0 %v8311_v30  ;;  %7235 = vmatprep.subr.bf16.mxu1 %v8331_v52  ;;  %v11412_v30 = vld [vmem:[#allocation34_spill] sm:$0xff]  ;;  %v11416_v52 = vld [vmem:[#allocation37_spill] sm:$0xff] }
 0xf7a   :  { %7205 = vmatpush1.bf16.msra.mxu0 %v8320_v42  ;;  %7237 = vmatpush1.bf16.msra.mxu1 %v11404_v8  ;;  %v11414_v42 = vld [vmem:[#allocation35_spill] sm:$0xff] }
 0xf7b   :  { %7207 = vmatprep.subr.bf16.mxu0 %v11405_v9  ;;  %7239 = vmatprep.subr.bf16.mxu1 %v11406_v14  ;;  %v11434_v8 = vld [vmem:[#allocation55_spill] sm:$0xff]  ;;  %v11435_v9 = vld [vmem:[#allocation52_spill] sm:$0xff] }
 0xf7c   :  { %v11436_v14 = vld [vmem:[#allocation56_spill] sm:$0xff] }
 0xf7e   :  { %7209 = vmatpush1.bf16.msra.mxu0 %v11407_v25  ;;  %7241 = vmatpush1.bf16.msra.mxu1 %v11408_v17  ;;  %v11437_v25 = vld [vmem:[#allocation54_spill] sm:$0xff]  ;;  %v11438_v17 = vld [vmem:[#allocation57_spill] sm:$0xff] }
 0xf7f   :  { %7211 = vmatprep.subr.bf16.mxu0 %v11409_v33  ;;  %7243 = vmatprep.subr.bf16.mxu1 %v11410_v26  ;;  %v11439_v33 = vld [vmem:[#allocation58_spill] sm:$0xff]  ;;  %v11440_v26 = vld [vmem:[#allocation59_spill] sm:$0xff] }
 0xf82   :  { %7213 = vmatpush1.bf16.msra.mxu0 %v11411_v37  ;;  %7245 = vmatpush1.bf16.msra.mxu1 %v11412_v30  ;;  %v11441_v37 = vld [vmem:[#allocation60_spill] sm:$0xff]  ;;  %v11442_v30 = vld [vmem:[#allocation61_spill] sm:$0xff] }
 0xf83   :  { %7215 = vmatprep.subr.bf16.mxu0 %v11413_v45  ;;  %7247 = vmatprep.subr.bf16.mxu1 %v11414_v42  ;;  %v11443_v45 = vld [vmem:[#allocation62_spill] sm:$0xff]  ;;  %v11444_v42 = vld [vmem:[#allocation63_spill] sm:$0xff] }
 0xf86   :  { %7217 = vmatpush1.bf16.msra.mxu0 %v11415_v48  ;;  %7249 = vmatpush1.bf16.msra.mxu1 %v11416_v52  ;;  %v11445_v48 = vld [vmem:[#allocation64_spill] sm:$0xff]  ;;  %v11446_v52 = vld [vmem:[#allocation65_spill] sm:$0xff] }
 0xf87   :  { %7219 = vmatprep.subr.bf16.mxu0 %v11417_v15  ;;  %7251 = vmatprep.subr.bf16.mxu1 %v11418_v54  ;;  %v11447_v15 = vld [vmem:[#allocation66_spill] sm:$0xff]  ;;  %v11448_v54 = vld [vmem:[#allocation67_spill] sm:$0xff] }
 0xf8a   :  { %7221 = vmatpush1.bf16.msra.mxu0 %v11419_v59  ;;  %7253 = vmatpush1.bf16.msra.mxu1 %v11420_v58  ;;  %v11449_v59 = vld [vmem:[#allocation68_spill] sm:$0xff]  ;;  %v11450_v58 = vld [vmem:[#allocation69_spill] sm:$0xff] }
 0xf8b   :  { %7255 = vmatprep.subr.bf16.mxu0 %v11421_v43  ;;  %7319 = vmatprep.subr.bf16.mxu1 %v11422_v19  ;;  %v11451_v43 = vld [vmem:[#allocation70_spill] sm:$0xff]  ;;  %v11452_v19 = vld [vmem:[#allocation71_spill] sm:$0xff] }
 0xf8d   :  { %4120 = vmatmul.mubr.f32.vlgmr.msra.gmra.mrb[42].mxu0 %v9886_v55  ;;  %4191 = vmatmul.mubr.f32.vlgmr.msra.gmra.mrb[42].mxu1 %v9886_v55  ;;  %v11432_v55 = vld [vmem:[#allocation53_spill] sm:$0xff] }
 0xf8e   :  { %4289 = vmatprep.mubr.f32.mxu0 %v3883_v46  ;;  %4360 = vmatprep.mubr.f32.mxu1 %v3883_v46  ;;  %v11433_v46 = vld [vmem:[#allocation50_spill] sm:$0xff] }
 0xf8f   :  { %7257 = vmatpush1.bf16.msra.mxu0 %v11423_v32  ;;  %7321 = vmatpush1.bf16.msra.mxu1 %v11424_v50  ;;  %v11453_v32 = vld [vmem:[#allocation72_spill] sm:$0xff]  ;;  %v11454_v50 = vld [vmem:[#allocation73_spill] sm:$0xff] }
 0xf90   :  { %7259 = vmatprep.subr.bf16.mxu0 %v11425_v21  ;;  %7323 = vmatprep.subr.bf16.mxu1 %v11426_v44  ;;  %v11455_v21 = vld [vmem:[#allocation74_spill] sm:$0xff]  ;;  %v11456_v44 = vld [vmem:[#allocation75_spill] sm:$0xff] }
 0xf93   :  { %7261 = vmatpush1.bf16.msra.mxu0 %v11427_v22  ;;  %7325 = vmatpush1.bf16.msra.mxu1 %v11428_v0  ;;  %v11457_v22 = vld [vmem:[#allocation76_spill] sm:$0xff]  ;;  %v11458_v0 = vld [vmem:[#allocation77_spill] sm:$0xff] }
 0xf94   :  { %7263 = vmatprep.subr.bf16.mxu0 %v11429_v40  ;;  %7327 = vmatprep.subr.bf16.mxu1 %v11430_v31  ;;  %v11459_v40 = vld [vmem:[#allocation78_spill] sm:$0xff]  ;;  %v11460_v31 = vld [vmem:[#allocation79_spill] sm:$0xff] }
 0xf97   :  { %7265 = vmatpush1.bf16.msra.mxu0 %v11431_v62  ;;  %7329 = vmatpush1.bf16.msra.mxu1 %v11432_v55  ;;  %v11461_v62 = vld [vmem:[#allocation80_spill] sm:$0xff]  ;;  %v11462_v55 = vld [vmem:[#allocation81_spill] sm:$0xff] }
 0xf98   :  { %7267 = vmatprep.subr.bf16.mxu0 %v11433_v46  ;;  %7331 = vmatprep.subr.bf16.mxu1 %v11434_v8  ;;  %v11463_v46 = vld [vmem:[#allocation82_spill] sm:$0xff]  ;;  %v11464_v8 = vld [vmem:[#allocation83_spill] sm:$0xff] }
 0xf9b   :  { %7269 = vmatpush1.bf16.msra.mxu0 %v11435_v9  ;;  %7333 = vmatpush1.bf16.msra.mxu1 %v11436_v14  ;;  %v11465_v9 = vld [vmem:[#allocation84_spill] sm:$0xff]  ;;  %v11466_v14 = vld [vmem:[#allocation85_spill] sm:$0xff] }
 0xf9c   :  { %7271 = vmatprep.subr.bf16.mxu0 %v11437_v25  ;;  %7335 = vmatprep.subr.bf16.mxu1 %v11438_v17  ;;  %v11467_v25 = vld [vmem:[#allocation86_spill] sm:$0xff]  ;;  %v11468_v17 = vld [vmem:[#allocation87_spill] sm:$0xff] }
 0xf9f   :  { %7273 = vmatpush1.bf16.msra.mxu0 %v11439_v33  ;;  %7337 = vmatpush1.bf16.msra.mxu1 %v11440_v26  ;;  %v11469_v33 = vld [vmem:[#allocation88_spill] sm:$0xff]  ;;  %v11470_v26 = vld [vmem:[#allocation89_spill] sm:$0xff] }
 0xfa0   :  { %7275 = vmatprep.subr.bf16.mxu0 %v11441_v37  ;;  %7339 = vmatprep.subr.bf16.mxu1 %v11442_v30  ;;  %v11471_v37 = vld [vmem:[#allocation90_spill] sm:$0xff]  ;;  %v11472_v30 = vld [vmem:[#allocation91_spill] sm:$0xff] }
 0xfa3   :  { %7277 = vmatpush1.bf16.msra.mxu0 %v11443_v45  ;;  %7341 = vmatpush1.bf16.msra.mxu1 %v11444_v42  ;;  %v11473_v45 = vld [vmem:[#allocation92_spill] sm:$0xff]  ;;  %v11474_v42 = vld [vmem:[#allocation93_spill] sm:$0xff] }
 0xfa4   :  { %7279 = vmatprep.subr.bf16.mxu0 %v11445_v48  ;;  %7343 = vmatprep.subr.bf16.mxu1 %v11446_v52  ;;  %v11475_v48 = vld [vmem:[#allocation94_spill] sm:$0xff]  ;;  %v11476_v52 = vld [vmem:[#allocation95_spill] sm:$0xff] }
 0xfa7   :  { %7281 = vmatpush1.bf16.msra.mxu0 %v11447_v15  ;;  %7345 = vmatpush1.bf16.msra.mxu1 %v11448_v54  ;;  %v11477_v15 = vld [vmem:[#allocation96_spill] sm:$0xff]  ;;  %v11478_v54 = vld [vmem:[#allocation97_spill] sm:$0xff] }
 0xfa8   :  { %7283 = vmatprep.subr.bf16.mxu0 %v11449_v59  ;;  %7347 = vmatprep.subr.bf16.mxu1 %v11450_v58  ;;  %v11479_v59 = vld [vmem:[#allocation98_spill] sm:$0xff]  ;;  %v11480_v58 = vld [vmem:[#allocation99_spill] sm:$0xff] }
 0xfab   :  { %7285 = vmatpush1.bf16.msra.mxu0 %v11451_v43  ;;  %7349 = vmatpush1.bf16.msra.mxu1 %v11452_v19  ;;  %v11481_v43 = vld [vmem:[#allocation100_spill] sm:$0xff]  ;;  %v11482_v19 = vld [vmem:[#allocation101_spill] sm:$0xff] }
 0xfac   :  { %7287 = vmatprep.subr.bf16.mxu0 %v11453_v32  ;;  %7351 = vmatprep.subr.bf16.mxu1 %v11454_v50  ;;  %v11483_v32 = vld [vmem:[#allocation102_spill] sm:$0xff]  ;;  %v11484_v50 = vld [vmem:[#allocation103_spill] sm:$0xff] }
 0xfaf   :  { %7289 = vmatpush1.bf16.msra.mxu0 %v11455_v21  ;;  %7353 = vmatpush1.bf16.msra.mxu1 %v11456_v44  ;;  %v11485_v21 = vld [vmem:[#allocation104_spill] sm:$0xff]  ;;  %v11486_v44 = vld [vmem:[#allocation105_spill] sm:$0xff] }
 0xfb0   :  { %7291 = vmatprep.subr.bf16.mxu0 %v11457_v22  ;;  %7355 = vmatprep.subr.bf16.mxu1 %v11458_v0 }
 0xfb3   :  { %7293 = vmatpush1.bf16.msra.mxu0 %v11459_v40  ;;  %7357 = vmatpush1.bf16.msra.mxu1 %v11460_v31  ;;  %v11487_v40 = vld [vmem:[#allocation172_spill] sm:$0xff] }
 0xfb4   :  { %7295 = vmatprep.subr.bf16.mxu0 %v11461_v62  ;;  %7359 = vmatprep.subr.bf16.mxu1 %v11462_v55 }
 0xfb7   :  { %7297 = vmatpush1.bf16.msra.mxu0 %v11463_v46  ;;  %7361 = vmatpush1.bf16.msra.mxu1 %v11464_v8  ;;  %v11488_v46 = vld [vmem:[#allocation173_spill] sm:$0xff] }
 0xfb8   :  { %7299 = vmatprep.subr.bf16.mxu0 %v11465_v9  ;;  %7363 = vmatprep.subr.bf16.mxu1 %v11466_v14 }
 0xfbb   :  { %7301 = vmatpush1.bf16.msra.mxu0 %v11467_v25  ;;  %7365 = vmatpush1.bf16.msra.mxu1 %v11468_v17  ;;  %v11489_v25 = vld [vmem:[#allocation174_spill] sm:$0xff] }
 0xfbc   :  { %7303 = vmatprep.subr.bf16.mxu0 %v11469_v33  ;;  %7367 = vmatprep.subr.bf16.mxu1 %v11470_v26 }
 0xfbf   :  { %7305 = vmatpush1.bf16.msra.mxu0 %v11471_v37  ;;  %7369 = vmatpush1.bf16.msra.mxu1 %v11472_v30 }
 0xfc0   :  { %7307 = vmatprep.subr.bf16.mxu0 %v11473_v45  ;;  %7371 = vmatprep.subr.bf16.mxu1 %v11474_v42 }
 0xfc3   :  { %7309 = vmatpush1.bf16.msra.mxu0 %v11475_v48  ;;  %7373 = vmatpush1.bf16.msra.mxu1 %v11476_v52 }
 0xfc4   :  { %7311 = vmatprep.subr.bf16.mxu0 %v11477_v15  ;;  %7375 = vmatprep.subr.bf16.mxu1 %v11478_v54  ;;  %v4051_v54 = vld [vmem:[#allocation4 + $0xe0] sm:$0xff] }
 0xfc7   :  { %7313 = vmatpush1.bf16.msra.mxu0 %v11479_v59  ;;  %7377 = vmatpush1.bf16.msra.mxu1 %v11480_v58  ;;  %v4052_v59 = vld [vmem:[#allocation4 + $0xe8] sm:$0xff] }
 0xfc8   :  { %7315 = vmatprep.subr.bf16.mxu0 %v11481_v43  ;;  %7379 = vmatprep.subr.bf16.mxu1 %v11482_v19 }
 0xfcb   :  { %7317 = vmatpush1.bf16.msra.mxu0 %v11483_v32  ;;  %7381 = vmatpush1.bf16.msra.mxu1 %v11484_v50 }
 0xfcc   :  { %7383 = vmatprep.subr.bf16.mxu0 %v11485_v21  ;;  %7447 = vmatprep.subr.bf16.mxu1 %v11486_v44 }
0x1040   :  { %v3950_v22 = vpop.f32.mrb[40].mxu0  ;;  %v4021_v0 = vpop.f32.mrb[40].mxu1 }
0x1041   :  { %v3951_v31 = vadd.f32 %v3950_v22, %v11487_v40  ;;  %v3952_v62 = vpop.f32.mrb[41].mxu0  ;;  %v4023_v55 = vpop.f32.mrb[41].mxu1  ;;  %v4022_v17 = vadd.f32 %v4021_v0, %v11489_v25 }
0x1042   :  { %v3953_v8 = vadd.f32 %v3952_v62, %v11488_v46  ;;  %v4024_v62 = vadd.f32 %v4023_v55, %v8938_v63 }
0x1043   :  { %v4832_v9 = vmul.f32 -1.442695, %v3951_v31  ;;  %v4054_v31 = vld [vmem:[#allocation4 + $0xf8] sm:$0xff] }
0x1044   :  { %v4833_v14 = vmul.f32 -1.442695, %v3953_v8 }
0x1045   :  { %7892 = vpow2.f32 %v4832_v9  ;;  %v4053_v9 = vld [vmem:[#allocation4 + $0xf0] sm:$0xff] }
0x1046   :  { %7894 = vpow2.f32 %v4833_v14 }
0x1047   :  { %7896 = vtanh.f32 %v4022_v17 }
0x104f   :  { %v7893_v33 = vpop.eup %7892 }
0x1050   :  { %v7895_v26 = vpop.eup %7894  ;;  %v4029_v37 = vadd.f32 1.0, %v7893_v33 }
0x1051   :  { %v4035_v30 = vadd.f32 1.0, %v7895_v26  ;;  %v7897_v45 = vpop.eup %7896 }
0x1052   :  { %7898 = vrcp.f32 %v4029_v37 }
0x1053   :  { %7900 = vrcp.f32 %v4035_v30 }
0x105c   :  { %v7899_v42 = vpop.eup %7898 }
0x105d   :  { %v7901_v48 = vpop.eup %7900  ;;  %v4046_v52 = vmul.f32 %v7899_v42, %v7897_v45 }
0x105e   :  { %v4045_v15 = vmul.f32 %v7901_v48, %v9878_v36  ;;  %v4834_v36 = vmul.f32 -1.442695, %v4024_v62  ;;  %v11518_v62 = vld [vmem:[#allocation161_spill] sm:$0xff] }
0x1060   :  { %v4121_v58 = vpop.f32.mrb[42].mxu0  ;;  %v4192_v43 = vpop.f32.mrb[42].mxu1  ;;  %v10066_v19 = vadd.f32 %v4046_v52, %v4045_v15 }
0x1061   :  { %v4197_v32 = vadd.f32 %v4121_v58, %v4051_v54  ;;  %v4123_v50 = vpop.f32.mrb[43].mxu0  ;;  %v4194_v21 = vpop.f32.mrb[43].mxu1  ;;  %v4199_v17 = vadd.f32 %v4192_v43, %v4053_v9  ;;  %v11520_v9 = vld [vmem:[#allocation163_spill] sm:$0xff] }
0x1062   :  { %v4198_v44 = vadd.f32 %v4123_v50, %v4052_v59  ;;  %v4200_v8 = vadd.f32 %v4194_v21, %v4054_v31  ;;  %v11517_v31 = vld [vmem:[#allocation160_spill] sm:$0xff] }
0x1063   :  { %v4835_v22 = vmul.f32 -1.442695, %v4197_v32 }
0x1064   :  { %v4836_v0 = vmul.f32 -1.442695, %v4198_v44  ;;  %v4837_v14 = vmul.f32 -1.442695, %v4200_v8  ;;  %v11519_v8 = vld [vmem:[#allocation162_spill] sm:$0xff] }
0x1065   :  { %7902 = vpow2.f32 %v4835_v22 }
0x1066   :  { %7904 = vpow2.f32 %v4836_v0 }
0x1067   :  { %7906 = vpow2.f32 %v4834_v36  ;;  %v11521_v36 = vld [vmem:[#allocation164_spill] sm:$0xff] }
0x1068   :  { %7908 = vpow2.f32 %v4837_v14  ;;  %v11522_v14 = vld [vmem:[#allocation165_spill] sm:$0xff] }
0x1069   :  { %7910 = vtanh.f32 %v4199_v17  ;;  %v11523_v17 = vld [vmem:[#allocation166_spill] sm:$0xff] }
0x106f   :  { %v7903_v33 = vpop.eup %7902 }
0x1070   :  { %v7905_v26 = vpop.eup %7904  ;;  %v4204_v37 = vadd.f32 1.0, %v7903_v33  ;;  %v11524_v33 = vld [vmem:[#allocation167_spill] sm:$0xff] }
0x1071   :  { %v4210_v30 = vadd.f32 1.0, %v7905_v26  ;;  %v7907_v45 = vpop.eup %7906  ;;  %v11525_v26 = vld [vmem:[#allocation168_spill] sm:$0xff] }
0x1072   :  { %7912 = vrcp.f32 %v4204_v37  ;;  %v7909_v42 = vpop.eup %7908  ;;  %v4042_v58 = vadd.f32 1.0, %v7907_v45  ;;  %v11526_v45 = vld [vmem:[#allocation169_spill] sm:$0xff] }
0x1073   :  { %7914 = vrcp.f32 %v4210_v30  ;;  %v7911_v48 = vpop.eup %7910  ;;  %v4217_v54 = vadd.f32 1.0, %v7909_v42 }
0x1074   :  { %7916 = vtanh.f32 %v10066_v19 }
0x1075   :  { %7918 = vrcp.f32 %v4217_v54 }
0x107c   :  { %v7913_v52 = vpop.eup %7912 }
0x107d   :  { %v7915_v15 = vpop.eup %7914  ;;  %v4221_v55 = vmul.f32 %v7913_v52, %v7911_v48 }
0x107e   :  { %v4220_v59 = vmul.f32 %v7915_v15, %v9882_v23  ;;  %v7917_v32 = vpop.eup %7916  ;;  %v11512_v23 = vld [vmem:[#allocation155_spill] sm:$0xff] }
0x107f   :  { %v7919_v50 = vpop.eup %7918 }
0x1080   :  { %v4222_v43 = vadd.f32 %v4221_v55, %v4220_v59 }
0x1082   :  { %7920 = vtanh.f32 %v4222_v43 }
0x1083   :  { %7922 = vrcp.f32 %v4042_v58 }
0x108c   :  { %v7921_v21 = vpop.eup %7920 }
0x108d   :  { %v7923_v44 = vpop.eup %7922  ;;  %v4224_v22 = vmul.f32 %v7921_v21, %v7919_v50 }
0x108e   :  { %v4049_v0 = vmul.f32 %v7923_v44, %v7917_v32 }
0x108f   :  { %4290 = vmatmul.mubr.f32.vlgmr.msra.gmra.mrb[44].mxu0 %v4224_v22  ;;  %4361 = vmatmul.mubr.f32.vlgmr.msra.gmra.mrb[44].mxu1 %v4224_v22 }
0x1090   :  { %4455 = vmatprep.mubr.f32.mxu0 %v4049_v0  ;;  %4526 = vmatprep.mubr.f32.mxu1 %v4049_v0 }
0x1091   :  { %7385 = vmatpush1.bf16.msra.mxu0 %v10717_v57  ;;  %7449 = vmatpush1.bf16.msra.mxu1 %v10718_v39  ;;  %v11490_v57 = vld [vmem:[#allocation133_spill] sm:$0xff]  ;;  %v11491_v39 = vld [vmem:[#allocation134_spill] sm:$0xff] }
0x1092   :  { %7387 = vmatprep.subr.bf16.mxu0 %v10719_v56  ;;  %7451 = vmatprep.subr.bf16.mxu1 %v10720_v53  ;;  %v11492_v56 = vld [vmem:[#allocation135_spill] sm:$0xff]  ;;  %v11493_v53 = vld [vmem:[#allocation136_spill] sm:$0xff] }
0x1095   :  { %7389 = vmatpush1.bf16.msra.mxu0 %v10721_v2  ;;  %7453 = vmatpush1.bf16.msra.mxu1 %v10722_v35  ;;  %v11494_v2 = vld [vmem:[#allocation137_spill] sm:$0xff]  ;;  %v11495_v35 = vld [vmem:[#allocation138_spill] sm:$0xff] }
0x1096   :  { %7391 = vmatprep.subr.bf16.mxu0 %v10845_v20  ;;  %7455 = vmatprep.subr.bf16.mxu1 %v10846_v12  ;;  %v11496_v20 = vld [vmem:[#allocation139_spill] sm:$0xff]  ;;  %v11497_v12 = vld [vmem:[#allocation140_spill] sm:$0xff] }
0x1099   :  { %7393 = vmatpush1.bf16.msra.mxu0 %v10847_v5  ;;  %7457 = vmatpush1.bf16.msra.mxu1 %v10848_v6  ;;  %v11498_v5 = vld [vmem:[#allocation141_spill] sm:$0xff]  ;;  %v11499_v6 = vld [vmem:[#allocation142_spill] sm:$0xff] }
0x109a   :  { %7395 = vmatprep.subr.bf16.mxu0 %v10974_v49  ;;  %7459 = vmatprep.subr.bf16.mxu1 %v10975_v38  ;;  %v11500_v49 = vld [vmem:[#allocation143_spill] sm:$0xff]  ;;  %v11501_v38 = vld [vmem:[#allocation144_spill] sm:$0xff] }
0x109d   :  { %7397 = vmatpush1.bf16.msra.mxu0 %v10976_v60  ;;  %7461 = vmatpush1.bf16.msra.mxu1 %v10977_v51  ;;  %v11502_v60 = vld [vmem:[#allocation145_spill] sm:$0xff]  ;;  %v11503_v51 = vld [vmem:[#allocation146_spill] sm:$0xff] }
0x109e   :  { %7399 = vmatprep.subr.bf16.mxu0 %v11103_v3  ;;  %7463 = vmatprep.subr.bf16.mxu1 %v11104_v47  ;;  %v11504_v3 = vld [vmem:[#allocation147_spill] sm:$0xff]  ;;  %v11505_v47 = vld [vmem:[#allocation148_spill] sm:$0xff] }
0x10a1   :  { %7401 = vmatpush1.bf16.msra.mxu0 %v11105_v41  ;;  %7465 = vmatpush1.bf16.msra.mxu1 %v11106_v34  ;;  %v11506_v41 = vld [vmem:[#allocation149_spill] sm:$0xff]  ;;  %v11507_v34 = vld [vmem:[#allocation150_spill] sm:$0xff] }
0x10a2   :  { %7403 = vmatprep.subr.bf16.mxu0 %v11232_v28  ;;  %7467 = vmatprep.subr.bf16.mxu1 %v11233_v61  ;;  %v11508_v28 = vld [vmem:[#allocation151_spill] sm:$0xff]  ;;  %v11509_v61 = vld [vmem:[#allocation152_spill] sm:$0xff] }
0x10a5   :  { %7405 = vmatpush1.bf16.msra.mxu0 %v11234_v24  ;;  %7469 = vmatpush1.bf16.msra.mxu1 %v11235_v18  ;;  %v11510_v24 = vld [vmem:[#allocation153_spill] sm:$0xff]  ;;  %v11511_v18 = vld [vmem:[#allocation154_spill] sm:$0xff] }
0x10a6   :  { %7407 = vmatprep.subr.bf16.mxu0 %v11361_v4  ;;  %7471 = vmatprep.subr.bf16.mxu1 %v11362_v10  ;;  %v11513_v4 = vld [vmem:[#allocation156_spill] sm:$0xff]  ;;  %v11514_v10 = vld [vmem:[#allocation157_spill] sm:$0xff] }
0x10a9   :  { %7409 = vmatpush1.bf16.msra.mxu0 %v11363_v7  ;;  %7473 = vmatpush1.bf16.msra.mxu1 %v11364_v1  ;;  %v11515_v7 = vld [vmem:[#allocation158_spill] sm:$0xff]  ;;  %v11516_v1 = vld [vmem:[#allocation159_spill] sm:$0xff] }
0x10aa   :  { %7411 = vmatprep.subr.bf16.mxu0 %v11490_v57  ;;  %7475 = vmatprep.subr.bf16.mxu1 %v11491_v39 }
0x10ad   :  { %7413 = vmatpush1.bf16.msra.mxu0 %v11492_v56  ;;  %7477 = vmatpush1.bf16.msra.mxu1 %v11493_v53 }
0x10ae   :  { %7415 = vmatprep.subr.bf16.mxu0 %v11494_v2  ;;  %7479 = vmatprep.subr.bf16.mxu1 %v11495_v35 }
0x10b1   :  { %7417 = vmatpush1.bf16.msra.mxu0 %v11496_v20  ;;  %7481 = vmatpush1.bf16.msra.mxu1 %v11497_v12  ;;  %v4566_v20 = vld [vmem:[#allocation12] sm:$0xff]  ;;  %v4567_v12 = vld [vmem:[#allocation12 + $0x8] sm:$0xff] }
0x10b2   :  { %7419 = vmatprep.subr.bf16.mxu0 %v11498_v5  ;;  %7483 = vmatprep.subr.bf16.mxu1 %v11499_v6  ;;  %v7511_v5 = vpack.c.bf16 %v4567_v12, %v4566_v20  ;;  %v8131_v6 = vmov 0.0|0.0  }
0x10b5   :  { %7421 = vmatpush1.bf16.msra.mxu0 %v11500_v49  ;;  %7485 = vmatpush1.bf16.msra.mxu1 %v11501_v38  ;;  %v4569_v49 = vld [vmem:[#allocation12 + $0x18] sm:$0xff] }
0x10b6   :  { %7423 = vmatprep.subr.bf16.mxu0 %v11502_v60  ;;  %7487 = vmatprep.subr.bf16.mxu1 %v11503_v51  ;;  %v4570_v60 = vld [vmem:[#allocation12 + $0x20] sm:$0xff]  ;;  %v4571_v51 = vld [vmem:[#allocation12 + $0x28] sm:$0xff] }
0x10b9   :  { %7425 = vmatpush1.bf16.msra.mxu0 %v11504_v3  ;;  %7489 = vmatpush1.bf16.msra.mxu1 %v11505_v47  ;;  %v7517_v3 = vpack.c.bf16 %v4571_v51, %v4570_v60  ;;  %v4572_v47 = vld [vmem:[#allocation12 + $0x30] sm:$0xff] }
0x10ba   :  { %7427 = vmatprep.subr.bf16.mxu0 %v11506_v41  ;;  %7491 = vmatprep.subr.bf16.mxu1 %v11507_v34  ;;  %v4573_v41 = vld [vmem:[#allocation12 + $0x38] sm:$0xff] }
0x10bb   :  { %v7520_v34 = vpack.c.bf16 %v4573_v41, %v4572_v47  ;;  %v4675_v47 = vld [vmem:[#allocation13 + $0x78] sm:$0xff] }
0x10bd   :  { %7429 = vmatpush1.bf16.msra.mxu0 %v11508_v28  ;;  %7493 = vmatpush1.bf16.msra.mxu1 %v11509_v61  ;;  %v4574_v28 = vld [vmem:[#allocation12 + $0x40] sm:$0xff]  ;;  %v4575_v61 = vld [vmem:[#allocation12 + $0x48] sm:$0xff] }
0x10be   :  { %7431 = vmatprep.subr.bf16.mxu0 %v11510_v24  ;;  %7495 = vmatprep.subr.bf16.mxu1 %v11511_v18  ;;  %v7523_v24 = vpack.c.bf16 %v4575_v61, %v4574_v28  ;;  %v4576_v18 = vld [vmem:[#allocation12 + $0x50] sm:$0xff] }
0x10c1   :  { %7433 = vmatpush1.bf16.msra.mxu0 %v11512_v23  ;;  %7497 = vmatpush1.bf16.msra.mxu1 %v11513_v4  ;;  %v4577_v23 = vld [vmem:[#allocation12 + $0x58] sm:$0xff]  ;;  %v4578_v4 = vld [vmem:[#allocation12 + $0x60] sm:$0xff] }
0x10c2   :  { %7435 = vmatprep.subr.bf16.mxu0 %v11514_v10  ;;  %7499 = vmatprep.subr.bf16.mxu1 %v11515_v7  ;;  %v7526_v10 = vpack.c.bf16 %v4577_v23, %v4576_v18  ;;  %v4579_v7 = vld [vmem:[#allocation12 + $0x68] sm:$0xff] }
0x10c5   :  { %7437 = vmatpush1.bf16.msra.mxu0 %v11516_v1  ;;  %7501 = vmatpush1.bf16.msra.mxu1 %v11517_v31  ;;  %v7529_v1 = vpack.c.bf16 %v4579_v7, %v4578_v4  ;;  %v4580_v31 = vld [vmem:[#allocation12 + $0x70] sm:$0xff] }
0x10c6   :  { %7439 = vmatprep.subr.bf16.mxu0 %v11518_v62  ;;  %7503 = vmatprep.subr.bf16.mxu1 %v11519_v8  ;;  %v4581_v62 = vld [vmem:[#allocation12 + $0x78] sm:$0xff] }
0x10c7   :  { %v7532_v8 = vpack.c.bf16 %v4581_v62, %v4580_v31 }
0x10c9   :  { %7441 = vmatpush1.bf16.msra.mxu0 %v11520_v9  ;;  %7505 = vmatpush1.bf16.msra.mxu1 %v11521_v36  ;;  %v4660_v9 = vld [vmem:[#allocation13] sm:$0xff]  ;;  %v4661_v36 = vld [vmem:[#allocation13 + $0x8] sm:$0xff] }
0x10ca   :  { %7443 = vmatprep.subr.bf16.mxu0 %v11522_v14  ;;  %7507 = vmatprep.subr.bf16.mxu1 %v11523_v17  ;;  %v4662_v14 = vld [vmem:[#allocation13 + $0x10] sm:$0xff]  ;;  %v7535_v17 = vpack.c.bf16 %v4661_v36, %v4660_v9 }
0x10cd   :  { %7445 = vmatpush1.bf16.msra.mxu0 %v11524_v33  ;;  %7509 = vmatpush1.bf16.msra.mxu1 %v11525_v26  ;;  %v4663_v33 = vld [vmem:[#allocation13 + $0x18] sm:$0xff] }
0x10ce   :  { %7510 = vmatprep.subr.bf16.mxu0 %v8131_v6  ;;  %7534 = vmatprep.subr.bf16.mxu1 %v8131_v6  ;;  %v7538_v26 = vpack.c.bf16 %v4663_v33, %v4662_v14 }
0x1162   :  { %v4291_v37 = vpop.f32.mrb[44].mxu0  ;;  %v4362_v30 = vpop.f32.mrb[44].mxu1 }
0x1163   :  { %v4292_v42 = vadd.f32 %v4291_v37, %v11526_v45  ;;  %v4293_v48 = vpop.f32.mrb[45].mxu0  ;;  %v4364_v52 = vpop.f32.mrb[45].mxu1  ;;  %v4363_v43 = vadd.f32 %v4362_v30, %v8810_v13  ;;  %v4665_v37 = vld [vmem:[#allocation13 + $0x28] sm:$0xff]  ;;  %v4666_v45 = vld [vmem:[#allocation13 + $0x30] sm:$0xff] }
0x1164   :  { %v4294_v15 = vadd.f32 %v4293_v48, %v10777_v16  ;;  %v4365_v59 = vadd.f32 %v4364_v52, %v10778_v29  ;;  %v4668_v52 = vld [vmem:[#allocation13 + $0x40] sm:$0xff] }
0x1165   :  { %v4838_v55 = vmul.f32 -1.442695, %v4292_v42  ;;  %v4667_v42 = vld [vmem:[#allocation13 + $0x38] sm:$0xff] }
0x1166   :  { %v4839_v54 = vmul.f32 -1.442695, %v4294_v15  ;;  %v4840_v58 = vmul.f32 -1.442695, %v4365_v59  ;;  %v7544_v48 = vpack.c.bf16 %v4667_v42, %v4666_v45  ;;  %v4669_v15 = vld [vmem:[#allocation13 + $0x48] sm:$0xff]  ;;  %v4671_v59 = vld [vmem:[#allocation13 + $0x58] sm:$0xff] }
0x1167   :  { %7924 = vpow2.f32 %v4838_v55  ;;  %v7547_v55 = vpack.c.bf16 %v4669_v15, %v4668_v52 }
0x1168   :  { %7926 = vpow2.f32 %v4839_v54  ;;  %v4670_v54 = vld [vmem:[#allocation13 + $0x50] sm:$0xff] }
0x1169   :  { %7928 = vpow2.f32 %v4840_v58  ;;  %v7550_v58 = vpack.c.bf16 %v4671_v59, %v4670_v54 }
0x116a   :  { %7930 = vtanh.f32 %v4363_v43  ;;  %v4672_v43 = vld [vmem:[#allocation13 + $0x60] sm:$0xff] }
0x1171   :  { %v7925_v32 = vpop.eup %7924 }
0x1172   :  { %v7927_v50 = vpop.eup %7926  ;;  %v4370_v21 = vadd.f32 1.0, %v7925_v32  ;;  %v4673_v32 = vld [vmem:[#allocation13 + $0x68] sm:$0xff] }
0x1173   :  { %v4376_v44 = vadd.f32 1.0, %v7927_v50  ;;  %v7929_v22 = vpop.eup %7928  ;;  %v7553_v50 = vpack.c.bf16 %v4673_v32, %v4672_v43 }
0x1174   :  { %7932 = vrcp.f32 %v4370_v21  ;;  %v7931_v0 = vpop.eup %7930  ;;  %v4383_v56 = vadd.f32 1.0, %v7929_v22 }
0x1175   :  { %7934 = vrcp.f32 %v4376_v44 }
0x1176   :  { %7936 = vrcp.f32 %v4383_v56 }
0x117e   :  { %v7933_v16 = vpop.eup %7932 }
0x117f   :  { %v7935_v57 = vpop.eup %7934  ;;  %v4387_v39 = vmul.f32 %v7933_v16, %v7931_v0 }
0x1180   :  { %v4386_v53 = vmul.f32 %v7935_v57, %v9959_v27  ;;  %v7937_v13 = vpop.eup %7936  ;;  %v4568_v27 = vld [vmem:[#allocation12 + $0x10] sm:$0xff] }
0x1181   :  { %v7514_v38 = vpack.c.bf16 %v4569_v49, %v4568_v27 }
0x1182   :  { %v4388_v29 = vadd.f32 %v4387_v39, %v4386_v53 }
0x1184   :  { %7938 = vtanh.f32 %v4388_v29 }
0x118e   :  { %v7939_v2 = vpop.eup %7938 }
0x118f   :  { %v4390_v35 = vmul.f32 %v7939_v2, %v7937_v13 }
0x1191   :  { %4456 = vmatmul.mubr.f32.vlgmr.msra.gmra.mrb[46].mxu0 %v4390_v35  ;;  %4527 = vmatmul.mubr.f32.vlgmr.msra.gmra.mrb[46].mxu1 %v4390_v35 }
0x1192   :  { %7512 = vmatpush3.bf16.msra.mxu0 %v7511_v5  ;;  %4912 = vmatprep.mubr.msk.f32.mxu0 %vm8132_vm0, %v10593_v11 }
0x1193   :  { %7513 = vmatprep.subr.bf16.mxu0 %v8131_v6  ;;  %4947 = vmatprep.mubr.msk.f32.mxu1 %vm8132_vm0, %v10593_v11  ;;  %v4664_v11 = vld [vmem:[#allocation13 + $0x20] sm:$0xff] }
0x1194   :  { %7536 = vmatpush3.bf16.msra.mxu1 %v7535_v17  ;;  %v7541_v30 = vpack.c.bf16 %v4665_v37, %v4664_v11 }
0x1195   :  { %7537 = vmatprep.subr.bf16.mxu1 %v8131_v6 }
0x1196   :  { %7515 = vmatpush3.bf16.msra.mxu0 %v7514_v38 }
0x1197   :  { %7516 = vmatprep.subr.bf16.mxu0 %v8131_v6 }
0x1198   :  { %7539 = vmatpush3.bf16.msra.mxu1 %v7538_v26 }
0x1199   :  { %7540 = vmatprep.subr.bf16.mxu1 %v8131_v6 }
0x119a   :  { %7518 = vmatpush3.bf16.msra.mxu0 %v7517_v3  ;;  %v4674_v3 = vld [vmem:[#allocation13 + $0x70] sm:$0xff] }
0x119b   :  { %7519 = vmatprep.subr.bf16.mxu0 %v8131_v6  ;;  %v7556_v41 = vpack.c.bf16 %v4675_v47, %v4674_v3 }
0x119c   :  { %7542 = vmatpush3.bf16.msra.mxu1 %v7541_v30 }
0x119d   :  { %7543 = vmatprep.subr.bf16.mxu1 %v8131_v6 }
0x119e   :  { %7521 = vmatpush3.bf16.msra.mxu0 %v7520_v34  ;;  %v4844_v34 = vld [vmem:[%s10186_s7] ss:$0 sm:$0xff] }
0x119f   :  { %7522 = vmatprep.subr.bf16.mxu0 %v8131_v6 }
0x11a0   :  { %7545 = vmatpush3.bf16.msra.mxu1 %v7544_v48 }
0x11a1   :  { %7546 = vmatprep.subr.bf16.mxu1 %v8131_v6 }
0x11a2   :  { %7524 = vmatpush3.bf16.msra.mxu0 %v7523_v24 }
0x11a3   :  { %7525 = vmatprep.subr.bf16.mxu0 %v8131_v6 }
0x11a4   :  { %7548 = vmatpush3.bf16.msra.mxu1 %v7547_v55 }
0x11a5   :  { %7549 = vmatprep.subr.bf16.mxu1 %v8131_v6 }
0x11a6   :  { %7527 = vmatpush3.bf16.msra.mxu0 %v7526_v10 }
0x11a7   :  { %7528 = vmatprep.subr.bf16.mxu0 %v8131_v6 }
0x11a8   :  { %7551 = vmatpush3.bf16.msra.mxu1 %v7550_v58 }
0x11a9   :  { %7552 = vmatprep.subr.bf16.mxu1 %v8131_v6 }
0x11aa   :  { %7530 = vmatpush3.bf16.msra.mxu0 %v7529_v1 }
0x11ab   :  { %7531 = vmatprep.subr.bf16.mxu0 %v8131_v6 }
0x11ac   :  { %7554 = vmatpush3.bf16.msra.mxu1 %v7553_v50 }
0x11ad   :  { %7555 = vmatprep.subr.bf16.mxu1 %v8131_v6 }
0x11ae   :  { %7533 = vmatpush3.bf16.msra.mxu0 %v7532_v8 }
0x11b0   :  { %7557 = vmatpush3.bf16.msra.mxu1 %v7556_v41 }
0x1264   :  { %v4457_v21 = vpop.f32.mrb[46].mxu0  ;;  %v4528_v44 = vpop.f32.mrb[46].mxu1 }
0x1265   :  { %v4458_v22 = vadd.f32 %v4457_v21, %v11487_v40  ;;  %v4459_v0 = vpop.f32.mrb[47].mxu0  ;;  %v4530_v16 = vpop.f32.mrb[47].mxu1  ;;  %v4529_v13 = vadd.f32 %v4528_v44, %v11489_v25 }
0x1266   :  { %v4460_v57 = vadd.f32 %v4459_v0, %v11488_v46  ;;  %v4531_v53 = vadd.f32 %v4530_v16, %v8938_v63 }
0x1267   :  { %v4841_v39 = vmul.f32 -1.442695, %v4458_v22 }
0x1268   :  { %v4842_v56 = vmul.f32 -1.442695, %v4460_v57  ;;  %v4843_v29 = vmul.f32 -1.442695, %v4531_v53 }
0x1269   :  { %7940 = vpow2.f32 %v4841_v39 }
0x126a   :  { %7942 = vpow2.f32 %v4842_v56 }
0x126b   :  { %7944 = vpow2.f32 %v4843_v29 }
0x126c   :  { %7946 = vtanh.f32 %v4529_v13 }
0x1273   :  { %v7941_v2 = vpop.eup %7940 }
0x1274   :  { %v7943_v35 = vpop.eup %7942  ;;  %v4536_v20 = vadd.f32 1.0, %v7941_v2 }
0x1275   :  { %v4542_v12 = vadd.f32 1.0, %v7943_v35  ;;  %v7945_v40 = vpop.eup %7944 }
0x1276   :  { %7948 = vrcp.f32 %v4536_v20  ;;  %v7947_v5 = vpop.eup %7946  ;;  %v4549_v49 = vadd.f32 1.0, %v7945_v40 }
0x1277   :  { %7950 = vrcp.f32 %v4542_v12 }
0x1278   :  { %7952 = vrcp.f32 %v4549_v49 }
0x1280   :  { %v7949_v46 = vpop.eup %7948 }
0x1281   :  { %v7951_v6 = vpop.eup %7950  ;;  %v4553_v27 = vmul.f32 %v7949_v46, %v7947_v5 }
0x1282   :  { %v4552_v38 = vmul.f32 %v7951_v6, %v10066_v19  ;;  %v7953_v25 = vpop.eup %7952  ;;  %v4845_v19 = vld [vmem:[%s10188_s9] ss:$0 sm:$0xff] }
0x1284   :  { %v4554_v63 = vadd.f32 %v4553_v27, %v4552_v38 }
0x1286   :  { %7954 = vtanh.f32 %v4554_v63 }
0x1290   :  { %v7955_v60 = vpop.eup %7954 }
0x1291   :  { %v4556_v51 = vmul.f32 %v7955_v60, %v7953_v25 }
0x1293   :  { %4913 = vmatmul.mubr.f32.vlgmr.msra.gmra.mrb[48].mxu0 %v4556_v51 }
0x1366   :  { %v4655_v28 = vpop.f32.mrb[48].mxu0 }
0x1367   :  { %v4656_v61 = vadd.f32 %v4844_v34, %v4655_v28  ;;  %v4914_v24 = vpop.f32.mrb[49].mxu0 }
0x1369   :  { %v4659_v18 = vmax.f32 %v4656_v61, 0.0 }
0x136b   :  { %4948 = vmatmul.mubr.f32.vlgmr.msra.gmra.mrb[48].mxu1 %v4659_v18 }
0x143e   :  { %v4749_v23 = vpop.f32.mrb[48].mxu1 }
0x143f   :  { %v4750_v4 = vadd.f32 %v4845_v19, %v4749_v23  ;;  %v4949_v10 = vpop.f32.mrb[49].mxu1 }
0x1441   :  { %4753 = vst [vmem:[#allocation15] sm:$0xff] %v4750_v4 }
0x1442   :  { %8099 = shalt.err (!%p8096_p10)
}
0x1443   :  { %s8100_s2 = scalar_lea.hbm %s10189_s10, 128 }
0x1444   :  { %p8101_p11 = scmp.ne.s32.totalorder %s10189_s10, %s8100_s2  ;;  %p8104_p12 = scmp.lt.u32.totalorder %s8100_s2, %s10189_s10 }
0x1446   :  { %p8106_p13 = pnand %p8104_p12, %p8101_p11 }
0x1448   :  { %8109 = shalt.err (!%p8106_p13)
}
0x1449   :  { %4763 = dma.vmem_to_hbm [thread:$0]  %s4761_s4, 128, %s10189_s10, [#allocation6]  }
0x144a   :  { %8118 = dma.done.wait [#allocation6], 128  }
0x144b   :  { %8119 = vsyncadd [#allocation6], 4294967168 }
0x144c   :  { %4767 = vsyncpa [#allocation5], 1 }
0x144d   :  { %4768 = vsyncpa [#allocation8], 1 }
0x144e   :  { %4769 = vsyncpa [#allocation11], 1 }
0x144f   :  { %4770 = vsyncpa [#allocation14], 1 }
0x1450   :  { %4771 = vsyncpa [#allocation6], 1 }

</bundles_post_ra>
